<compile_context>
chip_gen: v5e
topology: v5e:2x2
jax: 0.10.0
libtpu: 0.0.40
codegen_flags: <defaults>
</compile_context>

<pallas_src>
import functools

import jax
import jax.numpy as jnp
from jax.experimental import pallas as pl
from jax.experimental.pallas import tpu as pltpu


def _round_up(x, m):
    return ((x + m - 1) // m) * m


# ----------------------------------------------------------------------------
# Kernel
# ----------------------------------------------------------------------------
def _rnn_kernel(T, H, V_pad, G3_pad, num_layers, num_dirs,
                tok_ref, len_ref, *refs):
    """Fused RNN forward for one batch tile:
       in-kernel one-hot 'embedding' -> (bi)GRU stack -> fc -> ReLU -> final.

    refs = [ (w_ih, w_hh, b_ih, b_hh) * num_layers*num_dirs,
             fc_w, fc_b, final_w, final_b, out_ref, gx_scratch, seq_bufs... ]
    """
    n_gru = 4 * num_layers * num_dirs
    gru_refs = refs[:n_gru]
    fc_w_ref, fc_b_ref, fin_w_ref, fin_b_ref = refs[n_gru:n_gru + 4]
    out_ref = refs[n_gru + 4]
    gx_ref = refs[n_gru + 5]
    seq_bufs = refs[n_gru + 6:]

    tile_b = len_ref.shape[0]
    f32 = jnp.float32
    bf16 = jnp.bfloat16
    H2, H3 = 2 * H, 3 * H
    D = num_dirs * H

    # ---- Embedding: identity weight => build the one-hot in-kernel ----------
    # tokens arrive as (T, tile_b, 1) int32; compare against a lane iota.
    tok = tok_ref[...]
    iota = jax.lax.broadcasted_iota(jnp.int32, (T, tile_b, V_pad), 2)
    oh = (tok == iota).astype(bf16).reshape(T * tile_b, V_pad)   # bf16 MXU operand

    # ---- packed-sequence masks, hoisted out of all loops --------------------
    lens = len_ref[...]                                 # (tile_b, 1) int32
    masks = [t < lens for t in range(T)]                # T x (tile_b, 1) bool

    finals = []
    for layer in range(num_layers):
        finals = []
        write_seq = layer < num_layers - 1
        if layer == 0:
            x_all = oh                                  # (T*tile_b, V_pad) bf16
        else:
            seq_in = seq_bufs[(layer - 1) % len(seq_bufs)]
            x_all = seq_in[:, 0:D]                      # (T*tile_b, D) bf16 (K sliced)
        seq_out = seq_bufs[layer % len(seq_bufs)] if write_seq else None

        for d in range(num_dirs):
            base = 4 * (layer * num_dirs + d)
            w_ih = gru_refs[base + 0][...]              # (K, G3_pad)  bf16
            w_hh = gru_refs[base + 1][...]              # (H, G3_pad)  bf16
            b_ih = gru_refs[base + 2][...]              # (1, G3_pad)  f32
            # hoist the hidden-bias broadcast out of the time loop
            b_hh = jnp.broadcast_to(gru_refs[base + 3][...], (tile_b, G3_pad))

            # Non-recurrent input projection for ALL timesteps in one MXU pass
            # (bf16 x bf16 -> f32 accumulate), stored in bf16 scratch.
            gx_all = jnp.dot(x_all, w_ih, preferred_element_type=f32) + b_ih
            gx_ref[...] = gx_all.astype(gx_ref.dtype)   # (T*tile_b, G3_pad)

            reverse = (d == 1)
            h = jnp.zeros((tile_b, H), f32)
            steps = range(T - 1, -1, -1) if reverse else range(T)
            # T is small & static -> full unroll (best LLO scheduling).
            for t in steps:
                gx = gx_ref[pl.ds(t * tile_b, tile_b), :].astype(f32)
                gh = jnp.dot(h.astype(bf16), w_hh,
                             preferred_element_type=f32) + b_hh
                r = jax.nn.sigmoid(gx[:, 0:H] + gh[:, 0:H])
                z = jax.nn.sigmoid(gx[:, H:H2] + gh[:, H:H2])
                n = jnp.tanh(gx[:, H2:H3] + r * gh[:, H2:H3])
                h_new = (1.0 - z) * n + z * h
                # pack_sequence semantics: freeze h once t >= length
                h = jnp.where(masks[t], h_new, h)
                if write_seq:
                    seq_out[pl.ds(t * tile_b, tile_b),
                            d * H:(d + 1) * H] = h.astype(seq_out.dtype)
            finals.append(h)
        # TODO(synk): inter-layer dropout (training mode) omitted; eval == identity.

    # ---- Head: cat(h_fwd[, h_bwd]) -> fc -> ReLU -> final (lane-dense out) --
    acc = fc_b_ref[...]                                  # (1, H) f32
    for d in range(num_dirs):
        acc = acc + jnp.dot(finals[d].astype(bf16), fc_w_ref[d],
                            preferred_element_type=f32)
    y = jnp.maximum(acc, 0.0)
    out = jnp.dot(y.astype(bf16), fin_w_ref[...],
                  preferred_element_type=f32) + fin_b_ref[...]
    out_ref[...] = out.astype(out_ref.dtype)


# ----------------------------------------------------------------------------
# Parameter construction (PyTorch-equivalent natural layout) and padding
# ----------------------------------------------------------------------------
def init_rnn_params(key, n_vocab, gru_dim, num_layers, bidirectional, out_dim):
    """PyTorch-style init; embedding weight is the identity (as in the module)."""
    num_dirs = 2 if bidirectional else 1
    params = {"emb": jnp.eye(n_vocab, dtype=jnp.float32)}
    gru = []
    k = 1.0 / (gru_dim ** 0.5)
    for layer in range(num_layers):
        in_size = n_vocab if layer == 0 else gru_dim * num_dirs
        dirs = []
        for _ in range(num_dirs):
            key, k1, k2, k3, k4 = jax.random.split(key, 5)
            w_ih = jax.random.uniform(k1, (3 * gru_dim, in_size), jnp.float32, -k, k)
            w_hh = jax.random.uniform(k2, (3 * gru_dim, gru_dim), jnp.float32, -k, k)
            b_ih = jax.random.uniform(k3, (3 * gru_dim,), jnp.float32, -k, k)
            b_hh = jax.random.uniform(k4, (3 * gru_dim,), jnp.float32, -k, k)
            dirs.append((w_ih, w_hh, b_ih, b_hh))
        gru.append(dirs)
    params["gru"] = gru

    hid_dim = gru_dim * num_dirs
    key, k1, k2, k3, k4 = jax.random.split(key, 5)
    kf = 1.0 / (hid_dim ** 0.5)
    params["fc_w"] = jax.random.uniform(k1, (gru_dim, hid_dim), jnp.float32, -kf, kf)
    params["fc_b"] = jax.random.uniform(k2, (gru_dim,), jnp.float32, -kf, kf)
    ko = 1.0 / (gru_dim ** 0.5)
    params["final_w"] = jax.random.uniform(k3, (out_dim, gru_dim), jnp.float32, -ko, ko)
    params["final_b"] = jax.random.uniform(k4, (out_dim,), jnp.float32, -ko, ko)
    return params


def _build_padded_params(params, *, n_vocab, gru_dim, num_dirs,
                         V_pad, G3_pad, out_pad):
    """bf16 weights, compact gate packing (gates r|z|n at columns [0:3H])."""
    H = gru_dim
    H3 = 3 * H
    D = num_dirs * H
    f32, bf16 = jnp.float32, jnp.bfloat16
    pp = {}

    gru_p = []
    for layer, dirs in enumerate(params["gru"]):
        in_rows = V_pad if layer == 0 else D
        dl = []
        for (w_ih, w_hh, b_ih, b_hh) in dirs:
            in_size = w_ih.shape[1]
            w_ih_p = (jnp.zeros((in_rows, G3_pad), f32)
                      .at[:in_size, :H3].set(w_ih.T)).astype(bf16)
            w_hh_p = (jnp.zeros((H, G3_pad), f32)
                      .at[:, :H3].set(w_hh.T)).astype(bf16)
            b_ih_p = jnp.zeros((1, G3_pad), f32).at[0, :H3].set(b_ih)
            b_hh_p = jnp.zeros((1, G3_pad), f32).at[0, :H3].set(b_hh)
            dl.append((w_ih_p, w_hh_p, b_ih_p, b_hh_p))
        gru_p.append(dl)
    pp["gru"] = gru_p

    # fc: per-direction (H, H) blocks so the kernel does acc += h_d @ fc_w[d]
    fc_w = params["fc_w"]                                  # (H, num_dirs*H)
    pp["fc_w"] = jnp.stack([fc_w[:, d * H:(d + 1) * H].T
                            for d in range(num_dirs)], axis=0).astype(bf16)
    pp["fc_b"] = params["fc_b"].reshape(1, H).astype(f32)

    out_dim = params["final_w"].shape[0]
    pp["final_w"] = (jnp.zeros((H, out_pad), f32)
                     .at[:, :out_dim].set(params["final_w"].T)).astype(bf16)
    pp["final_b"] = (jnp.zeros((1, out_pad), f32)
                     .at[0, :out_dim].set(params["final_b"]))
    return pp


# ----------------------------------------------------------------------------
# Wrapper
# ----------------------------------------------------------------------------
def rnn_forward(tokens, lengths, params, *, n_vocab, gru_dim, num_layers,
                bidirectional, out_dim, pad_id=0):
    """tokens: (B, T) int32 padded with pad_id; lengths: (B,) int32."""
    num_dirs = 2 if bidirectional else 1
    B, T = tokens.shape
    H = gru_dim
    D = num_dirs * H

    V_pad = _round_up(n_vocab, 128)
    G3_pad = _round_up(3 * H, 128)
    D_pad = _round_up(D, 128)
    out_pad = _round_up(out_dim, 128)

    # Batch tiling: multiples of 16 sublanes (bf16 tile) so in-kernel reshapes
    # are layout-preserving; >= 2 grid steps when the batch allows it.
    B_pad = _round_up(max(B, 16), 16)
    if B_pad >= 32:
        tile_b = min(128, _round_up((B_pad + 1) // 2, 16))
    else:
        tile_b = B_pad

    n_seq = 0 if num_layers == 1 else (1 if num_layers == 2 else 2)

    def _scratch_bytes(tb):   # bf16 scratch: gx + inter-layer seq buffers
        return T * tb * (G3_pad + n_seq * D_pad) * 2

    # clamp tile_b so scratch stays well inside every generation's VMEM budget
    while tile_b > 16 and _scratch_bytes(tile_b) > 16 * 1024 * 1024:
        tile_b -= 16
    B_pad = _round_up(B_pad, tile_b)
    grid = (B_pad // tile_b,)

    tok_p = jnp.full((B_pad, T), pad_id, jnp.int32).at[:B].set(tokens.astype(jnp.int32))
    tok_tm = tok_p.T.reshape(T, B_pad, 1)               # time-major, lane dim 1
    len_p = jnp.zeros((B_pad, 1), jnp.int32).at[:B, 0].set(lengths.astype(jnp.int32))

    pp = _build_padded_params(params, n_vocab=n_vocab, gru_dim=gru_dim,
                              num_dirs=num_dirs, V_pad=V_pad, G3_pad=G3_pad,
                              out_pad=out_pad)

    args = [tok_tm, len_p]
    in_specs = [
        pl.BlockSpec((T, tile_b, 1), lambda i: (0, i, 0)),
        pl.BlockSpec((tile_b, 1), lambda i: (i, 0)),
    ]

    def _add_const(arr):
        args.append(arr)
        zeros = (0,) * arr.ndim
        # constant index_map weights: single-buffered (halves weight VMEM)
        in_specs.append(pl.BlockSpec(arr.shape, lambda i, _z=zeros: _z,
                                     pipeline_mode=pl.Buffered(1)))

    for layer_params in pp["gru"]:
        for dir_params in layer_params:
            for a in dir_params:
                _add_const(a)
    for name in ("fc_w", "fc_b", "final_w", "final_b"):
        _add_const(pp[name])

    scratch_shapes = [pltpu.VMEM((T * tile_b, G3_pad), jnp.bfloat16)]       # gx
    scratch_shapes += [pltpu.VMEM((T * tile_b, D_pad), jnp.bfloat16)
                       for _ in range(n_seq)]                               # seq

    # ---- advisory cost estimate (embedding matmul / one-hot bytes removed) --
    gx_flops = 0
    for layer in range(num_layers):
        k_in = V_pad if layer == 0 else D
        gx_flops += num_dirs * 2 * T * tile_b * k_in * G3_pad
    rec_flops = num_layers * num_dirs * T * 2 * tile_b * H * G3_pad
    head_flops = 2 * tile_b * (D * H + H * out_pad)
    flops = grid[0] * (gx_flops + rec_flops + head_flops)
    transcendentals = grid[0] * num_layers * num_dirs * T * tile_b * 3 * H
    bytes_accessed = int(sum(int(a.size) * a.dtype.itemsize for a in args)
                         + B_pad * out_pad * 4)
    cost = pl.CostEstimate(flops=int(flops), transcendentals=int(transcendentals),
                           bytes_accessed=bytes_accessed)

    # ---- explicit VMEM limit sized from the real footprint ------------------
    weight_bytes = sum(int(a.size) * a.dtype.itemsize for a in args[2:])
    io_bytes = 2 * (T * tile_b * 4 + tile_b * 4 + tile_b * out_pad * 4)
    est = weight_bytes + io_bytes + _scratch_bytes(tile_b)
    vmem_limit = int(min(max(2 * est + (8 << 20), 32 << 20), 64 << 20))

    kernel = functools.partial(_rnn_kernel, T, H, V_pad, G3_pad,
                               num_layers, num_dirs)

    out_p = pl.pallas_call(
        kernel,
        out_shape=jax.ShapeDtypeStruct((B_pad, out_pad), jnp.float32),
        grid_spec=pltpu.PrefetchScalarGridSpec(
            num_scalar_prefetch=0,
            grid=grid,
            in_specs=in_specs,
            out_specs=pl.BlockSpec((tile_b, out_pad), lambda i: (i, 0)),
            scratch_shapes=scratch_shapes),
        compiler_params=pltpu.CompilerParams(
            dimension_semantics=("parallel",),
            vmem_limit_bytes=vmem_limit),
        cost_estimate=cost,
    )(*args)

    return out_p[:B, :out_dim]


# ----------------------------------------------------------------------------
# Pure-JAX reference (natural, unpadded f32 shapes) for correctness checking
# ----------------------------------------------------------------------------
def reference_forward(tokens, lengths, params, *, n_vocab, gru_dim,
                      num_layers, bidirectional):
    num_dirs = 2 if bidirectional else 1
    H = gru_dim
    B, T = tokens.shape
    seq = jax.nn.one_hot(tokens, n_vocab, dtype=jnp.float32) @ params["emb"]
    finals = []
    for layer in range(num_layers):
        outs, finals = [], []
        for d in range(num_dirs):
            w_ih, w_hh, b_ih, b_hh = params["gru"][layer][d]
            h = jnp.zeros((B, H), jnp.float32)
            hs = [None] * T
            order = range(T) if d == 0 else range(T - 1, -1, -1)
            for t in order:
                x_t = seq[:, t, :]
                gx = x_t @ w_ih.T + b_ih
                gh = h @ w_hh.T + b_hh
                r = jax.nn.sigmoid(gx[:, :H] + gh[:, :H])
                z = jax.nn.sigmoid(gx[:, H:2 * H] + gh[:, H:2 * H])
                n = jnp.tanh(gx[:, 2 * H:] + r * gh[:, 2 * H:])
                h_new = (1.0 - z) * n + z * h
                h = jnp.where((t < lengths)[:, None], h_new, h)
                hs[t] = h
            outs.append(jnp.stack(hs, axis=1))
            finals.append(h)
        seq = jnp.concatenate(outs, axis=-1)
    hid = jnp.concatenate(finals, axis=-1)
    y = jnp.maximum(hid @ params["fc_w"].T + params["fc_b"], 0.0)
    return y @ params["final_w"].T + params["final_b"]


# ----------------------------------------------------------------------------
if __name__ == "__main__":
    # Config consistent with the PyTorch module (small shapes):
    #   vocab of 12 chars (id 0 = '<pad>'), GRU_dim=32, num_layers=2,
    #   Bidirect=True, out_dim=16, dropout (eval -> identity), seq_len<=8.
    n_vocab, gru_dim, num_layers, bidirectional, out_dim = 12, 32, 2, True, 16
    B, T = 3, 8
    lengths = jnp.array([8, 6, 5], dtype=jnp.int32)      # pack_sequence-style (sorted)

    key = jax.random.PRNGKey(0)
    key, kt = jax.random.split(key)
    tokens = jax.random.randint(kt, (B, T), 1, n_vocab, dtype=jnp.int32)
    pos = jnp.arange(T)[None, :]
    tokens = jnp.where(pos < lengths[:, None], tokens, 0)   # pad id 0 past length

    params = init_rnn_params(key, n_vocab, gru_dim, num_layers, bidirectional, out_dim)

    out = rnn_forward(tokens, lengths, params, n_vocab=n_vocab, gru_dim=gru_dim,
                      num_layers=num_layers, bidirectional=bidirectional,
                      out_dim=out_dim)
    out = jax.block_until_ready(out)

    ref = reference_forward(tokens, lengths, params, n_vocab=n_vocab,
                            gru_dim=gru_dim, num_layers=num_layers,
                            bidirectional=bidirectional)

    assert out.shape == (B, out_dim)
    err = float(jnp.max(jnp.abs(out - ref)))
    # bf16 MXU operands + bf16 activation scratch vs the pure-f32 reference.
    assert jnp.allclose(out, ref, atol=3e-2, rtol=3e-2), \
        f"mismatch vs reference (max abs err {err})"

    print("KERNEL_OK")
</pallas_src>

<mosaic_0001>
module attributes {stable_mosaic.version = 11 : i64} {
  func.func @_rnn_kernel(%arg0: i32, %arg1: memref<8x16x1xi32, #tpu.memory_space<vmem>>, %arg2: memref<16x1xi32, #tpu.memory_space<vmem>>, %arg3: memref<128x128xbf16, #tpu.memory_space<vmem>>, %arg4: memref<32x128xbf16, #tpu.memory_space<vmem>>, %arg5: memref<1x128xf32, #tpu.memory_space<vmem>>, %arg6: memref<1x128xf32, #tpu.memory_space<vmem>>, %arg7: memref<128x128xbf16, #tpu.memory_space<vmem>>, %arg8: memref<32x128xbf16, #tpu.memory_space<vmem>>, %arg9: memref<1x128xf32, #tpu.memory_space<vmem>>, %arg10: memref<1x128xf32, #tpu.memory_space<vmem>>, %arg11: memref<64x128xbf16, #tpu.memory_space<vmem>>, %arg12: memref<32x128xbf16, #tpu.memory_space<vmem>>, %arg13: memref<1x128xf32, #tpu.memory_space<vmem>>, %arg14: memref<1x128xf32, #tpu.memory_space<vmem>>, %arg15: memref<64x128xbf16, #tpu.memory_space<vmem>>, %arg16: memref<32x128xbf16, #tpu.memory_space<vmem>>, %arg17: memref<1x128xf32, #tpu.memory_space<vmem>>, %arg18: memref<1x128xf32, #tpu.memory_space<vmem>>, %arg19: memref<2x32x32xbf16, #tpu.memory_space<vmem>>, %arg20: memref<1x32xf32, #tpu.memory_space<vmem>>, %arg21: memref<32x128xbf16, #tpu.memory_space<vmem>>, %arg22: memref<1x128xf32, #tpu.memory_space<vmem>>, %arg23: memref<16x128xf32, #tpu.memory_space<vmem>>, %arg24: memref<128x128xbf16, #tpu.memory_space<vmem>>, %arg25: memref<128x128xbf16, #tpu.memory_space<vmem>>) attributes {dimension_semantics = [#tpu.dimension_semantics<parallel>], iteration_bounds = array<i64: 1>, scalar_prefetch = 0 : i64, scratch_operands = 2 : i64, tpu.core_type = #tpu.core_type<tc>, window_params = [{transform_indices = @transform_0, window_bounds = array<i64: 8, 16, 1>}, {transform_indices = @transform_1, window_bounds = array<i64: 16, 1>}, {pipeline_mode = #tpu.pipeline_mode<synchronous>, transform_indices = @transform_2, window_bounds = array<i64: 128, 128>}, {pipeline_mode = #tpu.pipeline_mode<synchronous>, transform_indices = @transform_3, window_bounds = array<i64: 32, 128>}, {pipeline_mode = #tpu.pipeline_mode<synchronous>, transform_indices = @transform_4, window_bounds = array<i64: 1, 128>}, {pipeline_mode = #tpu.pipeline_mode<synchronous>, transform_indices = @transform_5, window_bounds = array<i64: 1, 128>}, {pipeline_mode = #tpu.pipeline_mode<synchronous>, transform_indices = @transform_6, window_bounds = array<i64: 128, 128>}, {pipeline_mode = #tpu.pipeline_mode<synchronous>, transform_indices = @transform_7, window_bounds = array<i64: 32, 128>}, {pipeline_mode = #tpu.pipeline_mode<synchronous>, transform_indices = @transform_8, window_bounds = array<i64: 1, 128>}, {pipeline_mode = #tpu.pipeline_mode<synchronous>, transform_indices = @transform_9, window_bounds = array<i64: 1, 128>}, {pipeline_mode = #tpu.pipeline_mode<synchronous>, transform_indices = @transform_10, window_bounds = array<i64: 64, 128>}, {pipeline_mode = #tpu.pipeline_mode<synchronous>, transform_indices = @transform_11, window_bounds = array<i64: 32, 128>}, {pipeline_mode = #tpu.pipeline_mode<synchronous>, transform_indices = @transform_12, window_bounds = array<i64: 1, 128>}, {pipeline_mode = #tpu.pipeline_mode<synchronous>, transform_indices = @transform_13, window_bounds = array<i64: 1, 128>}, {pipeline_mode = #tpu.pipeline_mode<synchronous>, transform_indices = @transform_14, window_bounds = array<i64: 64, 128>}, {pipeline_mode = #tpu.pipeline_mode<synchronous>, transform_indices = @transform_15, window_bounds = array<i64: 32, 128>}, {pipeline_mode = #tpu.pipeline_mode<synchronous>, transform_indices = @transform_16, window_bounds = array<i64: 1, 128>}, {pipeline_mode = #tpu.pipeline_mode<synchronous>, transform_indices = @transform_17, window_bounds = array<i64: 1, 128>}, {pipeline_mode = #tpu.pipeline_mode<synchronous>, transform_indices = @transform_18, window_bounds = array<i64: 2, 32, 32>}, {pipeline_mode = #tpu.pipeline_mode<synchronous>, transform_indices = @transform_19, window_bounds = array<i64: 1, 32>}, {pipeline_mode = #tpu.pipeline_mode<synchronous>, transform_indices = @transform_20, window_bounds = array<i64: 32, 128>}, {pipeline_mode = #tpu.pipeline_mode<synchronous>, transform_indices = @transform_21, window_bounds = array<i64: 1, 128>}, {transform_indices = @transform_22, window_bounds = array<i64: 16, 128>}]} {
    %c0 = arith.constant 0 : index
    %c0_0 = arith.constant 0 : index
    %c0_1 = arith.constant 0 : index
    %0 = vector.load %arg1[%c0, %c0_0, %c0_1] : memref<8x16x1xi32, #tpu.memory_space<vmem>>, vector<8x16x1xi32>
    %1 = tpu.iota {dimensions = array<i32: 2>} : vector<8x16x128xi32>
    %2 = vector.broadcast %0 : vector<8x16x1xi32> to vector<8x16x128xi32>
    %3 = arith.cmpi eq, %2, %1 : vector<8x16x128xi32>
    %4 = arith.extui %3 : vector<8x16x128xi1> to vector<8x16x128xi32>
    %5 = arith.sitofp %4 : vector<8x16x128xi32> to vector<8x16x128xf32>
    %6 = arith.truncf %5 : vector<8x16x128xf32> to vector<8x16x128xbf16>
    %7 = vector.shape_cast %6 : vector<8x16x128xbf16> to vector<128x128xbf16>
    %c0_2 = arith.constant 0 : index
    %c0_3 = arith.constant 0 : index
    %8 = vector.load %arg2[%c0_2, %c0_3] : memref<16x1xi32, #tpu.memory_space<vmem>>, vector<16x1xi32>
    %c0_i32 = arith.constant 0 : i32
    %9 = vector.broadcast %c0_i32 : i32 to vector<16x1xi32>
    %10 = arith.cmpi sgt, %8, %9 : vector<16x1xi32>
    %c1_i32 = arith.constant 1 : i32
    %11 = vector.broadcast %c1_i32 : i32 to vector<16x1xi32>
    %12 = arith.cmpi sgt, %8, %11 : vector<16x1xi32>
    %c2_i32 = arith.constant 2 : i32
    %13 = vector.broadcast %c2_i32 : i32 to vector<16x1xi32>
    %14 = arith.cmpi sgt, %8, %13 : vector<16x1xi32>
    %c3_i32 = arith.constant 3 : i32
    %15 = vector.broadcast %c3_i32 : i32 to vector<16x1xi32>
    %16 = arith.cmpi sgt, %8, %15 : vector<16x1xi32>
    %c4_i32 = arith.constant 4 : i32
    %17 = vector.broadcast %c4_i32 : i32 to vector<16x1xi32>
    %18 = arith.cmpi sgt, %8, %17 : vector<16x1xi32>
    %c5_i32 = arith.constant 5 : i32
    %19 = vector.broadcast %c5_i32 : i32 to vector<16x1xi32>
    %20 = arith.cmpi sgt, %8, %19 : vector<16x1xi32>
    %c6_i32 = arith.constant 6 : i32
    %21 = vector.broadcast %c6_i32 : i32 to vector<16x1xi32>
    %22 = arith.cmpi sgt, %8, %21 : vector<16x1xi32>
    %c7_i32 = arith.constant 7 : i32
    %23 = vector.broadcast %c7_i32 : i32 to vector<16x1xi32>
    %24 = arith.cmpi sgt, %8, %23 : vector<16x1xi32>
    %c0_4 = arith.constant 0 : index
    %c0_5 = arith.constant 0 : index
    %25 = vector.load %arg3[%c0_4, %c0_5] : memref<128x128xbf16, #tpu.memory_space<vmem>>, vector<128x128xbf16>
    %c0_6 = arith.constant 0 : index
    %c0_7 = arith.constant 0 : index
    %26 = vector.load %arg4[%c0_6, %c0_7] : memref<32x128xbf16, #tpu.memory_space<vmem>>, vector<32x128xbf16>
    %c0_8 = arith.constant 0 : index
    %c0_9 = arith.constant 0 : index
    %27 = vector.load %arg5[%c0_8, %c0_9] : memref<1x128xf32, #tpu.memory_space<vmem>>, vector<1x128xf32>
    %c0_10 = arith.constant 0 : index
    %c0_11 = arith.constant 0 : index
    %28 = vector.load %arg6[%c0_10, %c0_11] : memref<1x128xf32, #tpu.memory_space<vmem>>, vector<1x128xf32>
    %29 = vector.shape_cast %28 : vector<1x128xf32> to vector<1x128xf32>
    %30 = vector.broadcast %29 : vector<1x128xf32> to vector<16x128xf32>
    %cst = arith.constant dense<0.000000e+00> : vector<128x128xf32>
    %31 = tpu.matmul %7, %25, %cst {dimension_numbers = #tpu.dot_dimension_numbers<[1], [0], [0], [1], [0, 0, 1, 1], [], []>} : vector<128x128xbf16>, vector<128x128xbf16>, vector<128x128xf32> -> vector<128x128xf32>
    %32 = vector.broadcast %27 : vector<1x128xf32> to vector<128x128xf32>
    %33 = arith.addf %31, %32 : vector<128x128xf32>
    %34 = arith.truncf %33 : vector<128x128xf32> to vector<128x128xbf16>
    %c0_12 = arith.constant 0 : index
    %c0_13 = arith.constant 0 : index
    %35 = vector.load %arg24[%c0_12, %c0_13] : memref<128x128xbf16, #tpu.memory_space<vmem>>, vector<128x128xbf16>
    tpu.vector_store %arg24[%c0_12, %c0_13], %34 {strides = array<i32>} : memref<128x128xbf16, #tpu.memory_space<vmem>>, vector<128x128xbf16>,
    %cst_14 = arith.constant 0.000000e+00 : f32
    %36 = vector.broadcast %cst_14 : f32 to vector<16x32xf32>
    %c0_15 = arith.constant 0 : index
    %c0_16 = arith.constant 0 : index
    %37 = vector.load %arg24[%c0_15, %c0_16] : memref<128x128xbf16, #tpu.memory_space<vmem>>, vector<16x128xbf16>
    %38 = arith.extf %37 : vector<16x128xbf16> to vector<16x128xf32>
    %39 = arith.truncf %36 : vector<16x32xf32> to vector<16x32xbf16>
    %cst_17 = arith.constant dense<0.000000e+00> : vector<16x128xf32>
    %40 = tpu.matmul %39, %26, %cst_17 {dimension_numbers = #tpu.dot_dimension_numbers<[1], [0], [0], [1], [0, 0, 1, 1], [], []>} : vector<16x32xbf16>, vector<32x128xbf16>, vector<16x128xf32> -> vector<16x128xf32>
    %41 = arith.addf %40, %30 : vector<16x128xf32>
    %42 = vector.extract_strided_slice %38 {offsets = [0, 0], sizes = [16, 32], strides = [1, 1]} : vector<16x128xf32> to vector<16x32xf32>
    %43 = vector.extract_strided_slice %41 {offsets = [0, 0], sizes = [16, 32], strides = [1, 1]} : vector<16x128xf32> to vector<16x32xf32>
    %44 = arith.addf %42, %43 : vector<16x32xf32>
    %45 = arith.negf %44 : vector<16x32xf32>
    %46 = math.exp %45 : vector<16x32xf32>
    %cst_18 = arith.constant 1.000000e+00 : f32
    %47 = vector.broadcast %cst_18 : f32 to vector<16x32xf32>
    %48 = arith.addf %47, %46 : vector<16x32xf32>
    %49 = arith.divf %47, %48 : vector<16x32xf32>
    %50 = vector.extract_strided_slice %38 {offsets = [0, 32], sizes = [16, 32], strides = [1, 1]} : vector<16x128xf32> to vector<16x32xf32>
    %51 = vector.extract_strided_slice %41 {offsets = [0, 32], sizes = [16, 32], strides = [1, 1]} : vector<16x128xf32> to vector<16x32xf32>
    %52 = arith.addf %50, %51 : vector<16x32xf32>
    %53 = arith.negf %52 : vector<16x32xf32>
    %54 = math.exp %53 : vector<16x32xf32>
    %cst_19 = arith.constant 1.000000e+00 : f32
    %55 = vector.broadcast %cst_19 : f32 to vector<16x32xf32>
    %56 = arith.addf %55, %54 : vector<16x32xf32>
    %57 = arith.divf %55, %56 : vector<16x32xf32>
    %58 = vector.extract_strided_slice %38 {offsets = [0, 64], sizes = [16, 32], strides = [1, 1]} : vector<16x128xf32> to vector<16x32xf32>
    %59 = vector.extract_strided_slice %41 {offsets = [0, 64], sizes = [16, 32], strides = [1, 1]} : vector<16x128xf32> to vector<16x32xf32>
    %60 = arith.mulf %49, %59 : vector<16x32xf32>
    %61 = arith.addf %58, %60 : vector<16x32xf32>
    %62 = math.tanh %61 : vector<16x32xf32>
    %cst_20 = arith.constant 1.000000e+00 : f32
    %63 = vector.broadcast %cst_20 : f32 to vector<16x32xf32>
    %64 = arith.subf %63, %57 : vector<16x32xf32>
    %65 = arith.mulf %64, %62 : vector<16x32xf32>
    %66 = arith.mulf %57, %36 : vector<16x32xf32>
    %67 = arith.addf %65, %66 : vector<16x32xf32>
    %68 = vector.shape_cast %10 : vector<16x1xi1> to vector<16x1xi1>
    %69 = vector.broadcast %68 : vector<16x1xi1> to vector<16x32xi1>
    %70 = arith.select %69, %67, %36 : vector<16x32xi1>, vector<16x32xf32>
    %71 = arith.truncf %70 : vector<16x32xf32> to vector<16x32xbf16>
    %c0_21 = arith.constant 0 : index
    %c0_22 = arith.constant 0 : index
    %72 = vector.load %arg25[%c0_21, %c0_22] : memref<128x128xbf16, #tpu.memory_space<vmem>>, vector<16x32xbf16>
    tpu.vector_store %arg25[%c0_21, %c0_22], %71 {strides = array<i32>} : memref<128x128xbf16, #tpu.memory_space<vmem>>, vector<16x32xbf16>,
    %c16 = arith.constant 16 : index
    %c0_23 = arith.constant 0 : index
    %73 = vector.load %arg24[%c16, %c0_23] : memref<128x128xbf16, #tpu.memory_space<vmem>>, vector<16x128xbf16>
    %74 = arith.extf %73 : vector<16x128xbf16> to vector<16x128xf32>
    %75 = arith.truncf %70 : vector<16x32xf32> to vector<16x32xbf16>
    %cst_24 = arith.constant dense<0.000000e+00> : vector<16x128xf32>
    %76 = tpu.matmul %75, %26, %cst_24 {dimension_numbers = #tpu.dot_dimension_numbers<[1], [0], [0], [1], [0, 0, 1, 1], [], []>} : vector<16x32xbf16>, vector<32x128xbf16>, vector<16x128xf32> -> vector<16x128xf32>
    %77 = arith.addf %76, %30 : vector<16x128xf32>
    %78 = vector.extract_strided_slice %74 {offsets = [0, 0], sizes = [16, 32], strides = [1, 1]} : vector<16x128xf32> to vector<16x32xf32>
    %79 = vector.extract_strided_slice %77 {offsets = [0, 0], sizes = [16, 32], strides = [1, 1]} : vector<16x128xf32> to vector<16x32xf32>
    %80 = arith.addf %78, %79 : vector<16x32xf32>
    %81 = arith.negf %80 : vector<16x32xf32>
    %82 = math.exp %81 : vector<16x32xf32>
    %cst_25 = arith.constant 1.000000e+00 : f32
    %83 = vector.broadcast %cst_25 : f32 to vector<16x32xf32>
    %84 = arith.addf %83, %82 : vector<16x32xf32>
    %85 = arith.divf %83, %84 : vector<16x32xf32>
    %86 = vector.extract_strided_slice %74 {offsets = [0, 32], sizes = [16, 32], strides = [1, 1]} : vector<16x128xf32> to vector<16x32xf32>
    %87 = vector.extract_strided_slice %77 {offsets = [0, 32], sizes = [16, 32], strides = [1, 1]} : vector<16x128xf32> to vector<16x32xf32>
    %88 = arith.addf %86, %87 : vector<16x32xf32>
    %89 = arith.negf %88 : vector<16x32xf32>
    %90 = math.exp %89 : vector<16x32xf32>
    %cst_26 = arith.constant 1.000000e+00 : f32
    %91 = vector.broadcast %cst_26 : f32 to vector<16x32xf32>
    %92 = arith.addf %91, %90 : vector<16x32xf32>
    %93 = arith.divf %91, %92 : vector<16x32xf32>
    %94 = vector.extract_strided_slice %74 {offsets = [0, 64], sizes = [16, 32], strides = [1, 1]} : vector<16x128xf32> to vector<16x32xf32>
    %95 = vector.extract_strided_slice %77 {offsets = [0, 64], sizes = [16, 32], strides = [1, 1]} : vector<16x128xf32> to vector<16x32xf32>
    %96 = arith.mulf %85, %95 : vector<16x32xf32>
    %97 = arith.addf %94, %96 : vector<16x32xf32>
    %98 = math.tanh %97 : vector<16x32xf32>
    %cst_27 = arith.constant 1.000000e+00 : f32
    %99 = vector.broadcast %cst_27 : f32 to vector<16x32xf32>
    %100 = arith.subf %99, %93 : vector<16x32xf32>
    %101 = arith.mulf %100, %98 : vector<16x32xf32>
    %102 = arith.mulf %93, %70 : vector<16x32xf32>
    %103 = arith.addf %101, %102 : vector<16x32xf32>
    %104 = vector.shape_cast %12 : vector<16x1xi1> to vector<16x1xi1>
    %105 = vector.broadcast %104 : vector<16x1xi1> to vector<16x32xi1>
    %106 = arith.select %105, %103, %70 : vector<16x32xi1>, vector<16x32xf32>
    %107 = arith.truncf %106 : vector<16x32xf32> to vector<16x32xbf16>
    %c16_28 = arith.constant 16 : index
    %c0_29 = arith.constant 0 : index
    %108 = vector.load %arg25[%c16_28, %c0_29] : memref<128x128xbf16, #tpu.memory_space<vmem>>, vector<16x32xbf16>
    tpu.vector_store %arg25[%c16_28, %c0_29], %107 {strides = array<i32>} : memref<128x128xbf16, #tpu.memory_space<vmem>>, vector<16x32xbf16>,
    %c32 = arith.constant 32 : index
    %c0_30 = arith.constant 0 : index
    %109 = vector.load %arg24[%c32, %c0_30] : memref<128x128xbf16, #tpu.memory_space<vmem>>, vector<16x128xbf16>
    %110 = arith.extf %109 : vector<16x128xbf16> to vector<16x128xf32>
    %111 = arith.truncf %106 : vector<16x32xf32> to vector<16x32xbf16>
    %cst_31 = arith.constant dense<0.000000e+00> : vector<16x128xf32>
    %112 = tpu.matmul %111, %26, %cst_31 {dimension_numbers = #tpu.dot_dimension_numbers<[1], [0], [0], [1], [0, 0, 1, 1], [], []>} : vector<16x32xbf16>, vector<32x128xbf16>, vector<16x128xf32> -> vector<16x128xf32>
    %113 = arith.addf %112, %30 : vector<16x128xf32>
    %114 = vector.extract_strided_slice %110 {offsets = [0, 0], sizes = [16, 32], strides = [1, 1]} : vector<16x128xf32> to vector<16x32xf32>
    %115 = vector.extract_strided_slice %113 {offsets = [0, 0], sizes = [16, 32], strides = [1, 1]} : vector<16x128xf32> to vector<16x32xf32>
    %116 = arith.addf %114, %115 : vector<16x32xf32>
    %117 = arith.negf %116 : vector<16x32xf32>
    %118 = math.exp %117 : vector<16x32xf32>
    %cst_32 = arith.constant 1.000000e+00 : f32
    %119 = vector.broadcast %cst_32 : f32 to vector<16x32xf32>
    %120 = arith.addf %119, %118 : vector<16x32xf32>
    %121 = arith.divf %119, %120 : vector<16x32xf32>
    %122 = vector.extract_strided_slice %110 {offsets = [0, 32], sizes = [16, 32], strides = [1, 1]} : vector<16x128xf32> to vector<16x32xf32>
    %123 = vector.extract_strided_slice %113 {offsets = [0, 32], sizes = [16, 32], strides = [1, 1]} : vector<16x128xf32> to vector<16x32xf32>
    %124 = arith.addf %122, %123 : vector<16x32xf32>
    %125 = arith.negf %124 : vector<16x32xf32>
    %126 = math.exp %125 : vector<16x32xf32>
    %cst_33 = arith.constant 1.000000e+00 : f32
    %127 = vector.broadcast %cst_33 : f32 to vector<16x32xf32>
    %128 = arith.addf %127, %126 : vector<16x32xf32>
    %129 = arith.divf %127, %128 : vector<16x32xf32>
    %130 = vector.extract_strided_slice %110 {offsets = [0, 64], sizes = [16, 32], strides = [1, 1]} : vector<16x128xf32> to vector<16x32xf32>
    %131 = vector.extract_strided_slice %113 {offsets = [0, 64], sizes = [16, 32], strides = [1, 1]} : vector<16x128xf32> to vector<16x32xf32>
    %132 = arith.mulf %121, %131 : vector<16x32xf32>
    %133 = arith.addf %130, %132 : vector<16x32xf32>
    %134 = math.tanh %133 : vector<16x32xf32>
    %cst_34 = arith.constant 1.000000e+00 : f32
    %135 = vector.broadcast %cst_34 : f32 to vector<16x32xf32>
    %136 = arith.subf %135, %129 : vector<16x32xf32>
    %137 = arith.mulf %136, %134 : vector<16x32xf32>
    %138 = arith.mulf %129, %106 : vector<16x32xf32>
    %139 = arith.addf %137, %138 : vector<16x32xf32>
    %140 = vector.shape_cast %14 : vector<16x1xi1> to vector<16x1xi1>
    %141 = vector.broadcast %140 : vector<16x1xi1> to vector<16x32xi1>
    %142 = arith.select %141, %139, %106 : vector<16x32xi1>, vector<16x32xf32>
    %143 = arith.truncf %142 : vector<16x32xf32> to vector<16x32xbf16>
    %c32_35 = arith.constant 32 : index
    %c0_36 = arith.constant 0 : index
    %144 = vector.load %arg25[%c32_35, %c0_36] : memref<128x128xbf16, #tpu.memory_space<vmem>>, vector<16x32xbf16>
    tpu.vector_store %arg25[%c32_35, %c0_36], %143 {strides = array<i32>} : memref<128x128xbf16, #tpu.memory_space<vmem>>, vector<16x32xbf16>,
    %c48 = arith.constant 48 : index
    %c0_37 = arith.constant 0 : index
    %145 = vector.load %arg24[%c48, %c0_37] : memref<128x128xbf16, #tpu.memory_space<vmem>>, vector<16x128xbf16>
    %146 = arith.extf %145 : vector<16x128xbf16> to vector<16x128xf32>
    %147 = arith.truncf %142 : vector<16x32xf32> to vector<16x32xbf16>
    %cst_38 = arith.constant dense<0.000000e+00> : vector<16x128xf32>
    %148 = tpu.matmul %147, %26, %cst_38 {dimension_numbers = #tpu.dot_dimension_numbers<[1], [0], [0], [1], [0, 0, 1, 1], [], []>} : vector<16x32xbf16>, vector<32x128xbf16>, vector<16x128xf32> -> vector<16x128xf32>
    %149 = arith.addf %148, %30 : vector<16x128xf32>
    %150 = vector.extract_strided_slice %146 {offsets = [0, 0], sizes = [16, 32], strides = [1, 1]} : vector<16x128xf32> to vector<16x32xf32>
    %151 = vector.extract_strided_slice %149 {offsets = [0, 0], sizes = [16, 32], strides = [1, 1]} : vector<16x128xf32> to vector<16x32xf32>
    %152 = arith.addf %150, %151 : vector<16x32xf32>
    %153 = arith.negf %152 : vector<16x32xf32>
    %154 = math.exp %153 : vector<16x32xf32>
    %cst_39 = arith.constant 1.000000e+00 : f32
    %155 = vector.broadcast %cst_39 : f32 to vector<16x32xf32>
    %156 = arith.addf %155, %154 : vector<16x32xf32>
    %157 = arith.divf %155, %156 : vector<16x32xf32>
    %158 = vector.extract_strided_slice %146 {offsets = [0, 32], sizes = [16, 32], strides = [1, 1]} : vector<16x128xf32> to vector<16x32xf32>
    %159 = vector.extract_strided_slice %149 {offsets = [0, 32], sizes = [16, 32], strides = [1, 1]} : vector<16x128xf32> to vector<16x32xf32>
    %160 = arith.addf %158, %159 : vector<16x32xf32>
    %161 = arith.negf %160 : vector<16x32xf32>
    %162 = math.exp %161 : vector<16x32xf32>
    %cst_40 = arith.constant 1.000000e+00 : f32
    %163 = vector.broadcast %cst_40 : f32 to vector<16x32xf32>
    %164 = arith.addf %163, %162 : vector<16x32xf32>
    %165 = arith.divf %163, %164 : vector<16x32xf32>
    %166 = vector.extract_strided_slice %146 {offsets = [0, 64], sizes = [16, 32], strides = [1, 1]} : vector<16x128xf32> to vector<16x32xf32>
    %167 = vector.extract_strided_slice %149 {offsets = [0, 64], sizes = [16, 32], strides = [1, 1]} : vector<16x128xf32> to vector<16x32xf32>
    %168 = arith.mulf %157, %167 : vector<16x32xf32>
    %169 = arith.addf %166, %168 : vector<16x32xf32>
    %170 = math.tanh %169 : vector<16x32xf32>
    %cst_41 = arith.constant 1.000000e+00 : f32
    %171 = vector.broadcast %cst_41 : f32 to vector<16x32xf32>
    %172 = arith.subf %171, %165 : vector<16x32xf32>
    %173 = arith.mulf %172, %170 : vector<16x32xf32>
    %174 = arith.mulf %165, %142 : vector<16x32xf32>
    %175 = arith.addf %173, %174 : vector<16x32xf32>
    %176 = vector.shape_cast %16 : vector<16x1xi1> to vector<16x1xi1>
    %177 = vector.broadcast %176 : vector<16x1xi1> to vector<16x32xi1>
    %178 = arith.select %177, %175, %142 : vector<16x32xi1>, vector<16x32xf32>
    %179 = arith.truncf %178 : vector<16x32xf32> to vector<16x32xbf16>
    %c48_42 = arith.constant 48 : index
    %c0_43 = arith.constant 0 : index
    %180 = vector.load %arg25[%c48_42, %c0_43] : memref<128x128xbf16, #tpu.memory_space<vmem>>, vector<16x32xbf16>
    tpu.vector_store %arg25[%c48_42, %c0_43], %179 {strides = array<i32>} : memref<128x128xbf16, #tpu.memory_space<vmem>>, vector<16x32xbf16>,
    %c64 = arith.constant 64 : index
    %c0_44 = arith.constant 0 : index
    %181 = vector.load %arg24[%c64, %c0_44] : memref<128x128xbf16, #tpu.memory_space<vmem>>, vector<16x128xbf16>
    %182 = arith.extf %181 : vector<16x128xbf16> to vector<16x128xf32>
    %183 = arith.truncf %178 : vector<16x32xf32> to vector<16x32xbf16>
    %cst_45 = arith.constant dense<0.000000e+00> : vector<16x128xf32>
    %184 = tpu.matmul %183, %26, %cst_45 {dimension_numbers = #tpu.dot_dimension_numbers<[1], [0], [0], [1], [0, 0, 1, 1], [], []>} : vector<16x32xbf16>, vector<32x128xbf16>, vector<16x128xf32> -> vector<16x128xf32>
    %185 = arith.addf %184, %30 : vector<16x128xf32>
    %186 = vector.extract_strided_slice %182 {offsets = [0, 0], sizes = [16, 32], strides = [1, 1]} : vector<16x128xf32> to vector<16x32xf32>
    %187 = vector.extract_strided_slice %185 {offsets = [0, 0], sizes = [16, 32], strides = [1, 1]} : vector<16x128xf32> to vector<16x32xf32>
    %188 = arith.addf %186, %187 : vector<16x32xf32>
    %189 = arith.negf %188 : vector<16x32xf32>
    %190 = math.exp %189 : vector<16x32xf32>
    %cst_46 = arith.constant 1.000000e+00 : f32
    %191 = vector.broadcast %cst_46 : f32 to vector<16x32xf32>
    %192 = arith.addf %191, %190 : vector<16x32xf32>
    %193 = arith.divf %191, %192 : vector<16x32xf32>
    %194 = vector.extract_strided_slice %182 {offsets = [0, 32], sizes = [16, 32], strides = [1, 1]} : vector<16x128xf32> to vector<16x32xf32>
    %195 = vector.extract_strided_slice %185 {offsets = [0, 32], sizes = [16, 32], strides = [1, 1]} : vector<16x128xf32> to vector<16x32xf32>
    %196 = arith.addf %194, %195 : vector<16x32xf32>
    %197 = arith.negf %196 : vector<16x32xf32>
    %198 = math.exp %197 : vector<16x32xf32>
    %cst_47 = arith.constant 1.000000e+00 : f32
    %199 = vector.broadcast %cst_47 : f32 to vector<16x32xf32>
    %200 = arith.addf %199, %198 : vector<16x32xf32>
    %201 = arith.divf %199, %200 : vector<16x32xf32>
    %202 = vector.extract_strided_slice %182 {offsets = [0, 64], sizes = [16, 32], strides = [1, 1]} : vector<16x128xf32> to vector<16x32xf32>
    %203 = vector.extract_strided_slice %185 {offsets = [0, 64], sizes = [16, 32], strides = [1, 1]} : vector<16x128xf32> to vector<16x32xf32>
    %204 = arith.mulf %193, %203 : vector<16x32xf32>
    %205 = arith.addf %202, %204 : vector<16x32xf32>
    %206 = math.tanh %205 : vector<16x32xf32>
    %cst_48 = arith.constant 1.000000e+00 : f32
    %207 = vector.broadcast %cst_48 : f32 to vector<16x32xf32>
    %208 = arith.subf %207, %201 : vector<16x32xf32>
    %209 = arith.mulf %208, %206 : vector<16x32xf32>
    %210 = arith.mulf %201, %178 : vector<16x32xf32>
    %211 = arith.addf %209, %210 : vector<16x32xf32>
    %212 = vector.shape_cast %18 : vector<16x1xi1> to vector<16x1xi1>
    %213 = vector.broadcast %212 : vector<16x1xi1> to vector<16x32xi1>
    %214 = arith.select %213, %211, %178 : vector<16x32xi1>, vector<16x32xf32>
    %215 = arith.truncf %214 : vector<16x32xf32> to vector<16x32xbf16>
    %c64_49 = arith.constant 64 : index
    %c0_50 = arith.constant 0 : index
    %216 = vector.load %arg25[%c64_49, %c0_50] : memref<128x128xbf16, #tpu.memory_space<vmem>>, vector<16x32xbf16>
    tpu.vector_store %arg25[%c64_49, %c0_50], %215 {strides = array<i32>} : memref<128x128xbf16, #tpu.memory_space<vmem>>, vector<16x32xbf16>,
    %c80 = arith.constant 80 : index
    %c0_51 = arith.constant 0 : index
    %217 = vector.load %arg24[%c80, %c0_51] : memref<128x128xbf16, #tpu.memory_space<vmem>>, vector<16x128xbf16>
    %218 = arith.extf %217 : vector<16x128xbf16> to vector<16x128xf32>
    %219 = arith.truncf %214 : vector<16x32xf32> to vector<16x32xbf16>
    %cst_52 = arith.constant dense<0.000000e+00> : vector<16x128xf32>
    %220 = tpu.matmul %219, %26, %cst_52 {dimension_numbers = #tpu.dot_dimension_numbers<[1], [0], [0], [1], [0, 0, 1, 1], [], []>} : vector<16x32xbf16>, vector<32x128xbf16>, vector<16x128xf32> -> vector<16x128xf32>
    %221 = arith.addf %220, %30 : vector<16x128xf32>
    %222 = vector.extract_strided_slice %218 {offsets = [0, 0], sizes = [16, 32], strides = [1, 1]} : vector<16x128xf32> to vector<16x32xf32>
    %223 = vector.extract_strided_slice %221 {offsets = [0, 0], sizes = [16, 32], strides = [1, 1]} : vector<16x128xf32> to vector<16x32xf32>
    %224 = arith.addf %222, %223 : vector<16x32xf32>
    %225 = arith.negf %224 : vector<16x32xf32>
    %226 = math.exp %225 : vector<16x32xf32>
    %cst_53 = arith.constant 1.000000e+00 : f32
    %227 = vector.broadcast %cst_53 : f32 to vector<16x32xf32>
    %228 = arith.addf %227, %226 : vector<16x32xf32>
    %229 = arith.divf %227, %228 : vector<16x32xf32>
    %230 = vector.extract_strided_slice %218 {offsets = [0, 32], sizes = [16, 32], strides = [1, 1]} : vector<16x128xf32> to vector<16x32xf32>
    %231 = vector.extract_strided_slice %221 {offsets = [0, 32], sizes = [16, 32], strides = [1, 1]} : vector<16x128xf32> to vector<16x32xf32>
    %232 = arith.addf %230, %231 : vector<16x32xf32>
    %233 = arith.negf %232 : vector<16x32xf32>
    %234 = math.exp %233 : vector<16x32xf32>
    %cst_54 = arith.constant 1.000000e+00 : f32
    %235 = vector.broadcast %cst_54 : f32 to vector<16x32xf32>
    %236 = arith.addf %235, %234 : vector<16x32xf32>
    %237 = arith.divf %235, %236 : vector<16x32xf32>
    %238 = vector.extract_strided_slice %218 {offsets = [0, 64], sizes = [16, 32], strides = [1, 1]} : vector<16x128xf32> to vector<16x32xf32>
    %239 = vector.extract_strided_slice %221 {offsets = [0, 64], sizes = [16, 32], strides = [1, 1]} : vector<16x128xf32> to vector<16x32xf32>
    %240 = arith.mulf %229, %239 : vector<16x32xf32>
    %241 = arith.addf %238, %240 : vector<16x32xf32>
    %242 = math.tanh %241 : vector<16x32xf32>
    %cst_55 = arith.constant 1.000000e+00 : f32
    %243 = vector.broadcast %cst_55 : f32 to vector<16x32xf32>
    %244 = arith.subf %243, %237 : vector<16x32xf32>
    %245 = arith.mulf %244, %242 : vector<16x32xf32>
    %246 = arith.mulf %237, %214 : vector<16x32xf32>
    %247 = arith.addf %245, %246 : vector<16x32xf32>
    %248 = vector.shape_cast %20 : vector<16x1xi1> to vector<16x1xi1>
    %249 = vector.broadcast %248 : vector<16x1xi1> to vector<16x32xi1>
    %250 = arith.select %249, %247, %214 : vector<16x32xi1>, vector<16x32xf32>
    %251 = arith.truncf %250 : vector<16x32xf32> to vector<16x32xbf16>
    %c80_56 = arith.constant 80 : index
    %c0_57 = arith.constant 0 : index
    %252 = vector.load %arg25[%c80_56, %c0_57] : memref<128x128xbf16, #tpu.memory_space<vmem>>, vector<16x32xbf16>
    tpu.vector_store %arg25[%c80_56, %c0_57], %251 {strides = array<i32>} : memref<128x128xbf16, #tpu.memory_space<vmem>>, vector<16x32xbf16>,
    %c96 = arith.constant 96 : index
    %c0_58 = arith.constant 0 : index
    %253 = vector.load %arg24[%c96, %c0_58] : memref<128x128xbf16, #tpu.memory_space<vmem>>, vector<16x128xbf16>
    %254 = arith.extf %253 : vector<16x128xbf16> to vector<16x128xf32>
    %255 = arith.truncf %250 : vector<16x32xf32> to vector<16x32xbf16>
    %cst_59 = arith.constant dense<0.000000e+00> : vector<16x128xf32>
    %256 = tpu.matmul %255, %26, %cst_59 {dimension_numbers = #tpu.dot_dimension_numbers<[1], [0], [0], [1], [0, 0, 1, 1], [], []>} : vector<16x32xbf16>, vector<32x128xbf16>, vector<16x128xf32> -> vector<16x128xf32>
    %257 = arith.addf %256, %30 : vector<16x128xf32>
    %258 = vector.extract_strided_slice %254 {offsets = [0, 0], sizes = [16, 32], strides = [1, 1]} : vector<16x128xf32> to vector<16x32xf32>
    %259 = vector.extract_strided_slice %257 {offsets = [0, 0], sizes = [16, 32], strides = [1, 1]} : vector<16x128xf32> to vector<16x32xf32>
    %260 = arith.addf %258, %259 : vector<16x32xf32>
    %261 = arith.negf %260 : vector<16x32xf32>
    %262 = math.exp %261 : vector<16x32xf32>
    %cst_60 = arith.constant 1.000000e+00 : f32
    %263 = vector.broadcast %cst_60 : f32 to vector<16x32xf32>
    %264 = arith.addf %263, %262 : vector<16x32xf32>
    %265 = arith.divf %263, %264 : vector<16x32xf32>
    %266 = vector.extract_strided_slice %254 {offsets = [0, 32], sizes = [16, 32], strides = [1, 1]} : vector<16x128xf32> to vector<16x32xf32>
    %267 = vector.extract_strided_slice %257 {offsets = [0, 32], sizes = [16, 32], strides = [1, 1]} : vector<16x128xf32> to vector<16x32xf32>
    %268 = arith.addf %266, %267 : vector<16x32xf32>
    %269 = arith.negf %268 : vector<16x32xf32>
    %270 = math.exp %269 : vector<16x32xf32>
    %cst_61 = arith.constant 1.000000e+00 : f32
    %271 = vector.broadcast %cst_61 : f32 to vector<16x32xf32>
    %272 = arith.addf %271, %270 : vector<16x32xf32>
    %273 = arith.divf %271, %272 : vector<16x32xf32>
    %274 = vector.extract_strided_slice %254 {offsets = [0, 64], sizes = [16, 32], strides = [1, 1]} : vector<16x128xf32> to vector<16x32xf32>
    %275 = vector.extract_strided_slice %257 {offsets = [0, 64], sizes = [16, 32], strides = [1, 1]} : vector<16x128xf32> to vector<16x32xf32>
    %276 = arith.mulf %265, %275 : vector<16x32xf32>
    %277 = arith.addf %274, %276 : vector<16x32xf32>
    %278 = math.tanh %277 : vector<16x32xf32>
    %cst_62 = arith.constant 1.000000e+00 : f32
    %279 = vector.broadcast %cst_62 : f32 to vector<16x32xf32>
    %280 = arith.subf %279, %273 : vector<16x32xf32>
    %281 = arith.mulf %280, %278 : vector<16x32xf32>
    %282 = arith.mulf %273, %250 : vector<16x32xf32>
    %283 = arith.addf %281, %282 : vector<16x32xf32>
    %284 = vector.shape_cast %22 : vector<16x1xi1> to vector<16x1xi1>
    %285 = vector.broadcast %284 : vector<16x1xi1> to vector<16x32xi1>
    %286 = arith.select %285, %283, %250 : vector<16x32xi1>, vector<16x32xf32>
    %287 = arith.truncf %286 : vector<16x32xf32> to vector<16x32xbf16>
    %c96_63 = arith.constant 96 : index
    %c0_64 = arith.constant 0 : index
    %288 = vector.load %arg25[%c96_63, %c0_64] : memref<128x128xbf16, #tpu.memory_space<vmem>>, vector<16x32xbf16>
    tpu.vector_store %arg25[%c96_63, %c0_64], %287 {strides = array<i32>} : memref<128x128xbf16, #tpu.memory_space<vmem>>, vector<16x32xbf16>,
    %c112 = arith.constant 112 : index
    %c0_65 = arith.constant 0 : index
    %289 = vector.load %arg24[%c112, %c0_65] : memref<128x128xbf16, #tpu.memory_space<vmem>>, vector<16x128xbf16>
    %290 = arith.extf %289 : vector<16x128xbf16> to vector<16x128xf32>
    %291 = arith.truncf %286 : vector<16x32xf32> to vector<16x32xbf16>
    %cst_66 = arith.constant dense<0.000000e+00> : vector<16x128xf32>
    %292 = tpu.matmul %291, %26, %cst_66 {dimension_numbers = #tpu.dot_dimension_numbers<[1], [0], [0], [1], [0, 0, 1, 1], [], []>} : vector<16x32xbf16>, vector<32x128xbf16>, vector<16x128xf32> -> vector<16x128xf32>
    %293 = arith.addf %292, %30 : vector<16x128xf32>
    %294 = vector.extract_strided_slice %290 {offsets = [0, 0], sizes = [16, 32], strides = [1, 1]} : vector<16x128xf32> to vector<16x32xf32>
    %295 = vector.extract_strided_slice %293 {offsets = [0, 0], sizes = [16, 32], strides = [1, 1]} : vector<16x128xf32> to vector<16x32xf32>
    %296 = arith.addf %294, %295 : vector<16x32xf32>
    %297 = arith.negf %296 : vector<16x32xf32>
    %298 = math.exp %297 : vector<16x32xf32>
    %cst_67 = arith.constant 1.000000e+00 : f32
    %299 = vector.broadcast %cst_67 : f32 to vector<16x32xf32>
    %300 = arith.addf %299, %298 : vector<16x32xf32>
    %301 = arith.divf %299, %300 : vector<16x32xf32>
    %302 = vector.extract_strided_slice %290 {offsets = [0, 32], sizes = [16, 32], strides = [1, 1]} : vector<16x128xf32> to vector<16x32xf32>
    %303 = vector.extract_strided_slice %293 {offsets = [0, 32], sizes = [16, 32], strides = [1, 1]} : vector<16x128xf32> to vector<16x32xf32>
    %304 = arith.addf %302, %303 : vector<16x32xf32>
    %305 = arith.negf %304 : vector<16x32xf32>
    %306 = math.exp %305 : vector<16x32xf32>
    %cst_68 = arith.constant 1.000000e+00 : f32
    %307 = vector.broadcast %cst_68 : f32 to vector<16x32xf32>
    %308 = arith.addf %307, %306 : vector<16x32xf32>
    %309 = arith.divf %307, %308 : vector<16x32xf32>
    %310 = vector.extract_strided_slice %290 {offsets = [0, 64], sizes = [16, 32], strides = [1, 1]} : vector<16x128xf32> to vector<16x32xf32>
    %311 = vector.extract_strided_slice %293 {offsets = [0, 64], sizes = [16, 32], strides = [1, 1]} : vector<16x128xf32> to vector<16x32xf32>
    %312 = arith.mulf %301, %311 : vector<16x32xf32>
    %313 = arith.addf %310, %312 : vector<16x32xf32>
    %314 = math.tanh %313 : vector<16x32xf32>
    %cst_69 = arith.constant 1.000000e+00 : f32
    %315 = vector.broadcast %cst_69 : f32 to vector<16x32xf32>
    %316 = arith.subf %315, %309 : vector<16x32xf32>
    %317 = arith.mulf %316, %314 : vector<16x32xf32>
    %318 = arith.mulf %309, %286 : vector<16x32xf32>
    %319 = arith.addf %317, %318 : vector<16x32xf32>
    %320 = vector.shape_cast %24 : vector<16x1xi1> to vector<16x1xi1>
    %321 = vector.broadcast %320 : vector<16x1xi1> to vector<16x32xi1>
    %322 = arith.select %321, %319, %286 : vector<16x32xi1>, vector<16x32xf32>
    %323 = arith.truncf %322 : vector<16x32xf32> to vector<16x32xbf16>
    %c112_70 = arith.constant 112 : index
    %c0_71 = arith.constant 0 : index
    %324 = vector.load %arg25[%c112_70, %c0_71] : memref<128x128xbf16, #tpu.memory_space<vmem>>, vector<16x32xbf16>
    tpu.vector_store %arg25[%c112_70, %c0_71], %323 {strides = array<i32>} : memref<128x128xbf16, #tpu.memory_space<vmem>>, vector<16x32xbf16>,
    %c0_72 = arith.constant 0 : index
    %c0_73 = arith.constant 0 : index
    %325 = vector.load %arg7[%c0_72, %c0_73] : memref<128x128xbf16, #tpu.memory_space<vmem>>, vector<128x128xbf16>
    %c0_74 = arith.constant 0 : index
    %c0_75 = arith.constant 0 : index
    %326 = vector.load %arg8[%c0_74, %c0_75] : memref<32x128xbf16, #tpu.memory_space<vmem>>, vector<32x128xbf16>
    %c0_76 = arith.constant 0 : index
    %c0_77 = arith.constant 0 : index
    %327 = vector.load %arg9[%c0_76, %c0_77] : memref<1x128xf32, #tpu.memory_space<vmem>>, vector<1x128xf32>
    %c0_78 = arith.constant 0 : index
    %c0_79 = arith.constant 0 : index
    %328 = vector.load %arg10[%c0_78, %c0_79] : memref<1x128xf32, #tpu.memory_space<vmem>>, vector<1x128xf32>
    %329 = vector.shape_cast %328 : vector<1x128xf32> to vector<1x128xf32>
    %330 = vector.broadcast %329 : vector<1x128xf32> to vector<16x128xf32>
    %cst_80 = arith.constant dense<0.000000e+00> : vector<128x128xf32>
    %331 = tpu.matmul %7, %325, %cst_80 {dimension_numbers = #tpu.dot_dimension_numbers<[1], [0], [0], [1], [0, 0, 1, 1], [], []>} : vector<128x128xbf16>, vector<128x128xbf16>, vector<128x128xf32> -> vector<128x128xf32>
    %332 = vector.broadcast %327 : vector<1x128xf32> to vector<128x128xf32>
    %333 = arith.addf %331, %332 : vector<128x128xf32>
    %334 = arith.truncf %333 : vector<128x128xf32> to vector<128x128xbf16>
    %c0_81 = arith.constant 0 : index
    %c0_82 = arith.constant 0 : index
    %335 = vector.load %arg24[%c0_81, %c0_82] : memref<128x128xbf16, #tpu.memory_space<vmem>>, vector<128x128xbf16>
    tpu.vector_store %arg24[%c0_81, %c0_82], %334 {strides = array<i32>} : memref<128x128xbf16, #tpu.memory_space<vmem>>, vector<128x128xbf16>,
    %cst_83 = arith.constant 0.000000e+00 : f32
    %336 = vector.broadcast %cst_83 : f32 to vector<16x32xf32>
    %c112_84 = arith.constant 112 : index
    %c0_85 = arith.constant 0 : index
    %337 = vector.load %arg24[%c112_84, %c0_85] : memref<128x128xbf16, #tpu.memory_space<vmem>>, vector<16x128xbf16>
    %338 = arith.extf %337 : vector<16x128xbf16> to vector<16x128xf32>
    %339 = arith.truncf %336 : vector<16x32xf32> to vector<16x32xbf16>
    %cst_86 = arith.constant dense<0.000000e+00> : vector<16x128xf32>
    %340 = tpu.matmul %339, %326, %cst_86 {dimension_numbers = #tpu.dot_dimension_numbers<[1], [0], [0], [1], [0, 0, 1, 1], [], []>} : vector<16x32xbf16>, vector<32x128xbf16>, vector<16x128xf32> -> vector<16x128xf32>
    %341 = arith.addf %340, %330 : vector<16x128xf32>
    %342 = vector.extract_strided_slice %338 {offsets = [0, 0], sizes = [16, 32], strides = [1, 1]} : vector<16x128xf32> to vector<16x32xf32>
    %343 = vector.extract_strided_slice %341 {offsets = [0, 0], sizes = [16, 32], strides = [1, 1]} : vector<16x128xf32> to vector<16x32xf32>
    %344 = arith.addf %342, %343 : vector<16x32xf32>
    %345 = arith.negf %344 : vector<16x32xf32>
    %346 = math.exp %345 : vector<16x32xf32>
    %cst_87 = arith.constant 1.000000e+00 : f32
    %347 = vector.broadcast %cst_87 : f32 to vector<16x32xf32>
    %348 = arith.addf %347, %346 : vector<16x32xf32>
    %349 = arith.divf %347, %348 : vector<16x32xf32>
    %350 = vector.extract_strided_slice %338 {offsets = [0, 32], sizes = [16, 32], strides = [1, 1]} : vector<16x128xf32> to vector<16x32xf32>
    %351 = vector.extract_strided_slice %341 {offsets = [0, 32], sizes = [16, 32], strides = [1, 1]} : vector<16x128xf32> to vector<16x32xf32>
    %352 = arith.addf %350, %351 : vector<16x32xf32>
    %353 = arith.negf %352 : vector<16x32xf32>
    %354 = math.exp %353 : vector<16x32xf32>
    %cst_88 = arith.constant 1.000000e+00 : f32
    %355 = vector.broadcast %cst_88 : f32 to vector<16x32xf32>
    %356 = arith.addf %355, %354 : vector<16x32xf32>
    %357 = arith.divf %355, %356 : vector<16x32xf32>
    %358 = vector.extract_strided_slice %338 {offsets = [0, 64], sizes = [16, 32], strides = [1, 1]} : vector<16x128xf32> to vector<16x32xf32>
    %359 = vector.extract_strided_slice %341 {offsets = [0, 64], sizes = [16, 32], strides = [1, 1]} : vector<16x128xf32> to vector<16x32xf32>
    %360 = arith.mulf %349, %359 : vector<16x32xf32>
    %361 = arith.addf %358, %360 : vector<16x32xf32>
    %362 = math.tanh %361 : vector<16x32xf32>
    %cst_89 = arith.constant 1.000000e+00 : f32
    %363 = vector.broadcast %cst_89 : f32 to vector<16x32xf32>
    %364 = arith.subf %363, %357 : vector<16x32xf32>
    %365 = arith.mulf %364, %362 : vector<16x32xf32>
    %366 = arith.mulf %357, %336 : vector<16x32xf32>
    %367 = arith.addf %365, %366 : vector<16x32xf32>
    %368 = vector.shape_cast %24 : vector<16x1xi1> to vector<16x1xi1>
    %369 = vector.broadcast %368 : vector<16x1xi1> to vector<16x32xi1>
    %370 = arith.select %369, %367, %336 : vector<16x32xi1>, vector<16x32xf32>
    %371 = arith.truncf %370 : vector<16x32xf32> to vector<16x32xbf16>
    %c112_90 = arith.constant 112 : index
    %c32_91 = arith.constant 32 : index
    %372 = vector.load %arg25[%c112_90, %c32_91] : memref<128x128xbf16, #tpu.memory_space<vmem>>, vector<16x32xbf16>
    tpu.vector_store %arg25[%c112_90, %c32_91], %371 {strides = array<i32>} : memref<128x128xbf16, #tpu.memory_space<vmem>>, vector<16x32xbf16>,
    %c96_92 = arith.constant 96 : index
    %c0_93 = arith.constant 0 : index
    %373 = vector.load %arg24[%c96_92, %c0_93] : memref<128x128xbf16, #tpu.memory_space<vmem>>, vector<16x128xbf16>
    %374 = arith.extf %373 : vector<16x128xbf16> to vector<16x128xf32>
    %375 = arith.truncf %370 : vector<16x32xf32> to vector<16x32xbf16>
    %cst_94 = arith.constant dense<0.000000e+00> : vector<16x128xf32>
    %376 = tpu.matmul %375, %326, %cst_94 {dimension_numbers = #tpu.dot_dimension_numbers<[1], [0], [0], [1], [0, 0, 1, 1], [], []>} : vector<16x32xbf16>, vector<32x128xbf16>, vector<16x128xf32> -> vector<16x128xf32>
    %377 = arith.addf %376, %330 : vector<16x128xf32>
    %378 = vector.extract_strided_slice %374 {offsets = [0, 0], sizes = [16, 32], strides = [1, 1]} : vector<16x128xf32> to vector<16x32xf32>
    %379 = vector.extract_strided_slice %377 {offsets = [0, 0], sizes = [16, 32], strides = [1, 1]} : vector<16x128xf32> to vector<16x32xf32>
    %380 = arith.addf %378, %379 : vector<16x32xf32>
    %381 = arith.negf %380 : vector<16x32xf32>
    %382 = math.exp %381 : vector<16x32xf32>
    %cst_95 = arith.constant 1.000000e+00 : f32
    %383 = vector.broadcast %cst_95 : f32 to vector<16x32xf32>
    %384 = arith.addf %383, %382 : vector<16x32xf32>
    %385 = arith.divf %383, %384 : vector<16x32xf32>
    %386 = vector.extract_strided_slice %374 {offsets = [0, 32], sizes = [16, 32], strides = [1, 1]} : vector<16x128xf32> to vector<16x32xf32>
    %387 = vector.extract_strided_slice %377 {offsets = [0, 32], sizes = [16, 32], strides = [1, 1]} : vector<16x128xf32> to vector<16x32xf32>
    %388 = arith.addf %386, %387 : vector<16x32xf32>
    %389 = arith.negf %388 : vector<16x32xf32>
    %390 = math.exp %389 : vector<16x32xf32>
    %cst_96 = arith.constant 1.000000e+00 : f32
    %391 = vector.broadcast %cst_96 : f32 to vector<16x32xf32>
    %392 = arith.addf %391, %390 : vector<16x32xf32>
    %393 = arith.divf %391, %392 : vector<16x32xf32>
    %394 = vector.extract_strided_slice %374 {offsets = [0, 64], sizes = [16, 32], strides = [1, 1]} : vector<16x128xf32> to vector<16x32xf32>
    %395 = vector.extract_strided_slice %377 {offsets = [0, 64], sizes = [16, 32], strides = [1, 1]} : vector<16x128xf32> to vector<16x32xf32>
    %396 = arith.mulf %385, %395 : vector<16x32xf32>
    %397 = arith.addf %394, %396 : vector<16x32xf32>
    %398 = math.tanh %397 : vector<16x32xf32>
    %cst_97 = arith.constant 1.000000e+00 : f32
    %399 = vector.broadcast %cst_97 : f32 to vector<16x32xf32>
    %400 = arith.subf %399, %393 : vector<16x32xf32>
    %401 = arith.mulf %400, %398 : vector<16x32xf32>
    %402 = arith.mulf %393, %370 : vector<16x32xf32>
    %403 = arith.addf %401, %402 : vector<16x32xf32>
    %404 = vector.shape_cast %22 : vector<16x1xi1> to vector<16x1xi1>
    %405 = vector.broadcast %404 : vector<16x1xi1> to vector<16x32xi1>
    %406 = arith.select %405, %403, %370 : vector<16x32xi1>, vector<16x32xf32>
    %407 = arith.truncf %406 : vector<16x32xf32> to vector<16x32xbf16>
    %c96_98 = arith.constant 96 : index
    %c32_99 = arith.constant 32 : index
    %408 = vector.load %arg25[%c96_98, %c32_99] : memref<128x128xbf16, #tpu.memory_space<vmem>>, vector<16x32xbf16>
    tpu.vector_store %arg25[%c96_98, %c32_99], %407 {strides = array<i32>} : memref<128x128xbf16, #tpu.memory_space<vmem>>, vector<16x32xbf16>,
    %c80_100 = arith.constant 80 : index
    %c0_101 = arith.constant 0 : index
    %409 = vector.load %arg24[%c80_100, %c0_101] : memref<128x128xbf16, #tpu.memory_space<vmem>>, vector<16x128xbf16>
    %410 = arith.extf %409 : vector<16x128xbf16> to vector<16x128xf32>
    %411 = arith.truncf %406 : vector<16x32xf32> to vector<16x32xbf16>
    %cst_102 = arith.constant dense<0.000000e+00> : vector<16x128xf32>
    %412 = tpu.matmul %411, %326, %cst_102 {dimension_numbers = #tpu.dot_dimension_numbers<[1], [0], [0], [1], [0, 0, 1, 1], [], []>} : vector<16x32xbf16>, vector<32x128xbf16>, vector<16x128xf32> -> vector<16x128xf32>
    %413 = arith.addf %412, %330 : vector<16x128xf32>
    %414 = vector.extract_strided_slice %410 {offsets = [0, 0], sizes = [16, 32], strides = [1, 1]} : vector<16x128xf32> to vector<16x32xf32>
    %415 = vector.extract_strided_slice %413 {offsets = [0, 0], sizes = [16, 32], strides = [1, 1]} : vector<16x128xf32> to vector<16x32xf32>
    %416 = arith.addf %414, %415 : vector<16x32xf32>
    %417 = arith.negf %416 : vector<16x32xf32>
    %418 = math.exp %417 : vector<16x32xf32>
    %cst_103 = arith.constant 1.000000e+00 : f32
    %419 = vector.broadcast %cst_103 : f32 to vector<16x32xf32>
    %420 = arith.addf %419, %418 : vector<16x32xf32>
    %421 = arith.divf %419, %420 : vector<16x32xf32>
    %422 = vector.extract_strided_slice %410 {offsets = [0, 32], sizes = [16, 32], strides = [1, 1]} : vector<16x128xf32> to vector<16x32xf32>
    %423 = vector.extract_strided_slice %413 {offsets = [0, 32], sizes = [16, 32], strides = [1, 1]} : vector<16x128xf32> to vector<16x32xf32>
    %424 = arith.addf %422, %423 : vector<16x32xf32>
    %425 = arith.negf %424 : vector<16x32xf32>
    %426 = math.exp %425 : vector<16x32xf32>
    %cst_104 = arith.constant 1.000000e+00 : f32
    %427 = vector.broadcast %cst_104 : f32 to vector<16x32xf32>
    %428 = arith.addf %427, %426 : vector<16x32xf32>
    %429 = arith.divf %427, %428 : vector<16x32xf32>
    %430 = vector.extract_strided_slice %410 {offsets = [0, 64], sizes = [16, 32], strides = [1, 1]} : vector<16x128xf32> to vector<16x32xf32>
    %431 = vector.extract_strided_slice %413 {offsets = [0, 64], sizes = [16, 32], strides = [1, 1]} : vector<16x128xf32> to vector<16x32xf32>
    %432 = arith.mulf %421, %431 : vector<16x32xf32>
    %433 = arith.addf %430, %432 : vector<16x32xf32>
    %434 = math.tanh %433 : vector<16x32xf32>
    %cst_105 = arith.constant 1.000000e+00 : f32
    %435 = vector.broadcast %cst_105 : f32 to vector<16x32xf32>
    %436 = arith.subf %435, %429 : vector<16x32xf32>
    %437 = arith.mulf %436, %434 : vector<16x32xf32>
    %438 = arith.mulf %429, %406 : vector<16x32xf32>
    %439 = arith.addf %437, %438 : vector<16x32xf32>
    %440 = vector.shape_cast %20 : vector<16x1xi1> to vector<16x1xi1>
    %441 = vector.broadcast %440 : vector<16x1xi1> to vector<16x32xi1>
    %442 = arith.select %441, %439, %406 : vector<16x32xi1>, vector<16x32xf32>
    %443 = arith.truncf %442 : vector<16x32xf32> to vector<16x32xbf16>
    %c80_106 = arith.constant 80 : index
    %c32_107 = arith.constant 32 : index
    %444 = vector.load %arg25[%c80_106, %c32_107] : memref<128x128xbf16, #tpu.memory_space<vmem>>, vector<16x32xbf16>
    tpu.vector_store %arg25[%c80_106, %c32_107], %443 {strides = array<i32>} : memref<128x128xbf16, #tpu.memory_space<vmem>>, vector<16x32xbf16>,
    %c64_108 = arith.constant 64 : index
    %c0_109 = arith.constant 0 : index
    %445 = vector.load %arg24[%c64_108, %c0_109] : memref<128x128xbf16, #tpu.memory_space<vmem>>, vector<16x128xbf16>
    %446 = arith.extf %445 : vector<16x128xbf16> to vector<16x128xf32>
    %447 = arith.truncf %442 : vector<16x32xf32> to vector<16x32xbf16>
    %cst_110 = arith.constant dense<0.000000e+00> : vector<16x128xf32>
    %448 = tpu.matmul %447, %326, %cst_110 {dimension_numbers = #tpu.dot_dimension_numbers<[1], [0], [0], [1], [0, 0, 1, 1], [], []>} : vector<16x32xbf16>, vector<32x128xbf16>, vector<16x128xf32> -> vector<16x128xf32>
    %449 = arith.addf %448, %330 : vector<16x128xf32>
    %450 = vector.extract_strided_slice %446 {offsets = [0, 0], sizes = [16, 32], strides = [1, 1]} : vector<16x128xf32> to vector<16x32xf32>
    %451 = vector.extract_strided_slice %449 {offsets = [0, 0], sizes = [16, 32], strides = [1, 1]} : vector<16x128xf32> to vector<16x32xf32>
    %452 = arith.addf %450, %451 : vector<16x32xf32>
    %453 = arith.negf %452 : vector<16x32xf32>
    %454 = math.exp %453 : vector<16x32xf32>
    %cst_111 = arith.constant 1.000000e+00 : f32
    %455 = vector.broadcast %cst_111 : f32 to vector<16x32xf32>
    %456 = arith.addf %455, %454 : vector<16x32xf32>
    %457 = arith.divf %455, %456 : vector<16x32xf32>
    %458 = vector.extract_strided_slice %446 {offsets = [0, 32], sizes = [16, 32], strides = [1, 1]} : vector<16x128xf32> to vector<16x32xf32>
    %459 = vector.extract_strided_slice %449 {offsets = [0, 32], sizes = [16, 32], strides = [1, 1]} : vector<16x128xf32> to vector<16x32xf32>
    %460 = arith.addf %458, %459 : vector<16x32xf32>
    %461 = arith.negf %460 : vector<16x32xf32>
    %462 = math.exp %461 : vector<16x32xf32>
    %cst_112 = arith.constant 1.000000e+00 : f32
    %463 = vector.broadcast %cst_112 : f32 to vector<16x32xf32>
    %464 = arith.addf %463, %462 : vector<16x32xf32>
    %465 = arith.divf %463, %464 : vector<16x32xf32>
    %466 = vector.extract_strided_slice %446 {offsets = [0, 64], sizes = [16, 32], strides = [1, 1]} : vector<16x128xf32> to vector<16x32xf32>
    %467 = vector.extract_strided_slice %449 {offsets = [0, 64], sizes = [16, 32], strides = [1, 1]} : vector<16x128xf32> to vector<16x32xf32>
    %468 = arith.mulf %457, %467 : vector<16x32xf32>
    %469 = arith.addf %466, %468 : vector<16x32xf32>
    %470 = math.tanh %469 : vector<16x32xf32>
    %cst_113 = arith.constant 1.000000e+00 : f32
    %471 = vector.broadcast %cst_113 : f32 to vector<16x32xf32>
    %472 = arith.subf %471, %465 : vector<16x32xf32>
    %473 = arith.mulf %472, %470 : vector<16x32xf32>
    %474 = arith.mulf %465, %442 : vector<16x32xf32>
    %475 = arith.addf %473, %474 : vector<16x32xf32>
    %476 = vector.shape_cast %18 : vector<16x1xi1> to vector<16x1xi1>
    %477 = vector.broadcast %476 : vector<16x1xi1> to vector<16x32xi1>
    %478 = arith.select %477, %475, %442 : vector<16x32xi1>, vector<16x32xf32>
    %479 = arith.truncf %478 : vector<16x32xf32> to vector<16x32xbf16>
    %c64_114 = arith.constant 64 : index
    %c32_115 = arith.constant 32 : index
    %480 = vector.load %arg25[%c64_114, %c32_115] : memref<128x128xbf16, #tpu.memory_space<vmem>>, vector<16x32xbf16>
    tpu.vector_store %arg25[%c64_114, %c32_115], %479 {strides = array<i32>} : memref<128x128xbf16, #tpu.memory_space<vmem>>, vector<16x32xbf16>,
    %c48_116 = arith.constant 48 : index
    %c0_117 = arith.constant 0 : index
    %481 = vector.load %arg24[%c48_116, %c0_117] : memref<128x128xbf16, #tpu.memory_space<vmem>>, vector<16x128xbf16>
    %482 = arith.extf %481 : vector<16x128xbf16> to vector<16x128xf32>
    %483 = arith.truncf %478 : vector<16x32xf32> to vector<16x32xbf16>
    %cst_118 = arith.constant dense<0.000000e+00> : vector<16x128xf32>
    %484 = tpu.matmul %483, %326, %cst_118 {dimension_numbers = #tpu.dot_dimension_numbers<[1], [0], [0], [1], [0, 0, 1, 1], [], []>} : vector<16x32xbf16>, vector<32x128xbf16>, vector<16x128xf32> -> vector<16x128xf32>
    %485 = arith.addf %484, %330 : vector<16x128xf32>
    %486 = vector.extract_strided_slice %482 {offsets = [0, 0], sizes = [16, 32], strides = [1, 1]} : vector<16x128xf32> to vector<16x32xf32>
    %487 = vector.extract_strided_slice %485 {offsets = [0, 0], sizes = [16, 32], strides = [1, 1]} : vector<16x128xf32> to vector<16x32xf32>
    %488 = arith.addf %486, %487 : vector<16x32xf32>
    %489 = arith.negf %488 : vector<16x32xf32>
    %490 = math.exp %489 : vector<16x32xf32>
    %cst_119 = arith.constant 1.000000e+00 : f32
    %491 = vector.broadcast %cst_119 : f32 to vector<16x32xf32>
    %492 = arith.addf %491, %490 : vector<16x32xf32>
    %493 = arith.divf %491, %492 : vector<16x32xf32>
    %494 = vector.extract_strided_slice %482 {offsets = [0, 32], sizes = [16, 32], strides = [1, 1]} : vector<16x128xf32> to vector<16x32xf32>
    %495 = vector.extract_strided_slice %485 {offsets = [0, 32], sizes = [16, 32], strides = [1, 1]} : vector<16x128xf32> to vector<16x32xf32>
    %496 = arith.addf %494, %495 : vector<16x32xf32>
    %497 = arith.negf %496 : vector<16x32xf32>
    %498 = math.exp %497 : vector<16x32xf32>
    %cst_120 = arith.constant 1.000000e+00 : f32
    %499 = vector.broadcast %cst_120 : f32 to vector<16x32xf32>
    %500 = arith.addf %499, %498 : vector<16x32xf32>
    %501 = arith.divf %499, %500 : vector<16x32xf32>
    %502 = vector.extract_strided_slice %482 {offsets = [0, 64], sizes = [16, 32], strides = [1, 1]} : vector<16x128xf32> to vector<16x32xf32>
    %503 = vector.extract_strided_slice %485 {offsets = [0, 64], sizes = [16, 32], strides = [1, 1]} : vector<16x128xf32> to vector<16x32xf32>
    %504 = arith.mulf %493, %503 : vector<16x32xf32>
    %505 = arith.addf %502, %504 : vector<16x32xf32>
    %506 = math.tanh %505 : vector<16x32xf32>
    %cst_121 = arith.constant 1.000000e+00 : f32
    %507 = vector.broadcast %cst_121 : f32 to vector<16x32xf32>
    %508 = arith.subf %507, %501 : vector<16x32xf32>
    %509 = arith.mulf %508, %506 : vector<16x32xf32>
    %510 = arith.mulf %501, %478 : vector<16x32xf32>
    %511 = arith.addf %509, %510 : vector<16x32xf32>
    %512 = vector.shape_cast %16 : vector<16x1xi1> to vector<16x1xi1>
    %513 = vector.broadcast %512 : vector<16x1xi1> to vector<16x32xi1>
    %514 = arith.select %513, %511, %478 : vector<16x32xi1>, vector<16x32xf32>
    %515 = arith.truncf %514 : vector<16x32xf32> to vector<16x32xbf16>
    %c48_122 = arith.constant 48 : index
    %c32_123 = arith.constant 32 : index
    %516 = vector.load %arg25[%c48_122, %c32_123] : memref<128x128xbf16, #tpu.memory_space<vmem>>, vector<16x32xbf16>
    tpu.vector_store %arg25[%c48_122, %c32_123], %515 {strides = array<i32>} : memref<128x128xbf16, #tpu.memory_space<vmem>>, vector<16x32xbf16>,
    %c32_124 = arith.constant 32 : index
    %c0_125 = arith.constant 0 : index
    %517 = vector.load %arg24[%c32_124, %c0_125] : memref<128x128xbf16, #tpu.memory_space<vmem>>, vector<16x128xbf16>
    %518 = arith.extf %517 : vector<16x128xbf16> to vector<16x128xf32>
    %519 = arith.truncf %514 : vector<16x32xf32> to vector<16x32xbf16>
    %cst_126 = arith.constant dense<0.000000e+00> : vector<16x128xf32>
    %520 = tpu.matmul %519, %326, %cst_126 {dimension_numbers = #tpu.dot_dimension_numbers<[1], [0], [0], [1], [0, 0, 1, 1], [], []>} : vector<16x32xbf16>, vector<32x128xbf16>, vector<16x128xf32> -> vector<16x128xf32>
    %521 = arith.addf %520, %330 : vector<16x128xf32>
    %522 = vector.extract_strided_slice %518 {offsets = [0, 0], sizes = [16, 32], strides = [1, 1]} : vector<16x128xf32> to vector<16x32xf32>
    %523 = vector.extract_strided_slice %521 {offsets = [0, 0], sizes = [16, 32], strides = [1, 1]} : vector<16x128xf32> to vector<16x32xf32>
    %524 = arith.addf %522, %523 : vector<16x32xf32>
    %525 = arith.negf %524 : vector<16x32xf32>
    %526 = math.exp %525 : vector<16x32xf32>
    %cst_127 = arith.constant 1.000000e+00 : f32
    %527 = vector.broadcast %cst_127 : f32 to vector<16x32xf32>
    %528 = arith.addf %527, %526 : vector<16x32xf32>
    %529 = arith.divf %527, %528 : vector<16x32xf32>
    %530 = vector.extract_strided_slice %518 {offsets = [0, 32], sizes = [16, 32], strides = [1, 1]} : vector<16x128xf32> to vector<16x32xf32>
    %531 = vector.extract_strided_slice %521 {offsets = [0, 32], sizes = [16, 32], strides = [1, 1]} : vector<16x128xf32> to vector<16x32xf32>
    %532 = arith.addf %530, %531 : vector<16x32xf32>
    %533 = arith.negf %532 : vector<16x32xf32>
    %534 = math.exp %533 : vector<16x32xf32>
    %cst_128 = arith.constant 1.000000e+00 : f32
    %535 = vector.broadcast %cst_128 : f32 to vector<16x32xf32>
    %536 = arith.addf %535, %534 : vector<16x32xf32>
    %537 = arith.divf %535, %536 : vector<16x32xf32>
    %538 = vector.extract_strided_slice %518 {offsets = [0, 64], sizes = [16, 32], strides = [1, 1]} : vector<16x128xf32> to vector<16x32xf32>
    %539 = vector.extract_strided_slice %521 {offsets = [0, 64], sizes = [16, 32], strides = [1, 1]} : vector<16x128xf32> to vector<16x32xf32>
    %540 = arith.mulf %529, %539 : vector<16x32xf32>
    %541 = arith.addf %538, %540 : vector<16x32xf32>
    %542 = math.tanh %541 : vector<16x32xf32>
    %cst_129 = arith.constant 1.000000e+00 : f32
    %543 = vector.broadcast %cst_129 : f32 to vector<16x32xf32>
    %544 = arith.subf %543, %537 : vector<16x32xf32>
    %545 = arith.mulf %544, %542 : vector<16x32xf32>
    %546 = arith.mulf %537, %514 : vector<16x32xf32>
    %547 = arith.addf %545, %546 : vector<16x32xf32>
    %548 = vector.shape_cast %14 : vector<16x1xi1> to vector<16x1xi1>
    %549 = vector.broadcast %548 : vector<16x1xi1> to vector<16x32xi1>
    %550 = arith.select %549, %547, %514 : vector<16x32xi1>, vector<16x32xf32>
    %551 = arith.truncf %550 : vector<16x32xf32> to vector<16x32xbf16>
    %c32_130 = arith.constant 32 : index
    %c32_131 = arith.constant 32 : index
    %552 = vector.load %arg25[%c32_130, %c32_131] : memref<128x128xbf16, #tpu.memory_space<vmem>>, vector<16x32xbf16>
    tpu.vector_store %arg25[%c32_130, %c32_131], %551 {strides = array<i32>} : memref<128x128xbf16, #tpu.memory_space<vmem>>, vector<16x32xbf16>,
    %c16_132 = arith.constant 16 : index
    %c0_133 = arith.constant 0 : index
    %553 = vector.load %arg24[%c16_132, %c0_133] : memref<128x128xbf16, #tpu.memory_space<vmem>>, vector<16x128xbf16>
    %554 = arith.extf %553 : vector<16x128xbf16> to vector<16x128xf32>
    %555 = arith.truncf %550 : vector<16x32xf32> to vector<16x32xbf16>
    %cst_134 = arith.constant dense<0.000000e+00> : vector<16x128xf32>
    %556 = tpu.matmul %555, %326, %cst_134 {dimension_numbers = #tpu.dot_dimension_numbers<[1], [0], [0], [1], [0, 0, 1, 1], [], []>} : vector<16x32xbf16>, vector<32x128xbf16>, vector<16x128xf32> -> vector<16x128xf32>
    %557 = arith.addf %556, %330 : vector<16x128xf32>
    %558 = vector.extract_strided_slice %554 {offsets = [0, 0], sizes = [16, 32], strides = [1, 1]} : vector<16x128xf32> to vector<16x32xf32>
    %559 = vector.extract_strided_slice %557 {offsets = [0, 0], sizes = [16, 32], strides = [1, 1]} : vector<16x128xf32> to vector<16x32xf32>
    %560 = arith.addf %558, %559 : vector<16x32xf32>
    %561 = arith.negf %560 : vector<16x32xf32>
    %562 = math.exp %561 : vector<16x32xf32>
    %cst_135 = arith.constant 1.000000e+00 : f32
    %563 = vector.broadcast %cst_135 : f32 to vector<16x32xf32>
    %564 = arith.addf %563, %562 : vector<16x32xf32>
    %565 = arith.divf %563, %564 : vector<16x32xf32>
    %566 = vector.extract_strided_slice %554 {offsets = [0, 32], sizes = [16, 32], strides = [1, 1]} : vector<16x128xf32> to vector<16x32xf32>
    %567 = vector.extract_strided_slice %557 {offsets = [0, 32], sizes = [16, 32], strides = [1, 1]} : vector<16x128xf32> to vector<16x32xf32>
    %568 = arith.addf %566, %567 : vector<16x32xf32>
    %569 = arith.negf %568 : vector<16x32xf32>
    %570 = math.exp %569 : vector<16x32xf32>
    %cst_136 = arith.constant 1.000000e+00 : f32
    %571 = vector.broadcast %cst_136 : f32 to vector<16x32xf32>
    %572 = arith.addf %571, %570 : vector<16x32xf32>
    %573 = arith.divf %571, %572 : vector<16x32xf32>
    %574 = vector.extract_strided_slice %554 {offsets = [0, 64], sizes = [16, 32], strides = [1, 1]} : vector<16x128xf32> to vector<16x32xf32>
    %575 = vector.extract_strided_slice %557 {offsets = [0, 64], sizes = [16, 32], strides = [1, 1]} : vector<16x128xf32> to vector<16x32xf32>
    %576 = arith.mulf %565, %575 : vector<16x32xf32>
    %577 = arith.addf %574, %576 : vector<16x32xf32>
    %578 = math.tanh %577 : vector<16x32xf32>
    %cst_137 = arith.constant 1.000000e+00 : f32
    %579 = vector.broadcast %cst_137 : f32 to vector<16x32xf32>
    %580 = arith.subf %579, %573 : vector<16x32xf32>
    %581 = arith.mulf %580, %578 : vector<16x32xf32>
    %582 = arith.mulf %573, %550 : vector<16x32xf32>
    %583 = arith.addf %581, %582 : vector<16x32xf32>
    %584 = vector.shape_cast %12 : vector<16x1xi1> to vector<16x1xi1>
    %585 = vector.broadcast %584 : vector<16x1xi1> to vector<16x32xi1>
    %586 = arith.select %585, %583, %550 : vector<16x32xi1>, vector<16x32xf32>
    %587 = arith.truncf %586 : vector<16x32xf32> to vector<16x32xbf16>
    %c16_138 = arith.constant 16 : index
    %c32_139 = arith.constant 32 : index
    %588 = vector.load %arg25[%c16_138, %c32_139] : memref<128x128xbf16, #tpu.memory_space<vmem>>, vector<16x32xbf16>
    tpu.vector_store %arg25[%c16_138, %c32_139], %587 {strides = array<i32>} : memref<128x128xbf16, #tpu.memory_space<vmem>>, vector<16x32xbf16>,
    %c0_140 = arith.constant 0 : index
    %c0_141 = arith.constant 0 : index
    %589 = vector.load %arg24[%c0_140, %c0_141] : memref<128x128xbf16, #tpu.memory_space<vmem>>, vector<16x128xbf16>
    %590 = arith.extf %589 : vector<16x128xbf16> to vector<16x128xf32>
    %591 = arith.truncf %586 : vector<16x32xf32> to vector<16x32xbf16>
    %cst_142 = arith.constant dense<0.000000e+00> : vector<16x128xf32>
    %592 = tpu.matmul %591, %326, %cst_142 {dimension_numbers = #tpu.dot_dimension_numbers<[1], [0], [0], [1], [0, 0, 1, 1], [], []>} : vector<16x32xbf16>, vector<32x128xbf16>, vector<16x128xf32> -> vector<16x128xf32>
    %593 = arith.addf %592, %330 : vector<16x128xf32>
    %594 = vector.extract_strided_slice %590 {offsets = [0, 0], sizes = [16, 32], strides = [1, 1]} : vector<16x128xf32> to vector<16x32xf32>
    %595 = vector.extract_strided_slice %593 {offsets = [0, 0], sizes = [16, 32], strides = [1, 1]} : vector<16x128xf32> to vector<16x32xf32>
    %596 = arith.addf %594, %595 : vector<16x32xf32>
    %597 = arith.negf %596 : vector<16x32xf32>
    %598 = math.exp %597 : vector<16x32xf32>
    %cst_143 = arith.constant 1.000000e+00 : f32
    %599 = vector.broadcast %cst_143 : f32 to vector<16x32xf32>
    %600 = arith.addf %599, %598 : vector<16x32xf32>
    %601 = arith.divf %599, %600 : vector<16x32xf32>
    %602 = vector.extract_strided_slice %590 {offsets = [0, 32], sizes = [16, 32], strides = [1, 1]} : vector<16x128xf32> to vector<16x32xf32>
    %603 = vector.extract_strided_slice %593 {offsets = [0, 32], sizes = [16, 32], strides = [1, 1]} : vector<16x128xf32> to vector<16x32xf32>
    %604 = arith.addf %602, %603 : vector<16x32xf32>
    %605 = arith.negf %604 : vector<16x32xf32>
    %606 = math.exp %605 : vector<16x32xf32>
    %cst_144 = arith.constant 1.000000e+00 : f32
    %607 = vector.broadcast %cst_144 : f32 to vector<16x32xf32>
    %608 = arith.addf %607, %606 : vector<16x32xf32>
    %609 = arith.divf %607, %608 : vector<16x32xf32>
    %610 = vector.extract_strided_slice %590 {offsets = [0, 64], sizes = [16, 32], strides = [1, 1]} : vector<16x128xf32> to vector<16x32xf32>
    %611 = vector.extract_strided_slice %593 {offsets = [0, 64], sizes = [16, 32], strides = [1, 1]} : vector<16x128xf32> to vector<16x32xf32>
    %612 = arith.mulf %601, %611 : vector<16x32xf32>
    %613 = arith.addf %610, %612 : vector<16x32xf32>
    %614 = math.tanh %613 : vector<16x32xf32>
    %cst_145 = arith.constant 1.000000e+00 : f32
    %615 = vector.broadcast %cst_145 : f32 to vector<16x32xf32>
    %616 = arith.subf %615, %609 : vector<16x32xf32>
    %617 = arith.mulf %616, %614 : vector<16x32xf32>
    %618 = arith.mulf %609, %586 : vector<16x32xf32>
    %619 = arith.addf %617, %618 : vector<16x32xf32>
    %620 = vector.shape_cast %10 : vector<16x1xi1> to vector<16x1xi1>
    %621 = vector.broadcast %620 : vector<16x1xi1> to vector<16x32xi1>
    %622 = arith.select %621, %619, %586 : vector<16x32xi1>, vector<16x32xf32>
    %623 = arith.truncf %622 : vector<16x32xf32> to vector<16x32xbf16>
    %c0_146 = arith.constant 0 : index
    %c32_147 = arith.constant 32 : index
    %624 = vector.load %arg25[%c0_146, %c32_147] : memref<128x128xbf16, #tpu.memory_space<vmem>>, vector<16x32xbf16>
    tpu.vector_store %arg25[%c0_146, %c32_147], %623 {strides = array<i32>} : memref<128x128xbf16, #tpu.memory_space<vmem>>, vector<16x32xbf16>,
    %c0_148 = arith.constant 0 : index
    %c0_149 = arith.constant 0 : index
    %625 = vector.load %arg25[%c0_148, %c0_149] : memref<128x128xbf16, #tpu.memory_space<vmem>>, vector<128x64xbf16>
    %c0_150 = arith.constant 0 : index
    %c0_151 = arith.constant 0 : index
    %626 = vector.load %arg11[%c0_150, %c0_151] : memref<64x128xbf16, #tpu.memory_space<vmem>>, vector<64x128xbf16>
    %c0_152 = arith.constant 0 : index
    %c0_153 = arith.constant 0 : index
    %627 = vector.load %arg12[%c0_152, %c0_153] : memref<32x128xbf16, #tpu.memory_space<vmem>>, vector<32x128xbf16>
    %c0_154 = arith.constant 0 : index
    %c0_155 = arith.constant 0 : index
    %628 = vector.load %arg13[%c0_154, %c0_155] : memref<1x128xf32, #tpu.memory_space<vmem>>, vector<1x128xf32>
    %c0_156 = arith.constant 0 : index
    %c0_157 = arith.constant 0 : index
    %629 = vector.load %arg14[%c0_156, %c0_157] : memref<1x128xf32, #tpu.memory_space<vmem>>, vector<1x128xf32>
    %630 = vector.shape_cast %629 : vector<1x128xf32> to vector<1x128xf32>
    %631 = vector.broadcast %630 : vector<1x128xf32> to vector<16x128xf32>
    %cst_158 = arith.constant dense<0.000000e+00> : vector<128x128xf32>
    %632 = tpu.matmul %625, %626, %cst_158 {dimension_numbers = #tpu.dot_dimension_numbers<[1], [0], [0], [1], [0, 0, 1, 1], [], []>} : vector<128x64xbf16>, vector<64x128xbf16>, vector<128x128xf32> -> vector<128x128xf32>
    %633 = vector.broadcast %628 : vector<1x128xf32> to vector<128x128xf32>
    %634 = arith.addf %632, %633 : vector<128x128xf32>
    %635 = arith.truncf %634 : vector<128x128xf32> to vector<128x128xbf16>
    %c0_159 = arith.constant 0 : index
    %c0_160 = arith.constant 0 : index
    %636 = vector.load %arg24[%c0_159, %c0_160] : memref<128x128xbf16, #tpu.memory_space<vmem>>, vector<128x128xbf16>
    tpu.vector_store %arg24[%c0_159, %c0_160], %635 {strides = array<i32>} : memref<128x128xbf16, #tpu.memory_space<vmem>>, vector<128x128xbf16>,
    %cst_161 = arith.constant 0.000000e+00 : f32
    %637 = vector.broadcast %cst_161 : f32 to vector<16x32xf32>
    %c0_162 = arith.constant 0 : index
    %c0_163 = arith.constant 0 : index
    %638 = vector.load %arg24[%c0_162, %c0_163] : memref<128x128xbf16, #tpu.memory_space<vmem>>, vector<16x128xbf16>
    %639 = arith.extf %638 : vector<16x128xbf16> to vector<16x128xf32>
    %640 = arith.truncf %637 : vector<16x32xf32> to vector<16x32xbf16>
    %cst_164 = arith.constant dense<0.000000e+00> : vector<16x128xf32>
    %641 = tpu.matmul %640, %627, %cst_164 {dimension_numbers = #tpu.dot_dimension_numbers<[1], [0], [0], [1], [0, 0, 1, 1], [], []>} : vector<16x32xbf16>, vector<32x128xbf16>, vector<16x128xf32> -> vector<16x128xf32>
    %642 = arith.addf %641, %631 : vector<16x128xf32>
    %643 = vector.extract_strided_slice %639 {offsets = [0, 0], sizes = [16, 32], strides = [1, 1]} : vector<16x128xf32> to vector<16x32xf32>
    %644 = vector.extract_strided_slice %642 {offsets = [0, 0], sizes = [16, 32], strides = [1, 1]} : vector<16x128xf32> to vector<16x32xf32>
    %645 = arith.addf %643, %644 : vector<16x32xf32>
    %646 = arith.negf %645 : vector<16x32xf32>
    %647 = math.exp %646 : vector<16x32xf32>
    %cst_165 = arith.constant 1.000000e+00 : f32
    %648 = vector.broadcast %cst_165 : f32 to vector<16x32xf32>
    %649 = arith.addf %648, %647 : vector<16x32xf32>
    %650 = arith.divf %648, %649 : vector<16x32xf32>
    %651 = vector.extract_strided_slice %639 {offsets = [0, 32], sizes = [16, 32], strides = [1, 1]} : vector<16x128xf32> to vector<16x32xf32>
    %652 = vector.extract_strided_slice %642 {offsets = [0, 32], sizes = [16, 32], strides = [1, 1]} : vector<16x128xf32> to vector<16x32xf32>
    %653 = arith.addf %651, %652 : vector<16x32xf32>
    %654 = arith.negf %653 : vector<16x32xf32>
    %655 = math.exp %654 : vector<16x32xf32>
    %cst_166 = arith.constant 1.000000e+00 : f32
    %656 = vector.broadcast %cst_166 : f32 to vector<16x32xf32>
    %657 = arith.addf %656, %655 : vector<16x32xf32>
    %658 = arith.divf %656, %657 : vector<16x32xf32>
    %659 = vector.extract_strided_slice %639 {offsets = [0, 64], sizes = [16, 32], strides = [1, 1]} : vector<16x128xf32> to vector<16x32xf32>
    %660 = vector.extract_strided_slice %642 {offsets = [0, 64], sizes = [16, 32], strides = [1, 1]} : vector<16x128xf32> to vector<16x32xf32>
    %661 = arith.mulf %650, %660 : vector<16x32xf32>
    %662 = arith.addf %659, %661 : vector<16x32xf32>
    %663 = math.tanh %662 : vector<16x32xf32>
    %cst_167 = arith.constant 1.000000e+00 : f32
    %664 = vector.broadcast %cst_167 : f32 to vector<16x32xf32>
    %665 = arith.subf %664, %658 : vector<16x32xf32>
    %666 = arith.mulf %665, %663 : vector<16x32xf32>
    %667 = arith.mulf %658, %637 : vector<16x32xf32>
    %668 = arith.addf %666, %667 : vector<16x32xf32>
    %669 = vector.shape_cast %10 : vector<16x1xi1> to vector<16x1xi1>
    %670 = vector.broadcast %669 : vector<16x1xi1> to vector<16x32xi1>
    %671 = arith.select %670, %668, %637 : vector<16x32xi1>, vector<16x32xf32>
    %c16_168 = arith.constant 16 : index
    %c0_169 = arith.constant 0 : index
    %672 = vector.load %arg24[%c16_168, %c0_169] : memref<128x128xbf16, #tpu.memory_space<vmem>>, vector<16x128xbf16>
    %673 = arith.extf %672 : vector<16x128xbf16> to vector<16x128xf32>
    %674 = arith.truncf %671 : vector<16x32xf32> to vector<16x32xbf16>
    %cst_170 = arith.constant dense<0.000000e+00> : vector<16x128xf32>
    %675 = tpu.matmul %674, %627, %cst_170 {dimension_numbers = #tpu.dot_dimension_numbers<[1], [0], [0], [1], [0, 0, 1, 1], [], []>} : vector<16x32xbf16>, vector<32x128xbf16>, vector<16x128xf32> -> vector<16x128xf32>
    %676 = arith.addf %675, %631 : vector<16x128xf32>
    %677 = vector.extract_strided_slice %673 {offsets = [0, 0], sizes = [16, 32], strides = [1, 1]} : vector<16x128xf32> to vector<16x32xf32>
    %678 = vector.extract_strided_slice %676 {offsets = [0, 0], sizes = [16, 32], strides = [1, 1]} : vector<16x128xf32> to vector<16x32xf32>
    %679 = arith.addf %677, %678 : vector<16x32xf32>
    %680 = arith.negf %679 : vector<16x32xf32>
    %681 = math.exp %680 : vector<16x32xf32>
    %cst_171 = arith.constant 1.000000e+00 : f32
    %682 = vector.broadcast %cst_171 : f32 to vector<16x32xf32>
    %683 = arith.addf %682, %681 : vector<16x32xf32>
    %684 = arith.divf %682, %683 : vector<16x32xf32>
    %685 = vector.extract_strided_slice %673 {offsets = [0, 32], sizes = [16, 32], strides = [1, 1]} : vector<16x128xf32> to vector<16x32xf32>
    %686 = vector.extract_strided_slice %676 {offsets = [0, 32], sizes = [16, 32], strides = [1, 1]} : vector<16x128xf32> to vector<16x32xf32>
    %687 = arith.addf %685, %686 : vector<16x32xf32>
    %688 = arith.negf %687 : vector<16x32xf32>
    %689 = math.exp %688 : vector<16x32xf32>
    %cst_172 = arith.constant 1.000000e+00 : f32
    %690 = vector.broadcast %cst_172 : f32 to vector<16x32xf32>
    %691 = arith.addf %690, %689 : vector<16x32xf32>
    %692 = arith.divf %690, %691 : vector<16x32xf32>
    %693 = vector.extract_strided_slice %673 {offsets = [0, 64], sizes = [16, 32], strides = [1, 1]} : vector<16x128xf32> to vector<16x32xf32>
    %694 = vector.extract_strided_slice %676 {offsets = [0, 64], sizes = [16, 32], strides = [1, 1]} : vector<16x128xf32> to vector<16x32xf32>
    %695 = arith.mulf %684, %694 : vector<16x32xf32>
    %696 = arith.addf %693, %695 : vector<16x32xf32>
    %697 = math.tanh %696 : vector<16x32xf32>
    %cst_173 = arith.constant 1.000000e+00 : f32
    %698 = vector.broadcast %cst_173 : f32 to vector<16x32xf32>
    %699 = arith.subf %698, %692 : vector<16x32xf32>
    %700 = arith.mulf %699, %697 : vector<16x32xf32>
    %701 = arith.mulf %692, %671 : vector<16x32xf32>
    %702 = arith.addf %700, %701 : vector<16x32xf32>
    %703 = vector.shape_cast %12 : vector<16x1xi1> to vector<16x1xi1>
    %704 = vector.broadcast %703 : vector<16x1xi1> to vector<16x32xi1>
    %705 = arith.select %704, %702, %671 : vector<16x32xi1>, vector<16x32xf32>
    %c32_174 = arith.constant 32 : index
    %c0_175 = arith.constant 0 : index
    %706 = vector.load %arg24[%c32_174, %c0_175] : memref<128x128xbf16, #tpu.memory_space<vmem>>, vector<16x128xbf16>
    %707 = arith.extf %706 : vector<16x128xbf16> to vector<16x128xf32>
    %708 = arith.truncf %705 : vector<16x32xf32> to vector<16x32xbf16>
    %cst_176 = arith.constant dense<0.000000e+00> : vector<16x128xf32>
    %709 = tpu.matmul %708, %627, %cst_176 {dimension_numbers = #tpu.dot_dimension_numbers<[1], [0], [0], [1], [0, 0, 1, 1], [], []>} : vector<16x32xbf16>, vector<32x128xbf16>, vector<16x128xf32> -> vector<16x128xf32>
    %710 = arith.addf %709, %631 : vector<16x128xf32>
    %711 = vector.extract_strided_slice %707 {offsets = [0, 0], sizes = [16, 32], strides = [1, 1]} : vector<16x128xf32> to vector<16x32xf32>
    %712 = vector.extract_strided_slice %710 {offsets = [0, 0], sizes = [16, 32], strides = [1, 1]} : vector<16x128xf32> to vector<16x32xf32>
    %713 = arith.addf %711, %712 : vector<16x32xf32>
    %714 = arith.negf %713 : vector<16x32xf32>
    %715 = math.exp %714 : vector<16x32xf32>
    %cst_177 = arith.constant 1.000000e+00 : f32
    %716 = vector.broadcast %cst_177 : f32 to vector<16x32xf32>
    %717 = arith.addf %716, %715 : vector<16x32xf32>
    %718 = arith.divf %716, %717 : vector<16x32xf32>
    %719 = vector.extract_strided_slice %707 {offsets = [0, 32], sizes = [16, 32], strides = [1, 1]} : vector<16x128xf32> to vector<16x32xf32>
    %720 = vector.extract_strided_slice %710 {offsets = [0, 32], sizes = [16, 32], strides = [1, 1]} : vector<16x128xf32> to vector<16x32xf32>
    %721 = arith.addf %719, %720 : vector<16x32xf32>
    %722 = arith.negf %721 : vector<16x32xf32>
    %723 = math.exp %722 : vector<16x32xf32>
    %cst_178 = arith.constant 1.000000e+00 : f32
    %724 = vector.broadcast %cst_178 : f32 to vector<16x32xf32>
    %725 = arith.addf %724, %723 : vector<16x32xf32>
    %726 = arith.divf %724, %725 : vector<16x32xf32>
    %727 = vector.extract_strided_slice %707 {offsets = [0, 64], sizes = [16, 32], strides = [1, 1]} : vector<16x128xf32> to vector<16x32xf32>
    %728 = vector.extract_strided_slice %710 {offsets = [0, 64], sizes = [16, 32], strides = [1, 1]} : vector<16x128xf32> to vector<16x32xf32>
    %729 = arith.mulf %718, %728 : vector<16x32xf32>
    %730 = arith.addf %727, %729 : vector<16x32xf32>
    %731 = math.tanh %730 : vector<16x32xf32>
    %cst_179 = arith.constant 1.000000e+00 : f32
    %732 = vector.broadcast %cst_179 : f32 to vector<16x32xf32>
    %733 = arith.subf %732, %726 : vector<16x32xf32>
    %734 = arith.mulf %733, %731 : vector<16x32xf32>
    %735 = arith.mulf %726, %705 : vector<16x32xf32>
    %736 = arith.addf %734, %735 : vector<16x32xf32>
    %737 = vector.shape_cast %14 : vector<16x1xi1> to vector<16x1xi1>
    %738 = vector.broadcast %737 : vector<16x1xi1> to vector<16x32xi1>
    %739 = arith.select %738, %736, %705 : vector<16x32xi1>, vector<16x32xf32>
    %c48_180 = arith.constant 48 : index
    %c0_181 = arith.constant 0 : index
    %740 = vector.load %arg24[%c48_180, %c0_181] : memref<128x128xbf16, #tpu.memory_space<vmem>>, vector<16x128xbf16>
    %741 = arith.extf %740 : vector<16x128xbf16> to vector<16x128xf32>
    %742 = arith.truncf %739 : vector<16x32xf32> to vector<16x32xbf16>
    %cst_182 = arith.constant dense<0.000000e+00> : vector<16x128xf32>
    %743 = tpu.matmul %742, %627, %cst_182 {dimension_numbers = #tpu.dot_dimension_numbers<[1], [0], [0], [1], [0, 0, 1, 1], [], []>} : vector<16x32xbf16>, vector<32x128xbf16>, vector<16x128xf32> -> vector<16x128xf32>
    %744 = arith.addf %743, %631 : vector<16x128xf32>
    %745 = vector.extract_strided_slice %741 {offsets = [0, 0], sizes = [16, 32], strides = [1, 1]} : vector<16x128xf32> to vector<16x32xf32>
    %746 = vector.extract_strided_slice %744 {offsets = [0, 0], sizes = [16, 32], strides = [1, 1]} : vector<16x128xf32> to vector<16x32xf32>
    %747 = arith.addf %745, %746 : vector<16x32xf32>
    %748 = arith.negf %747 : vector<16x32xf32>
    %749 = math.exp %748 : vector<16x32xf32>
    %cst_183 = arith.constant 1.000000e+00 : f32
    %750 = vector.broadcast %cst_183 : f32 to vector<16x32xf32>
    %751 = arith.addf %750, %749 : vector<16x32xf32>
    %752 = arith.divf %750, %751 : vector<16x32xf32>
    %753 = vector.extract_strided_slice %741 {offsets = [0, 32], sizes = [16, 32], strides = [1, 1]} : vector<16x128xf32> to vector<16x32xf32>
    %754 = vector.extract_strided_slice %744 {offsets = [0, 32], sizes = [16, 32], strides = [1, 1]} : vector<16x128xf32> to vector<16x32xf32>
    %755 = arith.addf %753, %754 : vector<16x32xf32>
    %756 = arith.negf %755 : vector<16x32xf32>
    %757 = math.exp %756 : vector<16x32xf32>
    %cst_184 = arith.constant 1.000000e+00 : f32
    %758 = vector.broadcast %cst_184 : f32 to vector<16x32xf32>
    %759 = arith.addf %758, %757 : vector<16x32xf32>
    %760 = arith.divf %758, %759 : vector<16x32xf32>
    %761 = vector.extract_strided_slice %741 {offsets = [0, 64], sizes = [16, 32], strides = [1, 1]} : vector<16x128xf32> to vector<16x32xf32>
    %762 = vector.extract_strided_slice %744 {offsets = [0, 64], sizes = [16, 32], strides = [1, 1]} : vector<16x128xf32> to vector<16x32xf32>
    %763 = arith.mulf %752, %762 : vector<16x32xf32>
    %764 = arith.addf %761, %763 : vector<16x32xf32>
    %765 = math.tanh %764 : vector<16x32xf32>
    %cst_185 = arith.constant 1.000000e+00 : f32
    %766 = vector.broadcast %cst_185 : f32 to vector<16x32xf32>
    %767 = arith.subf %766, %760 : vector<16x32xf32>
    %768 = arith.mulf %767, %765 : vector<16x32xf32>
    %769 = arith.mulf %760, %739 : vector<16x32xf32>
    %770 = arith.addf %768, %769 : vector<16x32xf32>
    %771 = vector.shape_cast %16 : vector<16x1xi1> to vector<16x1xi1>
    %772 = vector.broadcast %771 : vector<16x1xi1> to vector<16x32xi1>
    %773 = arith.select %772, %770, %739 : vector<16x32xi1>, vector<16x32xf32>
    %c64_186 = arith.constant 64 : index
    %c0_187 = arith.constant 0 : index
    %774 = vector.load %arg24[%c64_186, %c0_187] : memref<128x128xbf16, #tpu.memory_space<vmem>>, vector<16x128xbf16>
    %775 = arith.extf %774 : vector<16x128xbf16> to vector<16x128xf32>
    %776 = arith.truncf %773 : vector<16x32xf32> to vector<16x32xbf16>
    %cst_188 = arith.constant dense<0.000000e+00> : vector<16x128xf32>
    %777 = tpu.matmul %776, %627, %cst_188 {dimension_numbers = #tpu.dot_dimension_numbers<[1], [0], [0], [1], [0, 0, 1, 1], [], []>} : vector<16x32xbf16>, vector<32x128xbf16>, vector<16x128xf32> -> vector<16x128xf32>
    %778 = arith.addf %777, %631 : vector<16x128xf32>
    %779 = vector.extract_strided_slice %775 {offsets = [0, 0], sizes = [16, 32], strides = [1, 1]} : vector<16x128xf32> to vector<16x32xf32>
    %780 = vector.extract_strided_slice %778 {offsets = [0, 0], sizes = [16, 32], strides = [1, 1]} : vector<16x128xf32> to vector<16x32xf32>
    %781 = arith.addf %779, %780 : vector<16x32xf32>
    %782 = arith.negf %781 : vector<16x32xf32>
    %783 = math.exp %782 : vector<16x32xf32>
    %cst_189 = arith.constant 1.000000e+00 : f32
    %784 = vector.broadcast %cst_189 : f32 to vector<16x32xf32>
    %785 = arith.addf %784, %783 : vector<16x32xf32>
    %786 = arith.divf %784, %785 : vector<16x32xf32>
    %787 = vector.extract_strided_slice %775 {offsets = [0, 32], sizes = [16, 32], strides = [1, 1]} : vector<16x128xf32> to vector<16x32xf32>
    %788 = vector.extract_strided_slice %778 {offsets = [0, 32], sizes = [16, 32], strides = [1, 1]} : vector<16x128xf32> to vector<16x32xf32>
    %789 = arith.addf %787, %788 : vector<16x32xf32>
    %790 = arith.negf %789 : vector<16x32xf32>
    %791 = math.exp %790 : vector<16x32xf32>
    %cst_190 = arith.constant 1.000000e+00 : f32
    %792 = vector.broadcast %cst_190 : f32 to vector<16x32xf32>
    %793 = arith.addf %792, %791 : vector<16x32xf32>
    %794 = arith.divf %792, %793 : vector<16x32xf32>
    %795 = vector.extract_strided_slice %775 {offsets = [0, 64], sizes = [16, 32], strides = [1, 1]} : vector<16x128xf32> to vector<16x32xf32>
    %796 = vector.extract_strided_slice %778 {offsets = [0, 64], sizes = [16, 32], strides = [1, 1]} : vector<16x128xf32> to vector<16x32xf32>
    %797 = arith.mulf %786, %796 : vector<16x32xf32>
    %798 = arith.addf %795, %797 : vector<16x32xf32>
    %799 = math.tanh %798 : vector<16x32xf32>
    %cst_191 = arith.constant 1.000000e+00 : f32
    %800 = vector.broadcast %cst_191 : f32 to vector<16x32xf32>
    %801 = arith.subf %800, %794 : vector<16x32xf32>
    %802 = arith.mulf %801, %799 : vector<16x32xf32>
    %803 = arith.mulf %794, %773 : vector<16x32xf32>
    %804 = arith.addf %802, %803 : vector<16x32xf32>
    %805 = vector.shape_cast %18 : vector<16x1xi1> to vector<16x1xi1>
    %806 = vector.broadcast %805 : vector<16x1xi1> to vector<16x32xi1>
    %807 = arith.select %806, %804, %773 : vector<16x32xi1>, vector<16x32xf32>
    %c80_192 = arith.constant 80 : index
    %c0_193 = arith.constant 0 : index
    %808 = vector.load %arg24[%c80_192, %c0_193] : memref<128x128xbf16, #tpu.memory_space<vmem>>, vector<16x128xbf16>
    %809 = arith.extf %808 : vector<16x128xbf16> to vector<16x128xf32>
    %810 = arith.truncf %807 : vector<16x32xf32> to vector<16x32xbf16>
    %cst_194 = arith.constant dense<0.000000e+00> : vector<16x128xf32>
    %811 = tpu.matmul %810, %627, %cst_194 {dimension_numbers = #tpu.dot_dimension_numbers<[1], [0], [0], [1], [0, 0, 1, 1], [], []>} : vector<16x32xbf16>, vector<32x128xbf16>, vector<16x128xf32> -> vector<16x128xf32>
    %812 = arith.addf %811, %631 : vector<16x128xf32>
    %813 = vector.extract_strided_slice %809 {offsets = [0, 0], sizes = [16, 32], strides = [1, 1]} : vector<16x128xf32> to vector<16x32xf32>
    %814 = vector.extract_strided_slice %812 {offsets = [0, 0], sizes = [16, 32], strides = [1, 1]} : vector<16x128xf32> to vector<16x32xf32>
    %815 = arith.addf %813, %814 : vector<16x32xf32>
    %816 = arith.negf %815 : vector<16x32xf32>
    %817 = math.exp %816 : vector<16x32xf32>
    %cst_195 = arith.constant 1.000000e+00 : f32
    %818 = vector.broadcast %cst_195 : f32 to vector<16x32xf32>
    %819 = arith.addf %818, %817 : vector<16x32xf32>
    %820 = arith.divf %818, %819 : vector<16x32xf32>
    %821 = vector.extract_strided_slice %809 {offsets = [0, 32], sizes = [16, 32], strides = [1, 1]} : vector<16x128xf32> to vector<16x32xf32>
    %822 = vector.extract_strided_slice %812 {offsets = [0, 32], sizes = [16, 32], strides = [1, 1]} : vector<16x128xf32> to vector<16x32xf32>
    %823 = arith.addf %821, %822 : vector<16x32xf32>
    %824 = arith.negf %823 : vector<16x32xf32>
    %825 = math.exp %824 : vector<16x32xf32>
    %cst_196 = arith.constant 1.000000e+00 : f32
    %826 = vector.broadcast %cst_196 : f32 to vector<16x32xf32>
    %827 = arith.addf %826, %825 : vector<16x32xf32>
    %828 = arith.divf %826, %827 : vector<16x32xf32>
    %829 = vector.extract_strided_slice %809 {offsets = [0, 64], sizes = [16, 32], strides = [1, 1]} : vector<16x128xf32> to vector<16x32xf32>
    %830 = vector.extract_strided_slice %812 {offsets = [0, 64], sizes = [16, 32], strides = [1, 1]} : vector<16x128xf32> to vector<16x32xf32>
    %831 = arith.mulf %820, %830 : vector<16x32xf32>
    %832 = arith.addf %829, %831 : vector<16x32xf32>
    %833 = math.tanh %832 : vector<16x32xf32>
    %cst_197 = arith.constant 1.000000e+00 : f32
    %834 = vector.broadcast %cst_197 : f32 to vector<16x32xf32>
    %835 = arith.subf %834, %828 : vector<16x32xf32>
    %836 = arith.mulf %835, %833 : vector<16x32xf32>
    %837 = arith.mulf %828, %807 : vector<16x32xf32>
    %838 = arith.addf %836, %837 : vector<16x32xf32>
    %839 = vector.shape_cast %20 : vector<16x1xi1> to vector<16x1xi1>
    %840 = vector.broadcast %839 : vector<16x1xi1> to vector<16x32xi1>
    %841 = arith.select %840, %838, %807 : vector<16x32xi1>, vector<16x32xf32>
    %c96_198 = arith.constant 96 : index
    %c0_199 = arith.constant 0 : index
    %842 = vector.load %arg24[%c96_198, %c0_199] : memref<128x128xbf16, #tpu.memory_space<vmem>>, vector<16x128xbf16>
    %843 = arith.extf %842 : vector<16x128xbf16> to vector<16x128xf32>
    %844 = arith.truncf %841 : vector<16x32xf32> to vector<16x32xbf16>
    %cst_200 = arith.constant dense<0.000000e+00> : vector<16x128xf32>
    %845 = tpu.matmul %844, %627, %cst_200 {dimension_numbers = #tpu.dot_dimension_numbers<[1], [0], [0], [1], [0, 0, 1, 1], [], []>} : vector<16x32xbf16>, vector<32x128xbf16>, vector<16x128xf32> -> vector<16x128xf32>
    %846 = arith.addf %845, %631 : vector<16x128xf32>
    %847 = vector.extract_strided_slice %843 {offsets = [0, 0], sizes = [16, 32], strides = [1, 1]} : vector<16x128xf32> to vector<16x32xf32>
    %848 = vector.extract_strided_slice %846 {offsets = [0, 0], sizes = [16, 32], strides = [1, 1]} : vector<16x128xf32> to vector<16x32xf32>
    %849 = arith.addf %847, %848 : vector<16x32xf32>
    %850 = arith.negf %849 : vector<16x32xf32>
    %851 = math.exp %850 : vector<16x32xf32>
    %cst_201 = arith.constant 1.000000e+00 : f32
    %852 = vector.broadcast %cst_201 : f32 to vector<16x32xf32>
    %853 = arith.addf %852, %851 : vector<16x32xf32>
    %854 = arith.divf %852, %853 : vector<16x32xf32>
    %855 = vector.extract_strided_slice %843 {offsets = [0, 32], sizes = [16, 32], strides = [1, 1]} : vector<16x128xf32> to vector<16x32xf32>
    %856 = vector.extract_strided_slice %846 {offsets = [0, 32], sizes = [16, 32], strides = [1, 1]} : vector<16x128xf32> to vector<16x32xf32>
    %857 = arith.addf %855, %856 : vector<16x32xf32>
    %858 = arith.negf %857 : vector<16x32xf32>
    %859 = math.exp %858 : vector<16x32xf32>
    %cst_202 = arith.constant 1.000000e+00 : f32
    %860 = vector.broadcast %cst_202 : f32 to vector<16x32xf32>
    %861 = arith.addf %860, %859 : vector<16x32xf32>
    %862 = arith.divf %860, %861 : vector<16x32xf32>
    %863 = vector.extract_strided_slice %843 {offsets = [0, 64], sizes = [16, 32], strides = [1, 1]} : vector<16x128xf32> to vector<16x32xf32>
    %864 = vector.extract_strided_slice %846 {offsets = [0, 64], sizes = [16, 32], strides = [1, 1]} : vector<16x128xf32> to vector<16x32xf32>
    %865 = arith.mulf %854, %864 : vector<16x32xf32>
    %866 = arith.addf %863, %865 : vector<16x32xf32>
    %867 = math.tanh %866 : vector<16x32xf32>
    %cst_203 = arith.constant 1.000000e+00 : f32
    %868 = vector.broadcast %cst_203 : f32 to vector<16x32xf32>
    %869 = arith.subf %868, %862 : vector<16x32xf32>
    %870 = arith.mulf %869, %867 : vector<16x32xf32>
    %871 = arith.mulf %862, %841 : vector<16x32xf32>
    %872 = arith.addf %870, %871 : vector<16x32xf32>
    %873 = vector.shape_cast %22 : vector<16x1xi1> to vector<16x1xi1>
    %874 = vector.broadcast %873 : vector<16x1xi1> to vector<16x32xi1>
    %875 = arith.select %874, %872, %841 : vector<16x32xi1>, vector<16x32xf32>
    %c112_204 = arith.constant 112 : index
    %c0_205 = arith.constant 0 : index
    %876 = vector.load %arg24[%c112_204, %c0_205] : memref<128x128xbf16, #tpu.memory_space<vmem>>, vector<16x128xbf16>
    %877 = arith.extf %876 : vector<16x128xbf16> to vector<16x128xf32>
    %878 = arith.truncf %875 : vector<16x32xf32> to vector<16x32xbf16>
    %cst_206 = arith.constant dense<0.000000e+00> : vector<16x128xf32>
    %879 = tpu.matmul %878, %627, %cst_206 {dimension_numbers = #tpu.dot_dimension_numbers<[1], [0], [0], [1], [0, 0, 1, 1], [], []>} : vector<16x32xbf16>, vector<32x128xbf16>, vector<16x128xf32> -> vector<16x128xf32>
    %880 = arith.addf %879, %631 : vector<16x128xf32>
    %881 = vector.extract_strided_slice %877 {offsets = [0, 0], sizes = [16, 32], strides = [1, 1]} : vector<16x128xf32> to vector<16x32xf32>
    %882 = vector.extract_strided_slice %880 {offsets = [0, 0], sizes = [16, 32], strides = [1, 1]} : vector<16x128xf32> to vector<16x32xf32>
    %883 = arith.addf %881, %882 : vector<16x32xf32>
    %884 = arith.negf %883 : vector<16x32xf32>
    %885 = math.exp %884 : vector<16x32xf32>
    %cst_207 = arith.constant 1.000000e+00 : f32
    %886 = vector.broadcast %cst_207 : f32 to vector<16x32xf32>
    %887 = arith.addf %886, %885 : vector<16x32xf32>
    %888 = arith.divf %886, %887 : vector<16x32xf32>
    %889 = vector.extract_strided_slice %877 {offsets = [0, 32], sizes = [16, 32], strides = [1, 1]} : vector<16x128xf32> to vector<16x32xf32>
    %890 = vector.extract_strided_slice %880 {offsets = [0, 32], sizes = [16, 32], strides = [1, 1]} : vector<16x128xf32> to vector<16x32xf32>
    %891 = arith.addf %889, %890 : vector<16x32xf32>
    %892 = arith.negf %891 : vector<16x32xf32>
    %893 = math.exp %892 : vector<16x32xf32>
    %cst_208 = arith.constant 1.000000e+00 : f32
    %894 = vector.broadcast %cst_208 : f32 to vector<16x32xf32>
    %895 = arith.addf %894, %893 : vector<16x32xf32>
    %896 = arith.divf %894, %895 : vector<16x32xf32>
    %897 = vector.extract_strided_slice %877 {offsets = [0, 64], sizes = [16, 32], strides = [1, 1]} : vector<16x128xf32> to vector<16x32xf32>
    %898 = vector.extract_strided_slice %880 {offsets = [0, 64], sizes = [16, 32], strides = [1, 1]} : vector<16x128xf32> to vector<16x32xf32>
    %899 = arith.mulf %888, %898 : vector<16x32xf32>
    %900 = arith.addf %897, %899 : vector<16x32xf32>
    %901 = math.tanh %900 : vector<16x32xf32>
    %cst_209 = arith.constant 1.000000e+00 : f32
    %902 = vector.broadcast %cst_209 : f32 to vector<16x32xf32>
    %903 = arith.subf %902, %896 : vector<16x32xf32>
    %904 = arith.mulf %903, %901 : vector<16x32xf32>
    %905 = arith.mulf %896, %875 : vector<16x32xf32>
    %906 = arith.addf %904, %905 : vector<16x32xf32>
    %907 = vector.shape_cast %24 : vector<16x1xi1> to vector<16x1xi1>
    %908 = vector.broadcast %907 : vector<16x1xi1> to vector<16x32xi1>
    %909 = arith.select %908, %906, %875 : vector<16x32xi1>, vector<16x32xf32>
    %c0_210 = arith.constant 0 : index
    %c0_211 = arith.constant 0 : index
    %910 = vector.load %arg15[%c0_210, %c0_211] : memref<64x128xbf16, #tpu.memory_space<vmem>>, vector<64x128xbf16>
    %c0_212 = arith.constant 0 : index
    %c0_213 = arith.constant 0 : index
    %911 = vector.load %arg16[%c0_212, %c0_213] : memref<32x128xbf16, #tpu.memory_space<vmem>>, vector<32x128xbf16>
    %c0_214 = arith.constant 0 : index
    %c0_215 = arith.constant 0 : index
    %912 = vector.load %arg17[%c0_214, %c0_215] : memref<1x128xf32, #tpu.memory_space<vmem>>, vector<1x128xf32>
    %c0_216 = arith.constant 0 : index
    %c0_217 = arith.constant 0 : index
    %913 = vector.load %arg18[%c0_216, %c0_217] : memref<1x128xf32, #tpu.memory_space<vmem>>, vector<1x128xf32>
    %914 = vector.shape_cast %913 : vector<1x128xf32> to vector<1x128xf32>
    %915 = vector.broadcast %914 : vector<1x128xf32> to vector<16x128xf32>
    %cst_218 = arith.constant dense<0.000000e+00> : vector<128x128xf32>
    %916 = tpu.matmul %625, %910, %cst_218 {dimension_numbers = #tpu.dot_dimension_numbers<[1], [0], [0], [1], [0, 0, 1, 1], [], []>} : vector<128x64xbf16>, vector<64x128xbf16>, vector<128x128xf32> -> vector<128x128xf32>
    %917 = vector.broadcast %912 : vector<1x128xf32> to vector<128x128xf32>
    %918 = arith.addf %916, %917 : vector<128x128xf32>
    %919 = arith.truncf %918 : vector<128x128xf32> to vector<128x128xbf16>
    %c0_219 = arith.constant 0 : index
    %c0_220 = arith.constant 0 : index
    %920 = vector.load %arg24[%c0_219, %c0_220] : memref<128x128xbf16, #tpu.memory_space<vmem>>, vector<128x128xbf16>
    tpu.vector_store %arg24[%c0_219, %c0_220], %919 {strides = array<i32>} : memref<128x128xbf16, #tpu.memory_space<vmem>>, vector<128x128xbf16>,
    %cst_221 = arith.constant 0.000000e+00 : f32
    %921 = vector.broadcast %cst_221 : f32 to vector<16x32xf32>
    %c112_222 = arith.constant 112 : index
    %c0_223 = arith.constant 0 : index
    %922 = vector.load %arg24[%c112_222, %c0_223] : memref<128x128xbf16, #tpu.memory_space<vmem>>, vector<16x128xbf16>
    %923 = arith.extf %922 : vector<16x128xbf16> to vector<16x128xf32>
    %924 = arith.truncf %921 : vector<16x32xf32> to vector<16x32xbf16>
    %cst_224 = arith.constant dense<0.000000e+00> : vector<16x128xf32>
    %925 = tpu.matmul %924, %911, %cst_224 {dimension_numbers = #tpu.dot_dimension_numbers<[1], [0], [0], [1], [0, 0, 1, 1], [], []>} : vector<16x32xbf16>, vector<32x128xbf16>, vector<16x128xf32> -> vector<16x128xf32>
    %926 = arith.addf %925, %915 : vector<16x128xf32>
    %927 = vector.extract_strided_slice %923 {offsets = [0, 0], sizes = [16, 32], strides = [1, 1]} : vector<16x128xf32> to vector<16x32xf32>
    %928 = vector.extract_strided_slice %926 {offsets = [0, 0], sizes = [16, 32], strides = [1, 1]} : vector<16x128xf32> to vector<16x32xf32>
    %929 = arith.addf %927, %928 : vector<16x32xf32>
    %930 = arith.negf %929 : vector<16x32xf32>
    %931 = math.exp %930 : vector<16x32xf32>
    %cst_225 = arith.constant 1.000000e+00 : f32
    %932 = vector.broadcast %cst_225 : f32 to vector<16x32xf32>
    %933 = arith.addf %932, %931 : vector<16x32xf32>
    %934 = arith.divf %932, %933 : vector<16x32xf32>
    %935 = vector.extract_strided_slice %923 {offsets = [0, 32], sizes = [16, 32], strides = [1, 1]} : vector<16x128xf32> to vector<16x32xf32>
    %936 = vector.extract_strided_slice %926 {offsets = [0, 32], sizes = [16, 32], strides = [1, 1]} : vector<16x128xf32> to vector<16x32xf32>
    %937 = arith.addf %935, %936 : vector<16x32xf32>
    %938 = arith.negf %937 : vector<16x32xf32>
    %939 = math.exp %938 : vector<16x32xf32>
    %cst_226 = arith.constant 1.000000e+00 : f32
    %940 = vector.broadcast %cst_226 : f32 to vector<16x32xf32>
    %941 = arith.addf %940, %939 : vector<16x32xf32>
    %942 = arith.divf %940, %941 : vector<16x32xf32>
    %943 = vector.extract_strided_slice %923 {offsets = [0, 64], sizes = [16, 32], strides = [1, 1]} : vector<16x128xf32> to vector<16x32xf32>
    %944 = vector.extract_strided_slice %926 {offsets = [0, 64], sizes = [16, 32], strides = [1, 1]} : vector<16x128xf32> to vector<16x32xf32>
    %945 = arith.mulf %934, %944 : vector<16x32xf32>
    %946 = arith.addf %943, %945 : vector<16x32xf32>
    %947 = math.tanh %946 : vector<16x32xf32>
    %cst_227 = arith.constant 1.000000e+00 : f32
    %948 = vector.broadcast %cst_227 : f32 to vector<16x32xf32>
    %949 = arith.subf %948, %942 : vector<16x32xf32>
    %950 = arith.mulf %949, %947 : vector<16x32xf32>
    %951 = arith.mulf %942, %921 : vector<16x32xf32>
    %952 = arith.addf %950, %951 : vector<16x32xf32>
    %953 = vector.shape_cast %24 : vector<16x1xi1> to vector<16x1xi1>
    %954 = vector.broadcast %953 : vector<16x1xi1> to vector<16x32xi1>
    %955 = arith.select %954, %952, %921 : vector<16x32xi1>, vector<16x32xf32>
    %c96_228 = arith.constant 96 : index
    %c0_229 = arith.constant 0 : index
    %956 = vector.load %arg24[%c96_228, %c0_229] : memref<128x128xbf16, #tpu.memory_space<vmem>>, vector<16x128xbf16>
    %957 = arith.extf %956 : vector<16x128xbf16> to vector<16x128xf32>
    %958 = arith.truncf %955 : vector<16x32xf32> to vector<16x32xbf16>
    %cst_230 = arith.constant dense<0.000000e+00> : vector<16x128xf32>
    %959 = tpu.matmul %958, %911, %cst_230 {dimension_numbers = #tpu.dot_dimension_numbers<[1], [0], [0], [1], [0, 0, 1, 1], [], []>} : vector<16x32xbf16>, vector<32x128xbf16>, vector<16x128xf32> -> vector<16x128xf32>
    %960 = arith.addf %959, %915 : vector<16x128xf32>
    %961 = vector.extract_strided_slice %957 {offsets = [0, 0], sizes = [16, 32], strides = [1, 1]} : vector<16x128xf32> to vector<16x32xf32>
    %962 = vector.extract_strided_slice %960 {offsets = [0, 0], sizes = [16, 32], strides = [1, 1]} : vector<16x128xf32> to vector<16x32xf32>
    %963 = arith.addf %961, %962 : vector<16x32xf32>
    %964 = arith.negf %963 : vector<16x32xf32>
    %965 = math.exp %964 : vector<16x32xf32>
    %cst_231 = arith.constant 1.000000e+00 : f32
    %966 = vector.broadcast %cst_231 : f32 to vector<16x32xf32>
    %967 = arith.addf %966, %965 : vector<16x32xf32>
    %968 = arith.divf %966, %967 : vector<16x32xf32>
    %969 = vector.extract_strided_slice %957 {offsets = [0, 32], sizes = [16, 32], strides = [1, 1]} : vector<16x128xf32> to vector<16x32xf32>
    %970 = vector.extract_strided_slice %960 {offsets = [0, 32], sizes = [16, 32], strides = [1, 1]} : vector<16x128xf32> to vector<16x32xf32>
    %971 = arith.addf %969, %970 : vector<16x32xf32>
    %972 = arith.negf %971 : vector<16x32xf32>
    %973 = math.exp %972 : vector<16x32xf32>
    %cst_232 = arith.constant 1.000000e+00 : f32
    %974 = vector.broadcast %cst_232 : f32 to vector<16x32xf32>
    %975 = arith.addf %974, %973 : vector<16x32xf32>
    %976 = arith.divf %974, %975 : vector<16x32xf32>
    %977 = vector.extract_strided_slice %957 {offsets = [0, 64], sizes = [16, 32], strides = [1, 1]} : vector<16x128xf32> to vector<16x32xf32>
    %978 = vector.extract_strided_slice %960 {offsets = [0, 64], sizes = [16, 32], strides = [1, 1]} : vector<16x128xf32> to vector<16x32xf32>
    %979 = arith.mulf %968, %978 : vector<16x32xf32>
    %980 = arith.addf %977, %979 : vector<16x32xf32>
    %981 = math.tanh %980 : vector<16x32xf32>
    %cst_233 = arith.constant 1.000000e+00 : f32
    %982 = vector.broadcast %cst_233 : f32 to vector<16x32xf32>
    %983 = arith.subf %982, %976 : vector<16x32xf32>
    %984 = arith.mulf %983, %981 : vector<16x32xf32>
    %985 = arith.mulf %976, %955 : vector<16x32xf32>
    %986 = arith.addf %984, %985 : vector<16x32xf32>
    %987 = vector.shape_cast %22 : vector<16x1xi1> to vector<16x1xi1>
    %988 = vector.broadcast %987 : vector<16x1xi1> to vector<16x32xi1>
    %989 = arith.select %988, %986, %955 : vector<16x32xi1>, vector<16x32xf32>
    %c80_234 = arith.constant 80 : index
    %c0_235 = arith.constant 0 : index
    %990 = vector.load %arg24[%c80_234, %c0_235] : memref<128x128xbf16, #tpu.memory_space<vmem>>, vector<16x128xbf16>
    %991 = arith.extf %990 : vector<16x128xbf16> to vector<16x128xf32>
    %992 = arith.truncf %989 : vector<16x32xf32> to vector<16x32xbf16>
    %cst_236 = arith.constant dense<0.000000e+00> : vector<16x128xf32>
    %993 = tpu.matmul %992, %911, %cst_236 {dimension_numbers = #tpu.dot_dimension_numbers<[1], [0], [0], [1], [0, 0, 1, 1], [], []>} : vector<16x32xbf16>, vector<32x128xbf16>, vector<16x128xf32> -> vector<16x128xf32>
    %994 = arith.addf %993, %915 : vector<16x128xf32>
    %995 = vector.extract_strided_slice %991 {offsets = [0, 0], sizes = [16, 32], strides = [1, 1]} : vector<16x128xf32> to vector<16x32xf32>
    %996 = vector.extract_strided_slice %994 {offsets = [0, 0], sizes = [16, 32], strides = [1, 1]} : vector<16x128xf32> to vector<16x32xf32>
    %997 = arith.addf %995, %996 : vector<16x32xf32>
    %998 = arith.negf %997 : vector<16x32xf32>
    %999 = math.exp %998 : vector<16x32xf32>
    %cst_237 = arith.constant 1.000000e+00 : f32
    %1000 = vector.broadcast %cst_237 : f32 to vector<16x32xf32>
    %1001 = arith.addf %1000, %999 : vector<16x32xf32>
    %1002 = arith.divf %1000, %1001 : vector<16x32xf32>
    %1003 = vector.extract_strided_slice %991 {offsets = [0, 32], sizes = [16, 32], strides = [1, 1]} : vector<16x128xf32> to vector<16x32xf32>
    %1004 = vector.extract_strided_slice %994 {offsets = [0, 32], sizes = [16, 32], strides = [1, 1]} : vector<16x128xf32> to vector<16x32xf32>
    %1005 = arith.addf %1003, %1004 : vector<16x32xf32>
    %1006 = arith.negf %1005 : vector<16x32xf32>
    %1007 = math.exp %1006 : vector<16x32xf32>
    %cst_238 = arith.constant 1.000000e+00 : f32
    %1008 = vector.broadcast %cst_238 : f32 to vector<16x32xf32>
    %1009 = arith.addf %1008, %1007 : vector<16x32xf32>
    %1010 = arith.divf %1008, %1009 : vector<16x32xf32>
    %1011 = vector.extract_strided_slice %991 {offsets = [0, 64], sizes = [16, 32], strides = [1, 1]} : vector<16x128xf32> to vector<16x32xf32>
    %1012 = vector.extract_strided_slice %994 {offsets = [0, 64], sizes = [16, 32], strides = [1, 1]} : vector<16x128xf32> to vector<16x32xf32>
    %1013 = arith.mulf %1002, %1012 : vector<16x32xf32>
    %1014 = arith.addf %1011, %1013 : vector<16x32xf32>
    %1015 = math.tanh %1014 : vector<16x32xf32>
    %cst_239 = arith.constant 1.000000e+00 : f32
    %1016 = vector.broadcast %cst_239 : f32 to vector<16x32xf32>
    %1017 = arith.subf %1016, %1010 : vector<16x32xf32>
    %1018 = arith.mulf %1017, %1015 : vector<16x32xf32>
    %1019 = arith.mulf %1010, %989 : vector<16x32xf32>
    %1020 = arith.addf %1018, %1019 : vector<16x32xf32>
    %1021 = vector.shape_cast %20 : vector<16x1xi1> to vector<16x1xi1>
    %1022 = vector.broadcast %1021 : vector<16x1xi1> to vector<16x32xi1>
    %1023 = arith.select %1022, %1020, %989 : vector<16x32xi1>, vector<16x32xf32>
    %c64_240 = arith.constant 64 : index
    %c0_241 = arith.constant 0 : index
    %1024 = vector.load %arg24[%c64_240, %c0_241] : memref<128x128xbf16, #tpu.memory_space<vmem>>, vector<16x128xbf16>
    %1025 = arith.extf %1024 : vector<16x128xbf16> to vector<16x128xf32>
    %1026 = arith.truncf %1023 : vector<16x32xf32> to vector<16x32xbf16>
    %cst_242 = arith.constant dense<0.000000e+00> : vector<16x128xf32>
    %1027 = tpu.matmul %1026, %911, %cst_242 {dimension_numbers = #tpu.dot_dimension_numbers<[1], [0], [0], [1], [0, 0, 1, 1], [], []>} : vector<16x32xbf16>, vector<32x128xbf16>, vector<16x128xf32> -> vector<16x128xf32>
    %1028 = arith.addf %1027, %915 : vector<16x128xf32>
    %1029 = vector.extract_strided_slice %1025 {offsets = [0, 0], sizes = [16, 32], strides = [1, 1]} : vector<16x128xf32> to vector<16x32xf32>
    %1030 = vector.extract_strided_slice %1028 {offsets = [0, 0], sizes = [16, 32], strides = [1, 1]} : vector<16x128xf32> to vector<16x32xf32>
    %1031 = arith.addf %1029, %1030 : vector<16x32xf32>
    %1032 = arith.negf %1031 : vector<16x32xf32>
    %1033 = math.exp %1032 : vector<16x32xf32>
    %cst_243 = arith.constant 1.000000e+00 : f32
    %1034 = vector.broadcast %cst_243 : f32 to vector<16x32xf32>
    %1035 = arith.addf %1034, %1033 : vector<16x32xf32>
    %1036 = arith.divf %1034, %1035 : vector<16x32xf32>
    %1037 = vector.extract_strided_slice %1025 {offsets = [0, 32], sizes = [16, 32], strides = [1, 1]} : vector<16x128xf32> to vector<16x32xf32>
    %1038 = vector.extract_strided_slice %1028 {offsets = [0, 32], sizes = [16, 32], strides = [1, 1]} : vector<16x128xf32> to vector<16x32xf32>
    %1039 = arith.addf %1037, %1038 : vector<16x32xf32>
    %1040 = arith.negf %1039 : vector<16x32xf32>
    %1041 = math.exp %1040 : vector<16x32xf32>
    %cst_244 = arith.constant 1.000000e+00 : f32
    %1042 = vector.broadcast %cst_244 : f32 to vector<16x32xf32>
    %1043 = arith.addf %1042, %1041 : vector<16x32xf32>
    %1044 = arith.divf %1042, %1043 : vector<16x32xf32>
    %1045 = vector.extract_strided_slice %1025 {offsets = [0, 64], sizes = [16, 32], strides = [1, 1]} : vector<16x128xf32> to vector<16x32xf32>
    %1046 = vector.extract_strided_slice %1028 {offsets = [0, 64], sizes = [16, 32], strides = [1, 1]} : vector<16x128xf32> to vector<16x32xf32>
    %1047 = arith.mulf %1036, %1046 : vector<16x32xf32>
    %1048 = arith.addf %1045, %1047 : vector<16x32xf32>
    %1049 = math.tanh %1048 : vector<16x32xf32>
    %cst_245 = arith.constant 1.000000e+00 : f32
    %1050 = vector.broadcast %cst_245 : f32 to vector<16x32xf32>
    %1051 = arith.subf %1050, %1044 : vector<16x32xf32>
    %1052 = arith.mulf %1051, %1049 : vector<16x32xf32>
    %1053 = arith.mulf %1044, %1023 : vector<16x32xf32>
    %1054 = arith.addf %1052, %1053 : vector<16x32xf32>
    %1055 = vector.shape_cast %18 : vector<16x1xi1> to vector<16x1xi1>
    %1056 = vector.broadcast %1055 : vector<16x1xi1> to vector<16x32xi1>
    %1057 = arith.select %1056, %1054, %1023 : vector<16x32xi1>, vector<16x32xf32>
    %c48_246 = arith.constant 48 : index
    %c0_247 = arith.constant 0 : index
    %1058 = vector.load %arg24[%c48_246, %c0_247] : memref<128x128xbf16, #tpu.memory_space<vmem>>, vector<16x128xbf16>
    %1059 = arith.extf %1058 : vector<16x128xbf16> to vector<16x128xf32>
    %1060 = arith.truncf %1057 : vector<16x32xf32> to vector<16x32xbf16>
    %cst_248 = arith.constant dense<0.000000e+00> : vector<16x128xf32>
    %1061 = tpu.matmul %1060, %911, %cst_248 {dimension_numbers = #tpu.dot_dimension_numbers<[1], [0], [0], [1], [0, 0, 1, 1], [], []>} : vector<16x32xbf16>, vector<32x128xbf16>, vector<16x128xf32> -> vector<16x128xf32>
    %1062 = arith.addf %1061, %915 : vector<16x128xf32>
    %1063 = vector.extract_strided_slice %1059 {offsets = [0, 0], sizes = [16, 32], strides = [1, 1]} : vector<16x128xf32> to vector<16x32xf32>
    %1064 = vector.extract_strided_slice %1062 {offsets = [0, 0], sizes = [16, 32], strides = [1, 1]} : vector<16x128xf32> to vector<16x32xf32>
    %1065 = arith.addf %1063, %1064 : vector<16x32xf32>
    %1066 = arith.negf %1065 : vector<16x32xf32>
    %1067 = math.exp %1066 : vector<16x32xf32>
    %cst_249 = arith.constant 1.000000e+00 : f32
    %1068 = vector.broadcast %cst_249 : f32 to vector<16x32xf32>
    %1069 = arith.addf %1068, %1067 : vector<16x32xf32>
    %1070 = arith.divf %1068, %1069 : vector<16x32xf32>
    %1071 = vector.extract_strided_slice %1059 {offsets = [0, 32], sizes = [16, 32], strides = [1, 1]} : vector<16x128xf32> to vector<16x32xf32>
    %1072 = vector.extract_strided_slice %1062 {offsets = [0, 32], sizes = [16, 32], strides = [1, 1]} : vector<16x128xf32> to vector<16x32xf32>
    %1073 = arith.addf %1071, %1072 : vector<16x32xf32>
    %1074 = arith.negf %1073 : vector<16x32xf32>
    %1075 = math.exp %1074 : vector<16x32xf32>
    %cst_250 = arith.constant 1.000000e+00 : f32
    %1076 = vector.broadcast %cst_250 : f32 to vector<16x32xf32>
    %1077 = arith.addf %1076, %1075 : vector<16x32xf32>
    %1078 = arith.divf %1076, %1077 : vector<16x32xf32>
    %1079 = vector.extract_strided_slice %1059 {offsets = [0, 64], sizes = [16, 32], strides = [1, 1]} : vector<16x128xf32> to vector<16x32xf32>
    %1080 = vector.extract_strided_slice %1062 {offsets = [0, 64], sizes = [16, 32], strides = [1, 1]} : vector<16x128xf32> to vector<16x32xf32>
    %1081 = arith.mulf %1070, %1080 : vector<16x32xf32>
    %1082 = arith.addf %1079, %1081 : vector<16x32xf32>
    %1083 = math.tanh %1082 : vector<16x32xf32>
    %cst_251 = arith.constant 1.000000e+00 : f32
    %1084 = vector.broadcast %cst_251 : f32 to vector<16x32xf32>
    %1085 = arith.subf %1084, %1078 : vector<16x32xf32>
    %1086 = arith.mulf %1085, %1083 : vector<16x32xf32>
    %1087 = arith.mulf %1078, %1057 : vector<16x32xf32>
    %1088 = arith.addf %1086, %1087 : vector<16x32xf32>
    %1089 = vector.shape_cast %16 : vector<16x1xi1> to vector<16x1xi1>
    %1090 = vector.broadcast %1089 : vector<16x1xi1> to vector<16x32xi1>
    %1091 = arith.select %1090, %1088, %1057 : vector<16x32xi1>, vector<16x32xf32>
    %c32_252 = arith.constant 32 : index
    %c0_253 = arith.constant 0 : index
    %1092 = vector.load %arg24[%c32_252, %c0_253] : memref<128x128xbf16, #tpu.memory_space<vmem>>, vector<16x128xbf16>
    %1093 = arith.extf %1092 : vector<16x128xbf16> to vector<16x128xf32>
    %1094 = arith.truncf %1091 : vector<16x32xf32> to vector<16x32xbf16>
    %cst_254 = arith.constant dense<0.000000e+00> : vector<16x128xf32>
    %1095 = tpu.matmul %1094, %911, %cst_254 {dimension_numbers = #tpu.dot_dimension_numbers<[1], [0], [0], [1], [0, 0, 1, 1], [], []>} : vector<16x32xbf16>, vector<32x128xbf16>, vector<16x128xf32> -> vector<16x128xf32>
    %1096 = arith.addf %1095, %915 : vector<16x128xf32>
    %1097 = vector.extract_strided_slice %1093 {offsets = [0, 0], sizes = [16, 32], strides = [1, 1]} : vector<16x128xf32> to vector<16x32xf32>
    %1098 = vector.extract_strided_slice %1096 {offsets = [0, 0], sizes = [16, 32], strides = [1, 1]} : vector<16x128xf32> to vector<16x32xf32>
    %1099 = arith.addf %1097, %1098 : vector<16x32xf32>
    %1100 = arith.negf %1099 : vector<16x32xf32>
    %1101 = math.exp %1100 : vector<16x32xf32>
    %cst_255 = arith.constant 1.000000e+00 : f32
    %1102 = vector.broadcast %cst_255 : f32 to vector<16x32xf32>
    %1103 = arith.addf %1102, %1101 : vector<16x32xf32>
    %1104 = arith.divf %1102, %1103 : vector<16x32xf32>
    %1105 = vector.extract_strided_slice %1093 {offsets = [0, 32], sizes = [16, 32], strides = [1, 1]} : vector<16x128xf32> to vector<16x32xf32>
    %1106 = vector.extract_strided_slice %1096 {offsets = [0, 32], sizes = [16, 32], strides = [1, 1]} : vector<16x128xf32> to vector<16x32xf32>
    %1107 = arith.addf %1105, %1106 : vector<16x32xf32>
    %1108 = arith.negf %1107 : vector<16x32xf32>
    %1109 = math.exp %1108 : vector<16x32xf32>
    %cst_256 = arith.constant 1.000000e+00 : f32
    %1110 = vector.broadcast %cst_256 : f32 to vector<16x32xf32>
    %1111 = arith.addf %1110, %1109 : vector<16x32xf32>
    %1112 = arith.divf %1110, %1111 : vector<16x32xf32>
    %1113 = vector.extract_strided_slice %1093 {offsets = [0, 64], sizes = [16, 32], strides = [1, 1]} : vector<16x128xf32> to vector<16x32xf32>
    %1114 = vector.extract_strided_slice %1096 {offsets = [0, 64], sizes = [16, 32], strides = [1, 1]} : vector<16x128xf32> to vector<16x32xf32>
    %1115 = arith.mulf %1104, %1114 : vector<16x32xf32>
    %1116 = arith.addf %1113, %1115 : vector<16x32xf32>
    %1117 = math.tanh %1116 : vector<16x32xf32>
    %cst_257 = arith.constant 1.000000e+00 : f32
    %1118 = vector.broadcast %cst_257 : f32 to vector<16x32xf32>
    %1119 = arith.subf %1118, %1112 : vector<16x32xf32>
    %1120 = arith.mulf %1119, %1117 : vector<16x32xf32>
    %1121 = arith.mulf %1112, %1091 : vector<16x32xf32>
    %1122 = arith.addf %1120, %1121 : vector<16x32xf32>
    %1123 = vector.shape_cast %14 : vector<16x1xi1> to vector<16x1xi1>
    %1124 = vector.broadcast %1123 : vector<16x1xi1> to vector<16x32xi1>
    %1125 = arith.select %1124, %1122, %1091 : vector<16x32xi1>, vector<16x32xf32>
    %c16_258 = arith.constant 16 : index
    %c0_259 = arith.constant 0 : index
    %1126 = vector.load %arg24[%c16_258, %c0_259] : memref<128x128xbf16, #tpu.memory_space<vmem>>, vector<16x128xbf16>
    %1127 = arith.extf %1126 : vector<16x128xbf16> to vector<16x128xf32>
    %1128 = arith.truncf %1125 : vector<16x32xf32> to vector<16x32xbf16>
    %cst_260 = arith.constant dense<0.000000e+00> : vector<16x128xf32>
    %1129 = tpu.matmul %1128, %911, %cst_260 {dimension_numbers = #tpu.dot_dimension_numbers<[1], [0], [0], [1], [0, 0, 1, 1], [], []>} : vector<16x32xbf16>, vector<32x128xbf16>, vector<16x128xf32> -> vector<16x128xf32>
    %1130 = arith.addf %1129, %915 : vector<16x128xf32>
    %1131 = vector.extract_strided_slice %1127 {offsets = [0, 0], sizes = [16, 32], strides = [1, 1]} : vector<16x128xf32> to vector<16x32xf32>
    %1132 = vector.extract_strided_slice %1130 {offsets = [0, 0], sizes = [16, 32], strides = [1, 1]} : vector<16x128xf32> to vector<16x32xf32>
    %1133 = arith.addf %1131, %1132 : vector<16x32xf32>
    %1134 = arith.negf %1133 : vector<16x32xf32>
    %1135 = math.exp %1134 : vector<16x32xf32>
    %cst_261 = arith.constant 1.000000e+00 : f32
    %1136 = vector.broadcast %cst_261 : f32 to vector<16x32xf32>
    %1137 = arith.addf %1136, %1135 : vector<16x32xf32>
    %1138 = arith.divf %1136, %1137 : vector<16x32xf32>
    %1139 = vector.extract_strided_slice %1127 {offsets = [0, 32], sizes = [16, 32], strides = [1, 1]} : vector<16x128xf32> to vector<16x32xf32>
    %1140 = vector.extract_strided_slice %1130 {offsets = [0, 32], sizes = [16, 32], strides = [1, 1]} : vector<16x128xf32> to vector<16x32xf32>
    %1141 = arith.addf %1139, %1140 : vector<16x32xf32>
    %1142 = arith.negf %1141 : vector<16x32xf32>
    %1143 = math.exp %1142 : vector<16x32xf32>
    %cst_262 = arith.constant 1.000000e+00 : f32
    %1144 = vector.broadcast %cst_262 : f32 to vector<16x32xf32>
    %1145 = arith.addf %1144, %1143 : vector<16x32xf32>
    %1146 = arith.divf %1144, %1145 : vector<16x32xf32>
    %1147 = vector.extract_strided_slice %1127 {offsets = [0, 64], sizes = [16, 32], strides = [1, 1]} : vector<16x128xf32> to vector<16x32xf32>
    %1148 = vector.extract_strided_slice %1130 {offsets = [0, 64], sizes = [16, 32], strides = [1, 1]} : vector<16x128xf32> to vector<16x32xf32>
    %1149 = arith.mulf %1138, %1148 : vector<16x32xf32>
    %1150 = arith.addf %1147, %1149 : vector<16x32xf32>
    %1151 = math.tanh %1150 : vector<16x32xf32>
    %cst_263 = arith.constant 1.000000e+00 : f32
    %1152 = vector.broadcast %cst_263 : f32 to vector<16x32xf32>
    %1153 = arith.subf %1152, %1146 : vector<16x32xf32>
    %1154 = arith.mulf %1153, %1151 : vector<16x32xf32>
    %1155 = arith.mulf %1146, %1125 : vector<16x32xf32>
    %1156 = arith.addf %1154, %1155 : vector<16x32xf32>
    %1157 = vector.shape_cast %12 : vector<16x1xi1> to vector<16x1xi1>
    %1158 = vector.broadcast %1157 : vector<16x1xi1> to vector<16x32xi1>
    %1159 = arith.select %1158, %1156, %1125 : vector<16x32xi1>, vector<16x32xf32>
    %c0_264 = arith.constant 0 : index
    %c0_265 = arith.constant 0 : index
    %1160 = vector.load %arg24[%c0_264, %c0_265] : memref<128x128xbf16, #tpu.memory_space<vmem>>, vector<16x128xbf16>
    %1161 = arith.extf %1160 : vector<16x128xbf16> to vector<16x128xf32>
    %1162 = arith.truncf %1159 : vector<16x32xf32> to vector<16x32xbf16>
    %cst_266 = arith.constant dense<0.000000e+00> : vector<16x128xf32>
    %1163 = tpu.matmul %1162, %911, %cst_266 {dimension_numbers = #tpu.dot_dimension_numbers<[1], [0], [0], [1], [0, 0, 1, 1], [], []>} : vector<16x32xbf16>, vector<32x128xbf16>, vector<16x128xf32> -> vector<16x128xf32>
    %1164 = arith.addf %1163, %915 : vector<16x128xf32>
    %1165 = vector.extract_strided_slice %1161 {offsets = [0, 0], sizes = [16, 32], strides = [1, 1]} : vector<16x128xf32> to vector<16x32xf32>
    %1166 = vector.extract_strided_slice %1164 {offsets = [0, 0], sizes = [16, 32], strides = [1, 1]} : vector<16x128xf32> to vector<16x32xf32>
    %1167 = arith.addf %1165, %1166 : vector<16x32xf32>
    %1168 = arith.negf %1167 : vector<16x32xf32>
    %1169 = math.exp %1168 : vector<16x32xf32>
    %cst_267 = arith.constant 1.000000e+00 : f32
    %1170 = vector.broadcast %cst_267 : f32 to vector<16x32xf32>
    %1171 = arith.addf %1170, %1169 : vector<16x32xf32>
    %1172 = arith.divf %1170, %1171 : vector<16x32xf32>
    %1173 = vector.extract_strided_slice %1161 {offsets = [0, 32], sizes = [16, 32], strides = [1, 1]} : vector<16x128xf32> to vector<16x32xf32>
    %1174 = vector.extract_strided_slice %1164 {offsets = [0, 32], sizes = [16, 32], strides = [1, 1]} : vector<16x128xf32> to vector<16x32xf32>
    %1175 = arith.addf %1173, %1174 : vector<16x32xf32>
    %1176 = arith.negf %1175 : vector<16x32xf32>
    %1177 = math.exp %1176 : vector<16x32xf32>
    %cst_268 = arith.constant 1.000000e+00 : f32
    %1178 = vector.broadcast %cst_268 : f32 to vector<16x32xf32>
    %1179 = arith.addf %1178, %1177 : vector<16x32xf32>
    %1180 = arith.divf %1178, %1179 : vector<16x32xf32>
    %1181 = vector.extract_strided_slice %1161 {offsets = [0, 64], sizes = [16, 32], strides = [1, 1]} : vector<16x128xf32> to vector<16x32xf32>
    %1182 = vector.extract_strided_slice %1164 {offsets = [0, 64], sizes = [16, 32], strides = [1, 1]} : vector<16x128xf32> to vector<16x32xf32>
    %1183 = arith.mulf %1172, %1182 : vector<16x32xf32>
    %1184 = arith.addf %1181, %1183 : vector<16x32xf32>
    %1185 = math.tanh %1184 : vector<16x32xf32>
    %cst_269 = arith.constant 1.000000e+00 : f32
    %1186 = vector.broadcast %cst_269 : f32 to vector<16x32xf32>
    %1187 = arith.subf %1186, %1180 : vector<16x32xf32>
    %1188 = arith.mulf %1187, %1185 : vector<16x32xf32>
    %1189 = arith.mulf %1180, %1159 : vector<16x32xf32>
    %1190 = arith.addf %1188, %1189 : vector<16x32xf32>
    %1191 = vector.shape_cast %10 : vector<16x1xi1> to vector<16x1xi1>
    %1192 = vector.broadcast %1191 : vector<16x1xi1> to vector<16x32xi1>
    %1193 = arith.select %1192, %1190, %1159 : vector<16x32xi1>, vector<16x32xf32>
    %c0_270 = arith.constant 0 : index
    %c0_271 = arith.constant 0 : index
    %1194 = vector.load %arg20[%c0_270, %c0_271] : memref<1x32xf32, #tpu.memory_space<vmem>>, vector<1x32xf32>
    %1195 = arith.truncf %909 : vector<16x32xf32> to vector<16x32xbf16>
    %c0_272 = arith.constant 0 : index
    %c0_273 = arith.constant 0 : index
    %c0_274 = arith.constant 0 : index
    %1196 = vector.load %arg19[%c0_272, %c0_273, %c0_274] : memref<2x32x32xbf16, #tpu.memory_space<vmem>>, vector<1x32x32xbf16>
    %1197 = vector.shape_cast %1196 : vector<1x32x32xbf16> to vector<32x32xbf16>
    %cst_275 = arith.constant dense<0.000000e+00> : vector<16x32xf32>
    %1198 = tpu.matmul %1195, %1197, %cst_275 {dimension_numbers = #tpu.dot_dimension_numbers<[1], [0], [0], [1], [0, 0, 1, 1], [], []>} : vector<16x32xbf16>, vector<32x32xbf16>, vector<16x32xf32> -> vector<16x32xf32>
    %1199 = vector.broadcast %1194 : vector<1x32xf32> to vector<16x32xf32>
    %1200 = arith.addf %1199, %1198 : vector<16x32xf32>
    %1201 = arith.truncf %1193 : vector<16x32xf32> to vector<16x32xbf16>
    %c1 = arith.constant 1 : index
    %c0_276 = arith.constant 0 : index
    %c0_277 = arith.constant 0 : index
    %1202 = vector.load %arg19[%c1, %c0_276, %c0_277] : memref<2x32x32xbf16, #tpu.memory_space<vmem>>, vector<1x32x32xbf16>
    %1203 = vector.shape_cast %1202 : vector<1x32x32xbf16> to vector<32x32xbf16>
    %cst_278 = arith.constant dense<0.000000e+00> : vector<16x32xf32>
    %1204 = tpu.matmul %1201, %1203, %cst_278 {dimension_numbers = #tpu.dot_dimension_numbers<[1], [0], [0], [1], [0, 0, 1, 1], [], []>} : vector<16x32xbf16>, vector<32x32xbf16>, vector<16x32xf32> -> vector<16x32xf32>
    %1205 = arith.addf %1200, %1204 : vector<16x32xf32>
    %cst_279 = arith.constant 0.000000e+00 : f32
    %1206 = vector.broadcast %cst_279 : f32 to vector<16x32xf32>
    %1207 = arith.maximumf %1205, %1206 : vector<16x32xf32>
    %1208 = arith.truncf %1207 : vector<16x32xf32> to vector<16x32xbf16>
    %c0_280 = arith.constant 0 : index
    %c0_281 = arith.constant 0 : index
    %1209 = vector.load %arg21[%c0_280, %c0_281] : memref<32x128xbf16, #tpu.memory_space<vmem>>, vector<32x128xbf16>
    %cst_282 = arith.constant dense<0.000000e+00> : vector<16x128xf32>
    %1210 = tpu.matmul %1208, %1209, %cst_282 {dimension_numbers = #tpu.dot_dimension_numbers<[1], [0], [0], [1], [0, 0, 1, 1], [], []>} : vector<16x32xbf16>, vector<32x128xbf16>, vector<16x128xf32> -> vector<16x128xf32>
    %c0_283 = arith.constant 0 : index
    %c0_284 = arith.constant 0 : index
    %1211 = vector.load %arg22[%c0_283, %c0_284] : memref<1x128xf32, #tpu.memory_space<vmem>>, vector<1x128xf32>
    %1212 = vector.broadcast %1211 : vector<1x128xf32> to vector<16x128xf32>
    %1213 = arith.addf %1210, %1212 : vector<16x128xf32>
    %c0_285 = arith.constant 0 : index
    %c0_286 = arith.constant 0 : index
    %1214 = vector.load %arg23[%c0_285, %c0_286] : memref<16x128xf32, #tpu.memory_space<vmem>>, vector<16x128xf32>
    tpu.vector_store %arg23[%c0_285, %c0_286], %1213 {strides = array<i32>} : memref<16x128xf32, #tpu.memory_space<vmem>>, vector<16x128xf32>,
    return
  }
  func.func @transform_0(%arg0: i32) -> (i32, i32, i32) {
    %c0_i32 = arith.constant 0 : i32
    %c0_i32_0 = arith.constant 0 : i32
    %c0_i32_1 = arith.constant 0 : i32
    return %c0_i32, %arg0, %c0_i32_0 : i32, i32, i32
  }
  func.func @transform_1(%arg0: i32) -> (i32, i32) {
    %c0_i32 = arith.constant 0 : i32
    %c0_i32_0 = arith.constant 0 : i32
    return %arg0, %c0_i32 : i32, i32
  }
  func.func @transform_2(%arg0: i32) -> (i32, i32) {
    %c0_i32 = arith.constant 0 : i32
    %c0_i32_0 = arith.constant 0 : i32
    %c0_i32_1 = arith.constant 0 : i32
    return %c0_i32, %c0_i32_0 : i32, i32
  }
  func.func @transform_3(%arg0: i32) -> (i32, i32) {
    %c0_i32 = arith.constant 0 : i32
    %c0_i32_0 = arith.constant 0 : i32
    %c0_i32_1 = arith.constant 0 : i32
    return %c0_i32, %c0_i32_0 : i32, i32
  }
  func.func @transform_4(%arg0: i32) -> (i32, i32) {
    %c0_i32 = arith.constant 0 : i32
    %c0_i32_0 = arith.constant 0 : i32
    %c0_i32_1 = arith.constant 0 : i32
    return %c0_i32, %c0_i32_0 : i32, i32
  }
  func.func @transform_5(%arg0: i32) -> (i32, i32) {
    %c0_i32 = arith.constant 0 : i32
    %c0_i32_0 = arith.constant 0 : i32
    %c0_i32_1 = arith.constant 0 : i32
    return %c0_i32, %c0_i32_0 : i32, i32
  }
  func.func @transform_6(%arg0: i32) -> (i32, i32) {
    %c0_i32 = arith.constant 0 : i32
    %c0_i32_0 = arith.constant 0 : i32
    %c0_i32_1 = arith.constant 0 : i32
    return %c0_i32, %c0_i32_0 : i32, i32
  }
  func.func @transform_7(%arg0: i32) -> (i32, i32) {
    %c0_i32 = arith.constant 0 : i32
    %c0_i32_0 = arith.constant 0 : i32
    %c0_i32_1 = arith.constant 0 : i32
    return %c0_i32, %c0_i32_0 : i32, i32
  }
  func.func @transform_8(%arg0: i32) -> (i32, i32) {
    %c0_i32 = arith.constant 0 : i32
    %c0_i32_0 = arith.constant 0 : i32
    %c0_i32_1 = arith.constant 0 : i32
    return %c0_i32, %c0_i32_0 : i32, i32
  }
  func.func @transform_9(%arg0: i32) -> (i32, i32) {
    %c0_i32 = arith.constant 0 : i32
    %c0_i32_0 = arith.constant 0 : i32
    %c0_i32_1 = arith.constant 0 : i32
    return %c0_i32, %c0_i32_0 : i32, i32
  }
  func.func @transform_10(%arg0: i32) -> (i32, i32) {
    %c0_i32 = arith.constant 0 : i32
    %c0_i32_0 = arith.constant 0 : i32
    %c0_i32_1 = arith.constant 0 : i32
    return %c0_i32, %c0_i32_0 : i32, i32
  }
  func.func @transform_11(%arg0: i32) -> (i32, i32) {
    %c0_i32 = arith.constant 0 : i32
    %c0_i32_0 = arith.constant 0 : i32
    %c0_i32_1 = arith.constant 0 : i32
    return %c0_i32, %c0_i32_0 : i32, i32
  }
  func.func @transform_12(%arg0: i32) -> (i32, i32) {
    %c0_i32 = arith.constant 0 : i32
    %c0_i32_0 = arith.constant 0 : i32
    %c0_i32_1 = arith.constant 0 : i32
    return %c0_i32, %c0_i32_0 : i32, i32
  }
  func.func @transform_13(%arg0: i32) -> (i32, i32) {
    %c0_i32 = arith.constant 0 : i32
    %c0_i32_0 = arith.constant 0 : i32
    %c0_i32_1 = arith.constant 0 : i32
    return %c0_i32, %c0_i32_0 : i32, i32
  }
  func.func @transform_14(%arg0: i32) -> (i32, i32) {
    %c0_i32 = arith.constant 0 : i32
    %c0_i32_0 = arith.constant 0 : i32
    %c0_i32_1 = arith.constant 0 : i32
    return %c0_i32, %c0_i32_0 : i32, i32
  }
  func.func @transform_15(%arg0: i32) -> (i32, i32) {
    %c0_i32 = arith.constant 0 : i32
    %c0_i32_0 = arith.constant 0 : i32
    %c0_i32_1 = arith.constant 0 : i32
    return %c0_i32, %c0_i32_0 : i32, i32
  }
  func.func @transform_16(%arg0: i32) -> (i32, i32) {
    %c0_i32 = arith.constant 0 : i32
    %c0_i32_0 = arith.constant 0 : i32
    %c0_i32_1 = arith.constant 0 : i32
    return %c0_i32, %c0_i32_0 : i32, i32
  }
  func.func @transform_17(%arg0: i32) -> (i32, i32) {
    %c0_i32 = arith.constant 0 : i32
    %c0_i32_0 = arith.constant 0 : i32
    %c0_i32_1 = arith.constant 0 : i32
    return %c0_i32, %c0_i32_0 : i32, i32
  }
  func.func @transform_18(%arg0: i32) -> (i32, i32, i32) {
    %c0_i32 = arith.constant 0 : i32
    %c0_i32_0 = arith.constant 0 : i32
    %c0_i32_1 = arith.constant 0 : i32
    %c0_i32_2 = arith.constant 0 : i32
    return %c0_i32, %c0_i32_0, %c0_i32_1 : i32, i32, i32
  }
  func.func @transform_19(%arg0: i32) -> (i32, i32) {
    %c0_i32 = arith.constant 0 : i32
    %c0_i32_0 = arith.constant 0 : i32
    %c0_i32_1 = arith.constant 0 : i32
    return %c0_i32, %c0_i32_0 : i32, i32
  }
  func.func @transform_20(%arg0: i32) -> (i32, i32) {
    %c0_i32 = arith.constant 0 : i32
    %c0_i32_0 = arith.constant 0 : i32
    %c0_i32_1 = arith.constant 0 : i32
    return %c0_i32, %c0_i32_0 : i32, i32
  }
  func.func @transform_21(%arg0: i32) -> (i32, i32) {
    %c0_i32 = arith.constant 0 : i32
    %c0_i32_0 = arith.constant 0 : i32
    %c0_i32_1 = arith.constant 0 : i32
    return %c0_i32, %c0_i32_0 : i32, i32
  }
  func.func @transform_22(%arg0: i32) -> (i32, i32) {
    %c0_i32 = arith.constant 0 : i32
    %c0_i32_0 = arith.constant 0 : i32
    return %arg0, %c0_i32 : i32, i32
  }
}

</mosaic_0001>

<bundles_post_ra>
// kernel: tpu_custom_call.1
= control target key start
LH: loop header
LB: loop body
LE: loop exit
PB: predicated region body
PF: predicated region fallthrough
CT: control target
= control target key end

     0   :  { %s8100_s0 = inlined_call_operand.vmem [shape: s32[8,16,1], index: 0, kind: input, shape index: {}]   ;;  %s8101_s1 = inlined_call_operand.vmem [shape: s32[16,1], index: 1, kind: input, shape index: {}]   ;;  %s8102_s2 = inlined_call_operand.vmem [shape: bf16[128,128], index: 2, kind: input, shape index: {}]   ;;  %s8103_s3 = inlined_call_operand.hbm [shape: bf16[32,128], index: 3, kind: input, shape index: {}]   ;;  %s8104_s4 = inlined_call_operand.hbm [shape: f32[1,128], index: 4, kind: input, shape index: {}]   ;;  %s8105_s5 = inlined_call_operand.hbm [shape: f32[1,128], index: 5, kind: input, shape index: {}]   ;;  %s8106_s6 = inlined_call_operand.vmem [shape: bf16[128,128], index: 6, kind: input, shape index: {}]   ;;  %s8107_s7 = inlined_call_operand.hbm [shape: bf16[32,128], index: 7, kind: input, shape index: {}]   ;;  %s8108_s8 = inlined_call_operand.hbm [shape: f32[1,128], index: 8, kind: input, shape index: {}]   ;;  %s8109_s9 = inlined_call_operand.hbm [shape: f32[1,128], index: 9, kind: input, shape index: {}]   ;;  %s8110_s10 = inlined_call_operand.vmem [shape: bf16[64,128], index: 10, kind: input, shape index: {}]   ;;  %s8111_s11 = inlined_call_operand.hbm [shape: bf16[32,128], index: 11, kind: input, shape index: {}]   ;;  %s8112_s12 = inlined_call_operand.vmem [shape: f32[1,128], index: 12, kind: input, shape index: {}]   ;;  %s8113_s13 = inlined_call_operand.vmem [shape: f32[1,128], index: 13, kind: input, shape index: {}]   ;;  %s8114_s14 = inlined_call_operand.hbm [shape: bf16[64,128], index: 14, kind: input, shape index: {}]   ;;  %s8115_s15 = inlined_call_operand.hbm [shape: bf16[32,128], index: 15, kind: input, shape index: {}]   ;;  %s8116_s16 = inlined_call_operand.vmem [shape: f32[1,128], index: 16, kind: input, shape index: {}]   ;;  %s8117_s17 = inlined_call_operand.vmem [shape: f32[1,128], index: 17, kind: input, shape index: {}]   ;;  %s8118_s18 = inlined_call_operand.hbm [shape: bf16[2,32,32], index: 18, kind: input, shape index: {}]   ;;  %s8119_s19 = inlined_call_operand.vmem [shape: f32[1,32], index: 19, kind: input, shape index: {}]   ;;  %s8120_s20 = inlined_call_operand.hbm [shape: bf16[32,128], index: 20, kind: input, shape index: {}]   ;;  %s8121_s21 = inlined_call_operand.vmem [shape: f32[1,128], index: 21, kind: input, shape index: {}]   ;;  %s8122_s22 = inlined_call_operand.hbm [shape: f32[16,128], index: 22, kind: output, shape index: {}]  }
   0x1   :  { %8160 = sst [smem:[#allocation41_spill]] %s8100_s0 }
   0x2   :  { %8161 = sst [smem:[#allocation42_spill]] %s8101_s1 }
   0x3   :  { %8162 = sst [smem:[#allocation43_spill]] %s8102_s2 }
   0x4   :  { %8163 = sst [smem:[#allocation44_spill]] %s8103_s3 }
   0x5   :  { %8164 = sst [smem:[#allocation45_spill]] %s8104_s4 }
   0x6   :  { %8165 = sst [smem:[#allocation46_spill]] %s8105_s5 }
   0x7   :  { %8166 = sst [smem:[#allocation47_spill]] %s8106_s6 }
   0x8   :  { %27 = vsyncpa [#allocation5], 0 }
   0x9   :  { %28 = vsyncpa [#allocation8], 0 }
   0xa   :  { %29 = vsyncpa [#allocation11], 0 }
   0xb   :  { %30 = vsyncpa [#allocation14], 0 }
   0xc   :  { %31 = vsyncpa [#allocation17], 0 }
   0xd   :  { %32 = vsyncpa [#allocation20], 0  ;;  %s8167_s29 = sld [smem:[#allocation45_spill]] }
  0x13   :  { %s58_s30 = sshll.u32 %s8167_s29, 4  ;;  %s59_s30 = int_to_ptr.hbm [resolvable:$true] %s58_s30 }
  0x14   :  { %33 = vsyncpa [#allocation6], 0  ;;  %s6284_s4 = smov [#allocation7]   ;;  %s81_s5 = sshll.u32 %s8107_s7, 4  ;;  %s82_s5 = int_to_ptr.hbm [resolvable:$true] %s81_s5 }
  0x15   :  { %s60_s0 = sshll.u32 %s6284_s4, 4  ;;  %s6285_s24 = smov [#allocation10]   ;;  %s61_s0 = int_to_ptr.vmem [resolvable:$true] %s60_s0 }
  0x16   :  { %63 = dma.hbm_to_vmem [thread:$0]  %s59_s30, 16, %s61_s0, [#allocation8]  }
  0x17   :  { %s83_s6 = sshll.u32 %s6285_s24, 4  ;;  %s106_s2 = sshll.u32 %s8109_s9, 4  ;;  %s84_s6 = int_to_ptr.vmem [resolvable:$true] %s83_s6  ;;  %s107_s2 = int_to_ptr.hbm [resolvable:$true] %s106_s2 }
  0x18   :  { %s6286_s27 = smov 64   ;;  %s6287_s3 = smov 4  }
  0x19   :  { %89 = dma.hbm_to_vmem [thread:$0]  %s82_s5, 256, %s84_s6, [#allocation11], %s6286_s27, %s6286_s27, %s6287_s3  }
  0x1a   :  { %s135_s30 = sshll.u32 %s8114_s14, 4  ;;  %s6288_s7 = smov [#allocation13]   ;;  %s136_s30 = int_to_ptr.hbm [resolvable:$true] %s135_s30 }
  0x1b   :  { %s108_s4 = sshll.u32 %s6288_s7, 4  ;;  %s6289_s0 = smov [#allocation16]   ;;  %s109_s4 = int_to_ptr.vmem [resolvable:$true] %s108_s4 }
  0x1c   :  { %111 = dma.hbm_to_vmem [thread:$0]  %s107_s2, 16, %s109_s4, [#allocation14]  }
  0x1d   :  { %s137_s23 = sshll.u32 %s6289_s0, 4  ;;  %s165_s24 = sshll.u32 %s8118_s18, 4  ;;  %s138_s23 = int_to_ptr.vmem [resolvable:$true] %s137_s23  ;;  %s166_s24 = int_to_ptr.hbm [resolvable:$true] %s165_s24 }
  0x1e   :  { %143 = dma.hbm_to_vmem [thread:$0]  %s136_s30, 512, %s138_s23, [#allocation17], %s6286_s27, %s6286_s27, %s6287_s3  }
  0x1f   :  { %s8168_s14 = sld [smem:[#allocation44_spill]]  ;;  %s6290_s26 = smov [#allocation19]  }
  0x20   :  { %s167_s28 = sshll.u32 %s6290_s26, 4  ;;  %s6291_s2 = smov [#allocation4]   ;;  %s168_s28 = int_to_ptr.vmem [resolvable:$true] %s167_s28 }
  0x21   :  { %173 = dma.hbm_to_vmem [thread:$0]  %s166_s24, 512, %s168_s28, [#allocation20], %s6286_s27, %s6286_s27, %s6287_s3  }
  0x22   :  { %s46_s18 = sshll.u32 %s6291_s2, 4  ;;  %s8169_s4 = sld [smem:[#allocation46_spill]]  ;;  %s47_s18 = int_to_ptr.vmem [resolvable:$true] %s46_s18 }
  0x23   :  { %s95_s9 = sshll.u32 %s8108_s8, 4  ;;  %s6292_s1 = smov [#allocation9]   ;;  %s96_s9 = int_to_ptr.hbm [resolvable:$true] %s95_s9 }
  0x24   :  { %s71_s5 = sshll.u32 %s6292_s1, 4  ;;  %s6293_s24 = smov [#allocation12]   ;;  %s72_s5 = int_to_ptr.vmem [resolvable:$true] %s71_s5 }
  0x25   :  { %s44_s25 = sshll.u32 %s8168_s14, 4  ;;  %s97_s6 = sshll.u32 %s6293_s24, 4  ;;  %s45_s25 = int_to_ptr.hbm [resolvable:$true] %s44_s25  ;;  %s98_s6 = int_to_ptr.vmem [resolvable:$true] %s97_s6 }
  0x26   :  { %52 = dma.hbm_to_vmem [thread:$0]  %s45_s25, 256, %s47_s18, [#allocation5], %s6286_s27, %s6286_s27, %s6287_s3  }
  0x27   :  { %s118_s28 = sshll.u32 %s8111_s11, 4  ;;  %s148_s18 = sshll.u32 %s8115_s15, 4  ;;  %s119_s28 = int_to_ptr.hbm [resolvable:$true] %s118_s28  ;;  %s149_s18 = int_to_ptr.hbm [resolvable:$true] %s148_s18 }
  0x28   :  { %s69_s0 = sshll.u32 %s8169_s4, 4  ;;  %s6294_s29 = smov [#allocation15]   ;;  %s70_s0 = int_to_ptr.hbm [resolvable:$true] %s69_s0 }
  0x29   :  { %74 = dma.hbm_to_vmem [thread:$0]  %s70_s0, 16, %s72_s5, [#allocation8]  }
  0x2a   :  { %100 = dma.hbm_to_vmem [thread:$0]  %s96_s9, 16, %s98_s6, [#allocation11]  }
  0x2b   :  { %s120_s8 = sshll.u32 %s6294_s29, 4  ;;  %s6295_s7 = smov [#allocation18]   ;;  %s121_s8 = int_to_ptr.vmem [resolvable:$true] %s120_s8 }
  0x2c   :  { %126 = dma.hbm_to_vmem [thread:$0]  %s119_s28, 256, %s121_s8, [#allocation14], %s6286_s27, %s6286_s27, %s6287_s3  }
  0x2d   :  { %s150_s4 = sshll.u32 %s6295_s7, 4  ;;  %s180_s11 = sshll.u32 %s8120_s20, 4  ;;  %s151_s4 = int_to_ptr.vmem [resolvable:$true] %s150_s4  ;;  %s181_s11 = int_to_ptr.hbm [resolvable:$true] %s180_s11 }
  0x2e   :  { %156 = dma.hbm_to_vmem [thread:$0]  %s149_s18, 256, %s151_s4, [#allocation17], %s6286_s27, %s6286_s27, %s6287_s3  }
  0x2f   :  { %s6296_s15 = smov [#allocation21]  }
  0x30   :  { %s182_s23 = sshll.u32 %s6296_s15, 4  ;;  %s183_s23 = int_to_ptr.vmem [resolvable:$true] %s182_s23 }
  0x31   :  { %188 = dma.hbm_to_vmem [thread:$0]  %s181_s11, 256, %s183_s23, [#allocation20], %s6286_s27, %s6286_s27, %s6287_s3  }
  0x32   :  { %6270 = dma.done.wait [#allocation5], 256  }
  0x33   :  { %6271 = vsyncadd [#allocation5], 4294967040 }
  0x34   :  { %6272 = dma.done.wait [#allocation8], 32  }
  0x35   :  { %6273 = vsyncadd [#allocation8], 4294967264 }
  0x36   :  { %6274 = dma.done.wait [#allocation11], 272  }
  0x37   :  { %6275 = vsyncadd [#allocation11], 4294967024 }
  0x38   :  { %6276 = dma.done.wait [#allocation14], 272  }
  0x39   :  { %6277 = vsyncadd [#allocation14], 4294967024 }
  0x3a   :  { %6278 = dma.done.wait [#allocation17], 768  }
  0x3b   :  { %6279 = vsyncadd [#allocation17], 4294966528 }
  0x3c   :  { %6280 = dma.done.wait [#allocation20], 768  }
  0x3d   :  { %6281 = vsyncadd [#allocation20], 4294966528  ;;  %v8132_v0 = vmov 0   ;;  %s8170_s9 = sld [smem:[#allocation41_spill]]  ;;  %v6478_v2 = vld [vmem:[#allocation4 + $0x8] sm:$0xff]  ;;  %v6484_v4 = vld [vmem:[#allocation4] sm:$0xff]  ;;  %v252_v13 = vlaneseq }
  0x3e   :  { %5572 = vset.pattern.permute.xlu0 %v8132_v0  ;;  %5573 = vset.pattern.permute.xlu2 %v8132_v0  ;;  %s8171_s24 = sld [smem:[#allocation43_spill]]  ;;  %v6298_v16 = vmov 0.0   ;;  %v6532_v25 = vld [vmem:[#allocation9] ss:$0 sm:$0xff]  ;;  %v6539_v31 = vld [vmem:[#allocation7] ss:$0 sm:$0xff] }
  0x3f   :  { %5574 = vset.pattern.permute.xlu1 %v8132_v0  ;;  %615 = vmatpush.bf16.msra.mxu1 %v6478_v2  ;;  %v6524_v14 = vand.u32 127, %v252_v13  ;;  %s8172_s1 = sld [smem:[#allocation42_spill]]  ;;  %s6299_s26 = smov 96  }
  0x40   :  { %744 = vmatpush.bf16.msra.mxu2 %v6478_v2  ;;  %872 = vmatpush.bf16.msra.mxu3 %v6478_v2  ;;  %s8173_s2 = sld [smem:[#allocation47_spill]]  ;;  %s6300_s30 = smov [#allocation22]  }
  0x41   :  { %s4830_s23 = sshll.u32 %s8122_s22, 4  ;;  %s6301_s20 = smov 128   ;;  %s4831_s23 = int_to_ptr.hbm [resolvable:$true] %s4830_s23 }
  0x42   :  { %s6302_s3 = smov 8  }
  0x43   :  { %v236_v1 = vld [vmem:[%s8170_s9] sm:$0xff]  ;;  %v237_v6 = vld [vmem:[%s8170_s9 + $0x8] sm:$0xff]  ;;  %616 = vmatpush.bf16.msra.mxu1 %v6484_v4  ;;  %v238_v13 = vld [vmem:[%s8170_s9 + $0x10] sm:$0xff] }
  0x44   :  { %255 = vperm.xlu0 %5572, %v236_v1   ;;  %v5166_v3 = vld [vmem:[%s8171_s24 + $0x38] sm:$0xff]  ;;  %v5165_v5 = vld [vmem:[%s8171_s24 + $0x30] sm:$0xff]  ;;  %745 = vmatpush.bf16.msra.mxu2 %v6484_v4  ;;  %v5164_v7 = vld [vmem:[%s8171_s24 + $0x28] sm:$0xff] }
  0x45   :  { %508 = vmatpush.bf16.msra.mxu0 %v5166_v3  ;;  %873 = vmatpush.bf16.msra.mxu3 %v6484_v4  ;;  %v5163_v8 = vld [vmem:[%s8171_s24 + $0x20] sm:$0xff]  ;;  %v5162_v9 = vld [vmem:[%s8171_s24 + $0x18] sm:$0xff]  ;;  %v5161_v10 = vld [vmem:[%s8171_s24 + $0x10] sm:$0xff] }
  0x46   :  { %617 = vmatmul.bf16.vlgmr.msra.gmra.mxu1 %v8132_v0  ;;  %v5160_v11 = vld [vmem:[%s8171_s24 + $0x8] sm:$0xff]  ;;  %v5159_v12 = vld [vmem:[%s8171_s24] sm:$0xff] }
  0x47   :  { %1000 = vmatpush.bf16.msrb.mxu1 %v6478_v2 }
  0x48   :  { %1128 = vmatpush.bf16.msrb.mxu2 %v6478_v2 }
  0x49   :  { %509 = vmatpush.bf16.msra.mxu0 %v5165_v5  ;;  %1256 = vmatpush.bf16.msrb.mxu3 %v6478_v2 }
  0x4b   :  { %1001 = vmatpush.bf16.msrb.mxu1 %v6484_v4 }
  0x4c   :  { %258 = vperm.xlu0 %5572, %v237_v6   ;;  %1129 = vmatpush.bf16.msrb.mxu2 %v6484_v4 }
  0x4d   :  { %510 = vmatpush.bf16.msra.mxu0 %v5164_v7  ;;  %1257 = vmatpush.bf16.msrb.mxu3 %v6484_v4 }
  0x4f   :  { %1384 = vmatpush.bf16.msra.mxu1 %v6478_v2 }
  0x51   :  { %511 = vmatpush.bf16.msra.mxu0 %v5163_v8 }
  0x53   :  { %1385 = vmatpush.bf16.msra.mxu1 %v6484_v4 }
  0x55   :  { %512 = vmatpush.bf16.msra.mxu0 %v5162_v9  ;;  %v6548_v9 = vld [vmem:[%s8172_s1] sm:$0xff] }
  0x56   :  { %vm368_vm10 = vcmp.gt.s32.totalorder %v6548_v9, 0 }
  0x59   :  { %513 = vmatpush.bf16.msra.mxu0 %v5161_v10  ;;  %v701_v10 = vsel %vm368_vm10, 1, %v8132_v0 }
  0x5d   :  { %514 = vmatpush.bf16.msra.mxu0 %v5160_v11 }
  0x61   :  { %515 = vmatpush.bf16.msra.mxu0 %v5159_v12 }
  0xb6   :  { %v256_v15 = vpop.permute.xlu0 %255 }
  0xb7   :  { %vm302_vm0 = vcmp.eq.s32.totalorder %v256_v15, %v6524_v14 }
  0xb8   :  { %v4848_v17 = vsel %vm302_vm0, 1.0, %v6298_v16  ;;  %vm605_vm0 = vcmask 261120  }
  0xb9   :  { %v350_v19 = vpack.c.bf16 %v4848_v17, %v4848_v17 }
  0xbb   :  { %v428_v22 = vunpack.c.l.b16 %v350_v19  ;;  %v6558_v19 = vld [vmem:[%s8172_s1 + $0x8] sm:$0xff] }
  0xbc   :  { %vm369_vm11 = vcmp.gt.s32.totalorder %v6558_v19, 0  ;;  %vm371_vm10 = vcmp.gt.s32.totalorder %v6558_v19, 1 }
  0xbe   :  { %v259_v18 = vpop.permute.xlu0 %258 }
  0xbf   :  { %vm303_vm1 = vcmp.eq.s32.totalorder %v259_v18, %v6524_v14 }
  0xc0   :  { %v4849_v20 = vsel %vm303_vm1, 1.0, %v6298_v16 }
  0xc1   :  { %v351_v21 = vpack.c.bf16 %v4849_v20, %v4849_v20  ;;  %v702_v20 = vsel %vm369_vm11, 1, %v8132_v0 }
  0xc3   :  { %v429_v23 = vunpack.c.l.b16 %v351_v21  ;;  %v618_v26 = vpop.f32.mrf.mxu1 }
  0xc4   :  { %v619_v27 = vadd.f32 %v6532_v25, %v618_v26 }
  0xc5   :  { %v6530_v24 = vpack.c.b16 %v429_v23, %v428_v22  ;;  %v239_v22 = vld [vmem:[%s8170_s9 + $0x18] sm:$0xff] }
  0xc6   :  { %665 = vrot.lane.b32.xlu1 %v619_v27, %s6286_s27 }
  0xc7   :  { %516 = vmatmul.bf16.vlgmr.msra.gmra.mxu0 %v6530_v24 }
  0xcb   :  { %v620_v28 = vpop.f32.mrf.mxu1 }
  0xcc   :  { %v621_v29 = vadd.f32 %v6532_v25, %v620_v28 }
  0xce   :  { %667 = vrot.lane.b32.xlu1 %v621_v29, %s6286_s27 }
 0x138   :  { %v666_v55 = vpop.permute.xlu1 %665 }
 0x140   :  { %v668_v6 = vpop.permute.xlu1 %667 }
 0x144   :  { %v517_v30 = vpop.f32.mrf.mxu0 }
 0x145   :  { %v518_v33 = vadd.f32 %v6539_v31, %v517_v30 }
 0x14c   :  { %v519_v32 = vpop.f32.mrf.mxu0 }
 0x14d   :  { %v520_v34 = vadd.f32 %v6539_v31, %v519_v32 }
 0x14f   :  { %v5208_v35 = vpack.c.bf16 %v520_v34, %v518_v33 }
 0x151   :  { %v5247_v36 = vunpack.c.l.bf16 %v5208_v35  ;;  %v5248_v37 = vunpack.c.h.bf16 %v5208_v35 }
 0x153   :  { %v623_v38 = vadd.f32 %v5247_v36, %v619_v27  ;;  %v624_v39 = vadd.f32 %v5248_v37, %v621_v29 }
 0x155   :  { %v4904_v40 = vmul.f32 -1.442695, %v623_v38  ;;  %v4905_v41 = vmul.f32 -1.442695, %v624_v39 }
 0x157   :  { %5585 = vpow2.f32 %v4904_v40 }
 0x158   :  { %5587 = vpow2.f32 %v4905_v41 }
 0x15d   :  { %v5586_v42 = vpop.eup %5585 }
 0x15e   :  { %v5588_v43 = vpop.eup %5587  ;;  %v631_v44 = vadd.f32 1.0, %v5586_v42 }
 0x15f   :  { %v632_v45 = vadd.f32 1.0, %v5588_v43 }
 0x160   :  { %5589 = vrcp.f32 %v631_v44  ;;  %v644_v51 = vand.u32 2147483648, %v631_v44  ;;  %v642_v54 = vand.u32 2147483647, %v631_v44  ;;  %vm638_vm3 = vweird.f32 %v631_v44 }
 0x161   :  { %5591 = vrcp.f32 %v632_v45  ;;  %v659_v62 = vand.u32 2147483648, %v632_v45  ;;  %vm653_vm7 = vweird.f32 %v632_v45  ;;  %v657_v1 = vand.u32 2147483647, %v632_v45 }
 0x162   :  { %v645_v58 = vor.u32 1.1754944e-38, %v644_v51  ;;  %vm643_vm5 = vcmp.eq.f32.partialorder %v642_v54, 8.507059e+37 }
 0x163   :  { %v660_v5 = vor.u32 1.1754944e-38, %v659_v62  ;;  %vm658_vm9 = vcmp.eq.f32.partialorder %v657_v1, 8.507059e+37 }
 0x166   :  { %v5590_v46 = vpop.eup %5589 }
 0x167   :  { %v5592_v47 = vpop.eup %5591  ;;  %v634_v48 = vmul.f32 %v5590_v46, %v631_v44  ;;  %vm639_vm2 = vweird.f32 %v5590_v46 }
 0x168   :  { %v649_v49 = vmul.f32 %v5592_v47, %v632_v45  ;;  %vm640_vm4 = vmor %vm638_vm3, %vm639_vm2  ;;  %vm654_vm6 = vweird.f32 %v5592_v47 }
 0x169   :  { %v635_v50 = vsub.f32 1.0, %v634_v48  ;;  %vm655_vm8 = vmor %vm653_vm7, %vm654_vm6 }
 0x16a   :  { %v650_v52 = vsub.f32 1.0, %v649_v49 }
 0x16b   :  { %v636_v53 = vmul.f32 %v5590_v46, %v635_v50 }
 0x16c   :  { %v651_v56 = vmul.f32 %v5592_v47, %v650_v52 }
 0x16d   :  { %v637_v57 = vadd.f32 %v5590_v46, %v636_v53 }
 0x16e   :  { %v652_v60 = vadd.f32 %v5592_v47, %v651_v56 }
 0x16f   :  { %v641_v59 = vsel %vm640_vm4, %v5590_v46, %v637_v57 }
 0x170   :  { %v646_v61 = vsel %vm643_vm5, %v645_v58, %v641_v59  ;;  %v656_v3 = vsel %vm655_vm8, %v5592_v47, %v652_v60 }
 0x171   :  { %v671_v63 = vmul.f32 %v666_v55, %v646_v61  ;;  %v661_v7 = vsel %vm658_vm9, %v660_v5, %v656_v3  ;;  %v685_v26 = vsub.f32 1.0, %v646_v61  ;;  %v697_v29 = vmul.f32 0.0, %v646_v61 }
 0x172   :  { %v672_v8 = vmul.f32 %v668_v6, %v661_v7  ;;  %v686_v32 = vsub.f32 1.0, %v661_v7  ;;  %vm370_vm9 = vcmp.gt.s32.totalorder %v6548_v9, 1 }
 0x173   :  { %675 = vrot.lane.b32.xlu2 %v671_v63, %s6286_s27 }
 0x17b   :  { %677 = vrot.lane.b32.xlu2 %v672_v8, %s6286_s27 }
 0x183   :  { %704 = vperm.xlu2 %5573, %v701_v10  }
 0x18b   :  { %261 = vperm.xlu2 %5573, %v238_v13  }
 0x1cd   :  { %v676_v11 = vpop.permute.xlu2 %675 }
 0x1ce   :  { %v681_v12 = vadd.f32 %v5247_v36, %v676_v11 }
 0x1d0   :  { %5593 = vtanh.f32 %v681_v12 }
 0x1d5   :  { %v678_v15 = vpop.permute.xlu2 %677 }
 0x1d6   :  { %v5594_v17 = vpop.eup %5593  ;;  %v682_v18 = vadd.f32 %v5248_v37, %v678_v15  ;;  %v698_v37 = vmul.f32 0.0, %v661_v7 }
 0x1d7   :  { %689 = vrot.lane.b32.xlu0 %v5594_v17, %s6299_s26 }
 0x1d8   :  { %5595 = vtanh.f32 %v682_v18 }
 0x1dd   :  { %v6567_v23 = vpop.permute.xlu2 %704 }
 0x1de   :  { %v5596_v21 = vpop.eup %5595  ;;  %vm8128_vm12 = vcmp.eq.s32.totalorder %v6567_v23, 1 }
 0x1df   :  { %707 = vperm.xlu0 %5572, %v702_v20   ;;  %691 = vrot.lane.b32.xlu1 %v5596_v21, %s6299_s26 }
 0x1e5   :  { %v262_v33 = vpop.permute.xlu2 %261 }
 0x1e6   :  { %vm304_vm13 = vcmp.eq.s32.totalorder %v262_v33, %v6524_v14 }
 0x1e7   :  { %264 = vperm.xlu0 %5572, %v239_v22   ;;  %v4850_v42 = vsel %vm304_vm13, 1.0, %v6298_v16 }
 0x1e8   :  { %v352_v47 = vpack.c.bf16 %v4850_v42, %v4850_v42 }
 0x1ea   :  { %v430_v51 = vunpack.c.l.b16 %v352_v47 }
 0x249   :  { %v690_v27 = vpop.permute.xlu0 %689 }
 0x24a   :  { %v695_v28 = vmul.f32 %v690_v27, %v685_v26 }
 0x24c   :  { %v699_v30 = vadd.f32 %v697_v29, %v695_v28 }
 0x24e   :  { %v6574_v36 = vsel %vm8128_vm12, %v699_v30, 0.0 }
 0x24f   :  { %v6580_v40 = vpack.c.bf16 %v6574_v36, %v6574_v36 }
 0x251   :  { %v6570_v34 = vpop.permute.xlu0 %707  ;;  %v692_v35 = vpop.permute.xlu1 %691  ;;  %v730_v45 = vunpack.c.l.b16 %v6580_v40 }
 0x252   :  { %v696_v38 = vmul.f32 %v692_v35, %v686_v32  ;;  %vm8127_vm14 = vcmp.eq.s32.totalorder %v6570_v34, 1 }
 0x254   :  { %v700_v39 = vadd.f32 %v698_v37, %v696_v38 }
 0x256   :  { %v6584_v41 = vsel %vm8127_vm14, %v700_v39, 0.0 }
 0x257   :  { %v6589_v43 = vpack.c.bf16 %v6584_v41, %v6584_v41 }
 0x259   :  { %v265_v44 = vpop.permute.xlu0 %264  ;;  %v731_v46 = vunpack.c.l.b16 %v6589_v43 }
 0x25a   :  { %vm305_vm15 = vcmp.eq.s32.totalorder %v265_v44, %v6524_v14 }
 0x25b   :  { %v4851_v48 = vsel %vm305_vm15, 1.0, %v6298_v16  ;;  %v732_v49 = vpack.c.b16 %v731_v46, %v730_v45 }
 0x25c   :  { %v353_v50 = vpack.c.bf16 %v4851_v48, %v4851_v48  ;;  %v830_v48 = vsel %vm370_vm9, 1, %v8132_v0 }
 0x25d   :  { %733 = vrot.lane.b32.xlu1 %v732_v49, %s6299_s26  ;;  %v240_v49 = vld [vmem:[%s8170_s9 + $0x20] sm:$0xff] }
 0x25e   :  { %v431_v52 = vunpack.c.l.b16 %v353_v50 }
 0x260   :  { %v6596_v53 = vpack.c.b16 %v431_v52, %v430_v51 }
 0x262   :  { %521 = vmatmul.bf16.gmra.mxu0 %v6596_v53 }
 0x2cf   :  { %v734_v54 = vpop.permute.xlu1 %733 }
 0x2d0   :  { %4906 = vmatmul.msk.bf16.vlgmr.msra.gmra.mxu2 %vm605_vm0, %v734_v54 }
 0x2d1   :  { %1512 = vmatpush.bf16.msra.mxu2 %v6478_v2 }
 0x2d5   :  { %1513 = vmatpush.bf16.msra.mxu2 %v6484_v4 }
 0x2df   :  { %v522_v59 = vpop.f32.mrf.mxu0 }
 0x2e0   :  { %v523_v62 = vadd.f32 %v6539_v31, %v522_v59 }
 0x2e7   :  { %v524_v60 = vpop.f32.mrf.mxu0 }
 0x2e8   :  { %v525_v61 = vadd.f32 %v6539_v31, %v524_v60 }
 0x2ea   :  { %v5213_v63 = vpack.c.bf16 %v525_v61, %v523_v62 }
 0x2ec   :  { %v5252_v2 = vunpack.c.h.bf16 %v5213_v63  ;;  %v5251_v5 = vunpack.c.l.bf16 %v5213_v63 }
 0x353   :  { %v747_v55 = vpop.f32.mrf.mxu2 }
 0x354   :  { %v748_v56 = vadd.f32 %v6532_v25, %v747_v55 }
 0x356   :  { %794 = vrot.lane.b32.xlu1 %v748_v56, %s6286_s27  ;;  %v752_v6 = vadd.f32 %v5251_v5, %v748_v56 }
 0x358   :  { %v4907_v8 = vmul.f32 -1.442695, %v752_v6 }
 0x35b   :  { %v749_v57 = vpop.f32.mrf.mxu2 }
 0x35c   :  { %v750_v58 = vadd.f32 %v6532_v25, %v749_v57  ;;  %v831_v57 = vsel %vm371_vm10, 1, %v8132_v0  ;;  %vm372_vm10 = vcmp.gt.s32.totalorder %v6548_v9, 2 }
 0x35e   :  { %796 = vrot.lane.b32.xlu2 %v750_v58, %s6286_s27  ;;  %v753_v1 = vadd.f32 %v5252_v2, %v750_v58  ;;  %v241_v58 = vld [vmem:[%s8170_s9 + $0x28] sm:$0xff] }
 0x360   :  { %v4908_v4 = vmul.f32 -1.442695, %v753_v1 }
 0x362   :  { %5597 = vpow2.f32 %v4908_v4 }
 0x368   :  { %v5598_v3 = vpop.eup %5597 }
 0x369   :  { %v761_v7 = vadd.f32 1.0, %v5598_v3 }
 0x36b   :  { %5599 = vrcp.f32 %v761_v7  ;;  %v788_v21 = vand.u32 2147483648, %v761_v7  ;;  %vm782_vm2 = vweird.f32 %v761_v7  ;;  %v786_v22 = vand.u32 2147483647, %v761_v7 }
 0x36c   :  { %5601 = vpow2.f32 %v4907_v8 }
 0x36d   :  { %v789_v28 = vor.u32 1.1754944e-38, %v788_v21  ;;  %vm787_vm4 = vcmp.eq.f32.partialorder %v786_v22, 8.507059e+37 }
 0x371   :  { %v5600_v10 = vpop.eup %5599 }
 0x372   :  { %v5602_v11 = vpop.eup %5601  ;;  %v778_v12 = vmul.f32 %v5600_v10, %v761_v7  ;;  %vm783_vm1 = vweird.f32 %v5600_v10 }
 0x373   :  { %v760_v13 = vadd.f32 1.0, %v5602_v11  ;;  %vm784_vm3 = vmor %vm782_vm2, %vm783_vm1 }
 0x374   :  { %v779_v15 = vsub.f32 1.0, %v778_v12 }
 0x375   :  { %5603 = vrcp.f32 %v760_v13  ;;  %v773_v38 = vand.u32 2147483648, %v760_v13  ;;  %vm767_vm6 = vweird.f32 %v760_v13  ;;  %v771_v39 = vand.u32 2147483647, %v760_v13 }
 0x376   :  { %v780_v17 = vmul.f32 %v5600_v10, %v779_v15 }
 0x377   :  { %v774_v44 = vor.u32 1.1754944e-38, %v773_v38  ;;  %vm772_vm8 = vcmp.eq.f32.partialorder %v771_v39, 8.507059e+37 }
 0x378   :  { %v781_v18 = vadd.f32 %v5600_v10, %v780_v17 }
 0x37a   :  { %v785_v26 = vsel %vm784_vm3, %v5600_v10, %v781_v18 }
 0x37b   :  { %v5604_v20 = vpop.eup %5603  ;;  %v790_v30 = vsel %vm787_vm4, %v789_v28, %v785_v26 }
 0x37c   :  { %v763_v27 = vmul.f32 %v5604_v20, %v760_v13  ;;  %vm768_vm5 = vweird.f32 %v5604_v20  ;;  %v815_v1 = vsub.f32 1.0, %v790_v30  ;;  %v827_v7 = vmul.f32 %v790_v30, %v6584_v41 }
 0x37d   :  { %vm769_vm7 = vmor %vm767_vm6, %vm768_vm5 }
 0x37e   :  { %v764_v33 = vsub.f32 1.0, %v763_v27 }
 0x380   :  { %v765_v35 = vmul.f32 %v5604_v20, %v764_v33 }
 0x382   :  { %v766_v37 = vadd.f32 %v5604_v20, %v765_v35 }
 0x384   :  { %v770_v42 = vsel %vm769_vm7, %v5604_v20, %v766_v37 }
 0x385   :  { %v775_v46 = vsel %vm772_vm8, %v774_v44, %v770_v42 }
 0x386   :  { %v814_v60 = vsub.f32 1.0, %v775_v46  ;;  %v826_v63 = vmul.f32 %v775_v46, %v6574_v36 }
 0x3b8   :  { %v797_v29 = vpop.permute.xlu2 %796 }
 0x3b9   :  { %v801_v32 = vmul.f32 %v797_v29, %v790_v30 }
 0x3bb   :  { %806 = vrot.lane.b32.xlu1 %v801_v32, %s6286_s27 }
 0x3c3   :  { %833 = vperm.xlu1 %5574, %v830_v48  }
 0x3c8   :  { %v795_v45 = vpop.permute.xlu1 %794 }
 0x3c9   :  { %v800_v47 = vmul.f32 %v795_v45, %v775_v46 }
 0x3cb   :  { %804 = vrot.lane.b32.xlu0 %v800_v47, %s6286_s27  ;;  %267 = vperm.xlu1 %5574, %v240_v49  }
 0x42d   :  { %v807_v50 = vpop.permute.xlu1 %806 }
 0x42e   :  { %v811_v51 = vadd.f32 %v5252_v2, %v807_v50 }
 0x430   :  { %5605 = vtanh.f32 %v811_v51 }
 0x435   :  { %v6622_v59 = vpop.permute.xlu1 %833 }
 0x436   :  { %v5606_v52 = vpop.eup %5605  ;;  %vm8138_vm11 = vcmp.eq.s32.totalorder %v6622_v59, 1 }
 0x437   :  { %820 = vrot.lane.b32.xlu0 %v5606_v52, %s6299_s26 }
 0x43d   :  { %v805_v54 = vpop.permute.xlu0 %804  ;;  %v268_v4 = vpop.permute.xlu1 %267 }
 0x43e   :  { %v810_v55 = vadd.f32 %v5251_v5, %v805_v54  ;;  %vm306_vm13 = vcmp.eq.s32.totalorder %v268_v4, %v6524_v14 }
 0x440   :  { %5607 = vtanh.f32 %v810_v55 }
 0x446   :  { %v5608_v56 = vpop.eup %5607 }
 0x447   :  { %818 = vrot.lane.b32.xlu2 %v5608_v56, %s6299_s26 }
 0x44f   :  { %836 = vperm.xlu2 %5573, %v831_v57  }
 0x457   :  { %270 = vperm.xlu2 %5573, %v241_v58  }
 0x4a1   :  { %v819_v61 = vpop.permute.xlu2 %818 }
 0x4a2   :  { %v824_v62 = vmul.f32 %v819_v61, %v814_v60 }
 0x4a4   :  { %v828_v2 = vadd.f32 %v826_v63, %v824_v62 }
 0x4a6   :  { %v6631_v6 = vsel %vm8138_vm11, %v828_v2, %v6574_v36  ;;  %v4852_v36 = vsel %vm306_vm13, 1.0, %v6298_v16  ;;  %vm373_vm13 = vcmp.gt.s32.totalorder %v6558_v19, 2 }
 0x4a7   :  { %v6638_v11 = vpack.c.bf16 %v6631_v6, %v6631_v6  ;;  %v354_v20 = vpack.c.bf16 %v4852_v36, %v4852_v36 }
 0x4a9   :  { %v821_v3 = vpop.permute.xlu0 %820  ;;  %v6626_v5 = vpop.permute.xlu2 %836  ;;  %v858_v17 = vunpack.c.l.b16 %v6638_v11 }
 0x4aa   :  { %v825_v8 = vmul.f32 %v821_v3, %v815_v1  ;;  %vm8129_vm15 = vcmp.eq.s32.totalorder %v6626_v5, 1 }
 0x4ac   :  { %v829_v10 = vadd.f32 %v827_v7, %v825_v8 }
 0x4ae   :  { %v6643_v12 = vsel %vm8129_vm15, %v829_v10, %v6584_v41  ;;  %v432_v41 = vunpack.c.l.b16 %v354_v20 }
 0x4af   :  { %v6648_v13 = vpack.c.bf16 %v6643_v12, %v6643_v12 }
 0x4b1   :  { %v271_v15 = vpop.permute.xlu2 %270  ;;  %v859_v18 = vunpack.c.l.b16 %v6648_v13 }
 0x4b2   :  { %vm307_vm1 = vcmp.eq.s32.totalorder %v271_v15, %v6524_v14 }
 0x4b3   :  { %v4853_v21 = vsel %vm307_vm1, 1.0, %v6298_v16  ;;  %v860_v22 = vpack.c.b16 %v859_v18, %v858_v17 }
 0x4b4   :  { %v355_v26 = vpack.c.bf16 %v4853_v21, %v4853_v21 }
 0x4b5   :  { %861 = vrot.lane.b32.xlu0 %v860_v22, %s6299_s26 }
 0x4b6   :  { %v433_v27 = vunpack.c.l.b16 %v355_v26 }
 0x4b8   :  { %v6655_v28 = vpack.c.b16 %v433_v27, %v432_v41 }
 0x4ba   :  { %526 = vmatmul.bf16.gmra.mxu0 %v6655_v28 }
 0x527   :  { %v862_v29 = vpop.permute.xlu0 %861 }
 0x528   :  { %4909 = vmatmul.msk.bf16.vlgmr.msra.gmra.mxu3 %vm605_vm0, %v862_v29  ;;  %v958_v29 = vsel %vm372_vm10, 1, %v8132_v0 }
 0x537   :  { %v527_v37 = vpop.f32.mrf.mxu0 }
 0x538   :  { %v528_v42 = vadd.f32 %v6539_v31, %v527_v37  ;;  %v959_v37 = vsel %vm373_vm13, 1, %v8132_v0 }
 0x53f   :  { %v529_v38 = vpop.f32.mrf.mxu0 }
 0x540   :  { %v530_v39 = vadd.f32 %v6539_v31, %v529_v38 }
 0x542   :  { %v6665_v44 = vpack.c.bf16 %v530_v39, %v528_v42 }
 0x544   :  { %v5255_v45 = vunpack.c.l.bf16 %v6665_v44  ;;  %v5256_v48 = vunpack.c.h.bf16 %v6665_v44  ;;  %v242_v44 = vld [vmem:[%s8170_s9 + $0x30] sm:$0xff] }
 0x5ab   :  { %v875_v30 = vpop.f32.mrf.mxu3 }
 0x5ac   :  { %v876_v32 = vadd.f32 %v6532_v25, %v875_v30  ;;  %v243_v30 = vld [vmem:[%s8170_s9 + $0x38] sm:$0xff] }
 0x5ae   :  { %922 = vrot.lane.b32.xlu0 %v876_v32, %s6286_s27  ;;  %v880_v46 = vadd.f32 %v5255_v45, %v876_v32 }
 0x5b0   :  { %v4910_v47 = vmul.f32 -1.442695, %v880_v46 }
 0x5b2   :  { %5609 = vpow2.f32 %v4910_v47 }
 0x5b3   :  { %v877_v33 = vpop.f32.mrf.mxu3 }
 0x5b4   :  { %v878_v35 = vadd.f32 %v6532_v25, %v877_v33 }
 0x5b6   :  { %924 = vrot.lane.b32.xlu1 %v878_v35, %s6286_s27  ;;  %v881_v49 = vadd.f32 %v5256_v48, %v878_v35 }
 0x5b8   :  { %v4911_v50 = vmul.f32 -1.442695, %v881_v49  ;;  %v5610_v51 = vpop.eup %5609 }
 0x5b9   :  { %v888_v52 = vadd.f32 1.0, %v5610_v51 }
 0x5ba   :  { %5611 = vpow2.f32 %v4911_v50 }
 0x5bb   :  { %5613 = vrcp.f32 %v888_v52  ;;  %v901_v1 = vand.u32 2147483648, %v888_v52  ;;  %vm895_vm3 = vweird.f32 %v888_v52  ;;  %v899_v4 = vand.u32 2147483647, %v888_v52 }
 0x5bd   :  { %v902_v8 = vor.u32 1.1754944e-38, %v901_v1  ;;  %vm900_vm5 = vcmp.eq.f32.partialorder %v899_v4, 8.507059e+37 }
 0x5c0   :  { %v5612_v54 = vpop.eup %5611 }
 0x5c1   :  { %v889_v55 = vadd.f32 1.0, %v5612_v54  ;;  %v5614_v56 = vpop.eup %5613 }
 0x5c2   :  { %v891_v57 = vmul.f32 %v5614_v56, %v888_v52  ;;  %vm896_vm2 = vweird.f32 %v5614_v56 }
 0x5c3   :  { %5615 = vrcp.f32 %v889_v55  ;;  %vm897_vm4 = vmor %vm895_vm3, %vm896_vm2  ;;  %v916_v18 = vand.u32 2147483648, %v889_v55  ;;  %vm910_vm7 = vweird.f32 %v889_v55  ;;  %v914_v20 = vand.u32 2147483647, %v889_v55 }
 0x5c4   :  { %v892_v58 = vsub.f32 1.0, %v891_v57 }
 0x5c5   :  { %v917_v22 = vor.u32 1.1754944e-38, %v916_v18  ;;  %vm915_vm9 = vcmp.eq.f32.partialorder %v914_v20, 8.507059e+37 }
 0x5c6   :  { %v893_v61 = vmul.f32 %v5614_v56, %v892_v58 }
 0x5c8   :  { %v894_v63 = vadd.f32 %v5614_v56, %v893_v61 }
 0x5c9   :  { %v5616_v60 = vpop.eup %5615 }
 0x5ca   :  { %v906_v62 = vmul.f32 %v5616_v60, %v889_v55  ;;  %v898_v3 = vsel %vm897_vm4, %v5614_v56, %v894_v63  ;;  %vm911_vm6 = vweird.f32 %v5616_v60 }
 0x5cb   :  { %v903_v36 = vsel %vm900_vm5, %v902_v8, %v898_v3  ;;  %vm912_vm8 = vmor %vm910_vm7, %vm911_vm6 }
 0x5cc   :  { %v907_v2 = vsub.f32 1.0, %v906_v62  ;;  %v942_v46 = vsub.f32 1.0, %v903_v36  ;;  %v954_v50 = vmul.f32 %v903_v36, %v6631_v6 }
 0x5ce   :  { %v908_v7 = vmul.f32 %v5616_v60, %v907_v2 }
 0x5d0   :  { %v909_v17 = vadd.f32 %v5616_v60, %v908_v7 }
 0x5d2   :  { %v913_v21 = vsel %vm912_vm8, %v5616_v60, %v909_v17 }
 0x5d3   :  { %v918_v41 = vsel %vm915_vm9, %v917_v22, %v913_v21 }
 0x5d4   :  { %v943_v52 = vsub.f32 1.0, %v918_v41  ;;  %v955_v57 = vmul.f32 %v918_v41, %v6643_v12 }
 0x620   :  { %v923_v10 = vpop.permute.xlu0 %922 }
 0x621   :  { %v928_v15 = vmul.f32 %v923_v10, %v903_v36 }
 0x623   :  { %932 = vrot.lane.b32.xlu2 %v928_v15, %s6286_s27 }
 0x628   :  { %v925_v26 = vpop.permute.xlu1 %924 }
 0x629   :  { %v929_v27 = vmul.f32 %v925_v26, %v918_v41 }
 0x62b   :  { %934 = vrot.lane.b32.xlu0 %v929_v27, %s6286_s27 }
 0x633   :  { %961 = vperm.xlu0 %5572, %v958_v29  }
 0x63b   :  { %276 = vperm.xlu0 %5572, %v243_v30  }
 0x67d   :  { %v933_v32 = vpop.permute.xlu2 %932 }
 0x67e   :  { %v938_v33 = vadd.f32 %v5255_v45, %v933_v32 }
 0x680   :  { %5617 = vtanh.f32 %v938_v33 }
 0x686   :  { %v5618_v35 = vpop.eup %5617 }
 0x687   :  { %946 = vrot.lane.b32.xlu1 %v5618_v35, %s6299_s26 }
 0x68f   :  { %964 = vperm.xlu1 %5574, %v959_v37  }
 0x69d   :  { %v935_v38 = vpop.permute.xlu0 %934 }
 0x69e   :  { %v939_v39 = vadd.f32 %v5256_v48, %v935_v38 }
 0x6a0   :  { %5619 = vtanh.f32 %v939_v39 }
 0x6a5   :  { %v6683_v45 = vpop.permute.xlu0 %961 }
 0x6a6   :  { %v5620_v42 = vpop.eup %5619  ;;  %vm8152_vm1 = vcmp.eq.s32.totalorder %v6683_v45, 1 }
 0x6a7   :  { %948 = vrot.lane.b32.xlu2 %v5620_v42, %s6299_s26 }
 0x6ad   :  { %v277_v48 = vpop.permute.xlu0 %276 }
 0x6ae   :  { %vm309_vm2 = vcmp.eq.s32.totalorder %v277_v48, %v6524_v14 }
 0x6af   :  { %273 = vperm.xlu2 %5573, %v242_v44  }
 0x6f9   :  { %v947_v47 = vpop.permute.xlu1 %946 }
 0x6fa   :  { %v952_v49 = vmul.f32 %v947_v47, %v942_v46 }
 0x6fc   :  { %v956_v51 = vadd.f32 %v954_v50, %v952_v49 }
 0x6fe   :  { %v6690_v55 = vsel %vm8152_vm1, %v956_v51, %v6631_v6  ;;  %v4855_v6 = vsel %vm309_vm2, 1.0, %v6298_v16 }
 0x6ff   :  { %v6699_v61 = vpack.c.bf16 %v6690_v55, %v6690_v55  ;;  %v357_v3 = vpack.c.bf16 %v4855_v6, %v4855_v6 }
 0x701   :  { %v949_v54 = vpop.permute.xlu2 %948  ;;  %v6692_v56 = vpop.permute.xlu1 %964  ;;  %v986_v1 = vunpack.c.l.b16 %v6699_v61  ;;  %v435_v36 = vunpack.c.l.b16 %v357_v3 }
 0x702   :  { %v953_v58 = vmul.f32 %v949_v54, %v943_v52  ;;  %vm8151_vm3 = vcmp.eq.s32.totalorder %v6692_v56, 1 }
 0x704   :  { %v957_v60 = vadd.f32 %v955_v57, %v953_v58 }
 0x706   :  { %v6704_v62 = vsel %vm8151_vm3, %v957_v60, %v6643_v12 }
 0x707   :  { %v6709_v63 = vpack.c.bf16 %v6704_v62, %v6704_v62 }
 0x709   :  { %v274_v2 = vpop.permute.xlu2 %273  ;;  %v987_v4 = vunpack.c.l.b16 %v6709_v63 }
 0x70a   :  { %vm308_vm4 = vcmp.eq.s32.totalorder %v274_v2, %v6524_v14 }
 0x70b   :  { %v4854_v7 = vsel %vm308_vm4, 1.0, %v6298_v16  ;;  %v988_v8 = vpack.c.b16 %v987_v4, %v986_v1  ;;  %vm374_vm4 = vcmp.gt.s32.totalorder %v6548_v9, 3 }
 0x70c   :  { %v356_v10 = vpack.c.bf16 %v4854_v7, %v4854_v7 }
 0x70d   :  { %989 = vrot.lane.b32.xlu1 %v988_v8, %s6299_s26 }
 0x70e   :  { %v434_v12 = vunpack.c.l.b16 %v356_v10 }
 0x710   :  { %v6716_v15 = vpack.c.b16 %v435_v36, %v434_v12 }
 0x712   :  { %531 = vmatmul.bf16.gmra.mxu0 %v6716_v15 }
 0x77f   :  { %v990_v17 = vpop.permute.xlu1 %989 }
 0x780   :  { %4912 = vmatmul.msk.bf16.vlgmr.msrb.gmra.mxu1 %vm605_vm0, %v990_v17 }
 0x78f   :  { %v532_v26 = vpop.f32.mrf.mxu0 }
 0x790   :  { %v533_v29 = vadd.f32 %v6539_v31, %v532_v26  ;;  %v1086_v26 = vsel %vm374_vm4, 1, %v8132_v0 }
 0x797   :  { %v534_v41 = vpop.f32.mrf.mxu0 }
 0x798   :  { %v535_v27 = vadd.f32 %v6539_v31, %v534_v41  ;;  %v244_v41 = vld [vmem:[%s8170_s9 + $0x40] sm:$0xff] }
 0x79a   :  { %v5223_v30 = vpack.c.bf16 %v535_v27, %v533_v29 }
 0x79c   :  { %v5259_v32 = vunpack.c.l.bf16 %v5223_v30  ;;  %v5260_v42 = vunpack.c.h.bf16 %v5223_v30 }
 0x7fd   :  { %v1003_v18 = vpop.f32.mrf.mxu1 }
 0x7fe   :  { %v1004_v20 = vadd.f32 %v6532_v25, %v1003_v18 }
 0x800   :  { %1050 = vrot.lane.b32.xlu2 %v1004_v20, %s6286_s27  ;;  %v1008_v33 = vadd.f32 %v5259_v32, %v1004_v20 }
 0x802   :  { %v4913_v35 = vmul.f32 -1.442695, %v1008_v33 }
 0x804   :  { %5621 = vpow2.f32 %v4913_v35 }
 0x805   :  { %v1005_v21 = vpop.f32.mrf.mxu1 }
 0x806   :  { %v1006_v22 = vadd.f32 %v6532_v25, %v1005_v21 }
 0x808   :  { %1052 = vrot.lane.b32.xlu0 %v1006_v22, %s6286_s27  ;;  %v1009_v46 = vadd.f32 %v5260_v42, %v1006_v22 }
 0x80a   :  { %v5622_v37 = vpop.eup %5621  ;;  %v4914_v49 = vmul.f32 -1.442695, %v1009_v46 }
 0x80b   :  { %v1016_v38 = vadd.f32 1.0, %v5622_v37 }
 0x80d   :  { %5623 = vrcp.f32 %v1016_v38  ;;  %v1029_v52 = vand.u32 2147483648, %v1016_v38  ;;  %vm1023_vm6 = vweird.f32 %v1016_v38  ;;  %v1027_v48 = vand.u32 2147483647, %v1016_v38 }
 0x80e   :  { %5625 = vpow2.f32 %v4914_v49 }
 0x80f   :  { %v1030_v58 = vor.u32 1.1754944e-38, %v1029_v52  ;;  %vm1028_vm8 = vcmp.eq.f32.partialorder %v1027_v48, 8.507059e+37 }
 0x813   :  { %v5624_v39 = vpop.eup %5623 }
 0x814   :  { %v1019_v44 = vmul.f32 %v5624_v39, %v1016_v38  ;;  %vm1024_vm5 = vweird.f32 %v5624_v39  ;;  %v5626_v54 = vpop.eup %5625 }
 0x815   :  { %vm1025_vm7 = vmor %vm1023_vm6, %vm1024_vm5  ;;  %v1017_v60 = vadd.f32 1.0, %v5626_v54  ;;  %vm375_vm5 = vcmp.gt.s32.totalorder %v6558_v19, 3 }
 0x816   :  { %v1020_v47 = vsub.f32 1.0, %v1019_v44  ;;  %v1087_v37 = vsel %vm375_vm5, 1, %v8132_v0  ;;  %vm376_vm5 = vcmp.gt.s32.totalorder %v6548_v9, 4 }
 0x817   :  { %5627 = vrcp.f32 %v1017_v60  ;;  %v1044_v12 = vand.u32 2147483648, %v1017_v60  ;;  %vm1038_vm10 = vweird.f32 %v1017_v60  ;;  %v1042_v36 = vand.u32 2147483647, %v1017_v60 }
 0x818   :  { %v1021_v50 = vmul.f32 %v5624_v39, %v1020_v47 }
 0x819   :  { %v1045_v18 = vor.u32 1.1754944e-38, %v1044_v12  ;;  %vm1043_vm2 = vcmp.eq.f32.partialorder %v1042_v36, 8.507059e+37 }
 0x81a   :  { %v1022_v51 = vadd.f32 %v5624_v39, %v1021_v50 }
 0x81c   :  { %v1026_v57 = vsel %vm1025_vm7, %v5624_v39, %v1022_v51  ;;  %v245_v39 = vld [vmem:[%s8170_s9 + $0x48] sm:$0xff] }
 0x81d   :  { %v1031_v2 = vsel %vm1028_vm8, %v1030_v58, %v1026_v57  ;;  %v5628_v4 = vpop.eup %5627 }
 0x81e   :  { %v1034_v3 = vmul.f32 %v5628_v4, %v1017_v60  ;;  %vm1039_vm9 = vweird.f32 %v5628_v4  ;;  %v1070_v44 = vsub.f32 1.0, %v1031_v2  ;;  %v1082_v47 = vmul.f32 %v1031_v2, %v6690_v55 }
 0x81f   :  { %vm1040_vm13 = vmor %vm1038_vm10, %vm1039_vm9 }
 0x820   :  { %v1035_v7 = vsub.f32 1.0, %v1034_v3 }
 0x822   :  { %v1036_v8 = vmul.f32 %v5628_v4, %v1035_v7 }
 0x824   :  { %v1037_v10 = vadd.f32 %v5628_v4, %v1036_v8 }
 0x826   :  { %v1041_v17 = vsel %vm1040_vm13, %v5628_v4, %v1037_v10 }
 0x827   :  { %v1046_v21 = vsel %vm1043_vm2, %v1045_v18, %v1041_v17 }
 0x828   :  { %v1071_v51 = vsub.f32 1.0, %v1046_v21  ;;  %v1083_v57 = vmul.f32 %v1046_v21, %v6704_v62 }
 0x85a   :  { %v1051_v6 = vpop.permute.xlu2 %1050 }
 0x85b   :  { %v1056_v1 = vmul.f32 %v1051_v6, %v1031_v2 }
 0x85d   :  { %1060 = vrot.lane.b32.xlu1 %v1056_v1, %s6286_s27 }
 0x87a   :  { %v1053_v20 = vpop.permute.xlu0 %1052 }
 0x87b   :  { %v1057_v22 = vmul.f32 %v1053_v20, %v1046_v21 }
 0x87d   :  { %1062 = vrot.lane.b32.xlu2 %v1057_v22, %s6286_s27 }
 0x885   :  { %1089 = vperm.xlu2 %5573, %v1086_v26  }
 0x88d   :  { %279 = vperm.xlu2 %5573, %v244_v41  }
 0x8cf   :  { %v1061_v27 = vpop.permute.xlu1 %1060 }
 0x8d0   :  { %v1066_v29 = vadd.f32 %v5259_v32, %v1061_v27 }
 0x8d2   :  { %5629 = vtanh.f32 %v1066_v29 }
 0x8d7   :  { %v1063_v30 = vpop.permute.xlu2 %1062 }
 0x8d8   :  { %v5630_v33 = vpop.eup %5629  ;;  %v1067_v35 = vadd.f32 %v5260_v42, %v1063_v30 }
 0x8d9   :  { %1074 = vrot.lane.b32.xlu0 %v5630_v33, %s6299_s26 }
 0x8da   :  { %5631 = vtanh.f32 %v1067_v35 }
 0x8df   :  { %v6740_v32 = vpop.permute.xlu2 %1089 }
 0x8e0   :  { %v5632_v38 = vpop.eup %5631  ;;  %vm1094_vm6 = vcmp.eq.s32.totalorder %v6740_v32, 1 }
 0x8e1   :  { %1092 = vperm.xlu0 %5572, %v1087_v37   ;;  %1076 = vrot.lane.b32.xlu1 %v5632_v38, %s6299_s26 }
 0x8e7   :  { %v280_v50 = vpop.permute.xlu2 %279 }
 0x8e8   :  { %vm310_vm7 = vcmp.eq.s32.totalorder %v280_v50, %v6524_v14 }
 0x8e9   :  { %282 = vperm.xlu0 %5572, %v245_v39  }
 0x94b   :  { %v1075_v42 = vpop.permute.xlu0 %1074 }
 0x94c   :  { %v1080_v46 = vmul.f32 %v1075_v42, %v1070_v44 }
 0x94e   :  { %v1084_v49 = vadd.f32 %v1082_v47, %v1080_v46 }
 0x950   :  { %v6749_v54 = vsel %vm1094_vm6, %v1084_v49, %v6690_v55  ;;  %v4856_v55 = vsel %vm310_vm7, 1.0, %v6298_v16 }
 0x951   :  { %v6756_v6 = vpack.c.bf16 %v6749_v54, %v6749_v54  ;;  %v358_v8 = vpack.c.bf16 %v4856_v55, %v4856_v55 }
 0x953   :  { %v6744_v52 = vpop.permute.xlu0 %1092  ;;  %v1077_v48 = vpop.permute.xlu1 %1076  ;;  %v1114_v3 = vunpack.c.l.b16 %v6756_v6 }
 0x954   :  { %v1081_v58 = vmul.f32 %v1077_v48, %v1071_v51  ;;  %vm1095_vm8 = vcmp.eq.s32.totalorder %v6744_v52, 1 }
 0x956   :  { %v1085_v60 = vadd.f32 %v1083_v57, %v1081_v58 }
 0x958   :  { %v6761_v2 = vsel %vm1095_vm8, %v1085_v60, %v6704_v62  ;;  %v436_v62 = vunpack.c.l.b16 %v358_v8 }
 0x959   :  { %v6766_v1 = vpack.c.bf16 %v6761_v2, %v6761_v2 }
 0x95b   :  { %v283_v4 = vpop.permute.xlu0 %282  ;;  %v1115_v7 = vunpack.c.l.b16 %v6766_v1 }
 0x95c   :  { %vm311_vm9 = vcmp.eq.s32.totalorder %v283_v4, %v6524_v14 }
 0x95d   :  { %v4857_v10 = vsel %vm311_vm9, 1.0, %v6298_v16  ;;  %v1116_v12 = vpack.c.b16 %v1115_v7, %v1114_v3 }
 0x95e   :  { %v359_v36 = vpack.c.bf16 %v4857_v10, %v4857_v10 }
 0x95f   :  { %1117 = vrot.lane.b32.xlu1 %v1116_v12, %s6299_s26 }
 0x960   :  { %v437_v17 = vunpack.c.l.b16 %v359_v36 }
 0x962   :  { %v6773_v18 = vpack.c.b16 %v437_v17, %v436_v62 }
 0x964   :  { %536 = vmatmul.bf16.gmra.mxu0 %v6773_v18 }
 0x9d1   :  { %v1118_v20 = vpop.permute.xlu1 %1117 }
 0x9d2   :  { %4915 = vmatmul.msk.bf16.vlgmr.msrb.gmra.mxu2 %vm605_vm0, %v1118_v20  ;;  %v1214_v20 = vsel %vm376_vm5, 1, %v8132_v0 }
 0x9e1   :  { %v537_v27 = vpop.f32.mrf.mxu0 }
 0x9e2   :  { %v538_v33 = vadd.f32 %v6539_v31, %v537_v27 }
 0x9e9   :  { %v539_v29 = vpop.f32.mrf.mxu0 }
 0x9ea   :  { %v540_v30 = vadd.f32 %v6539_v31, %v539_v29 }
 0x9ec   :  { %v5228_v35 = vpack.c.bf16 %v540_v30, %v538_v33  ;;  %v246_v33 = vld [vmem:[%s8170_s9 + $0x50] sm:$0xff] }
 0x9ee   :  { %v5264_v37 = vunpack.c.h.bf16 %v5228_v35  ;;  %v5263_v42 = vunpack.c.l.bf16 %v5228_v35 }
 0xa55   :  { %v1131_v21 = vpop.f32.mrf.mxu2 }
 0xa56   :  { %v1132_v22 = vadd.f32 %v6532_v25, %v1131_v21 }
 0xa58   :  { %1178 = vrot.lane.b32.xlu1 %v1132_v22, %s6286_s27  ;;  %v1136_v46 = vadd.f32 %v5263_v42, %v1132_v22 }
 0xa5a   :  { %v4916_v49 = vmul.f32 -1.442695, %v1136_v46 }
 0xa5d   :  { %v1133_v26 = vpop.f32.mrf.mxu2 }
 0xa5e   :  { %v1134_v41 = vadd.f32 %v6532_v25, %v1133_v26 }
 0xa60   :  { %1180 = vrot.lane.b32.xlu2 %v1134_v41, %s6286_s27  ;;  %v1137_v38 = vadd.f32 %v5264_v37, %v1134_v41 }
 0xa62   :  { %v4917_v39 = vmul.f32 -1.442695, %v1137_v38 }
 0xa64   :  { %5633 = vpow2.f32 %v4917_v39 }
 0xa6a   :  { %v5634_v44 = vpop.eup %5633 }
 0xa6b   :  { %v1145_v47 = vadd.f32 1.0, %v5634_v44 }
 0xa6d   :  { %5635 = vrcp.f32 %v1145_v47  ;;  %v1172_v55 = vand.u32 2147483648, %v1145_v47  ;;  %vm1166_vm13 = vweird.f32 %v1145_v47  ;;  %v1170_v4 = vand.u32 2147483647, %v1145_v47 }
 0xa6e   :  { %5637 = vpow2.f32 %v4916_v49 }
 0xa6f   :  { %v1173_v8 = vor.u32 1.1754944e-38, %v1172_v55  ;;  %vm1171_vm4 = vcmp.eq.f32.partialorder %v1170_v4, 8.507059e+37 }
 0xa73   :  { %v5636_v25 = vpop.eup %5635 }
 0xa74   :  { %v5638_v50 = vpop.eup %5637  ;;  %v1162_v51 = vmul.f32 %v5636_v25, %v1145_v47  ;;  %vm1167_vm10 = vweird.f32 %v5636_v25 }
 0xa75   :  { %v1144_v48 = vadd.f32 1.0, %v5638_v50  ;;  %vm1168_vm2 = vmor %vm1166_vm13, %vm1167_vm10 }
 0xa76   :  { %v1163_v57 = vsub.f32 1.0, %v1162_v51  ;;  %v5174_v51 = vld [vmem:[%s8173_s2 + $0x28] sm:$0xff] }
 0xa77   :  { %5639 = vrcp.f32 %v1144_v48  ;;  %v1157_v22 = vand.u32 2147483648, %v1144_v48  ;;  %vm1151_vm9 = vweird.f32 %v1144_v48  ;;  %v1155_v26 = vand.u32 2147483647, %v1144_v48 }
 0xa78   :  { %v1164_v58 = vmul.f32 %v5636_v25, %v1163_v57 }
 0xa79   :  { %v1158_v27 = vor.u32 1.1754944e-38, %v1157_v22  ;;  %vm1156_vm13 = vcmp.eq.f32.partialorder %v1155_v26, 8.507059e+37 }
 0xa7a   :  { %v1165_v31 = vadd.f32 %v5636_v25, %v1164_v58 }
 0xa7c   :  { %v1169_v3 = vsel %vm1168_vm2, %v5636_v25, %v1165_v31  ;;  %vm377_vm2 = vcmp.gt.s32.totalorder %v6558_v19, 4  ;;  %v247_v25 = vld [vmem:[%s8170_s9 + $0x58] sm:$0xff]  ;;  %v5173_v31 = vld [vmem:[%s8173_s2 + $0x20] sm:$0xff] }
 0xa7d   :  { %v5640_v60 = vpop.eup %5639  ;;  %v1174_v12 = vsel %vm1171_vm4, %v1173_v8, %v1169_v3  ;;  %v1215_v49 = vsel %vm377_vm2, 1, %v8132_v0 }
 0xa7e   :  { %v1147_v7 = vmul.f32 %v5640_v60, %v1144_v48  ;;  %vm1152_vm7 = vweird.f32 %v5640_v60  ;;  %v1199_v4 = vsub.f32 1.0, %v1174_v12 }
 0xa7f   :  { %vm1153_vm10 = vmor %vm1151_vm9, %vm1152_vm7 }
 0xa80   :  { %v1148_v62 = vsub.f32 1.0, %v1147_v7 }
 0xa82   :  { %v1149_v17 = vmul.f32 %v5640_v60, %v1148_v62 }
 0xa84   :  { %v1150_v21 = vadd.f32 %v5640_v60, %v1149_v17 }
 0xa86   :  { %v1154_v41 = vsel %vm1153_vm10, %v5640_v60, %v1150_v21 }
 0xa87   :  { %v1159_v30 = vsel %vm1156_vm13, %v1158_v27, %v1154_v41 }
 0xa88   :  { %v1198_v19 = vsub.f32 1.0, %v1159_v30  ;;  %v1210_v58 = vmul.f32 %v1159_v30, %v6749_v54 }
 0xaba   :  { %v1181_v10 = vpop.permute.xlu2 %1180 }
 0xabb   :  { %v1185_v36 = vmul.f32 %v1181_v10, %v1174_v12  ;;  %v1211_v10 = vmul.f32 %v1174_v12, %v6761_v2 }
 0xabd   :  { %1190 = vrot.lane.b32.xlu1 %v1185_v36, %s6286_s27 }
 0xac5   :  { %1217 = vperm.xlu1 %5574, %v1214_v20  }
 0xaca   :  { %v1179_v29 = vpop.permute.xlu1 %1178 }
 0xacb   :  { %v1184_v9 = vmul.f32 %v1179_v29, %v1159_v30 }
 0xacd   :  { %1188 = vrot.lane.b32.xlu0 %v1184_v9, %s6286_s27  ;;  %285 = vperm.xlu1 %5574, %v246_v33  }
 0xb2f   :  { %v1191_v35 = vpop.permute.xlu1 %1190 }
 0xb30   :  { %v1195_v38 = vadd.f32 %v5264_v37, %v1191_v35  ;;  %v5176_v37 = vld [vmem:[%s8173_s2 + $0x38] sm:$0xff] }
 0xb31   :  { %1698 = vmatpush.bf16.msra.mxu3 %v5176_v37  ;;  %v5172_v35 = vld [vmem:[%s8173_s2 + $0x18] sm:$0xff] }
 0xb32   :  { %5641 = vtanh.f32 %v1195_v38  ;;  %v5171_v38 = vld [vmem:[%s8173_s2 + $0x10] sm:$0xff] }
 0xb37   :  { %v6803_v50 = vpop.permute.xlu1 %1217 }
 0xb38   :  { %v5642_v39 = vpop.eup %5641  ;;  %vm1222_vm4 = vcmp.eq.s32.totalorder %v6803_v50, 1 }
 0xb39   :  { %1204 = vrot.lane.b32.xlu0 %v5642_v39, %s6299_s26  ;;  %v5170_v39 = vld [vmem:[%s8173_s2 + $0x8] sm:$0xff] }
 0xb3f   :  { %v1189_v44 = vpop.permute.xlu0 %1188  ;;  %v286_v55 = vpop.permute.xlu1 %285 }
 0xb40   :  { %v1194_v46 = vadd.f32 %v5263_v42, %v1189_v44  ;;  %v5175_v42 = vld [vmem:[%s8173_s2 + $0x30] sm:$0xff]  ;;  %vm312_vm5 = vcmp.eq.s32.totalorder %v286_v55, %v6524_v14  ;;  %v5169_v44 = vld [vmem:[%s8173_s2] sm:$0xff] }
 0xb41   :  { %1699 = vmatpush.bf16.msra.mxu3 %v5175_v42 }
 0xb42   :  { %5643 = vtanh.f32 %v1194_v46 }
 0xb45   :  { %1700 = vmatpush.bf16.msra.mxu3 %v5174_v51 }
 0xb48   :  { %v5644_v47 = vpop.eup %5643 }
 0xb49   :  { %1202 = vrot.lane.b32.xlu2 %v5644_v47, %s6299_s26  ;;  %1701 = vmatpush.bf16.msra.mxu3 %v5173_v31 }
 0xb4d   :  { %1702 = vmatpush.bf16.msra.mxu3 %v5172_v35 }
 0xb51   :  { %1220 = vperm.xlu2 %5573, %v1215_v49   ;;  %1703 = vmatpush.bf16.msra.mxu3 %v5171_v38  ;;  %v6860_v49 = vld [vmem:[#allocation9] ss:$0 sm:$0xff] }
 0xb55   :  { %1704 = vmatpush.bf16.msra.mxu3 %v5170_v39 }
 0xb59   :  { %288 = vperm.xlu2 %5573, %v247_v25   ;;  %1705 = vmatpush.bf16.msra.mxu3 %v5169_v44 }
 0xba3   :  { %v1203_v48 = vpop.permute.xlu2 %1202 }
 0xba4   :  { %v1208_v57 = vmul.f32 %v1203_v48, %v1198_v19 }
 0xba6   :  { %v1212_v60 = vadd.f32 %v1210_v58, %v1208_v57  ;;  %v6878_v57 = vld [vmem:[#allocation7] ss:$0 sm:$0xff] }
 0xba8   :  { %v6818_v8 = vsel %vm1222_vm4, %v1212_v60, %v6749_v54  ;;  %v4858_v54 = vsel %vm312_vm5, 1.0, %v6298_v16 }
 0xba9   :  { %v6825_v17 = vpack.c.bf16 %v6818_v8, %v6818_v8  ;;  %v360_v41 = vpack.c.bf16 %v4858_v54, %v4858_v54 }
 0xbab   :  { %v1205_v3 = vpop.permute.xlu0 %1204  ;;  %v6813_v7 = vpop.permute.xlu2 %1220  ;;  %v1242_v22 = vunpack.c.l.b16 %v6825_v17 }
 0xbac   :  { %v1209_v36 = vmul.f32 %v1205_v3, %v1199_v4  ;;  %vm1223_vm7 = vcmp.eq.s32.totalorder %v6813_v7, 1 }
 0xbae   :  { %v1213_v62 = vadd.f32 %v1211_v10, %v1209_v36  ;;  %v6887_v10 = vld [vmem:[#allocation12] ss:$0 sm:$0xff] }
 0xbb0   :  { %v6830_v20 = vsel %vm1223_vm7, %v1213_v62, %v6761_v2  ;;  %v438_v2 = vunpack.c.l.b16 %v360_v41 }
 0xbb1   :  { %v6835_v12 = vpack.c.bf16 %v6830_v20, %v6830_v20 }
 0xbb3   :  { %v289_v21 = vpop.permute.xlu2 %288  ;;  %v1243_v26 = vunpack.c.l.b16 %v6835_v12 }
 0xbb4   :  { %vm313_vm9 = vcmp.eq.s32.totalorder %v289_v21, %v6524_v14 }
 0xbb5   :  { %v4859_v27 = vsel %vm313_vm9, 1.0, %v6298_v16  ;;  %v1244_v29 = vpack.c.b16 %v1243_v26, %v1242_v22 }
 0xbb6   :  { %v361_v30 = vpack.c.bf16 %v4859_v27, %v4859_v27 }
 0xbb7   :  { %1245 = vrot.lane.b32.xlu0 %v1244_v29, %s6299_s26 }
 0xbb8   :  { %v439_v33 = vunpack.c.l.b16 %v361_v30 }
 0xbba   :  { %v449_v9 = vpack.c.b16 %v439_v33, %v438_v2 }
 0xbbc   :  { %541 = vmatmul.bf16.gmra.mxu0 %v449_v9 }
 0xc29   :  { %v1246_v46 = vpop.permute.xlu0 %1245 }
 0xc2a   :  { %4918 = vmatmul.msk.bf16.vlgmr.msrb.gmra.mxu3 %vm605_vm0, %v1246_v46 }
 0xc3a   :  { %1706 = vmatmul.bf16.vlgmr.msra.gmra.mxu3 %v6530_v24 }
 0xc4a   :  { %1711 = vmatmul.bf16.gmra.mxu3 %v6596_v53 }
 0xc5a   :  { %1716 = vmatmul.bf16.gmra.mxu3 %v6655_v28 }
 0xc6a   :  { %1721 = vmatmul.bf16.gmra.mxu3 %v6716_v15 }
 0xc7a   :  { %1726 = vmatmul.bf16.gmra.mxu3 %v6773_v18  ;;  %v542_v18 = vpop.f32.mrf.mxu0 }
 0xc7b   :  { %v543_v31 = vadd.f32 %v6878_v57, %v542_v18 }
 0xc82   :  { %v544_v51 = vpop.f32.mrf.mxu0 }
 0xc83   :  { %v545_v58 = vadd.f32 %v6878_v57, %v544_v51 }
 0xc85   :  { %v6882_v60 = vpack.c.bf16 %v545_v58, %v543_v31 }
 0xc87   :  { %v5267_v4 = vunpack.c.l.bf16 %v6882_v60  ;;  %v5268_v22 = vunpack.c.h.bf16 %v6882_v60 }
 0xc8a   :  { %1731 = vmatmul.bf16.gmra.mxu3 %v449_v9 }
 0xcad   :  { %v1259_v47 = vpop.f32.mrf.mxu3 }
 0xcae   :  { %v1260_v25 = vadd.f32 %v6860_v49, %v1259_v47 }
 0xcb0   :  { %1306 = vrot.lane.b32.xlu0 %v1260_v25, %s6286_s27  ;;  %v1264_v3 = vadd.f32 %v5267_v4, %v1260_v25 }
 0xcb2   :  { %v4919_v36 = vmul.f32 -1.442695, %v1264_v3 }
 0xcb4   :  { %5645 = vpow2.f32 %v4919_v36 }
 0xcb5   :  { %v1261_v37 = vpop.f32.mrf.mxu3 }
 0xcb6   :  { %v1262_v42 = vadd.f32 %v6860_v49, %v1261_v37 }
 0xcb8   :  { %1308 = vrot.lane.b32.xlu1 %v1262_v42, %s6286_s27  ;;  %v1265_v41 = vadd.f32 %v5268_v22, %v1262_v42 }
 0xcba   :  { %v4920_v27 = vmul.f32 -1.442695, %v1265_v41  ;;  %v5646_v30 = vpop.eup %5645 }
 0xcbb   :  { %v1272_v2 = vadd.f32 1.0, %v5646_v30 }
 0xcbc   :  { %5647 = vpow2.f32 %v4920_v27 }
 0xcbd   :  { %v6866_v24 = vpop.f32.mrf.mxu3  ;;  %5649 = vrcp.f32 %v1272_v2  ;;  %v1285_v31 = vand.u32 2147483648, %v1272_v2  ;;  %vm1279_vm13 = vweird.f32 %v1272_v2 }
 0xcc2   :  { %v5648_v38 = vpop.eup %5647 }
 0xcc3   :  { %v1273_v44 = vadd.f32 1.0, %v5648_v38  ;;  %v5650_v46 = vpop.eup %5649 }
 0xcc4   :  { %v1275_v47 = vmul.f32 %v5650_v46, %v1272_v2  ;;  %vm1280_vm10 = vweird.f32 %v5650_v46 }
 0xcc5   :  { %v6868_v53 = vpop.f32.mrf.mxu3  ;;  %5651 = vrcp.f32 %v1273_v44  ;;  %vm1281_vm2 = vmor %vm1279_vm13, %vm1280_vm10  ;;  %vm1294_vm14 = vweird.f32 %v1273_v44  ;;  %v1298_v30 = vand.u32 2147483647, %v1273_v44 }
 0xcc6   :  { %v1276_v25 = vsub.f32 1.0, %v1275_v47 }
 0xcc7   :  { %vm1299_vm15 = vcmp.eq.f32.partialorder %v1298_v30, 8.507059e+37 }
 0xcc8   :  { %v1277_v42 = vmul.f32 %v5650_v46, %v1276_v25  ;;  %v251_v25 = vld [vmem:[%s8170_s9 + $0x78] sm:$0xff] }
 0xcca   :  { %v1278_v51 = vadd.f32 %v5650_v46, %v1277_v42 }
 0xccb   :  { %v5652_v37 = vpop.eup %5651 }
 0xccc   :  { %v1290_v18 = vmul.f32 %v5652_v37, %v1273_v44  ;;  %v1282_v3 = vsel %vm1281_vm2, %v5650_v46, %v1278_v51  ;;  %vm1295_vm9 = vweird.f32 %v5652_v37  ;;  %v6905_v46 = vld [vmem:[%s8172_s1] sm:$0xff]  ;;  %v6921_v51 = vld [vmem:[%s8172_s1 + $0x8] sm:$0xff] }
 0xccd   :  { %v6870_v28 = vpop.f32.mrf.mxu3  ;;  %vm1296_vm12 = vmor %vm1294_vm14, %vm1295_vm9  ;;  %vm378_vm10 = vcmp.gt.s32.totalorder %v6905_v46, 5 }
 0xcce   :  { %v1291_v58 = vsub.f32 1.0, %v1290_v18  ;;  %v1342_v47 = vsel %vm378_vm10, 1, %v8132_v0 }
 0xcd0   :  { %v1292_v36 = vmul.f32 %v5652_v37, %v1291_v58 }
 0xcd2   :  { %v1293_v27 = vadd.f32 %v5652_v37, %v1292_v36  ;;  %v250_v36 = vld [vmem:[%s8170_s9 + $0x70] sm:$0xff] }
 0xcd5   :  { %v6872_v15 = vpop.f32.mrf.mxu3 }
 0xcdd   :  { %v6874_v19 = vpop.f32.mrf.mxu3 }
 0xce5   :  { %v6876_v48 = vpop.f32.mrf.mxu3 }
 0xced   :  { %v1722_v55 = vpop.f32.mrf.mxu3 }
 0xcee   :  { %v1723_v54 = vadd.f32 %v6887_v10, %v1722_v55  ;;  %v1283_v55 = vand.u32 2147483647, %v1272_v2 }
 0xcf0   :  { %vm1284_vm5 = vcmp.eq.f32.partialorder %v1283_v55, 8.507059e+37 }
 0xcf5   :  { %v1724_v62 = vpop.f32.mrf.mxu3 }
 0xcf6   :  { %v1725_v21 = vadd.f32 %v6887_v10, %v1724_v62  ;;  %v1286_v62 = vor.u32 1.1754944e-38, %v1285_v31 }
 0xcf8   :  { %v6892_v26 = vpack.c.bf16 %v1725_v21, %v1723_v54  ;;  %v1287_v21 = vsel %vm1284_vm5, %v1286_v62, %v1282_v3  ;;  %v248_v3 = vld [vmem:[%s8170_s9 + $0x60] sm:$0xff] }
 0xcfd   :  { %v1727_v29 = vpop.f32.mrf.mxu3 }
 0xcfe   :  { %v1728_v9 = vadd.f32 %v6887_v10, %v1727_v29  ;;  %v1300_v29 = vand.u32 2147483648, %v1273_v44  ;;  %v249_v44 = vld [vmem:[%s8170_s9 + $0x68] sm:$0xff] }
 0xd05   :  { %v1729_v33 = vpop.f32.mrf.mxu3 }
 0xd06   :  { %v1730_v35 = vadd.f32 %v6887_v10, %v1729_v33  ;;  %v1297_v33 = vsel %vm1296_vm12, %v5652_v37, %v1293_v27  ;;  %vm379_vm12 = vcmp.gt.s32.totalorder %v6921_v51, 5 }
 0xd07   :  { %v1343_v58 = vsel %vm379_vm12, 1, %v8132_v0 }
 0xd08   :  { %v6898_v39 = vpack.c.bf16 %v1730_v35, %v1728_v9  ;;  %v1301_v9 = vor.u32 1.1754944e-38, %v1300_v29 }
 0xd0a   :  { %v1302_v35 = vsel %vm1299_vm15, %v1301_v9, %v1297_v33 }
 0xd0b   :  { %v1327_v29 = vsub.f32 1.0, %v1302_v35 }
 0xd22   :  { %v1307_v54 = vpop.permute.xlu0 %1306 }
 0xd23   :  { %v1312_v41 = vmul.f32 %v1307_v54, %v1287_v21  ;;  %v1326_v54 = vsub.f32 1.0, %v1287_v21 }
 0xd25   :  { %1316 = vrot.lane.b32.xlu2 %v1312_v41, %s6286_s27 }
 0xd2a   :  { %v1309_v2 = vpop.permute.xlu1 %1308 }
 0xd2b   :  { %v1313_v38 = vmul.f32 %v1309_v2, %v1302_v35 }
 0xd2d   :  { %1318 = vrot.lane.b32.xlu0 %v1313_v38, %s6286_s27  ;;  %v1339_v38 = vmul.f32 %v1302_v35, %v6830_v20 }
 0xd35   :  { %1345 = vperm.xlu0 %5572, %v1342_v47  }
 0xd3d   :  { %294 = vperm.xlu0 %5572, %v249_v44  }
 0xd45   :  { %300 = vperm.xlu0 %5572, %v251_v25  }
 0xd7f   :  { %v1317_v37 = vpop.permute.xlu2 %1316 }
 0xd80   :  { %v1322_v42 = vadd.f32 %v5267_v4, %v1317_v37 }
 0xd82   :  { %5653 = vtanh.f32 %v1322_v42 }
 0xd88   :  { %v5654_v18 = vpop.eup %5653 }
 0xd89   :  { %1330 = vrot.lane.b32.xlu1 %v5654_v18, %s6299_s26 }
 0xd91   :  { %1348 = vperm.xlu1 %5574, %v1343_v58  }
 0xd9f   :  { %v1319_v31 = vpop.permute.xlu0 %1318 }
 0xda0   :  { %v1323_v55 = vadd.f32 %v5268_v22, %v1319_v31  ;;  %v1338_v22 = vmul.f32 %v1287_v21, %v6818_v8 }
 0xda2   :  { %5655 = vtanh.f32 %v1323_v55 }
 0xda7   :  { %v6934_v62 = vpop.permute.xlu0 %1345 }
 0xda8   :  { %v5656_v4 = vpop.eup %5655  ;;  %vm8158_vm14 = vcmp.eq.s32.totalorder %v6934_v62, 1 }
 0xda9   :  { %1332 = vrot.lane.b32.xlu2 %v5656_v4, %s6299_s26 }
 0xdaf   :  { %v295_v30 = vpop.permute.xlu0 %294 }
 0xdb0   :  { %vm315_vm15 = vcmp.eq.s32.totalorder %v295_v30, %v6524_v14 }
 0xdb1   :  { %291 = vperm.xlu2 %5573, %v248_v3  }
 0xdb9   :  { %297 = vperm.xlu2 %5573, %v250_v36  }
 0xdfb   :  { %v1331_v41 = vpop.permute.xlu1 %1330 }
 0xdfc   :  { %v1336_v60 = vmul.f32 %v1331_v41, %v1326_v54  ;;  %v301_v54 = vpop.permute.xlu0 %300 }
 0xdfd   :  { %vm317_vm9 = vcmp.eq.s32.totalorder %v301_v54, %v6524_v14 }
 0xdfe   :  { %v1340_v27 = vadd.f32 %v1338_v22, %v1336_v60  ;;  %v4863_v22 = vsel %vm317_vm9, 1.0, %v6298_v16 }
 0xe00   :  { %v6941_v9 = vsel %vm8158_vm14, %v1340_v27, %v6818_v8  ;;  %v4861_v8 = vsel %vm315_vm15, 1.0, %v6298_v16 }
 0xe01   :  { %v6950_v21 = vpack.c.bf16 %v6941_v9, %v6941_v9  ;;  %v363_v58 = vpack.c.bf16 %v4861_v8, %v4861_v8 }
 0xe03   :  { %v1333_v33 = vpop.permute.xlu2 %1332  ;;  %v6943_v2 = vpop.permute.xlu1 %1348  ;;  %8174 = vst [vmem:[#allocation30_spill] sm:$0xff] %v6950_v21  ;;  %v1370_v42 = vunpack.c.l.b16 %v6950_v21  ;;  %v441_v3 = vunpack.c.l.b16 %v363_v58 }
 0xe04   :  { %v1337_v47 = vmul.f32 %v1333_v33, %v1327_v29  ;;  %vm8157_vm13 = vcmp.eq.s32.totalorder %v6943_v2, 1  ;;  %v365_v29 = vpack.c.bf16 %v4863_v22, %v4863_v22 }
 0xe06   :  { %v1341_v44 = vadd.f32 %v1339_v38, %v1337_v47  ;;  %v443_v33 = vunpack.c.l.b16 %v365_v29  ;;  %v6971_v47 = vld [vmem:[#allocation10 + $0x8] sm:$0xff] }
 0xe07   :  { %1801 = vmatpush.bf16.msrb.mxu1 %v6971_v47  ;;  %1914 = vmatpush.bf16.msrb.mxu2 %v6971_v47 }
 0xe08   :  { %v6955_v25 = vsel %vm8157_vm13, %v1341_v44, %v6830_v20  ;;  %v6974_v44 = vld [vmem:[#allocation10] sm:$0xff] }
 0xe09   :  { %v6960_v35 = vpack.c.bf16 %v6955_v25, %v6955_v25 }
 0xe0b   :  { %8175 = vst [vmem:[#allocation31_spill] sm:$0xff] %v6960_v35  ;;  %v292_v37 = vpop.permute.xlu2 %291  ;;  %v1371_v18 = vunpack.c.l.b16 %v6960_v35  ;;  %1802 = vmatpush.bf16.msrb.mxu1 %v6974_v44  ;;  %1915 = vmatpush.bf16.msrb.mxu2 %v6974_v44 }
 0xe0c   :  { %vm314_vm2 = vcmp.eq.s32.totalorder %v292_v37, %v6524_v14 }
 0xe0d   :  { %v4860_v31 = vsel %vm314_vm2, 1.0, %v6298_v16  ;;  %v1372_v55 = vpack.c.b16 %v1371_v18, %v1370_v42 }
 0xe0e   :  { %v362_v4 = vpack.c.bf16 %v4860_v31, %v4860_v31 }
 0xe0f   :  { %1373 = vrot.lane.b32.xlu1 %v1372_v55, %s6299_s26 }
 0xe10   :  { %v440_v20 = vunpack.c.l.b16 %v362_v4 }
 0xe12   :  { %v450_v36 = vpack.c.b16 %v441_v3, %v440_v20 }
 0xe13   :  { %v298_v41 = vpop.permute.xlu2 %297 }
 0xe14   :  { %vm316_vm5 = vcmp.eq.s32.totalorder %v298_v41, %v6524_v14  ;;  %546 = vmatmul.bf16.gmra.mxu0 %v450_v36  ;;  %1736 = vmatmul.bf16.gmra.mxu3 %v450_v36  ;;  %v6997_v36 = vld [vmem:[#allocation13] ss:$0 sm:$0xff] }
 0xe15   :  { %v4862_v60 = vsel %vm316_vm5, 1.0, %v6298_v16  ;;  %v6981_v16 = vpop.f32.mrf.mxu3 }
 0xe16   :  { %v364_v27 = vpack.c.bf16 %v4862_v60, %v4862_v60 }
 0xe18   :  { %v442_v30 = vunpack.c.l.b16 %v364_v27 }
 0xe1a   :  { %v451_v38 = vpack.c.b16 %v443_v33, %v442_v30 }
 0xe1d   :  { %v6984_v8 = vpop.f32.mrf.mxu3 }
 0xe24   :  { %551 = vmatmul.bf16.gmra.mxu0 %v451_v38  ;;  %1741 = vmatmul.bf16.gmra.mxu3 %v451_v38 }
 0xe81   :  { %v1374_v14 = vpop.permute.xlu1 %1373 }
 0xe82   :  { %4921 = vmatmul.msk.bf16.vlgmr.msra.gmra.mxu1 %vm605_vm0, %v1374_v14 }
 0xe83   :  { %2026 = vmatpush.bf16.msra.mxu1 %v6971_v47 }
 0xe87   :  { %2027 = vmatpush.bf16.msra.mxu1 %v6974_v44 }
 0xe91   :  { %v547_v27 = vpop.f32.mrf.mxu0 }
 0xe92   :  { %1803 = vmatmul.bf16.vlgmr.msrb.gmra.mxu1 %v8132_v0 }
 0xe93   :  { %2250 = vmatpush.bf16.msrb.mxu1 %v6971_v47 }
 0xe97   :  { %v1737_v37 = vpop.f32.mrf.mxu3  ;;  %2251 = vmatpush.bf16.msrb.mxu1 %v6974_v44 }
 0xe98   :  { %v1738_v18 = vadd.f32 %v6887_v10, %v1737_v37 }
 0xe99   :  { %v549_v29 = vpop.f32.mrf.mxu0 }
 0xe9a   :  { %v550_v30 = vadd.f32 %v6878_v57, %v549_v29 }
 0xe9f   :  { %v1739_v42 = vpop.f32.mrf.mxu3 }
 0xea0   :  { %v1740_v58 = vadd.f32 %v6887_v10, %v1739_v42 }
 0xea2   :  { %v6991_v31 = vpack.c.bf16 %v1740_v58, %v1738_v18 }
 0xea7   :  { %v1742_v42 = vpop.f32.mrf.mxu3 }
 0xeff   :  { %v1387_v55 = vpop.f32.mrf.mxu1 }
 0xf00   :  { %v1388_v4 = vadd.f32 %v6860_v49, %v1387_v55 }
 0xf02   :  { %1434 = vrot.lane.b32.xlu1 %v1388_v4, %s6286_s27 }
 0xf07   :  { %v1389_v20 = vpop.f32.mrf.mxu1 }
 0xf08   :  { %v1390_v3 = vadd.f32 %v6860_v49, %v1389_v20  ;;  %v548_v49 = vadd.f32 %v6878_v57, %v547_v27  ;;  %v1743_v27 = vadd.f32 %v6887_v10, %v1742_v42 }
 0xf0a   :  { %1436 = vrot.lane.b32.xlu2 %v1390_v3, %s6286_s27  ;;  %v7005_v33 = vpack.c.bf16 %v550_v30, %v548_v49 }
 0xf0c   :  { %v8130_v38 = vunpack.c.h.bf16 %v7005_v33  ;;  %v8131_v58 = vunpack.c.l.bf16 %v7005_v33 }
 0xf0e   :  { %v1393_v14 = vadd.f32 %v8130_v38, %v1390_v3  ;;  %v1392_v55 = vadd.f32 %v8131_v58, %v1388_v4 }
 0xf0f   :  { %v1804_v54 = vpop.f32.mrf.mxu1 }
 0xf10   :  { %v1805_v41 = vadd.f32 %v6997_v36, %v1804_v54  ;;  %v4923_v37 = vmul.f32 -1.442695, %v1393_v14  ;;  %v1744_v54 = vpop.f32.mrf.mxu3 }
 0xf11   :  { %v1745_v57 = vadd.f32 %v6887_v10, %v1744_v54 }
 0xf12   :  { %1851 = vrot.lane.b32.xlu0 %v1805_v41, %s6286_s27  ;;  %5657 = vpow2.f32 %v4923_v37 }
 0xf13   :  { %v7015_v29 = vpack.c.bf16 %v1745_v57, %v1743_v27 }
 0xf15   :  { %v8134_v49 = vunpack.c.l.bf16 %v7015_v29 }
 0xf17   :  { %v1806_v60 = vpop.f32.mrf.mxu1  ;;  %v1809_v37 = vadd.f32 %v8134_v49, %v1805_v41 }
 0xf18   :  { %v1807_v22 = vadd.f32 %v6997_v36, %v1806_v60  ;;  %v5658_v18 = vpop.eup %5657  ;;  %v4922_v60 = vmul.f32 -1.442695, %v1392_v55  ;;  %v8135_v55 = vunpack.c.h.bf16 %v7015_v29 }
 0xf19   :  { %v1401_v20 = vadd.f32 1.0, %v5658_v18  ;;  %v4967_v38 = vmul.f32 -1.442695, %v1809_v37 }
 0xf1a   :  { %1853 = vrot.lane.b32.xlu1 %v1807_v22, %s6286_s27  ;;  %v1810_v42 = vadd.f32 %v8135_v55, %v1807_v22 }
 0xf1b   :  { %5659 = vrcp.f32 %v1401_v20  ;;  %v1428_v27 = vand.u32 2147483648, %v1401_v20  ;;  %vm1422_vm12 = vweird.f32 %v1401_v20  ;;  %v1426_v0 = vand.u32 2147483647, %v1401_v20 }
 0xf1c   :  { %5661 = vpow2.f32 %v4922_v60  ;;  %v4968_v58 = vmul.f32 -1.442695, %v1810_v42 }
 0xf1d   :  { %v1429_v37 = vor.u32 1.1754944e-38, %v1428_v27  ;;  %vm1427_vm2 = vcmp.eq.f32.partialorder %v1426_v0, 8.507059e+37 }
 0xf21   :  { %v5660_v3 = vpop.eup %5659 }
 0xf22   :  { %v5662_v30 = vpop.eup %5661  ;;  %v1418_v14 = vmul.f32 %v5660_v3, %v1401_v20  ;;  %vm1423_vm10 = vweird.f32 %v5660_v3 }
 0xf23   :  { %v1400_v4 = vadd.f32 1.0, %v5662_v30  ;;  %vm1424_vm15 = vmor %vm1422_vm12, %vm1423_vm10 }
 0xf24   :  { %v1419_v18 = vsub.f32 1.0, %v1418_v14 }
 0xf25   :  { %5663 = vrcp.f32 %v1400_v4  ;;  %vm1407_vm9 = vweird.f32 %v1400_v4 }
 0xf26   :  { %v1420_v54 = vmul.f32 %v5660_v3, %v1419_v18  ;;  %5665 = vpow2.f32 %v4967_v38 }
 0xf27   :  { %5667 = vpow2.f32 %v4968_v58  ;;  %v1411_v58 = vand.u32 2147483647, %v1400_v4 }
 0xf28   :  { %v1421_v60 = vadd.f32 %v5660_v3, %v1420_v54 }
 0xf29   :  { %vm1412_vm12 = vcmp.eq.f32.partialorder %v1411_v58, 8.507059e+37 }
 0xf2a   :  { %v1425_v30 = vsel %vm1424_vm15, %v5660_v3, %v1421_v60  ;;  %v1413_v60 = vand.u32 2147483648, %v1400_v4 }
 0xf2b   :  { %v5664_v57 = vpop.eup %5663  ;;  %v7023_v38 = vsel %vm1427_vm2, %v1429_v37, %v1425_v30 }
 0xf2c   :  { %v5666_v41 = vpop.eup %5665  ;;  %v1403_v14 = vmul.f32 %v5664_v57, %v1400_v4  ;;  %vm1408_vm5 = vweird.f32 %v5664_v57 }
 0xf2d   :  { %v1817_v49 = vadd.f32 1.0, %v5666_v41  ;;  %v5668_v42 = vpop.eup %5667  ;;  %vm1409_vm10 = vmor %vm1407_vm9, %vm1408_vm5  ;;  %v1414_v41 = vor.u32 1.1754944e-38, %v1413_v60 }
 0xf2e   :  { %v1404_v54 = vsub.f32 1.0, %v1403_v14  ;;  %v1818_v20 = vadd.f32 1.0, %v5668_v42 }
 0xf2f   :  { %5669 = vrcp.f32 %v1817_v49  ;;  %v1830_v21 = vand.u32 2147483648, %v1817_v49  ;;  %vm1824_vm2 = vweird.f32 %v1817_v49 }
 0xf30   :  { %v1405_v55 = vmul.f32 %v5664_v57, %v1404_v54  ;;  %5671 = vrcp.f32 %v1818_v20 }
 0xf31   :  { %v1831_v58 = vor.u32 1.1754944e-38, %v1830_v21 }
 0xf32   :  { %v1406_v35 = vadd.f32 %v5664_v57, %v1405_v55 }
 0xf34   :  { %v1410_v0 = vsel %vm1409_vm10, %v5664_v57, %v1406_v35  ;;  %v1828_v35 = vand.u32 2147483647, %v1817_v49 }
 0xf35   :  { %v5670_v3 = vpop.eup %5669  ;;  %v7027_v14 = vsel %vm1412_vm12, %v1414_v41, %v1410_v0  ;;  %vm1839_vm12 = vweird.f32 %v1818_v20 }
 0xf36   :  { %v1820_v27 = vmul.f32 %v5670_v3, %v1817_v49  ;;  %vm1825_vm15 = vweird.f32 %v5670_v3  ;;  %vm1829_vm9 = vcmp.eq.f32.partialorder %v1828_v35, 8.507059e+37 }
 0xf37   :  { %vm1826_vm5 = vmor %vm1824_vm2, %vm1825_vm15  ;;  %vm380_vm2 = vcmp.gt.s32.totalorder %v6905_v46, 6 }
 0xf64   :  { %v1437_v18 = vpop.permute.xlu2 %1436 }
 0xf65   :  { %v1441_v22 = vmul.f32 %v1437_v18, %v7023_v38  ;;  %v1821_v18 = vsub.f32 1.0, %v1820_v27 }
 0xf67   :  { %1446 = vrot.lane.b32.xlu0 %v1441_v22, %s6286_s27  ;;  %v5672_v22 = vpop.eup %5671  ;;  %v1822_v55 = vmul.f32 %v5670_v3, %v1821_v18  ;;  %v1843_v18 = vand.u32 2147483647, %v1818_v20 }
 0xf68   :  { %v1835_v54 = vmul.f32 %v5672_v22, %v1818_v20  ;;  %vm1840_vm10 = vweird.f32 %v5672_v22 }
 0xf69   :  { %v1823_v42 = vadd.f32 %v5670_v3, %v1822_v55  ;;  %vm1841_vm11 = vmor %vm1839_vm12, %vm1840_vm10  ;;  %vm1844_vm15 = vcmp.eq.f32.partialorder %v1843_v18, 8.507059e+37 }
 0xf6a   :  { %v1836_v4 = vsub.f32 1.0, %v1835_v54 }
 0xf6b   :  { %v1827_v57 = vsel %vm1826_vm5, %v5670_v3, %v1823_v42  ;;  %v8176_v42 = vmov 0   ;;  %vm382_vm5 = vcmp.gt.s32.totalorder %v6905_v46, 7 }
 0xf6c   :  { %v1837_v60 = vmul.f32 %v5672_v22, %v1836_v4  ;;  %v7031_v41 = vsel %vm1829_vm9, %v1831_v58, %v1827_v57  ;;  %v1470_v4 = vsel %vm380_vm2, 1, %v8176_v42  ;;  %v8177_v57 = vunpack.c.l.bf16 %v7005_v33 }
 0xf6d   :  { %v8178_v58 = vunpack.c.h.bf16 %v7005_v33  ;;  %vm383_vm9 = vcmp.gt.s32.totalorder %v6921_v51, 7 }
 0xf6e   :  { %v1599_v46 = vsel %vm383_vm9, 1, %v8176_v42 }
 0xf74   :  { %v1435_v30 = vpop.permute.xlu1 %1434 }
 0xf75   :  { %v1440_v37 = vmul.f32 %v1435_v30, %v7027_v14  ;;  %v1838_v30 = vadd.f32 %v5672_v22, %v1837_v60 }
 0xf77   :  { %1444 = vrot.lane.b32.xlu2 %v1440_v37, %s6286_s27  ;;  %v1845_v37 = vand.u32 2147483648, %v1818_v20  ;;  %v1842_v55 = vsel %vm1841_vm11, %v5672_v22, %v1838_v30  ;;  %vm381_vm11 = vcmp.gt.s32.totalorder %v6921_v51, 6 }
 0xf79   :  { %v1846_v49 = vor.u32 1.1754944e-38, %v1845_v37  ;;  %v1598_v37 = vsel %vm382_vm5, 1, %v8176_v42 }
 0xf7b   :  { %v7035_v54 = vsel %vm1844_vm15, %v1846_v49, %v1842_v55  ;;  %v8179_v55 = vunpack.c.h.bf16 %v7015_v29 }
 0xf84   :  { %v1852_v0 = vpop.permute.xlu0 %1851 }
 0xf85   :  { %v1857_v27 = vmul.f32 %v1852_v0, %v7031_v41 }
 0xf87   :  { %1861 = vrot.lane.b32.xlu1 %v1857_v27, %s6286_s27  ;;  %v1471_v27 = vsel %vm381_vm11, 1, %v8176_v42 }
 0xf8c   :  { %v1854_v3 = vpop.permute.xlu1 %1853 }
 0xf8d   :  { %v1858_v21 = vmul.f32 %v1854_v3, %v7035_v54 }
 0xf8f   :  { %1863 = vrot.lane.b32.xlu2 %v1858_v21, %s6286_s27  ;;  %v8180_v21 = vunpack.c.l.bf16 %v7015_v29 }
 0xf97   :  { %1473 = vperm.xlu2 %5573, %v1470_v4  }
 0xfd1   :  { %v1445_v35 = vpop.permute.xlu2 %1444 }
 0xfd2   :  { %v1450_v20 = vadd.f32 %v8177_v57, %v1445_v35  ;;  %v1454_v57 = vsub.f32 1.0, %v7027_v14 }
 0xfd4   :  { %5673 = vtanh.f32 %v1450_v20 }
 0xfd9   :  { %v1447_v22 = vpop.permute.xlu0 %1446 }
 0xfda   :  { %v5674_v60 = vpop.eup %5673  ;;  %v1451_v0 = vadd.f32 %v8178_v58, %v1447_v22 }
 0xfdb   :  { %1458 = vrot.lane.b32.xlu0 %v5674_v60, %s6299_s26  ;;  %v1466_v60 = vmul.f32 %v7027_v14, %v6941_v9 }
 0xfdc   :  { %5675 = vtanh.f32 %v1451_v0  ;;  %v1455_v0 = vsub.f32 1.0, %v7023_v38 }
 0xfe2   :  { %v5676_v30 = vpop.eup %5675 }
 0xfe3   :  { %1460 = vrot.lane.b32.xlu1 %v5676_v30, %s6299_s26  ;;  %1476 = vperm.xlu0 %5572, %v1471_v27   ;;  %v1467_v30 = vmul.f32 %v7023_v38, %v6955_v25 }
 0xfe9   :  { %v1864_v18 = vpop.permute.xlu2 %1863 }
 0xfea   :  { %v1868_v33 = vadd.f32 %v8179_v55, %v1864_v18 }
 0xfeb   :  { %1601 = vperm.xlu0 %5572, %v1598_v37  }
 0xfec   :  { %5677 = vtanh.f32 %v1868_v33 }
 0xff1   :  { %v7062_v58 = vpop.permute.xlu2 %1473 }
 0xff2   :  { %v5678_v49 = vpop.eup %5677  ;;  %vm8156_vm10 = vcmp.eq.s32.totalorder %v7062_v58, 1 }
 0xff3   :  { %1877 = vrot.lane.b32.xlu2 %v5678_v49, %s6299_s26 }
 0xff9   :  { %v1862_v3 = vpop.permute.xlu1 %1861 }
 0xffa   :  { %v1867_v4 = vadd.f32 %v8180_v21, %v1862_v3  ;;  %v1871_v21 = vsub.f32 1.0, %v7031_v41 }
 0xffc   :  { %5679 = vtanh.f32 %v1867_v4 }
0x1002   :  { %v5680_v35 = vpop.eup %5679 }
0x1003   :  { %1875 = vrot.lane.b32.xlu1 %v5680_v35, %s6299_s26 }
0x100b   :  { %1604 = vperm.xlu1 %5574, %v1599_v46   ;;  %v1883_v46 = vmul.f32 0.0, %v7031_v41 }
0x104d   :  { %v1459_v20 = vpop.permute.xlu0 %1458  ;;  %v1878_v35 = vpop.permute.xlu2 %1877 }
0x104e   :  { %v1464_v22 = vmul.f32 %v1459_v20, %v1454_v57 }
0x1050   :  { %v1468_v29 = vadd.f32 %v1466_v60, %v1464_v22 }
0x1052   :  { %v7069_v51 = vsel %vm8156_vm10, %v1468_v29, %v6941_v9  ;;  %v1884_v29 = vmul.f32 0.0, %v7035_v54 }
0x1053   :  { %8181 = vst [vmem:[#allocation32_spill] sm:$0xff] %v7069_v51  ;;  %v7078_v55 = vpack.c.bf16 %v7069_v51, %v7069_v51 }
0x1055   :  { %v1461_v27 = vpop.permute.xlu1 %1460  ;;  %v7073_v18 = vpop.permute.xlu0 %1476  ;;  %v1498_v38 = vunpack.c.l.b16 %v7078_v55 }
0x1056   :  { %v1465_v37 = vmul.f32 %v1461_v27, %v1455_v0  ;;  %8182 = vst [vmem:[#allocation33_spill] sm:$0xff] %v7073_v18  ;;  %vm8153_vm12 = vcmp.eq.s32.totalorder %v7073_v18, 1 }
0x1058   :  { %v1469_v14 = vadd.f32 %v1467_v30, %v1465_v37 }
0x105a   :  { %v7083_v33 = vsel %vm8153_vm12, %v1469_v14, %v6955_v25  ;;  %v1872_v25 = vsub.f32 1.0, %v7035_v54 }
0x105b   :  { %8183 = vst [vmem:[#allocation34_spill] sm:$0xff] %v7083_v33  ;;  %v7087_v9 = vpack.c.bf16 %v7083_v33, %v7083_v33 }
0x105c   :  { %v1882_v60 = vmul.f32 %v1878_v35, %v1872_v25 }
0x105d   :  { %v1499_v49 = vunpack.c.l.b16 %v7087_v9  ;;  %v7095_v20 = vpop.permute.xlu0 %1601 }
0x105e   :  { %8184 = vst [vmem:[#allocation35_spill] sm:$0xff] %v7095_v20  ;;  %vm8150_vm15 = vcmp.eq.s32.totalorder %v7095_v20, 1  ;;  %v1886_v27 = vadd.f32 %v1884_v29, %v1882_v60  ;;  %v5324_v60 = vunpack.c.h.bf16 %v6991_v31 }
0x105f   :  { %v1500_v3 = vpack.c.b16 %v1499_v49, %v1498_v38 }
0x1061   :  { %1501 = vrot.lane.b32.xlu2 %v1500_v3, %s6299_s26 }
0x1075   :  { %v1876_v4 = vpop.permute.xlu1 %1875 }
0x1076   :  { %v1881_v57 = vmul.f32 %v1876_v4, %v1871_v21 }
0x1078   :  { %v1885_v22 = vadd.f32 %v1883_v46, %v1881_v57 }
0x107a   :  { %v7101_v0 = vsel %vm8150_vm15, %v1885_v22, 0.0 }
0x107b   :  { %v7108_v41 = vpack.c.bf16 %v7101_v0, %v7101_v0 }
0x107d   :  { %v7103_v30 = vpop.permute.xlu1 %1604  ;;  %8186 = vst [vmem:[#allocation37_spill] sm:$0xff] %v7108_v41  ;;  %v1900_v14 = vunpack.c.l.b16 %v7108_v41 }
0x107e   :  { %8185 = vst [vmem:[#allocation36_spill] sm:$0xff] %v7103_v30  ;;  %vm8147_vm2 = vcmp.eq.s32.totalorder %v7103_v30, 1 }
0x107f   :  { %v7112_v37 = vsel %vm8147_vm2, %v1886_v27, 0.0 }
0x1080   :  { %v7116_v54 = vpack.c.bf16 %v7112_v37, %v7112_v37 }
0x1082   :  { %8187 = vst [vmem:[#allocation38_spill] sm:$0xff] %v7116_v54  ;;  %v1901_v38 = vunpack.c.l.b16 %v7116_v54 }
0x1084   :  { %v1902_v49 = vpack.c.b16 %v1901_v38, %v1900_v14  ;;  %v5323_v38 = vunpack.c.l.bf16 %v6991_v31 }
0x1086   :  { %1903 = vrot.lane.b32.xlu0 %v1902_v49, %s6299_s26 }
0x10bb   :  { %v1502_v3 = vpop.permute.xlu2 %1501 }
0x10bc   :  { %4924 = vmatmul.msk.bf16.vlgmr.msra.gmra.mxu2 %vm605_vm0, %v1502_v3 }
0x10bd   :  { %2138 = vmatpush.bf16.msra.mxu2 %v6971_v47 }
0x10c1   :  { %2139 = vmatpush.bf16.msra.mxu2 %v6974_v44 }
0x10f8   :  { %v1904_v21 = vpop.permute.xlu0 %1903 }
0x10f9   :  { %4969 = vmatmul.msk.bf16.vlgmr.msrb.gmra.mxu2 %vm605_vm0, %v1904_v21 }
0x10fa   :  { %2362 = vmatpush.bf16.msrb.mxu2 %v6971_v47 }
0x10fe   :  { %2363 = vmatpush.bf16.msrb.mxu2 %v6974_v44 }
0x113f   :  { %v7127_v4 = vpop.f32.mrf.mxu2 }
0x1140   :  { %8188 = vst [vmem:[#allocation39_spill] sm:$0xff] %v7127_v4 }
0x1147   :  { %v7129_v35 = vpop.f32.mrf.mxu2 }
0x1148   :  { %8189 = vst [vmem:[#allocation40_spill] sm:$0xff] %v7129_v35 }
0x117c   :  { %v1917_v46 = vpop.f32.mrf.mxu2 }
0x117d   :  { %v1918_v57 = vadd.f32 %v6997_v36, %v1917_v46 }
0x117f   :  { %1964 = vrot.lane.b32.xlu1 %v1918_v57, %s6286_s27  ;;  %v1922_v49 = vadd.f32 %v5323_v38, %v1918_v57 }
0x1181   :  { %v4970_v21 = vmul.f32 -1.442695, %v1922_v49 }
0x1184   :  { %v1919_v25 = vpop.f32.mrf.mxu2 }
0x1185   :  { %v1920_v22 = vadd.f32 %v6997_v36, %v1919_v25 }
0x1187   :  { %1966 = vrot.lane.b32.xlu2 %v1920_v22, %s6286_s27  ;;  %v1923_v29 = vadd.f32 %v5324_v60, %v1920_v22 }
0x1189   :  { %v4971_v27 = vmul.f32 -1.442695, %v1923_v29 }
0x118b   :  { %5681 = vpow2.f32 %v4971_v27 }
0x1191   :  { %v5682_v14 = vpop.eup %5681 }
0x1192   :  { %v1931_v3 = vadd.f32 1.0, %v5682_v14 }
0x1194   :  { %5683 = vrcp.f32 %v1931_v3  ;;  %v1958_v29 = vand.u32 2147483648, %v1931_v3  ;;  %vm1952_vm5 = vweird.f32 %v1931_v3  ;;  %v1956_v27 = vand.u32 2147483647, %v1931_v3 }
0x1195   :  { %5685 = vpow2.f32 %v4970_v21 }
0x1196   :  { %v1959_v14 = vor.u32 1.1754944e-38, %v1958_v29  ;;  %vm1957_vm2 = vcmp.eq.f32.partialorder %v1956_v27, 8.507059e+37 }
0x119a   :  { %v5684_v46 = vpop.eup %5683 }
0x119b   :  { %v5686_v54 = vpop.eup %5685  ;;  %v1948_v41 = vmul.f32 %v5684_v46, %v1931_v3  ;;  %vm1953_vm11 = vweird.f32 %v5684_v46 }
0x119c   :  { %v1930_v30 = vadd.f32 1.0, %v5686_v54  ;;  %vm1954_vm9 = vmor %vm1952_vm5, %vm1953_vm11 }
0x119d   :  { %v1949_v25 = vsub.f32 1.0, %v1948_v41 }
0x119e   :  { %5687 = vrcp.f32 %v1930_v30  ;;  %vm1937_vm3 = vweird.f32 %v1930_v30 }
0x119f   :  { %v1950_v33 = vmul.f32 %v5684_v46, %v1949_v25  ;;  %v1941_v25 = vand.u32 2147483647, %v1930_v30 }
0x11a1   :  { %v1951_v20 = vadd.f32 %v5684_v46, %v1950_v33  ;;  %v1943_v33 = vand.u32 2147483648, %v1930_v30  ;;  %vm1942_vm11 = vcmp.eq.f32.partialorder %v1941_v25, 8.507059e+37 }
0x11a3   :  { %v1955_v31 = vsel %vm1954_vm9, %v5684_v46, %v1951_v20  ;;  %v1944_v3 = vor.u32 1.1754944e-38, %v1943_v33 }
0x11a4   :  { %v5688_v22 = vpop.eup %5687  ;;  %v1960_v21 = vsel %vm1957_vm2, %v1959_v14, %v1955_v31 }
0x11a5   :  { %v1933_v57 = vmul.f32 %v5688_v22, %v1930_v30  ;;  %vm1938_vm15 = vweird.f32 %v5688_v22  ;;  %v1997_v25 = vmul.f32 %v1960_v21, %v7112_v37 }
0x11a6   :  { %vm1939_vm1 = vmor %vm1937_vm3, %vm1938_vm15 }
0x11a7   :  { %v1934_v35 = vsub.f32 1.0, %v1933_v57 }
0x11a9   :  { %v1935_v41 = vmul.f32 %v5688_v22, %v1934_v35 }
0x11ab   :  { %v1936_v54 = vadd.f32 %v5688_v22, %v1935_v41 }
0x11ad   :  { %v1940_v4 = vsel %vm1939_vm1, %v5688_v22, %v1936_v54  ;;  %v1985_v54 = vsub.f32 1.0, %v1960_v21 }
0x11ae   :  { %v1945_v46 = vsel %vm1942_vm11, %v1944_v3, %v1940_v4 }
0x11af   :  { %v1984_v30 = vsub.f32 1.0, %v1945_v46  ;;  %v1996_v4 = vmul.f32 %v1945_v46, %v7101_v0 }
0x11e1   :  { %v1967_v49 = vpop.permute.xlu2 %1966 }
0x11e2   :  { %v1971_v51 = vmul.f32 %v1967_v49, %v1960_v21 }
0x11e4   :  { %1976 = vrot.lane.b32.xlu1 %v1971_v51, %s6286_s27 }
0x11f1   :  { %v1965_v20 = vpop.permute.xlu1 %1964 }
0x11f2   :  { %v1970_v29 = vmul.f32 %v1965_v20, %v1945_v46 }
0x11f4   :  { %1974 = vrot.lane.b32.xlu0 %v1970_v29, %s6286_s27 }
0x1256   :  { %v1977_v27 = vpop.permute.xlu1 %1976 }
0x1257   :  { %v1981_v31 = vadd.f32 %v5324_v60, %v1977_v27 }
0x1259   :  { %5689 = vtanh.f32 %v1981_v31 }
0x125f   :  { %v5690_v57 = vpop.eup %5689 }
0x1260   :  { %1990 = vrot.lane.b32.xlu0 %v5690_v57, %s6299_s26 }
0x1266   :  { %v1975_v51 = vpop.permute.xlu0 %1974 }
0x1267   :  { %v1980_v35 = vadd.f32 %v5323_v38, %v1975_v51 }
0x1269   :  { %5691 = vtanh.f32 %v1980_v35 }
0x126f   :  { %v5692_v14 = vpop.eup %5691 }
0x1270   :  { %1988 = vrot.lane.b32.xlu2 %v5692_v14, %s6299_s26  ;;  %v1735_v14 = vadd.f32 %v6887_v10, %v6984_v8 }
0x12ca   :  { %v1989_v22 = vpop.permute.xlu2 %1988 }
0x12cb   :  { %v1994_v49 = vmul.f32 %v1989_v22, %v1984_v30  ;;  %v1733_v30 = vadd.f32 %v6887_v10, %v6981_v16 }
0x12cd   :  { %v1998_v41 = vadd.f32 %v1996_v4, %v1994_v49  ;;  %v5305_v22 = vpack.c.bf16 %v1735_v14, %v1733_v30 }
0x12cf   :  { %v7145_v60 = vsel %vm8156_vm10, %v1998_v41, %v7101_v0  ;;  %v5327_v49 = vunpack.c.l.bf16 %v5305_v22 }
0x12d0   :  { %v7150_v20 = vpack.c.bf16 %v7145_v60, %v7145_v60 }
0x12d2   :  { %v1991_v33 = vpop.permute.xlu0 %1990  ;;  %v2012_v0 = vunpack.c.l.b16 %v7150_v20 }
0x12d3   :  { %v1995_v38 = vmul.f32 %v1991_v33, %v1985_v54 }
0x12d5   :  { %v1999_v3 = vadd.f32 %v1997_v25, %v1995_v38  ;;  %v5328_v38 = vunpack.c.h.bf16 %v5305_v22 }
0x12d7   :  { %v7155_v46 = vsel %vm8153_vm12, %v1999_v3, %v7112_v37 }
0x12d8   :  { %v7159_v29 = vpack.c.bf16 %v7155_v46, %v7155_v46 }
0x12da   :  { %v2013_v27 = vunpack.c.l.b16 %v7159_v29 }
0x12dc   :  { %v2014_v21 = vpack.c.b16 %v2013_v27, %v2012_v0 }
0x12de   :  { %2015 = vrot.lane.b32.xlu1 %v2014_v21, %s6299_s26 }
0x1350   :  { %v2016_v31 = vpop.permute.xlu1 %2015 }
0x1351   :  { %4972 = vmatmul.msk.bf16.vlgmr.msra.gmra.mxu1 %vm605_vm0, %v2016_v31 }
0x1352   :  { %2474 = vmatpush.bf16.msra.mxu1 %v6971_v47 }
0x1356   :  { %2475 = vmatpush.bf16.msra.mxu1 %v6974_v44 }
0x13ce   :  { %v2029_v37 = vpop.f32.mrf.mxu1 }
0x13cf   :  { %v2030_v57 = vadd.f32 %v6997_v36, %v2029_v37 }
0x13d1   :  { %2076 = vrot.lane.b32.xlu2 %v2030_v57, %s6286_s27  ;;  %v2034_v4 = vadd.f32 %v5327_v49, %v2030_v57 }
0x13d3   :  { %v4973_v41 = vmul.f32 -1.442695, %v2034_v4 }
0x13d5   :  { %5693 = vpow2.f32 %v4973_v41 }
0x13d6   :  { %v2031_v51 = vpop.f32.mrf.mxu1 }
0x13d7   :  { %v2032_v35 = vadd.f32 %v6997_v36, %v2031_v51 }
0x13d9   :  { %2078 = vrot.lane.b32.xlu0 %v2032_v35, %s6286_s27  ;;  %v2035_v0 = vadd.f32 %v5328_v38, %v2032_v35 }
0x13db   :  { %v5694_v54 = vpop.eup %5693  ;;  %v4974_v21 = vmul.f32 -1.442695, %v2035_v0 }
0x13dc   :  { %v2042_v33 = vadd.f32 1.0, %v5694_v54 }
0x13de   :  { %5695 = vrcp.f32 %v2042_v33  ;;  %v2055_v37 = vand.u32 2147483648, %v2042_v33  ;;  %vm2049_vm3 = vweird.f32 %v2042_v33  ;;  %v2053_v10 = vand.u32 2147483647, %v2042_v33 }
0x13df   :  { %5697 = vpow2.f32 %v4974_v21 }
0x13e0   :  { %v2056_v51 = vor.u32 1.1754944e-38, %v2055_v37  ;;  %vm2054_vm2 = vcmp.eq.f32.partialorder %v2053_v10, 8.507059e+37 }
0x13e4   :  { %v5696_v25 = vpop.eup %5695 }
0x13e5   :  { %v2045_v3 = vmul.f32 %v5696_v25, %v2042_v33  ;;  %vm2050_vm1 = vweird.f32 %v5696_v25  ;;  %v5698_v16 = vpop.eup %5697 }
0x13e6   :  { %vm2051_vm15 = vmor %vm2049_vm3, %vm2050_vm1  ;;  %v2043_v14 = vadd.f32 1.0, %v5698_v16 }
0x13e7   :  { %v2046_v27 = vsub.f32 1.0, %v2045_v3 }
0x13e8   :  { %5699 = vrcp.f32 %v2043_v14  ;;  %vm2064_vm9 = vweird.f32 %v2043_v14  ;;  %v2068_v33 = vand.u32 2147483647, %v2043_v14 }
0x13e9   :  { %v2047_v31 = vmul.f32 %v5696_v25, %v2046_v27  ;;  %v2070_v27 = vand.u32 2147483648, %v2043_v14 }
0x13ea   :  { %vm2069_vm1 = vcmp.eq.f32.partialorder %v2068_v33, 8.507059e+37 }
0x13eb   :  { %v2048_v8 = vadd.f32 %v5696_v25, %v2047_v31  ;;  %v2071_v21 = vor.u32 1.1754944e-38, %v2070_v27 }
0x13ed   :  { %v2052_v57 = vsel %vm2051_vm15, %v5696_v25, %v2048_v8 }
0x13ee   :  { %v2057_v4 = vsel %vm2054_vm2, %v2056_v51, %v2052_v57  ;;  %v5700_v35 = vpop.eup %5699 }
0x13ef   :  { %v2060_v41 = vmul.f32 %v5700_v35, %v2043_v14  ;;  %vm2065_vm5 = vweird.f32 %v5700_v35  ;;  %v2096_v14 = vsub.f32 1.0, %v2057_v4 }
0x13f0   :  { %vm2066_vm11 = vmor %vm2064_vm9, %vm2065_vm5 }
0x13f1   :  { %v2061_v54 = vsub.f32 1.0, %v2060_v41 }
0x13f3   :  { %v2062_v3 = vmul.f32 %v5700_v35, %v2061_v54  ;;  %v2108_v54 = vmul.f32 %v2057_v4, %v7145_v60 }
0x13f5   :  { %v2063_v0 = vadd.f32 %v5700_v35, %v2062_v3 }
0x13f7   :  { %v2067_v25 = vsel %vm2066_vm11, %v5700_v35, %v2063_v0 }
0x13f8   :  { %v2072_v8 = vsel %vm2069_vm1, %v2071_v21, %v2067_v25 }
0x13f9   :  { %v2097_v0 = vsub.f32 1.0, %v2072_v8 }
0x142b   :  { %v2077_v30 = vpop.permute.xlu2 %2076 }
0x142c   :  { %v2082_v22 = vmul.f32 %v2077_v30, %v2057_v4 }
0x142e   :  { %2086 = vrot.lane.b32.xlu1 %v2082_v22, %s6286_s27 }
0x144b   :  { %v2079_v31 = vpop.permute.xlu0 %2078 }
0x144c   :  { %v2083_v37 = vmul.f32 %v2079_v31, %v2072_v8 }
0x144e   :  { %2088 = vrot.lane.b32.xlu2 %v2083_v37, %s6286_s27 }
0x14a0   :  { %v2087_v10 = vpop.permute.xlu1 %2086 }
0x14a1   :  { %v2092_v16 = vadd.f32 %v5327_v49, %v2087_v10 }
0x14a3   :  { %5701 = vtanh.f32 %v2092_v16 }
0x14a8   :  { %v2089_v57 = vpop.permute.xlu2 %2088 }
0x14a9   :  { %v5702_v51 = vpop.eup %5701  ;;  %v2093_v30 = vadd.f32 %v5328_v38, %v2089_v57  ;;  %v2109_v38 = vmul.f32 %v2072_v8, %v7155_v46 }
0x14aa   :  { %2100 = vrot.lane.b32.xlu0 %v5702_v51, %s6299_s26 }
0x14ab   :  { %5703 = vtanh.f32 %v2093_v30  ;;  %v5331_v30 = vunpack.c.l.bf16 %v6898_v39 }
0x14b1   :  { %v5704_v22 = vpop.eup %5703 }
0x14b2   :  { %2102 = vrot.lane.b32.xlu1 %v5704_v22, %s6299_s26 }
0x151c   :  { %v2101_v35 = vpop.permute.xlu0 %2100 }
0x151d   :  { %v2106_v41 = vmul.f32 %v2101_v35, %v2096_v14  ;;  %v5332_v35 = vunpack.c.h.bf16 %v6898_v39 }
0x151f   :  { %v2110_v3 = vadd.f32 %v2108_v54, %v2106_v41 }
0x1521   :  { %v7183_v49 = vsel %vm8158_vm14, %v2110_v3, %v7145_v60 }
0x1522   :  { %v7188_v21 = vpack.c.bf16 %v7183_v49, %v7183_v49 }
0x1524   :  { %v2103_v27 = vpop.permute.xlu1 %2102  ;;  %v2124_v60 = vunpack.c.l.b16 %v7188_v21 }
0x1525   :  { %v2107_v33 = vmul.f32 %v2103_v27, %v2097_v0 }
0x1527   :  { %v2111_v25 = vadd.f32 %v2109_v38, %v2107_v33 }
0x1529   :  { %v7193_v4 = vsel %vm8157_vm13, %v2111_v25, %v7155_v46 }
0x152a   :  { %v7197_v31 = vpack.c.bf16 %v7193_v4, %v7193_v4 }
0x152c   :  { %v2125_v37 = vunpack.c.l.b16 %v7197_v31 }
0x152e   :  { %v2126_v8 = vpack.c.b16 %v2125_v37, %v2124_v60 }
0x1530   :  { %2127 = vrot.lane.b32.xlu2 %v2126_v8, %s6299_s26 }
0x158a   :  { %v2128_v10 = vpop.permute.xlu2 %2127 }
0x158b   :  { %4975 = vmatmul.msk.bf16.vlgmr.msra.gmra.mxu2 %vm605_vm0, %v2128_v10 }
0x158c   :  { %2586 = vmatpush.bf16.msra.mxu2 %v6971_v47 }
0x1590   :  { %2587 = vmatpush.bf16.msra.mxu2 %v6974_v44 }
0x160e   :  { %v2141_v46 = vpop.f32.mrf.mxu2 }
0x160f   :  { %v2142_v16 = vadd.f32 %v6997_v36, %v2141_v46 }
0x1611   :  { %2188 = vrot.lane.b32.xlu0 %v2142_v16, %s6286_s27  ;;  %v2146_v22 = vadd.f32 %v5331_v30, %v2142_v16 }
0x1613   :  { %v4976_v14 = vmul.f32 -1.442695, %v2146_v22 }
0x1615   :  { %5705 = vpow2.f32 %v4976_v14 }
0x1616   :  { %v2143_v57 = vpop.f32.mrf.mxu2 }
0x1617   :  { %v2144_v51 = vadd.f32 %v6997_v36, %v2143_v57 }
0x1619   :  { %2190 = vrot.lane.b32.xlu1 %v2144_v51, %s6286_s27  ;;  %v2147_v47 = vadd.f32 %v5332_v35, %v2144_v51 }
0x161b   :  { %v4977_v41 = vmul.f32 -1.442695, %v2147_v47  ;;  %v5706_v44 = vpop.eup %5705 }
0x161c   :  { %v2154_v54 = vadd.f32 1.0, %v5706_v44 }
0x161d   :  { %5707 = vpow2.f32 %v4977_v41 }
0x161e   :  { %5709 = vrcp.f32 %v2154_v54  ;;  %v2167_v39 = vand.u32 2147483648, %v2154_v54  ;;  %vm2161_vm15 = vweird.f32 %v2154_v54  ;;  %v2165_v46 = vand.u32 2147483647, %v2154_v54 }
0x1620   :  { %v2168_v51 = vor.u32 1.1754944e-38, %v2167_v39  ;;  %vm2166_vm5 = vcmp.eq.f32.partialorder %v2165_v46, 8.507059e+37 }
0x1623   :  { %v5708_v3 = vpop.eup %5707 }
0x1624   :  { %v2155_v0 = vadd.f32 1.0, %v5708_v3  ;;  %v5710_v27 = vpop.eup %5709 }
0x1625   :  { %v2157_v38 = vmul.f32 %v5710_v27, %v2154_v54  ;;  %vm2162_vm3 = vweird.f32 %v5710_v27 }
0x1626   :  { %5711 = vrcp.f32 %v2155_v0  ;;  %vm2163_vm2 = vmor %vm2161_vm15, %vm2162_vm3  ;;  %v2182_v44 = vand.u32 2147483648, %v2155_v0  ;;  %vm2176_vm11 = vweird.f32 %v2155_v0  ;;  %v2180_v3 = vand.u32 2147483647, %v2155_v0 }
0x1627   :  { %v2158_v33 = vsub.f32 1.0, %v2157_v38 }
0x1628   :  { %vm2181_vm12 = vcmp.eq.f32.partialorder %v2180_v3, 8.507059e+37 }
0x1629   :  { %v2159_v60 = vmul.f32 %v5710_v27, %v2158_v33  ;;  %v2183_v33 = vor.u32 1.1754944e-38, %v2182_v44 }
0x162b   :  { %v2160_v8 = vadd.f32 %v5710_v27, %v2159_v60 }
0x162c   :  { %v5712_v25 = vpop.eup %5711 }
0x162d   :  { %v2172_v37 = vmul.f32 %v5712_v25, %v2155_v0  ;;  %v2164_v16 = vsel %vm2163_vm2, %v5710_v27, %v2160_v8  ;;  %vm2177_vm9 = vweird.f32 %v5712_v25 }
0x162e   :  { %v2169_v14 = vsel %vm2166_vm5, %v2168_v51, %v2164_v16  ;;  %vm2178_vm1 = vmor %vm2176_vm11, %vm2177_vm9 }
0x162f   :  { %v2173_v10 = vsub.f32 1.0, %v2172_v37  ;;  %v2208_v0 = vsub.f32 1.0, %v2169_v14  ;;  %v2220_v51 = vmul.f32 %v2169_v14, %v7183_v49 }
0x1631   :  { %v2174_v57 = vmul.f32 %v5712_v25, %v2173_v10 }
0x1633   :  { %v2175_v41 = vadd.f32 %v5712_v25, %v2174_v57 }
0x1635   :  { %v2179_v38 = vsel %vm2178_vm1, %v5712_v25, %v2175_v41 }
0x1636   :  { %v2184_v60 = vsel %vm2181_vm12, %v2183_v33, %v2179_v38 }
0x1637   :  { %v2221_v44 = vmul.f32 %v2184_v60, %v7193_v4 }
0x1683   :  { %v2189_v22 = vpop.permute.xlu0 %2188 }
0x1684   :  { %v2194_v47 = vmul.f32 %v2189_v22, %v2169_v14 }
0x1686   :  { %2198 = vrot.lane.b32.xlu2 %v2194_v47, %s6286_s27  ;;  %v2209_v47 = vsub.f32 1.0, %v2184_v60 }
0x168b   :  { %v2191_v54 = vpop.permute.xlu1 %2190 }
0x168c   :  { %v2195_v27 = vmul.f32 %v2191_v54, %v2184_v60 }
0x168e   :  { %2200 = vrot.lane.b32.xlu0 %v2195_v27, %s6286_s27 }
0x16e0   :  { %v2199_v37 = vpop.permute.xlu2 %2198 }
0x16e1   :  { %v2204_v8 = vadd.f32 %v5331_v30, %v2199_v37 }
0x16e3   :  { %5713 = vtanh.f32 %v2204_v8 }
0x16e9   :  { %v5714_v10 = vpop.eup %5713 }
0x16ea   :  { %2212 = vrot.lane.b32.xlu1 %v5714_v10, %s6299_s26 }
0x1700   :  { %v2201_v39 = vpop.permute.xlu0 %2200 }
0x1701   :  { %v2205_v46 = vadd.f32 %v5332_v35, %v2201_v39  ;;  %v5336_v39 = vunpack.c.h.bf16 %v6892_v26 }
0x1703   :  { %5715 = vtanh.f32 %v2205_v46 }
0x1709   :  { %v5716_v16 = vpop.eup %5715 }
0x170a   :  { %2214 = vrot.lane.b32.xlu2 %v5716_v16, %s6299_s26 }
0x175c   :  { %v2213_v25 = vpop.permute.xlu1 %2212 }
0x175d   :  { %v2218_v57 = vmul.f32 %v2213_v25, %v2208_v0  ;;  %v5335_v25 = vunpack.c.l.bf16 %v6892_v26 }
0x175f   :  { %v2222_v22 = vadd.f32 %v2220_v51, %v2218_v57 }
0x1761   :  { %v7219_v30 = vsel %vm1222_vm4, %v2222_v22, %v7183_v49 }
0x1762   :  { %v7224_v38 = vpack.c.bf16 %v7219_v30, %v7219_v30 }
0x1764   :  { %v2215_v41 = vpop.permute.xlu2 %2214  ;;  %v2236_v49 = vunpack.c.l.b16 %v7224_v38 }
0x1765   :  { %v2219_v35 = vmul.f32 %v2215_v41, %v2209_v47 }
0x1767   :  { %v2223_v3 = vadd.f32 %v2221_v44, %v2219_v35 }
0x1769   :  { %v7229_v14 = vsel %vm1223_vm7, %v2223_v3, %v7193_v4 }
0x176a   :  { %v7233_v33 = vpack.c.bf16 %v7229_v14, %v7229_v14 }
0x176c   :  { %v2237_v54 = vunpack.c.l.b16 %v7233_v33 }
0x176e   :  { %v2238_v60 = vpack.c.b16 %v2237_v54, %v2236_v49 }
0x1770   :  { %2239 = vrot.lane.b32.xlu0 %v2238_v60, %s6299_s26 }
0x17e2   :  { %v2240_v27 = vpop.permute.xlu0 %2239 }
0x17e3   :  { %4978 = vmatmul.msk.bf16.vlgmr.msrb.gmra.mxu1 %vm605_vm0, %v2240_v27 }
0x1860   :  { %v2253_v37 = vpop.f32.mrf.mxu1 }
0x1861   :  { %v2254_v8 = vadd.f32 %v6997_v36, %v2253_v37 }
0x1863   :  { %2300 = vrot.lane.b32.xlu1 %v2254_v8, %s6286_s27  ;;  %v2258_v57 = vadd.f32 %v5335_v25, %v2254_v8 }
0x1865   :  { %v4979_v22 = vmul.f32 -1.442695, %v2258_v57 }
0x1868   :  { %v2255_v4 = vpop.f32.mrf.mxu1 }
0x1869   :  { %v2256_v10 = vadd.f32 %v6997_v36, %v2255_v4 }
0x186b   :  { %2302 = vrot.lane.b32.xlu2 %v2256_v10, %s6286_s27  ;;  %v2259_v46 = vadd.f32 %v5336_v39, %v2256_v10 }
0x186d   :  { %v4980_v16 = vmul.f32 -1.442695, %v2259_v46 }
0x186f   :  { %5717 = vpow2.f32 %v4980_v16 }
0x1875   :  { %v5718_v0 = vpop.eup %5717 }
0x1876   :  { %v2267_v51 = vadd.f32 1.0, %v5718_v0 }
0x1878   :  { %5719 = vrcp.f32 %v2267_v51  ;;  %v2294_v60 = vand.u32 2147483648, %v2267_v51  ;;  %vm2288_vm3 = vweird.f32 %v2267_v51  ;;  %v2292_v27 = vand.u32 2147483647, %v2267_v51 }
0x1879   :  { %5721 = vpow2.f32 %v4979_v22 }
0x187a   :  { %v2295_v8 = vor.u32 1.1754944e-38, %v2294_v60  ;;  %vm2293_vm2 = vcmp.eq.f32.partialorder %v2292_v27, 8.507059e+37 }
0x187e   :  { %v5720_v47 = vpop.eup %5719 }
0x187f   :  { %v5722_v41 = vpop.eup %5721  ;;  %v2284_v44 = vmul.f32 %v5720_v47, %v2267_v51  ;;  %vm2289_vm12 = vweird.f32 %v5720_v47 }
0x1880   :  { %v2266_v35 = vadd.f32 1.0, %v5722_v41  ;;  %vm2290_vm15 = vmor %vm2288_vm3, %vm2289_vm12 }
0x1881   :  { %v2285_v36 = vsub.f32 1.0, %v2284_v44 }
0x1882   :  { %5723 = vrcp.f32 %v2266_v35  ;;  %v2279_v22 = vand.u32 2147483648, %v2266_v35  ;;  %vm2273_vm9 = vweird.f32 %v2266_v35  ;;  %v2277_v41 = vand.u32 2147483647, %v2266_v35 }
0x1883   :  { %v2286_v3 = vmul.f32 %v5720_v47, %v2285_v36 }
0x1884   :  { %v2280_v51 = vor.u32 1.1754944e-38, %v2279_v22  ;;  %vm2278_vm1 = vcmp.eq.f32.partialorder %v2277_v41, 8.507059e+37 }
0x1885   :  { %v2287_v49 = vadd.f32 %v5720_v47, %v2286_v3 }
0x1887   :  { %v2291_v26 = vsel %vm2290_vm15, %v5720_v47, %v2287_v49 }
0x1888   :  { %v5724_v54 = vpop.eup %5723  ;;  %v2296_v10 = vsel %vm2293_vm2, %v2295_v8, %v2291_v26 }
0x1889   :  { %v2269_v37 = vmul.f32 %v5724_v54, %v2266_v35  ;;  %vm2274_vm5 = vweird.f32 %v5724_v54  ;;  %v2333_v22 = vmul.f32 %v2296_v10, %v7229_v14 }
0x188a   :  { %vm2275_vm11 = vmor %vm2273_vm9, %vm2274_vm5 }
0x188b   :  { %v2270_v16 = vsub.f32 1.0, %v2269_v37 }
0x188d   :  { %v2271_v0 = vmul.f32 %v5724_v54, %v2270_v16 }
0x188f   :  { %v2272_v57 = vadd.f32 %v5724_v54, %v2271_v0  ;;  %v2321_v0 = vsub.f32 1.0, %v2296_v10 }
0x1891   :  { %v2276_v44 = vsel %vm2275_vm11, %v5724_v54, %v2272_v57 }
0x1892   :  { %v2281_v36 = vsel %vm2278_vm1, %v2280_v51, %v2276_v44 }
0x1893   :  { %v2320_v35 = vsub.f32 1.0, %v2281_v36 }
0x18c5   :  { %v2303_v4 = vpop.permute.xlu2 %2302 }
0x18c6   :  { %v2307_v46 = vmul.f32 %v2303_v4, %v2296_v10 }
0x18c8   :  { %2312 = vrot.lane.b32.xlu1 %v2307_v46, %s6286_s27  ;;  %v2332_v46 = vmul.f32 %v2281_v36, %v7219_v30 }
0x18d5   :  { %v2301_v47 = vpop.permute.xlu1 %2300 }
0x18d6   :  { %v2306_v3 = vmul.f32 %v2301_v47, %v2281_v36 }
0x18d8   :  { %2310 = vrot.lane.b32.xlu0 %v2306_v3, %s6286_s27 }
0x193a   :  { %v2313_v49 = vpop.permute.xlu1 %2312 }
0x193b   :  { %v2317_v60 = vadd.f32 %v5336_v39, %v2313_v49 }
0x193d   :  { %5725 = vtanh.f32 %v2317_v60  ;;  %v7273_v60 = vld [vmem:[#allocation13] ss:$0 sm:$0xff] }
0x1943   :  { %v5726_v27 = vpop.eup %5725 }
0x1944   :  { %2326 = vrot.lane.b32.xlu0 %v5726_v27, %s6299_s26 }
0x194a   :  { %v2311_v26 = vpop.permute.xlu0 %2310 }
0x194b   :  { %v2316_v37 = vadd.f32 %v5335_v25, %v2311_v26 }
0x194d   :  { %5727 = vtanh.f32 %v2316_v37  ;;  %v7279_v37 = vld [vmem:[#allocation12] ss:$0 sm:$0xff] }
0x1953   :  { %v5728_v8 = vpop.eup %5727 }
0x1954   :  { %2324 = vrot.lane.b32.xlu2 %v5728_v8, %s6299_s26  ;;  %v1720_v8 = vadd.f32 %v7279_v37, %v6876_v48 }
0x19ae   :  { %v2325_v54 = vpop.permute.xlu2 %2324 }
0x19af   :  { %v2330_v4 = vmul.f32 %v2325_v54, %v2320_v35  ;;  %v1718_v35 = vadd.f32 %v7279_v37, %v6874_v19 }
0x19b1   :  { %v2334_v16 = vadd.f32 %v2332_v46, %v2330_v4  ;;  %v5290_v54 = vpack.c.bf16 %v1720_v8, %v1718_v35 }
0x19b3   :  { %v7253_v39 = vsel %vm1094_vm6, %v2334_v16, %v7219_v30  ;;  %v5339_v4 = vunpack.c.l.bf16 %v5290_v54 }
0x19b4   :  { %v7258_v44 = vpack.c.bf16 %v7253_v39, %v7253_v39 }
0x19b6   :  { %v2327_v57 = vpop.permute.xlu0 %2326  ;;  %v2348_v30 = vunpack.c.l.b16 %v7258_v44 }
0x19b7   :  { %v2331_v25 = vmul.f32 %v2327_v57, %v2321_v0 }
0x19b9   :  { %v2335_v41 = vadd.f32 %v2333_v22, %v2331_v25  ;;  %v5340_v25 = vunpack.c.h.bf16 %v5290_v54 }
0x19bb   :  { %v7263_v51 = vsel %vm1095_vm8, %v2335_v41, %v7229_v14 }
0x19bc   :  { %v7267_v47 = vpack.c.bf16 %v7263_v51, %v7263_v51 }
0x19be   :  { %v2349_v36 = vunpack.c.l.b16 %v7267_v47 }
0x19c0   :  { %v2350_v10 = vpack.c.b16 %v2349_v36, %v2348_v30 }
0x19c2   :  { %2351 = vrot.lane.b32.xlu1 %v2350_v10, %s6299_s26 }
0x1a34   :  { %v2352_v3 = vpop.permute.xlu1 %2351 }
0x1a35   :  { %4981 = vmatmul.msk.bf16.vlgmr.msrb.gmra.mxu2 %vm605_vm0, %v2352_v3 }
0x1ab8   :  { %v2365_v49 = vpop.f32.mrf.mxu2 }
0x1ab9   :  { %v2366_v14 = vadd.f32 %v7273_v60, %v2365_v49 }
0x1abb   :  { %2412 = vrot.lane.b32.xlu2 %v2366_v14, %s6286_s27  ;;  %v2370_v46 = vadd.f32 %v5339_v4, %v2366_v14 }
0x1abd   :  { %v4982_v16 = vmul.f32 -1.442695, %v2370_v46 }
0x1abf   :  { %5729 = vpow2.f32 %v4982_v16 }
0x1ac0   :  { %v2367_v27 = vpop.f32.mrf.mxu2 }
0x1ac1   :  { %v2368_v26 = vadd.f32 %v7273_v60, %v2367_v27 }
0x1ac3   :  { %2414 = vrot.lane.b32.xlu0 %v2368_v26, %s6286_s27  ;;  %v2371_v30 = vadd.f32 %v5340_v25, %v2368_v26 }
0x1ac5   :  { %v5730_v0 = vpop.eup %5729  ;;  %v4983_v10 = vmul.f32 -1.442695, %v2371_v30 }
0x1ac6   :  { %v2378_v57 = vadd.f32 1.0, %v5730_v0 }
0x1ac8   :  { %5731 = vrcp.f32 %v2378_v57  ;;  %v2391_v49 = vand.u32 2147483648, %v2378_v57  ;;  %vm2385_vm3 = vweird.f32 %v2378_v57  ;;  %v2389_v19 = vand.u32 2147483647, %v2378_v57 }
0x1ac9   :  { %5733 = vpow2.f32 %v4983_v10 }
0x1aca   :  { %v2392_v8 = vor.u32 1.1754944e-38, %v2391_v49  ;;  %vm2390_vm2 = vcmp.eq.f32.partialorder %v2389_v19, 8.507059e+37 }
0x1ace   :  { %v5732_v22 = vpop.eup %5731 }
0x1acf   :  { %v2381_v41 = vmul.f32 %v5732_v22, %v2378_v57  ;;  %vm2386_vm12 = vweird.f32 %v5732_v22  ;;  %v5734_v14 = vpop.eup %5733 }
0x1ad0   :  { %vm2387_vm15 = vmor %vm2385_vm3, %vm2386_vm12  ;;  %v2379_v35 = vadd.f32 1.0, %v5734_v14  ;;  %vm8190_vm12 = vcmp.eq.s32.totalorder %v6683_v45, 1  ;;  %vm8191_vm3 = vcmp.eq.s32.totalorder %v6692_v56, 1 }
0x1ad1   :  { %v2382_v36 = vsub.f32 1.0, %v2381_v41 }
0x1ad2   :  { %5735 = vrcp.f32 %v2379_v35  ;;  %v2406_v10 = vand.u32 2147483648, %v2379_v35  ;;  %vm2400_vm9 = vweird.f32 %v2379_v35  ;;  %v2404_v57 = vand.u32 2147483647, %v2379_v35 }
0x1ad3   :  { %v2383_v3 = vmul.f32 %v5732_v22, %v2382_v36 }
0x1ad4   :  { %vm2405_vm1 = vcmp.eq.f32.partialorder %v2404_v57, 8.507059e+37 }
0x1ad5   :  { %v2384_v48 = vadd.f32 %v5732_v22, %v2383_v3  ;;  %v2407_v3 = vor.u32 1.1754944e-38, %v2406_v10 }
0x1ad7   :  { %v2388_v27 = vsel %vm2387_vm15, %v5732_v22, %v2384_v48 }
0x1ad8   :  { %v2393_v16 = vsel %vm2390_vm2, %v2392_v8, %v2388_v27  ;;  %v5736_v26 = vpop.eup %5735 }
0x1ad9   :  { %v2396_v0 = vmul.f32 %v5736_v26, %v2379_v35  ;;  %vm2401_vm5 = vweird.f32 %v5736_v26  ;;  %v2432_v35 = vsub.f32 1.0, %v2393_v16 }
0x1ada   :  { %vm2402_vm11 = vmor %vm2400_vm9, %vm2401_vm5 }
0x1adb   :  { %v2397_v41 = vsub.f32 1.0, %v2396_v0 }
0x1add   :  { %v2398_v30 = vmul.f32 %v5736_v26, %v2397_v41 }
0x1adf   :  { %v2399_v36 = vadd.f32 %v5736_v26, %v2398_v30  ;;  %v2444_v30 = vmul.f32 %v2393_v16, %v7253_v39 }
0x1ae1   :  { %v2403_v22 = vsel %vm2402_vm11, %v5736_v26, %v2399_v36 }
0x1ae2   :  { %v2408_v49 = vsel %vm2405_vm1, %v2407_v3, %v2403_v22 }
0x1ae3   :  { %v2433_v10 = vsub.f32 1.0, %v2408_v49 }
0x1b15   :  { %v2413_v46 = vpop.permute.xlu2 %2412 }
0x1b16   :  { %v2418_v54 = vmul.f32 %v2413_v46, %v2393_v16 }
0x1b18   :  { %2422 = vrot.lane.b32.xlu1 %v2418_v54, %s6286_s27 }
0x1b35   :  { %v2415_v48 = vpop.permute.xlu0 %2414 }
0x1b36   :  { %v2419_v19 = vmul.f32 %v2415_v48, %v2408_v49 }
0x1b38   :  { %2424 = vrot.lane.b32.xlu2 %v2419_v19, %s6286_s27 }
0x1b8a   :  { %v2423_v14 = vpop.permute.xlu1 %2422 }
0x1b8b   :  { %v2428_v27 = vadd.f32 %v5339_v4, %v2423_v14 }
0x1b8d   :  { %5737 = vtanh.f32 %v2428_v27 }
0x1b92   :  { %v2425_v8 = vpop.permute.xlu2 %2424 }
0x1b93   :  { %v5738_v46 = vpop.eup %5737  ;;  %v2429_v54 = vadd.f32 %v5340_v25, %v2425_v8  ;;  %v2445_v25 = vmul.f32 %v2408_v49, %v7263_v51 }
0x1b94   :  { %2436 = vrot.lane.b32.xlu0 %v5738_v46, %s6299_s26 }
0x1b95   :  { %5739 = vtanh.f32 %v2429_v54 }
0x1b9b   :  { %v5740_v0 = vpop.eup %5739 }
0x1b9c   :  { %2438 = vrot.lane.b32.xlu1 %v5740_v0, %s6299_s26  ;;  %v1715_v0 = vadd.f32 %v7279_v37, %v6872_v15 }
0x1c06   :  { %v2437_v26 = vpop.permute.xlu0 %2436 }
0x1c07   :  { %v2442_v41 = vmul.f32 %v2437_v26, %v2432_v35  ;;  %v1713_v35 = vadd.f32 %v7279_v37, %v6870_v28 }
0x1c09   :  { %v2446_v36 = vadd.f32 %v2444_v30, %v2442_v41  ;;  %v5285_v26 = vpack.c.bf16 %v1715_v0, %v1713_v35 }
0x1c0b   :  { %v7293_v4 = vsel %vm8190_vm12, %v2446_v36, %v7253_v39  ;;  %v5343_v41 = vunpack.c.l.bf16 %v5285_v26 }
0x1c0c   :  { %v7298_v48 = vpack.c.bf16 %v7293_v4, %v7293_v4 }
0x1c0e   :  { %v2439_v57 = vpop.permute.xlu1 %2438  ;;  %v2460_v39 = vunpack.c.l.b16 %v7298_v48 }
0x1c0f   :  { %v2443_v22 = vmul.f32 %v2439_v57, %v2433_v10  ;;  %v5344_v10 = vunpack.c.h.bf16 %v5285_v26 }
0x1c11   :  { %v2447_v3 = vadd.f32 %v2445_v25, %v2443_v22 }
0x1c13   :  { %v7303_v16 = vsel %vm8191_vm3, %v2447_v3, %v7263_v51 }
0x1c14   :  { %v7307_v19 = vpack.c.bf16 %v7303_v16, %v7303_v16 }
0x1c16   :  { %v2461_v14 = vunpack.c.l.b16 %v7307_v19 }
0x1c18   :  { %v2462_v49 = vpack.c.b16 %v2461_v14, %v2460_v39 }
0x1c1a   :  { %2463 = vrot.lane.b32.xlu2 %v2462_v49, %s6299_s26 }
0x1c74   :  { %v2464_v27 = vpop.permute.xlu2 %2463 }
0x1c75   :  { %4984 = vmatmul.msk.bf16.vlgmr.msra.gmra.mxu1 %vm605_vm0, %v2464_v27 }
0x1cf2   :  { %v2477_v8 = vpop.f32.mrf.mxu1 }
0x1cf3   :  { %v2478_v46 = vadd.f32 %v7273_v60, %v2477_v8 }
0x1cf5   :  { %2524 = vrot.lane.b32.xlu0 %v2478_v46, %s6286_s27  ;;  %v2482_v30 = vadd.f32 %v5343_v41, %v2478_v46 }
0x1cf7   :  { %v4985_v36 = vmul.f32 -1.442695, %v2482_v30 }
0x1cf9   :  { %5741 = vpow2.f32 %v4985_v36 }
0x1cfa   :  { %v2479_v51 = vpop.f32.mrf.mxu1 }
0x1cfb   :  { %v2480_v54 = vadd.f32 %v7273_v60, %v2479_v51 }
0x1cfd   :  { %2526 = vrot.lane.b32.xlu1 %v2480_v54, %s6286_s27  ;;  %v2483_v57 = vadd.f32 %v5344_v10, %v2480_v54 }
0x1cff   :  { %v4986_v25 = vmul.f32 -1.442695, %v2483_v57  ;;  %v5742_v22 = vpop.eup %5741 }
0x1d00   :  { %v2490_v3 = vadd.f32 1.0, %v5742_v22 }
0x1d01   :  { %5743 = vpow2.f32 %v4986_v25 }
0x1d02   :  { %5745 = vrcp.f32 %v2490_v3  ;;  %v2503_v35 = vand.u32 2147483648, %v2490_v3  ;;  %vm2497_vm2 = vweird.f32 %v2490_v3  ;;  %v2501_v54 = vand.u32 2147483647, %v2490_v3 }
0x1d04   :  { %v2504_v36 = vor.u32 1.1754944e-38, %v2503_v35  ;;  %vm2502_vm9 = vcmp.eq.f32.partialorder %v2501_v54, 8.507059e+37 }
0x1d07   :  { %v5744_v39 = vpop.eup %5743 }
0x1d08   :  { %v2491_v14 = vadd.f32 1.0, %v5744_v39  ;;  %v5746_v49 = vpop.eup %5745 }
0x1d09   :  { %v2493_v15 = vmul.f32 %v5746_v49, %v2490_v3  ;;  %vm2498_vm15 = vweird.f32 %v5746_v49 }
0x1d0a   :  { %5747 = vrcp.f32 %v2491_v14  ;;  %vm2499_vm5 = vmor %vm2497_vm2, %vm2498_vm15  ;;  %vm2512_vm1 = vweird.f32 %v2491_v14  ;;  %vm8192_vm15 = vcmp.eq.s32.totalorder %v6622_v59, 1  ;;  %vm8193_vm2 = vcmp.eq.s32.totalorder %v6626_v5, 1 }
0x1d0b   :  { %v2494_v27 = vsub.f32 1.0, %v2493_v15  ;;  %v2518_v15 = vand.u32 2147483648, %v2491_v14 }
0x1d0d   :  { %v2495_v28 = vmul.f32 %v5746_v49, %v2494_v27  ;;  %v2516_v27 = vand.u32 2147483647, %v2491_v14 }
0x1d0f   :  { %v2496_v0 = vadd.f32 %v5746_v49, %v2495_v28  ;;  %vm2517_vm3 = vcmp.eq.f32.partialorder %v2516_v27, 8.507059e+37 }
0x1d10   :  { %v5748_v8 = vpop.eup %5747 }
0x1d11   :  { %v2508_v51 = vmul.f32 %v5748_v8, %v2491_v14  ;;  %v2500_v26 = vsel %vm2499_vm5, %v5746_v49, %v2496_v0  ;;  %vm2513_vm11 = vweird.f32 %v5748_v8 }
0x1d12   :  { %v2505_v25 = vsel %vm2502_vm9, %v2504_v36, %v2500_v26  ;;  %vm2514_vm12 = vmor %vm2512_vm1, %vm2513_vm11 }
0x1d13   :  { %v2509_v46 = vsub.f32 1.0, %v2508_v51  ;;  %v2519_v51 = vor.u32 1.1754944e-38, %v2518_v15  ;;  %v2544_v14 = vsub.f32 1.0, %v2505_v25 }
0x1d15   :  { %v2510_v30 = vmul.f32 %v5748_v8, %v2509_v46 }
0x1d17   :  { %v2511_v39 = vadd.f32 %v5748_v8, %v2510_v30 }
0x1d19   :  { %v2515_v28 = vsel %vm2514_vm12, %v5748_v8, %v2511_v39 }
0x1d1a   :  { %v2520_v18 = vsel %vm2517_vm3, %v2519_v51, %v2515_v28 }
0x1d1b   :  { %v2545_v39 = vsub.f32 1.0, %v2520_v18  ;;  %v2557_v27 = vmul.f32 %v2520_v18, %v7303_v16 }
0x1d67   :  { %v2525_v57 = vpop.permute.xlu0 %2524 }
0x1d68   :  { %v2530_v22 = vmul.f32 %v2525_v57, %v2505_v25  ;;  %v2556_v57 = vmul.f32 %v2505_v25, %v7293_v4 }
0x1d6a   :  { %2534 = vrot.lane.b32.xlu2 %v2530_v22, %s6286_s27 }
0x1d6f   :  { %v2527_v3 = vpop.permute.xlu1 %2526 }
0x1d70   :  { %v2531_v49 = vmul.f32 %v2527_v3, %v2520_v18 }
0x1d72   :  { %2536 = vrot.lane.b32.xlu0 %v2531_v49, %s6286_s27 }
0x1dc4   :  { %v2535_v0 = vpop.permute.xlu2 %2534 }
0x1dc5   :  { %v2540_v46 = vadd.f32 %v5343_v41, %v2535_v0 }
0x1dc7   :  { %5749 = vtanh.f32 %v2540_v46 }
0x1dcd   :  { %v5750_v35 = vpop.eup %5749 }
0x1dce   :  { %2548 = vrot.lane.b32.xlu1 %v5750_v35, %s6299_s26 }
0x1de4   :  { %v2537_v54 = vpop.permute.xlu0 %2536 }
0x1de5   :  { %v2541_v26 = vadd.f32 %v5344_v10, %v2537_v54 }
0x1de7   :  { %5751 = vtanh.f32 %v2541_v26  ;;  %v1710_v26 = vadd.f32 %v7279_v37, %v6868_v53 }
0x1ded   :  { %v5752_v30 = vpop.eup %5751 }
0x1dee   :  { %2550 = vrot.lane.b32.xlu2 %v5752_v30, %s6299_s26  ;;  %v1708_v30 = vadd.f32 %v7279_v37, %v6866_v24 }
0x1e40   :  { %v2549_v8 = vpop.permute.xlu1 %2548 }
0x1e41   :  { %v2554_v36 = vmul.f32 %v2549_v8, %v2544_v14  ;;  %v7357_v14 = vpack.c.bf16 %v1710_v26, %v1708_v30 }
0x1e43   :  { %v2558_v22 = vadd.f32 %v2556_v57, %v2554_v36  ;;  %v5348_v8 = vunpack.c.h.bf16 %v7357_v14 }
0x1e45   :  { %v7329_v41 = vsel %vm8192_vm15, %v2558_v22, %v7293_v4 }
0x1e46   :  { %v7334_v51 = vpack.c.bf16 %v7329_v41, %v7329_v41 }
0x1e48   :  { %v2551_v15 = vpop.permute.xlu2 %2550  ;;  %v2572_v4 = vunpack.c.l.b16 %v7334_v51 }
0x1e49   :  { %v2555_v10 = vmul.f32 %v2551_v15, %v2545_v39  ;;  %v5347_v39 = vunpack.c.l.bf16 %v7357_v14  ;;  %v5188_v14 = vld [vmem:[%s8110_s10 + $0x8] sm:$0xff] }
0x1e4b   :  { %v2559_v28 = vadd.f32 %v2557_v27, %v2555_v10 }
0x1e4d   :  { %v7339_v25 = vsel %vm8193_vm2, %v2559_v28, %v7303_v16 }
0x1e4e   :  { %v7343_v3 = vpack.c.bf16 %v7339_v25, %v7339_v25 }
0x1e50   :  { %v2573_v49 = vunpack.c.l.b16 %v7343_v3 }
0x1e52   :  { %v2574_v18 = vpack.c.b16 %v2573_v49, %v2572_v4 }
0x1e54   :  { %2575 = vrot.lane.b32.xlu0 %v2574_v18, %s6299_s26 }
0x1ec6   :  { %v2576_v0 = vpop.permute.xlu0 %2575 }
0x1ec7   :  { %4987 = vmatmul.msk.bf16.vlgmr.msra.gmra.mxu2 %vm605_vm0, %v2576_v0 }
0x1f4a   :  { %v2589_v46 = vpop.f32.mrf.mxu2 }
0x1f4b   :  { %v2590_v35 = vadd.f32 %v7273_v60, %v2589_v46 }
0x1f4d   :  { %2636 = vrot.lane.b32.xlu1 %v2590_v35, %s6286_s27 }
0x1f52   :  { %v2591_v16 = vpop.f32.mrf.mxu2 }
0x1f53   :  { %v2592_v54 = vadd.f32 %v7273_v60, %v2591_v16  ;;  %v2594_v60 = vadd.f32 %v5347_v39, %v2590_v35 }
0x1f55   :  { %2638 = vrot.lane.b32.xlu2 %v2592_v54, %s6286_s27  ;;  %v2595_v36 = vadd.f32 %v5348_v8, %v2592_v54  ;;  %v4988_v27 = vmul.f32 -1.442695, %v2594_v60 }
0x1f57   :  { %v4989_v57 = vmul.f32 -1.442695, %v2595_v36 }
0x1f59   :  { %5753 = vpow2.f32 %v4989_v57 }
0x1f5f   :  { %v5754_v22 = vpop.eup %5753 }
0x1f60   :  { %v2603_v15 = vadd.f32 1.0, %v5754_v22 }
0x1f62   :  { %5755 = vrcp.f32 %v2603_v15  ;;  %v2630_v0 = vand.u32 2147483648, %v2603_v15  ;;  %vm2624_vm9 = vweird.f32 %v2603_v15  ;;  %v2628_v46 = vand.u32 2147483647, %v2603_v15 }
0x1f63   :  { %5757 = vpow2.f32 %v4988_v27 }
0x1f64   :  { %v2631_v54 = vor.u32 1.1754944e-38, %v2630_v0  ;;  %vm2629_vm1 = vcmp.eq.f32.partialorder %v2628_v46, 8.507059e+37  ;;  %v7370_v46 = vld [vmem:[#allocation15 + $0x8] sm:$0xff] }
0x1f65   :  { %2906 = vmatpush.bf16.msrb.mxu2 %v7370_v46  ;;  %3221 = vmatpush.bf16.msrb.mxu0 %v7370_v46 }
0x1f66   :  { %3641 = vmatpush.bf16.msrb.mxu3 %v7370_v46 }
0x1f68   :  { %v5756_v53 = vpop.eup %5755 }
0x1f69   :  { %v5758_v10 = vpop.eup %5757  ;;  %v2620_v24 = vmul.f32 %v5756_v53, %v2603_v15  ;;  %vm2625_vm5 = vweird.f32 %v5756_v53 }
0x1f6a   :  { %v2602_v37 = vadd.f32 1.0, %v5758_v10  ;;  %vm2626_vm11 = vmor %vm2624_vm9, %vm2625_vm5  ;;  %vm723_vm5 = vcmask 257024   ;;  %vm1891_vm9 = vcmask 519424  }
0x1f6b   :  { %v2621_v28 = vsub.f32 1.0, %v2620_v24 }
0x1f6c   :  { %5759 = vrcp.f32 %v2602_v37  ;;  %v2615_v27 = vand.u32 2147483648, %v2602_v37  ;;  %vm2609_vm3 = vweird.f32 %v2602_v37  ;;  %v2613_v15 = vand.u32 2147483647, %v2602_v37 }
0x1f6d   :  { %v2622_v4 = vmul.f32 %v5756_v53, %v2621_v28 }
0x1f6e   :  { %v2616_v10 = vor.u32 1.1754944e-38, %v2615_v27  ;;  %vm2614_vm2 = vcmp.eq.f32.partialorder %v2613_v15, 8.507059e+37 }
0x1f6f   :  { %v2623_v49 = vadd.f32 %v5756_v53, %v2622_v4 }
0x1f71   :  { %v2627_v16 = vsel %vm2626_vm11, %v5756_v53, %v2623_v49  ;;  %vm8194_vm11 = vcmp.eq.s32.totalorder %v6567_v23, 1 }
0x1f72   :  { %v5760_v18 = vpop.eup %5759  ;;  %v7363_v30 = vsel %vm2629_vm1, %v2631_v54, %v2627_v16  ;;  %v7373_v16 = vld [vmem:[#allocation15] sm:$0xff]  ;;  %v5190_v54 = vld [vmem:[%s8110_s10 + $0x18] sm:$0xff]  ;;  %vm8195_vm1 = vcmp.eq.s32.totalorder %v6570_v34, 1 }
0x1f73   :  { %v2605_v35 = vmul.f32 %v5760_v18, %v2602_v37  ;;  %vm2610_vm12 = vweird.f32 %v5760_v18  ;;  %2907 = vmatpush.bf16.msrb.mxu2 %v7373_v16  ;;  %3222 = vmatpush.bf16.msrb.mxu0 %v7373_v16 }
0x1f74   :  { %vm2611_vm15 = vmor %vm2609_vm3, %vm2610_vm12  ;;  %3642 = vmatpush.bf16.msrb.mxu3 %v7373_v16  ;;  %2807 = vmatpush.bf16.msrb.mxu1 %v5190_v54  ;;  %vm2778_vm12 = vcmask 523264   ;;  %v7435_v54 = vld [vmem:[%s8112_s12] ss:$0 sm:$0xff] }
0x1f75   :  { %v2606_v57 = vsub.f32 1.0, %v2605_v35 }
0x1f76   :  { %2908 = vmatmul.bf16.vlgmr.msrb.gmra.mxu2 %v8176_v42 }
0x1f77   :  { %v2607_v22 = vmul.f32 %v5760_v18, %v2606_v57  ;;  %3011 = vmatpush.bf16.msra.mxu2 %v7370_v46  ;;  %3431 = vmatpush.bf16.msra.mxu0 %v7370_v46 }
0x1f79   :  { %v2608_v60 = vadd.f32 %v5760_v18, %v2607_v22 }
0x1f7b   :  { %v2612_v53 = vsel %vm2611_vm15, %v5760_v18, %v2608_v60  ;;  %3012 = vmatpush.bf16.msra.mxu2 %v7373_v16  ;;  %3432 = vmatpush.bf16.msra.mxu0 %v7373_v16 }
0x1f7c   :  { %v2617_v28 = vsel %vm2614_vm2, %v2616_v10, %v2612_v53  ;;  %v2657_v53 = vsub.f32 1.0, %v7363_v30 }
0x1f7d   :  { %v2668_v57 = vmul.f32 %v2617_v28, %v7329_v41 }
0x1f7f   :  { %3116 = vmatpush.bf16.msrb.mxu2 %v7370_v46 }
0x1f83   :  { %3117 = vmatpush.bf16.msrb.mxu2 %v7373_v16 }
0x1faf   :  { %v2639_v26 = vpop.permute.xlu2 %2638 }
0x1fb0   :  { %v2643_v36 = vmul.f32 %v2639_v26, %v7363_v30  ;;  %v5189_v26 = vld [vmem:[%s8110_s10 + $0x10] sm:$0xff] }
0x1fb1   :  { %2808 = vmatpush.bf16.msrb.mxu1 %v5189_v26 }
0x1fb2   :  { %2648 = vrot.lane.b32.xlu1 %v2643_v36, %s6286_s27 }
0x1fb5   :  { %2809 = vmatpush.bf16.msrb.mxu1 %v5188_v14 }
0x1fba   :  { %717 = vrot.lane.b32.xlu1 %v6580_v40, %s6299_s26 }
0x1fbf   :  { %v2637_v24 = vpop.permute.xlu1 %2636 }
0x1fc0   :  { %v2642_v4 = vmul.f32 %v2637_v24, %v2617_v28 }
0x1fc2   :  { %2646 = vrot.lane.b32.xlu0 %v2642_v4, %s6286_s27  ;;  %v2669_v4 = vmul.f32 %v7363_v30, %v7339_v25 }
0x1ff9   :  { %v2909_v30 = vpop.f32.mrf.mxu2 }
0x2024   :  { %v2649_v49 = vpop.permute.xlu1 %2648 }
0x2025   :  { %v2653_v0 = vadd.f32 %v5348_v8, %v2649_v49 }
0x2027   :  { %5761 = vtanh.f32 %v2653_v0 }
0x202c   :  { %v718_v40 = vpop.permute.xlu1 %717 }
0x202d   :  { %v5762_v37 = vpop.eup %5761  ;;  %724 = vst.msk [vmem:[#allocation3] sm:$0xf] %vm723_vm5, %v718_v40 }
0x202e   :  { %2662 = vrot.lane.b32.xlu0 %v5762_v37, %s6299_s26  ;;  %v7424_v37 = vld [vmem:[%s8113_s13] ss:$0 sm:$0xff] }
0x2034   :  { %v2647_v8 = vpop.permute.xlu0 %2646 }
0x2035   :  { %v2652_v18 = vadd.f32 %v5347_v39, %v2647_v8  ;;  %v5187_v39 = vld [vmem:[%s8110_s10] sm:$0xff]  ;;  %v2910_v8 = vadd.f32 %v7424_v37, %v2909_v30 }
0x2036   :  { %2810 = vmatpush.bf16.msrb.mxu1 %v5187_v39 }
0x2037   :  { %5763 = vtanh.f32 %v2652_v18  ;;  %2956 = vrot.lane.b32.xlu0 %v2910_v8, %s6286_s27 }
0x203d   :  { %v5764_v35 = vpop.eup %5763 }
0x203e   :  { %2660 = vrot.lane.b32.xlu2 %v5764_v35, %s6299_s26 }
0x2046   :  { %719 = vrot.lane.b32.xlu2 %v6589_v43, %s6299_s26  ;;  %v2656_v43 = vsub.f32 1.0, %v2617_v28 }
0x2098   :  { %v2661_v36 = vpop.permute.xlu2 %2660 }
0x2099   :  { %v2666_v22 = vmul.f32 %v2661_v36, %v2656_v43 }
0x209b   :  { %v2670_v60 = vadd.f32 %v2668_v57, %v2666_v22 }
0x209d   :  { %v2672_v27 = vsel %vm8194_vm11, %v2670_v60, %v7329_v41 }
0x209e   :  { %v2674_v15 = vpack.c.bf16 %v2672_v27, %v2672_v27 }
0x20a0   :  { %2676 = vst.msk [vmem:[#allocation3] sm:$0xf] %vm1891_vm9, %v2674_v15  ;;  %v720_v10 = vpop.permute.xlu2 %719  ;;  %v2663_v24 = vpop.permute.xlu0 %2662 }
0x20a1   :  { %725 = vst.msk [vmem:[#allocation3 + $0x4] sm:$0xf] %vm723_vm5, %v720_v10  ;;  %v2667_v28 = vmul.f32 %v2663_v24, %v2657_v53 }
0x20a3   :  { %v2671_v49 = vadd.f32 %v2669_v4, %v2667_v28 }
0x20a5   :  { %v2673_v0 = vsel %vm8195_vm1, %v2671_v49, %v7339_v25  ;;  %v2911_v25 = vpop.f32.mrf.mxu2 }
0x20a6   :  { %v2675_v40 = vpack.c.bf16 %v2673_v0, %v2673_v0  ;;  %v2912_v18 = vadd.f32 %v7424_v37, %v2911_v25 }
0x20a8   :  { %2677 = vst.msk [vmem:[#allocation3 + $0x4] sm:$0xf] %vm1891_vm9, %v2675_v40  ;;  %2958 = vrot.lane.b32.xlu1 %v2912_v18, %s6286_s27 }
0x20af   :  { %v7419_v41 = vld [vmem:[#allocation3] sm:$0xff] }
0x20b0   :  { %5038 = vmatmul.msk.bf16.vlgmr.msrb.gmra.mxu1 %vm2778_vm12, %v7419_v41 }
0x212d   :  { %v2812_v35 = vpop.f32.mrf.mxu1 }
0x212e   :  { %v2813_v14 = vadd.f32 %v7435_v54, %v2812_v35 }
0x2135   :  { %v2814_v26 = vpop.f32.mrf.mxu1 }
0x2136   :  { %v2815_v39 = vadd.f32 %v7435_v54, %v2814_v26 }
0x2138   :  { %v5352_v43 = vpack.c.bf16 %v2815_v39, %v2813_v14 }
0x213a   :  { %v5391_v36 = vunpack.c.l.bf16 %v5352_v43  ;;  %v5392_v57 = vunpack.c.h.bf16 %v5352_v43 }
0x213c   :  { %v2914_v22 = vadd.f32 %v5391_v36, %v2910_v8  ;;  %v2915_v60 = vadd.f32 %v5392_v57, %v2912_v18 }
0x213e   :  { %v5054_v27 = vmul.f32 -1.442695, %v2914_v22  ;;  %v5055_v15 = vmul.f32 -1.442695, %v2915_v60 }
0x2140   :  { %5765 = vpow2.f32 %v5054_v27 }
0x2141   :  { %5767 = vpow2.f32 %v5055_v15 }
0x2146   :  { %v5766_v53 = vpop.eup %5765 }
0x2147   :  { %v5768_v10 = vpop.eup %5767  ;;  %v2922_v24 = vadd.f32 1.0, %v5766_v53 }
0x2148   :  { %v2923_v4 = vadd.f32 1.0, %v5768_v10 }
0x2149   :  { %5769 = vrcp.f32 %v2922_v24  ;;  %v2935_v35 = vand.u32 2147483648, %v2922_v24  ;;  %v2933_v18 = vand.u32 2147483647, %v2922_v24  ;;  %vm2929_vm2 = vweird.f32 %v2922_v24 }
0x214a   :  { %5771 = vrcp.f32 %v2923_v4  ;;  %v2950_v26 = vand.u32 2147483648, %v2923_v4  ;;  %v2948_v39 = vand.u32 2147483647, %v2923_v4  ;;  %vm2944_vm11 = vweird.f32 %v2923_v4 }
0x214b   :  { %v2936_v60 = vor.u32 1.1754944e-38, %v2935_v35  ;;  %vm2934_vm13 = vcmp.eq.f32.partialorder %v2933_v18, 8.507059e+37 }
0x214c   :  { %v2951_v27 = vor.u32 1.1754944e-38, %v2950_v26  ;;  %vm2949_vm14 = vcmp.eq.f32.partialorder %v2948_v39, 8.507059e+37 }
0x214f   :  { %v5770_v28 = vpop.eup %5769 }
0x2150   :  { %v5772_v49 = vpop.eup %5771  ;;  %v2925_v0 = vmul.f32 %v5770_v28, %v2922_v24  ;;  %vm2930_vm3 = vweird.f32 %v5770_v28 }
0x2151   :  { %v2940_v40 = vmul.f32 %v5772_v49, %v2923_v4  ;;  %vm2945_vm15 = vweird.f32 %v5772_v49  ;;  %vm2931_vm1 = vmor %vm2929_vm2, %vm2930_vm3 }
0x2152   :  { %v2926_v30 = vsub.f32 1.0, %v2925_v0  ;;  %vm2946_vm10 = vmor %vm2944_vm11, %vm2945_vm15  ;;  %v2957_v0 = vpop.permute.xlu0 %2956 }
0x2153   :  { %v2941_v25 = vsub.f32 1.0, %v2940_v40  ;;  %v2959_v40 = vpop.permute.xlu1 %2958 }
0x2154   :  { %v2927_v8 = vmul.f32 %v5770_v28, %v2926_v30 }
0x2155   :  { %v2942_v14 = vmul.f32 %v5772_v49, %v2941_v25 }
0x2156   :  { %v2928_v43 = vadd.f32 %v5770_v28, %v2927_v8 }
0x2157   :  { %v2943_v22 = vadd.f32 %v5772_v49, %v2942_v14 }
0x2158   :  { %v2932_v15 = vsel %vm2931_vm1, %v5770_v28, %v2928_v43 }
0x2159   :  { %v2947_v53 = vsel %vm2946_vm10, %v5772_v49, %v2943_v22  ;;  %v2937_v10 = vsel %vm2934_vm13, %v2936_v60, %v2932_v15  ;;  %vm8197_vm13 = vcmp.eq.s32.totalorder %v6570_v34, 1 }
0x215a   :  { %v2952_v30 = vsel %vm2949_vm14, %v2951_v27, %v2947_v53  ;;  %v2962_v42 = vmul.f32 %v2957_v0, %v2937_v10  ;;  %v2988_v18 = vmul.f32 0.0, %v2937_v10  ;;  %vm8196_vm14 = vcmp.eq.s32.totalorder %v6567_v23, 1 }
0x215b   :  { %v2963_v25 = vmul.f32 %v2959_v40, %v2952_v30  ;;  %v2989_v43 = vmul.f32 0.0, %v2952_v30 }
0x215c   :  { %2966 = vrot.lane.b32.xlu2 %v2962_v42, %s6286_s27 }
0x215d   :  { %2968 = vrot.lane.b32.xlu0 %v2963_v25, %s6286_s27 }
0x2165   :  { %846 = vrot.lane.b32.xlu0 %v6638_v11, %s6299_s26  ;;  %v2976_v11 = vsub.f32 1.0, %v2937_v10 }
0x21b6   :  { %v2967_v24 = vpop.permute.xlu2 %2966 }
0x21b7   :  { %v2972_v4 = vadd.f32 %v5391_v36, %v2967_v24  ;;  %v2977_v36 = vsub.f32 1.0, %v2952_v30 }
0x21b9   :  { %5773 = vtanh.f32 %v2972_v4 }
0x21bf   :  { %v5774_v28 = vpop.eup %5773 }
0x21c0   :  { %2980 = vrot.lane.b32.xlu1 %v5774_v28, %s6299_s26 }
0x21c8   :  { %848 = vrot.lane.b32.xlu1 %v6648_v13, %s6299_s26 }
0x21cf   :  { %v2969_v49 = vpop.permute.xlu0 %2968 }
0x21d0   :  { %v2973_v35 = vadd.f32 %v5392_v57, %v2969_v49 }
0x21d2   :  { %5775 = vtanh.f32 %v2973_v35 }
0x21d7   :  { %v847_v26 = vpop.permute.xlu0 %846 }
0x21d8   :  { %v5776_v8 = vpop.eup %5775  ;;  %852 = vst.msk [vmem:[#allocation3 + $0x8] sm:$0xf] %vm723_vm5, %v847_v26 }
0x21d9   :  { %2564 = vst.msk [vmem:[#allocation3 + $0x8] sm:$0xf] %vm1891_vm9, %v7334_v51  ;;  %2982 = vrot.lane.b32.xlu2 %v5776_v8, %s6299_s26 }
0x2232   :  { %v2981_v42 = vpop.permute.xlu1 %2980 }
0x2233   :  { %v2986_v14 = vmul.f32 %v2981_v42, %v2976_v11  ;;  %v2983_v39 = vpop.permute.xlu2 %2982 }
0x2234   :  { %v2987_v13 = vmul.f32 %v2983_v39, %v2977_v36 }
0x2235   :  { %v2990_v22 = vadd.f32 %v2988_v18, %v2986_v14 }
0x2236   :  { %v2991_v57 = vadd.f32 %v2989_v43, %v2987_v13 }
0x2237   :  { %v7452_v60 = vsel %vm8196_vm14, %v2990_v22, 0.0 }
0x2238   :  { %v7456_v27 = vsel %vm8197_vm13, %v2991_v57, 0.0 }
0x2239   :  { %v2998_v51 = vpack.c.bf16 %v7456_v27, %v7452_v60 }
0x223a   :  { %v849_v15 = vpop.permute.xlu1 %848 }
0x223b   :  { %853 = vst.msk [vmem:[#allocation3 + $0xc] sm:$0xf] %vm723_vm5, %v849_v15  ;;  %3000 = vrot.lane.b32.xlu2 %v2998_v51, %s6299_s26 }
0x223c   :  { %2565 = vst.msk [vmem:[#allocation3 + $0xc] sm:$0xf] %vm1891_vm9, %v7343_v3 }
0x2243   :  { %v7464_v53 = vld [vmem:[#allocation3 + $0x8] sm:$0xff] }
0x2244   :  { %5039 = vmatmul.msk.bf16.gmra.mxu1 %vm2778_vm12, %v7464_v53 }
0x2295   :  { %v3001_v10 = vpop.permute.xlu2 %3000 }
0x2296   :  { %5056 = vmatmul.msk.bf16.vlgmr.msra.gmra.mxu2 %vm605_vm0, %v3001_v10 }
0x2297   :  { %3326 = vmatpush.bf16.msra.mxu2 %v7370_v46 }
0x229b   :  { %3327 = vmatpush.bf16.msra.mxu2 %v7373_v16 }
0x22c1   :  { %v2817_v25 = vpop.f32.mrf.mxu1 }
0x22c2   :  { %v2818_v28 = vadd.f32 %v7435_v54, %v2817_v25 }
0x22c9   :  { %v2819_v24 = vpop.f32.mrf.mxu1 }
0x22ca   :  { %v2820_v4 = vadd.f32 %v7435_v54, %v2819_v24 }
0x22cc   :  { %v5357_v49 = vpack.c.bf16 %v2820_v4, %v2818_v28 }
0x22ce   :  { %v5395_v35 = vunpack.c.l.bf16 %v5357_v49  ;;  %v5396_v11 = vunpack.c.h.bf16 %v5357_v49 }
0x2319   :  { %v3014_v0 = vpop.f32.mrf.mxu2 }
0x231a   :  { %v3015_v40 = vadd.f32 %v7424_v37, %v3014_v0 }
0x231c   :  { %3061 = vrot.lane.b32.xlu0 %v3015_v40, %s6286_s27  ;;  %v3019_v26 = vadd.f32 %v5395_v35, %v3015_v40 }
0x231e   :  { %v5057_v8 = vmul.f32 -1.442695, %v3019_v26 }
0x2320   :  { %5777 = vpow2.f32 %v5057_v8 }
0x2321   :  { %v3016_v30 = vpop.f32.mrf.mxu2 }
0x2322   :  { %v3017_v3 = vadd.f32 %v7424_v37, %v3016_v30 }
0x2324   :  { %3063 = vrot.lane.b32.xlu1 %v3017_v3, %s6286_s27  ;;  %v3020_v42 = vadd.f32 %v5396_v11, %v3017_v3 }
0x2326   :  { %v5058_v36 = vmul.f32 -1.442695, %v3020_v42  ;;  %v5778_v18 = vpop.eup %5777 }
0x2327   :  { %v3027_v14 = vadd.f32 1.0, %v5778_v18 }
0x2328   :  { %5779 = vpow2.f32 %v5058_v36 }
0x2329   :  { %5781 = vrcp.f32 %v3027_v14  ;;  %v3040_v30 = vand.u32 2147483648, %v3027_v14  ;;  %vm3034_vm3 = vweird.f32 %v3027_v14  ;;  %v3038_v3 = vand.u32 2147483647, %v3027_v14 }
0x232b   :  { %v3041_v4 = vor.u32 1.1754944e-38, %v3040_v30  ;;  %vm3039_vm2 = vcmp.eq.f32.partialorder %v3038_v3, 8.507059e+37 }
0x232e   :  { %v5780_v39 = vpop.eup %5779 }
0x232f   :  { %v3028_v43 = vadd.f32 1.0, %v5780_v39  ;;  %v5782_v13 = vpop.eup %5781 }
0x2330   :  { %v3030_v22 = vmul.f32 %v5782_v13, %v3027_v14  ;;  %vm3035_vm10 = vweird.f32 %v5782_v13 }
0x2331   :  { %5783 = vrcp.f32 %v3028_v43  ;;  %vm3036_vm15 = vmor %vm3034_vm3, %vm3035_vm10  ;;  %v3055_v42 = vand.u32 2147483648, %v3028_v43  ;;  %vm3049_vm1 = vweird.f32 %v3028_v43  ;;  %v3053_v36 = vand.u32 2147483647, %v3028_v43 }
0x2332   :  { %v3031_v57 = vsub.f32 1.0, %v3030_v22  ;;  %vm8198_vm10 = vcmp.eq.s32.totalorder %v6622_v59, 1  ;;  %vm8199_vm3 = vcmp.eq.s32.totalorder %v6626_v5, 1 }
0x2333   :  { %v3056_v39 = vor.u32 1.1754944e-38, %v3055_v42  ;;  %vm3054_vm13 = vcmp.eq.f32.partialorder %v3053_v36, 8.507059e+37 }
0x2334   :  { %v3032_v15 = vmul.f32 %v5782_v13, %v3031_v57 }
0x2336   :  { %v3033_v0 = vadd.f32 %v5782_v13, %v3032_v15 }
0x2337   :  { %v5784_v51 = vpop.eup %5783 }
0x2338   :  { %v3045_v10 = vmul.f32 %v5784_v51, %v3028_v43  ;;  %v3037_v25 = vsel %vm3036_vm15, %v5782_v13, %v3033_v0  ;;  %vm3050_vm11 = vweird.f32 %v5784_v51 }
0x2339   :  { %v3042_v28 = vsel %vm3039_vm2, %v3041_v4, %v3037_v25  ;;  %vm3051_vm14 = vmor %vm3049_vm1, %vm3050_vm11 }
0x233a   :  { %v3046_v40 = vsub.f32 1.0, %v3045_v10  ;;  %v3093_v3 = vmul.f32 %v3042_v28, %v7452_v60 }
0x233c   :  { %v3047_v24 = vmul.f32 %v5784_v51, %v3046_v40 }
0x233e   :  { %v3048_v8 = vadd.f32 %v5784_v51, %v3047_v24 }
0x2340   :  { %v3052_v18 = vsel %vm3051_vm14, %v5784_v51, %v3048_v8 }
0x2341   :  { %v3057_v22 = vsel %vm3054_vm13, %v3056_v39, %v3052_v18 }
0x2342   :  { %v3082_v25 = vsub.f32 1.0, %v3057_v22 }
0x238e   :  { %v3062_v49 = vpop.permute.xlu0 %3061 }
0x238f   :  { %v3067_v26 = vmul.f32 %v3062_v49, %v3042_v28 }
0x2391   :  { %3071 = vrot.lane.b32.xlu2 %v3067_v26, %s6286_s27 }
0x2396   :  { %v3064_v14 = vpop.permute.xlu1 %3063 }
0x2397   :  { %v3068_v13 = vmul.f32 %v3064_v14, %v3057_v22 }
0x2399   :  { %3073 = vrot.lane.b32.xlu0 %v3068_v13, %s6286_s27 }
0x23a1   :  { %974 = vrot.lane.b32.xlu0 %v6699_v61, %s6299_s26 }
0x23eb   :  { %v3072_v57 = vpop.permute.xlu2 %3071 }
0x23ec   :  { %v3077_v15 = vadd.f32 %v5395_v35, %v3072_v57  ;;  %v3081_v35 = vsub.f32 1.0, %v3042_v28 }
0x23ee   :  { %5785 = vtanh.f32 %v3077_v15 }
0x23f4   :  { %v5786_v10 = vpop.eup %5785 }
0x23f5   :  { %3085 = vrot.lane.b32.xlu1 %v5786_v10, %s6299_s26 }
0x23fd   :  { %976 = vrot.lane.b32.xlu1 %v6709_v63, %s6299_s26 }
0x240b   :  { %v3074_v43 = vpop.permute.xlu0 %3073 }
0x240c   :  { %v3078_v51 = vadd.f32 %v5396_v11, %v3074_v43  ;;  %v3094_v11 = vmul.f32 %v3057_v22, %v7456_v27 }
0x240e   :  { %5787 = vtanh.f32 %v3078_v51 }
0x2413   :  { %v975_v0 = vpop.permute.xlu0 %974 }
0x2414   :  { %v5788_v40 = vpop.eup %5787  ;;  %980 = vst.msk [vmem:[#allocation3 + $0x10] sm:$0xf] %vm723_vm5, %v975_v0 }
0x2415   :  { %2452 = vst.msk [vmem:[#allocation3 + $0x10] sm:$0xf] %vm1891_vm9, %v7298_v48  ;;  %3087 = vrot.lane.b32.xlu2 %v5788_v40, %s6299_s26 }
0x2467   :  { %v3086_v61 = vpop.permute.xlu1 %3085 }
0x2468   :  { %v3091_v30 = vmul.f32 %v3086_v61, %v3081_v35 }
0x246a   :  { %v3095_v4 = vadd.f32 %v3093_v3, %v3091_v30 }
0x246c   :  { %v7496_v26 = vsel %vm8198_vm10, %v3095_v4, %v7452_v60 }
0x246f   :  { %v977_v24 = vpop.permute.xlu1 %976  ;;  %v3088_v63 = vpop.permute.xlu2 %3087 }
0x2470   :  { %981 = vst.msk [vmem:[#allocation3 + $0x14] sm:$0xf] %vm723_vm5, %v977_v24  ;;  %v3092_v49 = vmul.f32 %v3088_v63, %v3082_v25 }
0x2471   :  { %2453 = vst.msk [vmem:[#allocation3 + $0x14] sm:$0xf] %vm1891_vm9, %v7307_v19 }
0x2472   :  { %v3096_v48 = vadd.f32 %v3094_v11, %v3092_v49 }
0x2474   :  { %v7501_v28 = vsel %vm8199_vm3, %v3096_v48, %v7456_v27 }
0x2475   :  { %v3103_v8 = vpack.c.bf16 %v7501_v28, %v7496_v26 }
0x2477   :  { %3105 = vrot.lane.b32.xlu2 %v3103_v8, %s6299_s26 }
0x2478   :  { %v7506_v42 = vld [vmem:[#allocation3 + $0x10] sm:$0xff] }
0x2479   :  { %5040 = vmatmul.msk.bf16.gmra.mxu1 %vm2778_vm12, %v7506_v42 }
0x24d1   :  { %v3106_v19 = vpop.permute.xlu2 %3105 }
0x24d2   :  { %5059 = vmatmul.msk.bf16.vlgmr.msrb.gmra.mxu2 %vm605_vm0, %v3106_v19 }
0x24d3   :  { %3536 = vmatpush.bf16.msrb.mxu2 %v7370_v46 }
0x24d7   :  { %3537 = vmatpush.bf16.msrb.mxu2 %v7373_v16 }
0x24f6   :  { %v2822_v39 = vpop.f32.mrf.mxu1 }
0x24f7   :  { %v2823_v13 = vadd.f32 %v7435_v54, %v2822_v39 }
0x24fe   :  { %v2824_v14 = vpop.f32.mrf.mxu1 }
0x24ff   :  { %v2825_v22 = vadd.f32 %v7435_v54, %v2824_v14 }
0x2501   :  { %v5362_v57 = vpack.c.bf16 %v2825_v22, %v2823_v13 }
0x2503   :  { %v5399_v46 = vunpack.c.l.bf16 %v5362_v57  ;;  %v5400_v10 = vunpack.c.h.bf16 %v5362_v57 }
0x2555   :  { %v3119_v60 = vpop.f32.mrf.mxu2 }
0x2556   :  { %v3120_v27 = vadd.f32 %v7424_v37, %v3119_v60 }
0x2558   :  { %3166 = vrot.lane.b32.xlu0 %v3120_v27, %s6286_s27  ;;  %v3124_v15 = vadd.f32 %v5399_v46, %v3120_v27 }
0x255a   :  { %v5060_v16 = vmul.f32 -1.442695, %v3124_v15 }
0x255c   :  { %5789 = vpow2.f32 %v5060_v16 }
0x255d   :  { %v3121_v36 = vpop.f32.mrf.mxu2 }
0x255e   :  { %v3122_v18 = vadd.f32 %v7424_v37, %v3121_v36 }
0x2560   :  { %3168 = vrot.lane.b32.xlu1 %v3122_v18, %s6286_s27  ;;  %v3125_v43 = vadd.f32 %v5400_v10, %v3122_v18 }
0x2562   :  { %v5061_v51 = vmul.f32 -1.442695, %v3125_v43  ;;  %v5790_v0 = vpop.eup %5789 }
0x2563   :  { %v3132_v40 = vadd.f32 1.0, %v5790_v0 }
0x2564   :  { %5791 = vpow2.f32 %v5061_v51 }
0x2565   :  { %5793 = vrcp.f32 %v3132_v40  ;;  %v3145_v48 = vand.u32 2147483648, %v3132_v40  ;;  %vm3139_vm2 = vweird.f32 %v3132_v40  ;;  %v3143_v8 = vand.u32 2147483647, %v3132_v40 }
0x2567   :  { %v3146_v27 = vor.u32 1.1754944e-38, %v3145_v48  ;;  %vm3144_vm1 = vcmp.eq.f32.partialorder %v3143_v8, 8.507059e+37 }
0x256a   :  { %v5792_v61 = vpop.eup %5791 }
0x256b   :  { %v3133_v35 = vadd.f32 1.0, %v5792_v61  ;;  %v5794_v30 = vpop.eup %5793 }
0x256c   :  { %v3135_v3 = vmul.f32 %v5794_v30, %v3132_v40  ;;  %vm3140_vm15 = vweird.f32 %v5794_v30 }
0x256d   :  { %5795 = vrcp.f32 %v3133_v35  ;;  %vm3141_vm11 = vmor %vm3139_vm2, %vm3140_vm15  ;;  %v3160_v22 = vand.u32 2147483648, %v3133_v35  ;;  %vm3154_vm13 = vweird.f32 %v3133_v35  ;;  %v3158_v13 = vand.u32 2147483647, %v3133_v35 }
0x256e   :  { %v3136_v25 = vsub.f32 1.0, %v3135_v3  ;;  %vm8200_vm15 = vcmp.eq.s32.totalorder %v6683_v45, 1  ;;  %vm8201_vm2 = vcmp.eq.s32.totalorder %v6692_v56, 1 }
0x256f   :  { %v3161_v15 = vor.u32 1.1754944e-38, %v3160_v22  ;;  %vm3159_vm3 = vcmp.eq.f32.partialorder %v3158_v13, 8.507059e+37 }
0x2570   :  { %v3137_v63 = vmul.f32 %v5794_v30, %v3136_v25 }
0x2572   :  { %v3138_v11 = vadd.f32 %v5794_v30, %v3137_v63 }
0x2573   :  { %v5796_v24 = vpop.eup %5795 }
0x2574   :  { %v3150_v4 = vmul.f32 %v5796_v24, %v3133_v35  ;;  %v3142_v19 = vsel %vm3141_vm11, %v5794_v30, %v3138_v11  ;;  %vm3155_vm14 = vweird.f32 %v5796_v24 }
0x2575   :  { %v3147_v36 = vsel %vm3144_vm1, %v3146_v27, %v3142_v19  ;;  %vm3156_vm10 = vmor %vm3154_vm13, %vm3155_vm14 }
0x2576   :  { %v3151_v49 = vsub.f32 1.0, %v3150_v4  ;;  %v3198_v63 = vmul.f32 %v3147_v36, %v7496_v26 }
0x2578   :  { %v3152_v60 = vmul.f32 %v5796_v24, %v3151_v49 }
0x257a   :  { %v3153_v14 = vadd.f32 %v5796_v24, %v3152_v60 }
0x257c   :  { %v3157_v57 = vsel %vm3156_vm10, %v5796_v24, %v3153_v14 }
0x257d   :  { %v3162_v43 = vsel %vm3159_vm3, %v3161_v15, %v3157_v57 }
0x257e   :  { %v3187_v4 = vsub.f32 1.0, %v3162_v43 }
0x25ca   :  { %v3167_v18 = vpop.permute.xlu0 %3166 }
0x25cb   :  { %v3172_v39 = vmul.f32 %v3167_v18, %v3147_v36 }
0x25cd   :  { %3176 = vrot.lane.b32.xlu2 %v3172_v39, %s6286_s27 }
0x25d2   :  { %v3169_v16 = vpop.permute.xlu1 %3168 }
0x25d3   :  { %v3173_v51 = vmul.f32 %v3169_v16, %v3162_v43 }
0x25d5   :  { %3178 = vrot.lane.b32.xlu0 %v3173_v51, %s6286_s27 }
0x25dd   :  { %1102 = vrot.lane.b32.xlu0 %v6756_v6, %s6299_s26 }
0x2627   :  { %v3177_v0 = vpop.permute.xlu2 %3176 }
0x2628   :  { %v3182_v40 = vadd.f32 %v5399_v46, %v3177_v0  ;;  %v3186_v46 = vsub.f32 1.0, %v3147_v36 }
0x262a   :  { %5797 = vtanh.f32 %v3182_v40 }
0x2630   :  { %v5798_v61 = vpop.eup %5797 }
0x2631   :  { %3190 = vrot.lane.b32.xlu1 %v5798_v61, %s6299_s26 }
0x2639   :  { %1104 = vrot.lane.b32.xlu1 %v6766_v1, %s6299_s26 }
0x2647   :  { %v3179_v35 = vpop.permute.xlu0 %3178 }
0x2648   :  { %v3183_v30 = vadd.f32 %v5400_v10, %v3179_v35  ;;  %v3199_v10 = vmul.f32 %v3162_v43, %v7501_v28 }
0x264a   :  { %5799 = vtanh.f32 %v3183_v30 }
0x264f   :  { %v1103_v3 = vpop.permute.xlu0 %1102 }
0x2650   :  { %v5800_v25 = vpop.eup %5799  ;;  %1108 = vst.msk [vmem:[#allocation3 + $0x18] sm:$0xf] %vm723_vm5, %v1103_v3 }
0x2651   :  { %2340 = vst.msk [vmem:[#allocation3 + $0x18] sm:$0xf] %vm1891_vm9, %v7258_v44  ;;  %3192 = vrot.lane.b32.xlu2 %v5800_v25, %s6299_s26 }
0x26a3   :  { %v3191_v6 = vpop.permute.xlu1 %3190 }
0x26a4   :  { %v3196_v24 = vmul.f32 %v3191_v6, %v3186_v46 }
0x26a6   :  { %v3200_v49 = vadd.f32 %v3198_v63, %v3196_v24 }
0x26a8   :  { %v7538_v8 = vsel %vm8200_vm15, %v3200_v49, %v7496_v26  ;;  %v7553_v26 = vpop.f32.mrf.mxu0 }
0x26ab   :  { %v1105_v11 = vpop.permute.xlu1 %1104  ;;  %v3193_v1 = vpop.permute.xlu2 %3192 }
0x26ac   :  { %1109 = vst.msk [vmem:[#allocation3 + $0x1c] sm:$0xf] %vm723_vm5, %v1105_v11  ;;  %v3197_v48 = vmul.f32 %v3193_v1, %v3187_v4 }
0x26ad   :  { %2341 = vst.msk [vmem:[#allocation3 + $0x1c] sm:$0xf] %vm1891_vm9, %v7267_v47 }
0x26ae   :  { %v3201_v44 = vadd.f32 %v3199_v10, %v3197_v48 }
0x26b0   :  { %v7543_v19 = vsel %vm8201_vm2, %v3201_v44, %v7501_v28  ;;  %v7555_v36 = vpop.f32.mrf.mxu0 }
0x26b1   :  { %v3208_v60 = vpack.c.bf16 %v7543_v19, %v7538_v8 }
0x26b3   :  { %3210 = vrot.lane.b32.xlu2 %v3208_v60, %s6299_s26 }
0x26b4   :  { %v7548_v27 = vld [vmem:[#allocation3 + $0x18] sm:$0xff] }
0x26b5   :  { %5041 = vmatmul.msk.bf16.gmra.mxu1 %vm2778_vm12, %v7548_v27 }
0x270d   :  { %v3211_v47 = vpop.permute.xlu2 %3210 }
0x270e   :  { %5062 = vmatmul.msk.bf16.vlgmr.msrb.gmra.mxu0 %vm605_vm0, %v3211_v47 }
0x2732   :  { %v2827_v22 = vpop.f32.mrf.mxu1 }
0x2733   :  { %v2828_v15 = vadd.f32 %v7435_v54, %v2827_v22 }
0x273a   :  { %v2829_v13 = vpop.f32.mrf.mxu1 }
0x273b   :  { %v2830_v57 = vadd.f32 %v7435_v54, %v2829_v13 }
0x273d   :  { %v5367_v16 = vpack.c.bf16 %v2830_v57, %v2828_v15 }
0x273f   :  { %v5403_v43 = vunpack.c.l.bf16 %v5367_v16  ;;  %v5404_v40 = vunpack.c.h.bf16 %v5367_v16 }
0x278b   :  { %v3224_v18 = vpop.f32.mrf.mxu0 }
0x278c   :  { %v3225_v28 = vadd.f32 %v7424_v37, %v3224_v18 }
0x278e   :  { %3271 = vrot.lane.b32.xlu0 %v3225_v28, %s6286_s27  ;;  %v3229_v51 = vadd.f32 %v5403_v43, %v3225_v28 }
0x2790   :  { %v5063_v0 = vmul.f32 -1.442695, %v3229_v51 }
0x2792   :  { %5801 = vpow2.f32 %v5063_v0 }
0x2793   :  { %v3226_v39 = vpop.f32.mrf.mxu0 }
0x2794   :  { %v3227_v14 = vadd.f32 %v7424_v37, %v3226_v39 }
0x2796   :  { %3273 = vrot.lane.b32.xlu1 %v3227_v14, %s6286_s27  ;;  %v3230_v61 = vadd.f32 %v5404_v40, %v3227_v14 }
0x2798   :  { %v5064_v35 = vmul.f32 -1.442695, %v3230_v61  ;;  %v5802_v30 = vpop.eup %5801 }
0x2799   :  { %v3237_v3 = vadd.f32 1.0, %v5802_v30 }
0x279a   :  { %5803 = vpow2.f32 %v5064_v35 }
0x279b   :  { %5805 = vrcp.f32 %v3237_v3  ;;  %v3250_v48 = vand.u32 2147483648, %v3237_v3  ;;  %vm3244_vm1 = vweird.f32 %v3237_v3  ;;  %v3248_v44 = vand.u32 2147483647, %v3237_v3 }
0x279d   :  { %v3251_v18 = vor.u32 1.1754944e-38, %v3250_v48  ;;  %vm3249_vm13 = vcmp.eq.f32.partialorder %v3248_v44, 8.507059e+37 }
0x27a0   :  { %v5804_v25 = vpop.eup %5803 }
0x27a1   :  { %v3238_v6 = vadd.f32 1.0, %v5804_v25  ;;  %v5806_v46 = vpop.eup %5805 }
0x27a2   :  { %v3240_v24 = vmul.f32 %v5806_v46, %v3237_v3  ;;  %vm3245_vm11 = vweird.f32 %v5806_v46 }
0x27a3   :  { %5807 = vrcp.f32 %v3238_v6  ;;  %vm3246_vm14 = vmor %vm3244_vm1, %vm3245_vm11  ;;  %v3265_v13 = vand.u32 2147483648, %v3238_v6  ;;  %vm3259_vm3 = vweird.f32 %v3238_v6  ;;  %v3263_v57 = vand.u32 2147483647, %v3238_v6 }
0x27a4   :  { %v3241_v63 = vsub.f32 1.0, %v3240_v24 }
0x27a5   :  { %v3266_v16 = vor.u32 1.1754944e-38, %v3265_v13  ;;  %vm3264_vm2 = vcmp.eq.f32.partialorder %v3263_v57, 8.507059e+37 }
0x27a6   :  { %v3242_v11 = vmul.f32 %v5806_v46, %v3241_v63 }
0x27a8   :  { %v3243_v49 = vadd.f32 %v5806_v46, %v3242_v11 }
0x27a9   :  { %v5808_v4 = vpop.eup %5807 }
0x27aa   :  { %v3255_v1 = vmul.f32 %v5808_v4, %v3238_v6  ;;  %v3247_v60 = vsel %vm3246_vm14, %v5806_v46, %v3243_v49  ;;  %vm3260_vm10 = vweird.f32 %v5808_v4 }
0x27ab   :  { %v3252_v28 = vsel %vm3249_vm13, %v3251_v18, %v3247_v60  ;;  %vm3261_vm15 = vmor %vm3259_vm3, %vm3260_vm10 }
0x27ac   :  { %v3256_v10 = vsub.f32 1.0, %v3255_v1 }
0x27ae   :  { %v3257_v47 = vmul.f32 %v5808_v4, %v3256_v10 }
0x27b0   :  { %v3258_v22 = vadd.f32 %v5808_v4, %v3257_v47 }
0x27b2   :  { %v3262_v15 = vsel %vm3261_vm15, %v5808_v4, %v3258_v22  ;;  %v3303_v4 = vmul.f32 %v3252_v28, %v7538_v8 }
0x27b3   :  { %v3267_v0 = vsel %vm3264_vm2, %v3266_v16, %v3262_v15 }
0x27b4   :  { %v3292_v11 = vsub.f32 1.0, %v3267_v0 }
0x2800   :  { %v3272_v39 = vpop.permute.xlu0 %3271 }
0x2801   :  { %v3277_v14 = vmul.f32 %v3272_v39, %v3252_v28 }
0x2803   :  { %3281 = vrot.lane.b32.xlu2 %v3277_v14, %s6286_s27 }
0x2808   :  { %v3274_v51 = vpop.permute.xlu1 %3273 }
0x2809   :  { %v3278_v61 = vmul.f32 %v3274_v51, %v3267_v0 }
0x280b   :  { %3283 = vrot.lane.b32.xlu0 %v3278_v61, %s6286_s27 }
0x2813   :  { %1230 = vrot.lane.b32.xlu0 %v6825_v17, %s6299_s26 }
0x285d   :  { %v3282_v35 = vpop.permute.xlu2 %3281 }
0x285e   :  { %v3287_v30 = vadd.f32 %v5403_v43, %v3282_v35  ;;  %v3291_v43 = vsub.f32 1.0, %v3252_v28 }
0x2860   :  { %5809 = vtanh.f32 %v3287_v30 }
0x2866   :  { %v5810_v3 = vpop.eup %5809 }
0x2867   :  { %3295 = vrot.lane.b32.xlu1 %v5810_v3, %s6299_s26 }
0x286f   :  { %1232 = vrot.lane.b32.xlu1 %v6835_v12, %s6299_s26 }
0x287d   :  { %v3284_v25 = vpop.permute.xlu0 %3283 }
0x287e   :  { %v3288_v6 = vadd.f32 %v5404_v40, %v3284_v25  ;;  %v3304_v40 = vmul.f32 %v3267_v0, %v7543_v19 }
0x2880   :  { %5811 = vtanh.f32 %v3288_v6 }
0x2885   :  { %v1231_v46 = vpop.permute.xlu0 %1230 }
0x2886   :  { %v5812_v24 = vpop.eup %5811  ;;  %1236 = vst.msk [vmem:[#allocation3 + $0x20] sm:$0xf] %vm723_vm5, %v1231_v46 }
0x2887   :  { %2228 = vst.msk [vmem:[#allocation3 + $0x20] sm:$0xf] %vm1891_vm9, %v7224_v38  ;;  %3297 = vrot.lane.b32.xlu2 %v5812_v24, %s6299_s26 }
0x28d9   :  { %v3296_v17 = vpop.permute.xlu1 %3295 }
0x28da   :  { %v3301_v63 = vmul.f32 %v3296_v17, %v3291_v43 }
0x28dc   :  { %v3305_v49 = vadd.f32 %v3303_v4, %v3301_v63 }
0x28de   :  { %v7582_v48 = vsel %vm1094_vm6, %v3305_v49, %v7538_v8 }
0x28e1   :  { %v1233_v1 = vpop.permute.xlu1 %1232  ;;  %v3298_v12 = vpop.permute.xlu2 %3297 }
0x28e2   :  { %1237 = vst.msk [vmem:[#allocation3 + $0x24] sm:$0xf] %vm723_vm5, %v1233_v1  ;;  %v3302_v10 = vmul.f32 %v3298_v12, %v3292_v11 }
0x28e3   :  { %2229 = vst.msk [vmem:[#allocation3 + $0x24] sm:$0xf] %vm1891_vm9, %v7233_v33 }
0x28e4   :  { %v3306_v38 = vadd.f32 %v3304_v40, %v3302_v10 }
0x28e6   :  { %v7587_v44 = vsel %vm1095_vm8, %v3306_v38, %v7543_v19 }
0x28e7   :  { %v3313_v60 = vpack.c.bf16 %v7587_v44, %v7582_v48 }
0x28e9   :  { %3315 = vrot.lane.b32.xlu2 %v3313_v60, %s6299_s26 }
0x28ea   :  { %v7592_v47 = vld [vmem:[#allocation3 + $0x20] sm:$0xff] }
0x28eb   :  { %5042 = vmatmul.msk.bf16.gmra.mxu1 %vm2778_vm12, %v7592_v47 }
0x2943   :  { %v3316_v33 = vpop.permute.xlu2 %3315 }
0x2944   :  { %5065 = vmatmul.msk.bf16.vlgmr.msra.gmra.mxu2 %vm605_vm0, %v3316_v33 }
0x2968   :  { %v2832_v39 = vpop.f32.mrf.mxu1 }
0x2969   :  { %v2833_v13 = vadd.f32 %v7435_v54, %v2832_v39 }
0x2970   :  { %v2834_v14 = vpop.f32.mrf.mxu1 }
0x2971   :  { %v2835_v22 = vadd.f32 %v7435_v54, %v2834_v14 }
0x2973   :  { %v5372_v57 = vpack.c.bf16 %v2835_v22, %v2833_v13 }
0x2975   :  { %v5407_v15 = vunpack.c.l.bf16 %v5372_v57  ;;  %v5408_v0 = vunpack.c.h.bf16 %v5372_v57  ;;  %v8202_v57 = vld [vmem:[#allocation30_spill] sm:$0xff] }
0x29c7   :  { %v3329_v8 = vpop.f32.mrf.mxu2 }
0x29c8   :  { %v3330_v18 = vadd.f32 %v7424_v37, %v3329_v8 }
0x29ca   :  { %3376 = vrot.lane.b32.xlu0 %v3330_v18, %s6286_s27  ;;  %v3334_v16 = vadd.f32 %v5407_v15, %v3330_v18 }
0x29cc   :  { %v5066_v51 = vmul.f32 -1.442695, %v3334_v16 }
0x29ce   :  { %5813 = vpow2.f32 %v5066_v51 }
0x29cf   :  { %v3331_v19 = vpop.f32.mrf.mxu2 }
0x29d0   :  { %v3332_v28 = vadd.f32 %v7424_v37, %v3331_v19 }
0x29d2   :  { %3378 = vrot.lane.b32.xlu1 %v3332_v28, %s6286_s27  ;;  %v3335_v61 = vadd.f32 %v5408_v0, %v3332_v28 }
0x29d4   :  { %v5067_v35 = vmul.f32 -1.442695, %v3335_v61  ;;  %v5814_v30 = vpop.eup %5813 }
0x29d5   :  { %v3342_v3 = vadd.f32 1.0, %v5814_v30 }
0x29d6   :  { %5815 = vpow2.f32 %v5067_v35  ;;  %v8203_v35 = vld [vmem:[#allocation31_spill] sm:$0xff] }
0x29d7   :  { %5817 = vrcp.f32 %v3342_v3  ;;  %v3355_v1 = vand.u32 2147483648, %v3342_v3  ;;  %vm3349_vm1 = vweird.f32 %v3342_v3  ;;  %v3353_v12 = vand.u32 2147483647, %v3342_v3 }
0x29d9   :  { %v3356_v10 = vor.u32 1.1754944e-38, %v3355_v1  ;;  %vm3354_vm13 = vcmp.eq.f32.partialorder %v3353_v12, 8.507059e+37 }
0x29dc   :  { %v5816_v25 = vpop.eup %5815 }
0x29dd   :  { %v3343_v6 = vadd.f32 1.0, %v5816_v25  ;;  %v5818_v46 = vpop.eup %5817 }
0x29de   :  { %v3345_v24 = vmul.f32 %v5818_v46, %v3342_v3  ;;  %vm3350_vm11 = vweird.f32 %v5818_v46 }
0x29df   :  { %5819 = vrcp.f32 %v3343_v6  ;;  %vm3351_vm14 = vmor %vm3349_vm1, %vm3350_vm11  ;;  %v3370_v18 = vand.u32 2147483648, %v3343_v6  ;;  %vm3364_vm3 = vweird.f32 %v3343_v6  ;;  %v3368_v19 = vand.u32 2147483647, %v3343_v6 }
0x29e0   :  { %v3346_v17 = vsub.f32 1.0, %v3345_v24 }
0x29e1   :  { %v3371_v39 = vor.u32 1.1754944e-38, %v3370_v18  ;;  %vm3369_vm2 = vcmp.eq.f32.partialorder %v3368_v19, 8.507059e+37 }
0x29e2   :  { %v3347_v54 = vmul.f32 %v5818_v46, %v3346_v17 }
0x29e4   :  { %v3348_v4 = vadd.f32 %v5818_v46, %v3347_v54 }
0x29e5   :  { %v5820_v43 = vpop.eup %5819 }
0x29e6   :  { %v3360_v63 = vmul.f32 %v5820_v43, %v3343_v6  ;;  %v3352_v49 = vsel %vm3351_vm14, %v5818_v46, %v3348_v4  ;;  %vm3365_vm10 = vweird.f32 %v5820_v43 }
0x29e7   :  { %v3357_v38 = vsel %vm3354_vm13, %v3356_v10, %v3352_v49  ;;  %vm3366_vm15 = vmor %vm3364_vm3, %vm3365_vm10  ;;  %v5195_v10 = vld [vmem:[#allocation16 + $0x10] sm:$0xff] }
0x29e8   :  { %v3361_v11 = vsub.f32 1.0, %v3360_v63  ;;  %v3396_v46 = vsub.f32 1.0, %v3357_v38  ;;  %v3408_v17 = vmul.f32 %v3357_v38, %v7582_v48 }
0x29ea   :  { %v3362_v40 = vmul.f32 %v5820_v43, %v3361_v11 }
0x29ec   :  { %v3363_v8 = vadd.f32 %v5820_v43, %v3362_v40 }
0x29ee   :  { %v3367_v28 = vsel %vm3366_vm15, %v5820_v43, %v3363_v8 }
0x29ef   :  { %v3372_v22 = vsel %vm3369_vm2, %v3371_v39, %v3367_v28 }
0x29f0   :  { %v3397_v43 = vsub.f32 1.0, %v3372_v22 }
0x2a3c   :  { %v3377_v60 = vpop.permute.xlu0 %3376 }
0x2a3d   :  { %v3382_v33 = vmul.f32 %v3377_v60, %v3357_v38  ;;  %v5193_v38 = vld [vmem:[#allocation16] sm:$0xff] }
0x2a3f   :  { %3386 = vrot.lane.b32.xlu2 %v3382_v33, %s6286_s27 }
0x2a44   :  { %v3379_v14 = vpop.permute.xlu1 %3378 }
0x2a45   :  { %v3383_v13 = vmul.f32 %v3379_v14, %v3372_v22 }
0x2a47   :  { %3388 = vrot.lane.b32.xlu0 %v3383_v13, %s6286_s27 }
0x2a4f   :  { %1358 = vrot.lane.b32.xlu0 %v8202_v57, %s6299_s26 }
0x2a99   :  { %v3387_v16 = vpop.permute.xlu2 %3386 }
0x2a9a   :  { %v3392_v51 = vadd.f32 %v5407_v15, %v3387_v16 }
0x2a9c   :  { %5821 = vtanh.f32 %v3392_v51 }
0x2aa2   :  { %v5822_v61 = vpop.eup %5821 }
0x2aa3   :  { %3400 = vrot.lane.b32.xlu1 %v5822_v61, %s6299_s26 }
0x2aab   :  { %1360 = vrot.lane.b32.xlu1 %v8203_v35, %s6299_s26 }
0x2ab9   :  { %v3389_v30 = vpop.permute.xlu0 %3388 }
0x2aba   :  { %v3393_v3 = vadd.f32 %v5408_v0, %v3389_v30  ;;  %v3409_v0 = vmul.f32 %v3372_v22, %v7587_v44  ;;  %v7667_v30 = vld [vmem:[%s8112_s12] ss:$0 sm:$0xff] }
0x2abc   :  { %5823 = vtanh.f32 %v3393_v3 }
0x2ac1   :  { %v1359_v25 = vpop.permute.xlu0 %1358 }
0x2ac2   :  { %v5824_v6 = vpop.eup %5823  ;;  %1364 = vst.msk [vmem:[#allocation3 + $0x28] sm:$0xf] %vm723_vm5, %v1359_v25 }
0x2ac3   :  { %2116 = vst.msk [vmem:[#allocation3 + $0x28] sm:$0xf] %vm1891_vm9, %v7188_v21  ;;  %3402 = vrot.lane.b32.xlu2 %v5824_v6, %s6299_s26 }
0x2b15   :  { %v3401_v15 = vpop.permute.xlu1 %3400 }
0x2b16   :  { %v3406_v24 = vmul.f32 %v3401_v15, %v3396_v46 }
0x2b18   :  { %v3410_v4 = vadd.f32 %v3408_v17, %v3406_v24 }
0x2b1a   :  { %v7622_v1 = vsel %vm1222_vm4, %v3410_v4, %v7582_v48  ;;  %v5194_v48 = vld [vmem:[#allocation16 + $0x8] sm:$0xff] }
0x2b1d   :  { %v1361_v54 = vpop.permute.xlu1 %1360  ;;  %v3403_v63 = vpop.permute.xlu2 %3402 }
0x2b1e   :  { %1365 = vst.msk [vmem:[#allocation3 + $0x2c] sm:$0xf] %vm723_vm5, %v1361_v54  ;;  %v3407_v11 = vmul.f32 %v3403_v63, %v3397_v43 }
0x2b1f   :  { %2117 = vst.msk [vmem:[#allocation3 + $0x2c] sm:$0xf] %vm1891_vm9, %v7197_v31  ;;  %v5196_v31 = vld [vmem:[#allocation16 + $0x18] sm:$0xff] }
0x2b20   :  { %v3411_v21 = vadd.f32 %v3409_v0, %v3407_v11  ;;  %3777 = vmatpush.bf16.msrb.mxu0 %v5196_v31  ;;  %5549 = vmatpush.bf16.msra.mxu3 %v5196_v31 }
0x2b22   :  { %v7627_v12 = vsel %vm1223_vm7, %v3411_v21, %v7587_v44 }
0x2b23   :  { %v3418_v49 = vpack.c.bf16 %v7627_v12, %v7622_v1 }
0x2b24   :  { %3778 = vmatpush.bf16.msrb.mxu0 %v5195_v10  ;;  %5550 = vmatpush.bf16.msra.mxu3 %v5195_v10 }
0x2b25   :  { %3420 = vrot.lane.b32.xlu2 %v3418_v49, %s6299_s26 }
0x2b26   :  { %v5184_v40 = vld [vmem:[#allocation3 + $0x28] sm:$0xff] }
0x2b27   :  { %5043 = vmatmul.msk.bf16.gmra.mxu1 %vm2778_vm12, %v5184_v40 }
0x2b28   :  { %3779 = vmatpush.bf16.msrb.mxu0 %v5194_v48  ;;  %5551 = vmatpush.bf16.msra.mxu3 %v5194_v48 }
0x2b2c   :  { %3780 = vmatpush.bf16.msrb.mxu0 %v5193_v38  ;;  %5552 = vmatpush.bf16.msra.mxu3 %v5193_v38 }
0x2b7f   :  { %v3421_v44 = vpop.permute.xlu2 %3420 }
0x2b80   :  { %5068 = vmatmul.msk.bf16.vlgmr.msra.gmra.mxu0 %vm605_vm0, %v3421_v44 }
0x2b90   :  { %5093 = vmatmul.msk.bf16.vlgmr.msrb.gmra.mxu0 %vm2778_vm12, %v7419_v41 }
0x2ba0   :  { %5094 = vmatmul.msk.bf16.gmra.mxu0 %vm2778_vm12, %v7464_v53 }
0x2ba4   :  { %v2837_v13 = vpop.f32.mrf.mxu1 }
0x2ba5   :  { %v2838_v6 = vadd.f32 %v7667_v30, %v2837_v13 }
0x2bac   :  { %v2839_v16 = vpop.f32.mrf.mxu1 }
0x2bad   :  { %v2840_v3 = vadd.f32 %v7667_v30, %v2839_v16 }
0x2baf   :  { %v7673_v15 = vpack.c.bf16 %v2840_v3, %v2838_v6 }
0x2bb0   :  { %5095 = vmatmul.msk.bf16.gmra.mxu0 %vm2778_vm12, %v7506_v42  ;;  %v7652_v42 = vld [vmem:[%s8116_s16] ss:$0 sm:$0xff] }
0x2bb1   :  { %v5411_v24 = vunpack.c.l.bf16 %v7673_v15  ;;  %v5412_v0 = vunpack.c.h.bf16 %v7673_v15 }
0x2bc0   :  { %5096 = vmatmul.msk.bf16.gmra.mxu0 %vm2778_vm12, %v7548_v27 }
0x2bd0   :  { %5097 = vmatmul.msk.bf16.gmra.mxu0 %vm2778_vm12, %v7592_v47 }
0x2be0   :  { %5098 = vmatmul.msk.bf16.gmra.mxu0 %vm2778_vm12, %v5184_v40 }
0x2bfd   :  { %v3434_v60 = vpop.f32.mrf.mxu0 }
0x2bfe   :  { %v3435_v33 = vadd.f32 %v7424_v37, %v3434_v60 }
0x2c00   :  { %3481 = vrot.lane.b32.xlu0 %v3435_v33, %s6286_s27  ;;  %v3439_v17 = vadd.f32 %v5411_v24, %v3435_v33 }
0x2c02   :  { %v5069_v43 = vmul.f32 -1.442695, %v3439_v17 }
0x2c04   :  { %5825 = vpow2.f32 %v5069_v43 }
0x2c05   :  { %v3436_v41 = vpop.f32.mrf.mxu0 }
0x2c06   :  { %v3437_v8 = vadd.f32 %v7424_v37, %v3436_v41 }
0x2c08   :  { %3483 = vrot.lane.b32.xlu1 %v3437_v8, %s6286_s27  ;;  %v3440_v21 = vadd.f32 %v5412_v0, %v3437_v8 }
0x2c0a   :  { %v5070_v49 = vmul.f32 -1.442695, %v3440_v21  ;;  %v5826_v31 = vpop.eup %5825 }
0x2c0b   :  { %v3447_v10 = vadd.f32 1.0, %v5826_v31 }
0x2c0c   :  { %5827 = vpow2.f32 %v5070_v49 }
0x2c0d   :  { %v3782_v53 = vpop.f32.mrf.mxu0  ;;  %5829 = vrcp.f32 %v3447_v10  ;;  %vm3454_vm1 = vweird.f32 %v3447_v10  ;;  %v3458_v13 = vand.u32 2147483647, %v3447_v10 }
0x2c0e   :  { %v3783_v47 = vadd.f32 %v7652_v42, %v3782_v53 }
0x2c0f   :  { %vm3459_vm13 = vcmp.eq.f32.partialorder %v3458_v13, 8.507059e+37 }
0x2c12   :  { %v5828_v60 = vpop.eup %5827 }
0x2c13   :  { %v3448_v41 = vadd.f32 1.0, %v5828_v60  ;;  %v5830_v53 = vpop.eup %5829 }
0x2c14   :  { %vm3455_vm11 = vweird.f32 %v5830_v53 }
0x2c15   :  { %v3784_v27 = vpop.f32.mrf.mxu0  ;;  %5831 = vrcp.f32 %v3448_v41  ;;  %vm3456_vm14 = vmor %vm3454_vm1, %vm3455_vm11  ;;  %v3475_v15 = vand.u32 2147483648, %v3448_v41  ;;  %vm3469_vm3 = vweird.f32 %v3448_v41  ;;  %vm8204_vm11 = vcmp.eq.s32.totalorder %v6934_v62, 1 }
0x2c16   :  { %v3785_v18 = vadd.f32 %v7652_v42, %v3784_v27  ;;  %v3450_v27 = vmul.f32 %v5830_v53, %v3447_v10  ;;  %vm8205_vm1 = vcmp.eq.s32.totalorder %v6943_v2, 1 }
0x2c17   :  { %v3476_v43 = vor.u32 1.1754944e-38, %v3475_v15 }
0x2c18   :  { %v7656_v19 = vpack.c.bf16 %v3785_v18, %v3783_v47  ;;  %v3451_v47 = vsub.f32 1.0, %v3450_v27 }
0x2c1a   :  { %v3452_v18 = vmul.f32 %v5830_v53, %v3451_v47 }
0x2c1b   :  { %v5832_v8 = vpop.eup %5831 }
0x2c1c   :  { %vm3470_vm10 = vweird.f32 %v5832_v8 }
0x2c1d   :  { %v3787_v28 = vpop.f32.mrf.mxu0  ;;  %vm3471_vm15 = vmor %vm3469_vm3, %vm3470_vm10 }
0x2c1e   :  { %v3788_v14 = vadd.f32 %v7652_v42, %v3787_v28  ;;  %v3465_v28 = vmul.f32 %v5832_v8, %v3448_v41 }
0x2c25   :  { %v3789_v39 = vpop.f32.mrf.mxu0 }
0x2c26   :  { %v3790_v37 = vadd.f32 %v7652_v42, %v3789_v39  ;;  %v3453_v39 = vadd.f32 %v5830_v53, %v3452_v18 }
0x2c28   :  { %v7660_v22 = vpack.c.bf16 %v3790_v37, %v3788_v14  ;;  %v3466_v14 = vsub.f32 1.0, %v3465_v28  ;;  %v3460_v37 = vand.u32 2147483648, %v3447_v10 }
0x2c2a   :  { %v3467_v16 = vmul.f32 %v5832_v8, %v3466_v14  ;;  %v8206_v14 = vld [vmem:[#allocation39_spill] sm:$0xff] }
0x2c2c   :  { %v3468_v6 = vadd.f32 %v5832_v8, %v3467_v16 }
0x2c2d   :  { %v3792_v57 = vpop.f32.mrf.mxu0 }
0x2c2e   :  { %v3793_v61 = vadd.f32 %v7652_v42, %v3792_v57  ;;  %v3457_v57 = vsel %vm3456_vm14, %v5830_v53, %v3453_v39  ;;  %v3472_v17 = vsel %vm3471_vm15, %v5832_v8, %v3468_v6 }
0x2c35   :  { %v3794_v51 = vpop.f32.mrf.mxu0 }
0x2c36   :  { %v3795_v35 = vadd.f32 %v7652_v42, %v3794_v51  ;;  %v3461_v51 = vor.u32 1.1754944e-38, %v3460_v37 }
0x2c38   :  { %v7670_v25 = vpack.c.bf16 %v3795_v35, %v3793_v61  ;;  %v3462_v61 = vsel %vm3459_vm13, %v3461_v51, %v3457_v57 }
0x2c39   :  { %v3513_v60 = vmul.f32 %v3462_v61, %v7622_v1 }
0x2c3a   :  { %v5483_v52 = vunpack.c.l.bf16 %v7670_v25 }
0x2c3d   :  { %v3797_v46 = vpop.f32.mrf.mxu0 }
0x2c3e   :  { %v3798_v63 = vadd.f32 %v7652_v42, %v3797_v46  ;;  %v3473_v46 = vand.u32 2147483647, %v3448_v41 }
0x2c40   :  { %vm3474_vm2 = vcmp.eq.f32.partialorder %v3473_v46, 8.507059e+37 }
0x2c45   :  { %v3799_v54 = vpop.f32.mrf.mxu0 }
0x2c46   :  { %v3800_v4 = vadd.f32 %v7652_v42, %v3799_v54 }
0x2c48   :  { %v7679_v11 = vpack.c.bf16 %v3800_v4, %v3798_v63  ;;  %v3477_v63 = vsel %vm3474_vm2, %v3476_v43, %v3472_v17 }
0x2c49   :  { %v3502_v41 = vsub.f32 1.0, %v3477_v63 }
0x2c4a   :  { %v5480_v7 = vunpack.c.h.bf16 %v7679_v11 }
0x2c4d   :  { %v3802_v40 = vpop.f32.mrf.mxu0 }
0x2c4e   :  { %v3803_v38 = vadd.f32 %v7652_v42, %v3802_v40 }
0x2c55   :  { %v3804_v48 = vpop.f32.mrf.mxu0 }
0x2c56   :  { %v3805_v44 = vadd.f32 %v7652_v42, %v3804_v48 }
0x2c58   :  { %v7683_v33 = vpack.c.bf16 %v3805_v44, %v3803_v38 }
0x2c72   :  { %v3482_v35 = vpop.permute.xlu0 %3481 }
0x2c73   :  { %v3487_v3 = vmul.f32 %v3482_v35, %v3462_v61 }
0x2c75   :  { %3491 = vrot.lane.b32.xlu2 %v3487_v3, %s6286_s27 }
0x2c7a   :  { %v3484_v54 = vpop.permute.xlu1 %3483 }
0x2c7b   :  { %v3488_v4 = vmul.f32 %v3484_v54, %v3477_v63 }
0x2c7d   :  { %3493 = vrot.lane.b32.xlu0 %v3488_v4, %s6286_s27  ;;  %v8207_v4 = vld [vmem:[#allocation40_spill] sm:$0xff] }
0x2c85   :  { %1486 = vrot.lane.b32.xlu0 %v7078_v55, %s6299_s26 }
0x2ccf   :  { %v3492_v21 = vpop.permute.xlu2 %3491 }
0x2cd0   :  { %v3497_v49 = vadd.f32 %v5411_v24, %v3492_v21  ;;  %v3501_v24 = vsub.f32 1.0, %v3462_v61 }
0x2cd2   :  { %5833 = vtanh.f32 %v3497_v49 }
0x2cd8   :  { %v5834_v40 = vpop.eup %5833 }
0x2cd9   :  { %3505 = vrot.lane.b32.xlu1 %v5834_v40, %s6299_s26 }
0x2ce1   :  { %1488 = vrot.lane.b32.xlu1 %v7087_v9, %s6299_s26 }
0x2cef   :  { %v3494_v31 = vpop.permute.xlu0 %3493 }
0x2cf0   :  { %v3498_v10 = vadd.f32 %v5412_v0, %v3494_v31  ;;  %v3514_v0 = vmul.f32 %v3477_v63, %v7627_v12 }
0x2cf2   :  { %5835 = vtanh.f32 %v3498_v10 }
0x2cf7   :  { %v1487_v48 = vpop.permute.xlu0 %1486 }
0x2cf8   :  { %v5836_v38 = vpop.eup %5835  ;;  %1492 = vst.msk [vmem:[#allocation3 + $0x30] sm:$0xf] %vm723_vm5, %v1487_v48 }
0x2cf9   :  { %2004 = vst.msk [vmem:[#allocation3 + $0x30] sm:$0xf] %vm1891_vm9, %v7150_v20  ;;  %3507 = vrot.lane.b32.xlu2 %v5836_v38, %s6299_s26 }
0x2d4b   :  { %v3506_v55 = vpop.permute.xlu1 %3505 }
0x2d4c   :  { %v3511_v44 = vmul.f32 %v3506_v55, %v3501_v24 }
0x2d4e   :  { %v3515_v27 = vadd.f32 %v3513_v60, %v3511_v44 }
0x2d50   :  { %v7704_v8 = vsel %vm8204_vm11, %v3515_v27, %v7622_v1 }
0x2d53   :  { %v1489_v53 = vpop.permute.xlu1 %1488  ;;  %v3508_v9 = vpop.permute.xlu2 %3507 }
0x2d54   :  { %1493 = vst.msk [vmem:[#allocation3 + $0x34] sm:$0xf] %vm723_vm5, %v1489_v53  ;;  %v3512_v47 = vmul.f32 %v3508_v9, %v3502_v41 }
0x2d55   :  { %2005 = vst.msk [vmem:[#allocation3 + $0x34] sm:$0xf] %vm1891_vm9, %v7159_v29  ;;  %v5976_v29 = vld [vmem:[#allocation9] ss:$0 sm:$0xff] }
0x2d56   :  { %v3516_v20 = vadd.f32 %v3514_v0, %v3512_v47  ;;  %v1516_v37 = vadd.f32 %v5976_v29, %v8206_v14  ;;  %v1518_v21 = vadd.f32 %v5976_v29, %v8207_v4 }
0x2d58   :  { %v7709_v18 = vsel %vm8205_vm1, %v3516_v20, %v7627_v12  ;;  %v5977_v12 = vld [vmem:[#allocation7] ss:$0 sm:$0xff] }
0x2d59   :  { %v3523_v28 = vpack.c.bf16 %v7709_v18, %v7704_v8  ;;  %v555_v13 = vadd.f32 %v5977_v12, %v7555_v36  ;;  %v553_v57 = vadd.f32 %v5977_v12, %v7553_v26  ;;  %v5978_v26 = vld [vmem:[%s8113_s13] ss:$0 sm:$0xff] }
0x2d5b   :  { %3525 = vrot.lane.b32.xlu2 %v3523_v28, %s6299_s26  ;;  %v7723_v16 = vpack.c.bf16 %v555_v13, %v553_v57 }
0x2d5c   :  { %v7714_v39 = vld [vmem:[#allocation3 + $0x30] sm:$0xff] }
0x2d5d   :  { %5044 = vmatmul.msk.bf16.gmra.mxu1 %vm2778_vm12, %v7714_v39  ;;  %v5275_v51 = vunpack.c.l.bf16 %v7723_v16  ;;  %v5276_v28 = vunpack.c.h.bf16 %v7723_v16 }
0x2d5f   :  { %v1520_v61 = vadd.f32 %v5275_v51, %v1516_v37  ;;  %v1521_v14 = vadd.f32 %v5276_v28, %v1518_v21 }
0x2d61   :  { %v4925_v35 = vmul.f32 -1.442695, %v1520_v61 }
0x2d63   :  { %1562 = vrot.lane.b32.xlu2 %v1516_v37, %s6286_s27  ;;  %5837 = vpow2.f32 %v4925_v35 }
0x2d69   :  { %v5838_v3 = vpop.eup %5837 }
0x2d6a   :  { %v1528_v6 = vadd.f32 1.0, %v5838_v3 }
0x2d6c   :  { %5839 = vrcp.f32 %v1528_v6  ;;  %v1541_v31 = vand.u32 2147483648, %v1528_v6  ;;  %vm1535_vm13 = vweird.f32 %v1528_v6  ;;  %v1539_v10 = vand.u32 2147483647, %v1528_v6 }
0x2d6e   :  { %v1542_v55 = vor.u32 1.1754944e-38, %v1541_v31  ;;  %vm1540_vm3 = vcmp.eq.f32.partialorder %v1539_v10, 8.507059e+37 }
0x2d72   :  { %v5840_v15 = vpop.eup %5839 }
0x2d73   :  { %v1531_v46 = vmul.f32 %v5840_v15, %v1528_v6  ;;  %vm1536_vm14 = vweird.f32 %v5840_v15 }
0x2d74   :  { %vm1537_vm10 = vmor %vm1535_vm13, %vm1536_vm14 }
0x2d75   :  { %v1532_v43 = vsub.f32 1.0, %v1531_v46 }
0x2d77   :  { %v1533_v54 = vmul.f32 %v5840_v15, %v1532_v43 }
0x2d79   :  { %v1534_v49 = vadd.f32 %v5840_v15, %v1533_v54 }
0x2d7b   :  { %v1538_v48 = vsel %vm1537_vm10, %v5840_v15, %v1534_v49 }
0x2d7c   :  { %v7735_v24 = vsel %vm1540_vm3, %v1542_v55, %v1538_v48 }
0x2db5   :  { %v3526_v1 = vpop.permute.xlu2 %3525 }
0x2db6   :  { %5071 = vmatmul.msk.bf16.vlgmr.msrb.gmra.mxu2 %vm605_vm0, %v3526_v1 }
0x2dbd   :  { %v1563_v38 = vpop.permute.xlu2 %1562 }
0x2dbe   :  { %v1568_v44 = vmul.f32 %v1563_v38, %v7735_v24 }
0x2dda   :  { %v2842_v60 = vpop.f32.mrf.mxu1 }
0x2ddb   :  { %v2843_v9 = vadd.f32 %v7667_v30, %v2842_v60 }
0x2de2   :  { %v2844_v41 = vpop.f32.mrf.mxu1 }
0x2de3   :  { %v2845_v53 = vadd.f32 %v7667_v30, %v2844_v41  ;;  %v4926_v30 = vmul.f32 -1.442695, %v1521_v14 }
0x2de5   :  { %v7741_v27 = vpack.c.bf16 %v2845_v53, %v2843_v9 }
0x2de7   :  { %v5415_v0 = vunpack.c.l.bf16 %v7741_v27  ;;  %v5416_v29 = vunpack.c.h.bf16 %v7741_v27 }
0x2e39   :  { %v3539_v17 = vpop.f32.mrf.mxu2 }
0x2e3a   :  { %v3540_v36 = vadd.f32 %v5978_v26, %v3539_v17 }
0x2e3c   :  { %3586 = vrot.lane.b32.xlu0 %v3540_v36, %s6286_s27  ;;  %v3544_v47 = vadd.f32 %v5415_v0, %v3540_v36 }
0x2e3e   :  { %v5072_v20 = vmul.f32 -1.442695, %v3544_v47 }
0x2e40   :  { %5841 = vpow2.f32 %v5072_v20 }
0x2e41   :  { %v3541_v63 = vpop.f32.mrf.mxu2  ;;  %5843 = vpow2.f32 %v4926_v30 }
0x2e42   :  { %v3542_v40 = vadd.f32 %v5978_v26, %v3541_v63 }
0x2e44   :  { %3588 = vrot.lane.b32.xlu1 %v3542_v40, %s6286_s27  ;;  %1564 = vrot.lane.b32.xlu0 %v1518_v21, %s6286_s27  ;;  %v3545_v37 = vadd.f32 %v5416_v29, %v3542_v40 }
0x2e46   :  { %v5073_v1 = vmul.f32 -1.442695, %v3545_v37  ;;  %v5842_v12 = vpop.eup %5841 }
0x2e47   :  { %v3552_v13 = vadd.f32 1.0, %v5842_v12  ;;  %v5844_v57 = vpop.eup %5843 }
0x2e48   :  { %5845 = vpow2.f32 %v5073_v1  ;;  %v1529_v35 = vadd.f32 1.0, %v5844_v57 }
0x2e49   :  { %5847 = vrcp.f32 %v3552_v13  ;;  %v3565_v49 = vand.u32 2147483648, %v3552_v13  ;;  %vm3559_vm2 = vweird.f32 %v3552_v13  ;;  %v3563_v40 = vand.u32 2147483647, %v3552_v13 }
0x2e4a   :  { %5849 = vrcp.f32 %v1529_v35  ;;  %vm1550_vm10 = vweird.f32 %v1529_v35  ;;  %v1556_v47 = vand.u32 2147483648, %v1529_v35  ;;  %v1554_v14 = vand.u32 2147483647, %v1529_v35 }
0x2e4b   :  { %v3566_v38 = vor.u32 1.1754944e-38, %v3565_v49  ;;  %vm3564_vm1 = vcmp.eq.f32.partialorder %v3563_v40, 8.507059e+37 }
0x2e4c   :  { %1572 = vrot.lane.b32.xlu0 %v1568_v44, %s6286_s27  ;;  %v1557_v12 = vor.u32 1.1754944e-38, %v1556_v47  ;;  %v8211_v47 = vld [vmem:[#allocation34_spill] sm:$0xff] }
0x2e4e   :  { %v5846_v61 = vpop.eup %5845 }
0x2e4f   :  { %v3553_v3 = vadd.f32 1.0, %v5846_v61  ;;  %v5848_v6 = vpop.eup %5847 }
0x2e50   :  { %v3555_v15 = vmul.f32 %v5848_v6, %v3552_v13  ;;  %v5850_v46 = vpop.eup %5849  ;;  %vm3560_vm15 = vweird.f32 %v5848_v6 }
0x2e51   :  { %5851 = vrcp.f32 %v3553_v3  ;;  %v1546_v54 = vmul.f32 %v5850_v46, %v1529_v35  ;;  %vm3561_vm11 = vmor %vm3559_vm2, %vm3560_vm15  ;;  %vm1551_vm14 = vweird.f32 %v5850_v46  ;;  %v3580_v9 = vand.u32 2147483648, %v3553_v3 }
0x2e52   :  { %v3556_v17 = vsub.f32 1.0, %v3555_v15  ;;  %vm3574_vm3 = vweird.f32 %v3553_v3  ;;  %v3578_v20 = vand.u32 2147483647, %v3553_v3  ;;  %vm1552_vm15 = vmor %vm1550_vm10, %vm1551_vm14 }
0x2e53   :  { %v1547_v21 = vsub.f32 1.0, %v1546_v54  ;;  %v3581_v1 = vor.u32 1.1754944e-38, %v3580_v9 }
0x2e54   :  { %v3557_v26 = vmul.f32 %v5848_v6, %v3556_v17 }
0x2e55   :  { %v1548_v48 = vmul.f32 %v5850_v46, %v1547_v21 }
0x2e56   :  { %v3558_v63 = vadd.f32 %v5848_v6, %v3557_v26 }
0x2e57   :  { %v5852_v43 = vpop.eup %5851  ;;  %v1549_v53 = vadd.f32 %v5850_v46, %v1548_v48  ;;  %v8209_v48 = vld [vmem:[#allocation35_spill] sm:$0xff] }
0x2e58   :  { %v3570_v36 = vmul.f32 %v5852_v43, %v3553_v3  ;;  %v3562_v31 = vsel %vm3561_vm11, %v5848_v6, %v3558_v63  ;;  %vm3575_vm13 = vweird.f32 %v5852_v43  ;;  %vm3579_vm11 = vcmp.eq.f32.partialorder %v3578_v20, 8.507059e+37 }
0x2e59   :  { %v3567_v55 = vsel %vm3564_vm1, %v3566_v38, %v3562_v31  ;;  %vm3576_vm2 = vmor %vm3574_vm3, %vm3575_vm13  ;;  %v1553_v30 = vsel %vm1552_vm15, %v5850_v46, %v1549_v53  ;;  %vm1555_vm1 = vcmp.eq.f32.partialorder %v1554_v14, 8.507059e+37  ;;  %v8208_v31 = vld [vmem:[#allocation32_spill] sm:$0xff]  ;;  %vm8210_vm14 = vcmp.eq.s32.totalorder %v8209_v48, 1 }
0x2e5a   :  { %v3571_v4 = vsub.f32 1.0, %v3570_v36  ;;  %v1558_v6 = vsel %vm1555_vm1, %v1557_v12, %v1553_v30  ;;  %vm8212_vm13 = vcmp.eq.s32.totalorder %v7062_v58, 1 }
0x2e5b   :  { %v1583_v53 = vsub.f32 1.0, %v1558_v6  ;;  %v1595_v20 = vmul.f32 %v1558_v6, %v8211_v47 }
0x2e5c   :  { %v3572_v10 = vmul.f32 %v5852_v43, %v3571_v4 }
0x2e5e   :  { %v3573_v41 = vadd.f32 %v5852_v43, %v3572_v10  ;;  %v1594_v10 = vmul.f32 %v7735_v24, %v8208_v31 }
0x2e60   :  { %v3577_v37 = vsel %vm3576_vm2, %v5852_v43, %v3573_v41  ;;  %v3618_v41 = vmul.f32 %v3567_v55, %v7704_v8 }
0x2e61   :  { %v3582_v57 = vsel %vm3579_vm11, %v3581_v1, %v3577_v37 }
0x2e62   :  { %v3607_v9 = vsub.f32 1.0, %v3582_v57  ;;  %v3619_v1 = vmul.f32 %v3582_v57, %v7709_v18 }
0x2eae   :  { %v3587_v44 = vpop.permute.xlu0 %3586 }
0x2eaf   :  { %v3592_v60 = vmul.f32 %v3587_v44, %v3567_v55  ;;  %v3606_v44 = vsub.f32 1.0, %v3567_v55  ;;  %v8213_v55 = vld [vmem:[#allocation36_spill] sm:$0xff] }
0x2eb0   :  { %vm8214_vm10 = vcmp.eq.s32.totalorder %v8213_v55, 1 }
0x2eb1   :  { %3596 = vrot.lane.b32.xlu1 %v3592_v60, %s6286_s27 }
0x2eb6   :  { %v3589_v13 = vpop.permute.xlu1 %3588  ;;  %v1565_v61 = vpop.permute.xlu0 %1564 }
0x2eb7   :  { %v3593_v15 = vmul.f32 %v3589_v13, %v3582_v57  ;;  %v1569_v17 = vmul.f32 %v1565_v61, %v1558_v6  ;;  %v8215_v6 = vld [vmem:[#allocation33_spill] sm:$0xff] }
0x2eb8   :  { %vm8216_vm3 = vcmp.eq.s32.totalorder %v8215_v6, 1 }
0x2eb9   :  { %1574 = vrot.lane.b32.xlu1 %v1569_v17, %s6286_s27  ;;  %3598 = vrot.lane.b32.xlu2 %v3593_v15, %s6286_s27 }
0x2ebe   :  { %v1573_v3 = vpop.permute.xlu0 %1572 }
0x2ebf   :  { %v1578_v35 = vadd.f32 %v5275_v51, %v1573_v3 }
0x2ec1   :  { %5853 = vtanh.f32 %v1578_v35 }
0x2ec7   :  { %v5854_v46 = vpop.eup %5853 }
0x2ec8   :  { %1586 = vrot.lane.b32.xlu1 %v5854_v46, %s6299_s26  ;;  %v7792_v46 = vld [vmem:[#allocation18 + $0x8] sm:$0xff] }
0x2ec9   :  { %3876 = vmatpush.bf16.msra.mxu2 %v7792_v46  ;;  %4506 = vmatpush.bf16.msra.mxu1 %v7792_v46 }
0x2f13   :  { %v3599_v43 = vpop.permute.xlu2 %3598 }
0x2f14   :  { %v3603_v26 = vadd.f32 %v5416_v29, %v3599_v43  ;;  %v1582_v29 = vsub.f32 1.0, %v7735_v24 }
0x2f16   :  { %5855 = vtanh.f32 %v3603_v26  ;;  %v8218_v26 = vld [vmem:[#allocation37_spill] sm:$0xff] }
0x2f1c   :  { %v5856_v36 = vpop.eup %5855 }
0x2f1d   :  { %3612 = vrot.lane.b32.xlu0 %v5856_v36, %s6299_s26 }
0x2f23   :  { %v3597_v54 = vpop.permute.xlu1 %3596 }
0x2f24   :  { %v3602_v63 = vadd.f32 %v5415_v0, %v3597_v54  ;;  %v8219_v54 = vld [vmem:[#allocation38_spill] sm:$0xff] }
0x2f26   :  { %5857 = vtanh.f32 %v3602_v63 }
0x2f2b   :  { %v1575_v4 = vpop.permute.xlu1 %1574 }
0x2f2c   :  { %v5858_v21 = vpop.eup %5857  ;;  %v1579_v51 = vadd.f32 %v5276_v28, %v1575_v4 }
0x2f2d   :  { %3610 = vrot.lane.b32.xlu2 %v5858_v21, %s6299_s26  ;;  %v7823_v21 = vld [vmem:[%s8117_s17] ss:$0 sm:$0xff] }
0x2f2e   :  { %5859 = vtanh.f32 %v1579_v51 }
0x2f34   :  { %v5860_v49 = vpop.eup %5859 }
0x2f35   :  { %1588 = vrot.lane.b32.xlu2 %v5860_v49, %s6299_s26 }
0x2f3a   :  { %v1587_v40 = vpop.permute.xlu1 %1586 }
0x2f3b   :  { %v1592_v27 = vmul.f32 %v1587_v40, %v1582_v29 }
0x2f3d   :  { %v1596_v0 = vadd.f32 %v1594_v10, %v1592_v27 }
0x2f3f   :  { %v1608_v38 = vsel %vm8210_vm14, %v1596_v0, %v8208_v31 }
0x2f40   :  { %v1610_v16 = vpack.c.bf16 %v1608_v38, %v1608_v38 }
0x2f42   :  { %1614 = vrot.lane.b32.xlu1 %v1610_v16, %s6299_s26 }
0x2f87   :  { %v3611_v28 = vpop.permute.xlu2 %3610 }
0x2f88   :  { %v3616_v60 = vmul.f32 %v3611_v28, %v3606_v44 }
0x2f8a   :  { %v3620_v37 = vadd.f32 %v3618_v41, %v3616_v60 }
0x2f8c   :  { %v7780_v15 = vsel %vm8212_vm13, %v3620_v37, %v7704_v8  ;;  %v7797_v8 = vld [vmem:[#allocation18] sm:$0xff]  ;;  %vm8220_vm13 = vcmp.eq.s32.totalorder %v8209_v48, 1 }
0x2f8d   :  { %3877 = vmatpush.bf16.msra.mxu2 %v7797_v8  ;;  %4507 = vmatpush.bf16.msra.mxu1 %v7797_v8 }
0x2f8f   :  { %v1589_v14 = vpop.permute.xlu2 %1588  ;;  %v3613_v24 = vpop.permute.xlu0 %3612 }
0x2f90   :  { %v1593_v30 = vmul.f32 %v1589_v14, %v1583_v53  ;;  %v3617_v12 = vmul.f32 %v3613_v24, %v3607_v9 }
0x2f91   :  { %4086 = vmatpush.bf16.msrb.mxu2 %v7792_v46 }
0x2f92   :  { %v1597_v13 = vadd.f32 %v1595_v20, %v1593_v30  ;;  %v3621_v61 = vadd.f32 %v3619_v1, %v3617_v12 }
0x2f94   :  { %v1609_v17 = vsel %vm8214_vm10, %v1597_v13, %v8211_v47  ;;  %v7788_v3 = vsel %vm8216_vm3, %v3621_v61, %v7709_v18  ;;  %v8217_v18 = vmov 0  }
0x2f95   :  { %v1611_v35 = vpack.c.bf16 %v1609_v17, %v1609_v17  ;;  %v3628_v57 = vpack.c.bf16 %v7788_v3, %v7780_v15  ;;  %3878 = vmatmul.bf16.vlgmr.msra.gmra.mxu2 %v8217_v18 }
0x2f96   :  { %4087 = vmatpush.bf16.msrb.mxu2 %v7797_v8 }
0x2f97   :  { %1616 = vrot.lane.b32.xlu2 %v1611_v35, %s6299_s26  ;;  %3630 = vrot.lane.b32.xlu0 %v3628_v57, %s6299_s26 }
0x2f9a   :  { %4296 = vmatpush.bf16.msra.mxu2 %v7792_v46 }
0x2f9e   :  { %4297 = vmatpush.bf16.msra.mxu2 %v7797_v8 }
0x2fb4   :  { %v1615_v43 = vpop.permute.xlu1 %1614 }
0x2fb5   :  { %1620 = vst.msk [vmem:[#allocation3 + $0x38] sm:$0xf] %vm723_vm5, %v1615_v43 }
0x2fb6   :  { %1892 = vst.msk [vmem:[#allocation3 + $0x38] sm:$0xf] %vm1891_vm9, %v8218_v26 }
0x2ff1   :  { %v1617_v36 = vpop.permute.xlu2 %1616 }
0x2ff2   :  { %1621 = vst.msk [vmem:[#allocation3 + $0x3c] sm:$0xf] %vm723_vm5, %v1617_v36 }
0x2ff3   :  { %1893 = vst.msk [vmem:[#allocation3 + $0x3c] sm:$0xf] %vm1891_vm9, %v8219_v54 }
0x2ffa   :  { %v5186_v63 = vld [vmem:[#allocation3 + $0x38] sm:$0xff] }
0x2ffb   :  { %5045 = vmatmul.msk.bf16.gmra.mxu1 %vm2778_vm12, %v5186_v63 }
0x3009   :  { %v3631_v4 = vpop.permute.xlu0 %3630 }
0x300a   :  { %5074 = vmatmul.msk.bf16.vlgmr.msrb.gmra.mxu3 %vm605_vm0, %v3631_v4 }
0x300b   :  { %3981 = vmatpush.bf16.msrb.mxu3 %v7792_v46 }
0x300f   :  { %3982 = vmatpush.bf16.msrb.mxu3 %v7797_v8 }
0x3018   :  { %v3879_v51 = vpop.f32.mrf.mxu2 }
0x3019   :  { %v3880_v49 = vadd.f32 %v7823_v21, %v3879_v51 }
0x301a   :  { %5099 = vmatmul.msk.bf16.vlgmr.msra.gmra.mxu3 %vm2778_vm12, %v7714_v39 }
0x301b   :  { %4191 = vmatpush.bf16.msra.mxu3 %v7792_v46  ;;  %3926 = vrot.lane.b32.xlu0 %v3880_v49, %s6286_s27 }
0x301f   :  { %4192 = vmatpush.bf16.msra.mxu3 %v7797_v8 }
0x3020   :  { %v3881_v29 = vpop.f32.mrf.mxu2 }
0x3021   :  { %v3882_v40 = vadd.f32 %v7823_v21, %v3881_v29 }
0x3023   :  { %3928 = vrot.lane.b32.xlu1 %v3882_v40, %s6286_s27 }
0x302a   :  { %5100 = vmatmul.msk.bf16.gmra.mxu3 %vm2778_vm12, %v5186_v63 }
0x308d   :  { %v7831_v39 = vpop.f32.mrf.mxu3 }
0x3095   :  { %v7833_v31 = vpop.f32.mrf.mxu3 }
0x309d   :  { %v3812_v10 = vpop.f32.mrf.mxu3 }
0x309e   :  { %v3813_v0 = vadd.f32 %v7652_v42, %v3812_v10 }
0x30a5   :  { %v3814_v27 = vpop.f32.mrf.mxu3 }
0x30a6   :  { %v3815_v38 = vadd.f32 %v7652_v42, %v3814_v27 }
0x30a8   :  { %v7837_v16 = vpack.c.bf16 %v3815_v38, %v3813_v0 }
0x30ad   :  { %v3817_v28 = vpop.f32.mrf.mxu3 }
0x30ae   :  { %v3818_v60 = vadd.f32 %v7652_v42, %v3817_v28  ;;  %v3927_v28 = vpop.permute.xlu0 %3926 }
0x30b5   :  { %v3819_v44 = vpop.f32.mrf.mxu3 }
0x30b6   :  { %v3820_v41 = vadd.f32 %v7652_v42, %v3819_v44  ;;  %v3929_v44 = vpop.permute.xlu1 %3928 }
0x30b8   :  { %v5459_v53 = vpack.c.bf16 %v3820_v41, %v3818_v60 }
0x30ba   :  { %v5463_v9 = vunpack.c.l.bf16 %v5459_v53  ;;  %v5464_v47 = vunpack.c.h.bf16 %v5459_v53 }
0x30bc   :  { %v3884_v20 = vadd.f32 %v5463_v9, %v3880_v49  ;;  %v3885_v14 = vadd.f32 %v5464_v47, %v3882_v40 }
0x30be   :  { %v5109_v24 = vmul.f32 -1.442695, %v3884_v20  ;;  %v5110_v37 = vmul.f32 -1.442695, %v3885_v14 }
0x30c0   :  { %5861 = vpow2.f32 %v5109_v24 }
0x30c1   :  { %5863 = vpow2.f32 %v5110_v37 }
0x30c6   :  { %v5862_v30 = vpop.eup %5861 }
0x30c7   :  { %v5864_v1 = vpop.eup %5863  ;;  %v3892_v12 = vadd.f32 1.0, %v5862_v30 }
0x30c8   :  { %v3893_v13 = vadd.f32 1.0, %v5864_v1 }
0x30c9   :  { %5865 = vrcp.f32 %v3892_v12  ;;  %v3905_v26 = vand.u32 2147483648, %v3892_v12  ;;  %v3903_v63 = vand.u32 2147483647, %v3892_v12  ;;  %vm3899_vm12 = vweird.f32 %v3892_v12 }
0x30ca   :  { %5867 = vrcp.f32 %v3893_v13  ;;  %v3920_v36 = vand.u32 2147483648, %v3893_v13  ;;  %v3918_v51 = vand.u32 2147483647, %v3893_v13  ;;  %vm3914_vm15 = vweird.f32 %v3893_v13 }
0x30cb   :  { %v3906_v40 = vor.u32 1.1754944e-38, %v3905_v26  ;;  %vm3904_vm1 = vcmp.eq.f32.partialorder %v3903_v63, 8.507059e+37 }
0x30cc   :  { %v3921_v10 = vor.u32 1.1754944e-38, %v3920_v36  ;;  %vm3919_vm14 = vcmp.eq.f32.partialorder %v3918_v51, 8.507059e+37 }
0x30cf   :  { %v5866_v61 = vpop.eup %5865 }
0x30d0   :  { %v5868_v17 = vpop.eup %5867  ;;  %v3895_v35 = vmul.f32 %v5866_v61, %v3892_v12  ;;  %vm3900_vm5 = vweird.f32 %v5866_v61 }
0x30d1   :  { %v3910_v57 = vmul.f32 %v5868_v17, %v3893_v13  ;;  %vm3915_vm9 = vweird.f32 %v5868_v17  ;;  %vm3901_vm2 = vmor %vm3899_vm12, %vm3900_vm5 }
0x30d2   :  { %v3896_v18 = vsub.f32 1.0, %v3895_v35  ;;  %vm3916_vm11 = vmor %vm3914_vm15, %vm3915_vm9 }
0x30d3   :  { %v3911_v43 = vsub.f32 1.0, %v3910_v57 }
0x30d4   :  { %v3897_v54 = vmul.f32 %v5866_v61, %v3896_v18 }
0x30d5   :  { %v3912_v4 = vmul.f32 %v5868_v17, %v3911_v43 }
0x30d6   :  { %v3898_v49 = vadd.f32 %v5866_v61, %v3897_v54 }
0x30d7   :  { %v3913_v29 = vadd.f32 %v5868_v17, %v3912_v4 }
0x30d8   :  { %v3902_v27 = vsel %vm3901_vm2, %v5866_v61, %v3898_v49 }
0x30d9   :  { %v3917_v0 = vsel %vm3916_vm11, %v5868_v17, %v3913_v29  ;;  %v3907_v38 = vsel %vm3904_vm1, %v3906_v40, %v3902_v27  ;;  %v5468_v40 = vunpack.c.h.bf16 %v7837_v16 }
0x30da   :  { %v3922_v60 = vsel %vm3919_vm14, %v3921_v10, %v3917_v0  ;;  %v3932_v41 = vmul.f32 %v3927_v28, %v3907_v38  ;;  %v3946_v12 = vsub.f32 1.0, %v3907_v38  ;;  %v3958_v17 = vmul.f32 0.0, %v3907_v38 }
0x30db   :  { %v3933_v53 = vmul.f32 %v3929_v44, %v3922_v60  ;;  %v3947_v61 = vsub.f32 1.0, %v3922_v60  ;;  %v3959_v18 = vmul.f32 0.0, %v3922_v60  ;;  %v5467_v38 = vunpack.c.l.bf16 %v7837_v16 }
0x30dc   :  { %3936 = vrot.lane.b32.xlu2 %v3932_v41, %s6286_s27  ;;  %vm8221_vm14 = vcmp.eq.s32.totalorder %v7062_v58, 1 }
0x30dd   :  { %3938 = vrot.lane.b32.xlu0 %v3933_v53, %s6286_s27 }
0x3136   :  { %v3937_v20 = vpop.permute.xlu2 %3936 }
0x3137   :  { %v3942_v14 = vadd.f32 %v5463_v9, %v3937_v20 }
0x3139   :  { %5869 = vtanh.f32 %v3942_v14 }
0x313f   :  { %v5870_v24 = vpop.eup %5869 }
0x3140   :  { %3950 = vrot.lane.b32.xlu1 %v5870_v24, %s6299_s26 }
0x314f   :  { %v3939_v37 = vpop.permute.xlu0 %3938 }
0x3150   :  { %v3943_v30 = vadd.f32 %v5464_v47, %v3939_v37 }
0x3152   :  { %5871 = vtanh.f32 %v3943_v30 }
0x3158   :  { %v5872_v1 = vpop.eup %5871 }
0x3159   :  { %3952 = vrot.lane.b32.xlu2 %v5872_v1, %s6299_s26 }
0x31b2   :  { %v3951_v13 = vpop.permute.xlu1 %3950 }
0x31b3   :  { %v3956_v35 = vmul.f32 %v3951_v13, %v3946_v12  ;;  %v3953_v57 = vpop.permute.xlu2 %3952 }
0x31b4   :  { %v3957_v43 = vmul.f32 %v3953_v57, %v3947_v61 }
0x31b5   :  { %v3960_v26 = vadd.f32 %v3958_v17, %v3956_v35 }
0x31b6   :  { %v3961_v9 = vadd.f32 %v3959_v18, %v3957_v43 }
0x31b7   :  { %v7847_v36 = vsel %vm8220_vm13, %v3960_v26, 0.0  ;;  %vm8222_vm13 = vcmp.eq.s32.totalorder %v8215_v6, 1 }
0x31b8   :  { %v7851_v47 = vsel %vm8214_vm10, %v3961_v9, 0.0 }
0x31b9   :  { %v3968_v54 = vpack.c.bf16 %v7851_v47, %v7847_v36 }
0x31bb   :  { %3970 = vrot.lane.b32.xlu0 %v3968_v54, %s6299_s26 }
0x322d   :  { %v3971_v63 = vpop.permute.xlu0 %3970 }
0x322e   :  { %5111 = vmatmul.msk.bf16.vlgmr.msrb.gmra.mxu3 %vm605_vm0, %v3971_v63 }
0x322f   :  { %4401 = vmatpush.bf16.msrb.mxu3 %v7792_v46 }
0x3233   :  { %4402 = vmatpush.bf16.msrb.mxu3 %v7797_v8 }
0x32b1   :  { %v3984_v4 = vpop.f32.mrf.mxu3 }
0x32b2   :  { %v3985_v51 = vadd.f32 %v7823_v21, %v3984_v4 }
0x32b4   :  { %4031 = vrot.lane.b32.xlu1 %v3985_v51, %s6286_s27  ;;  %v3989_v28 = vadd.f32 %v5467_v38, %v3985_v51 }
0x32b6   :  { %v5112_v60 = vmul.f32 -1.442695, %v3989_v28 }
0x32b9   :  { %v3986_v49 = vpop.f32.mrf.mxu3 }
0x32ba   :  { %v3987_v29 = vadd.f32 %v7823_v21, %v3986_v49 }
0x32bc   :  { %4033 = vrot.lane.b32.xlu2 %v3987_v29, %s6286_s27  ;;  %v3990_v10 = vadd.f32 %v5468_v40, %v3987_v29 }
0x32be   :  { %v5113_v27 = vmul.f32 -1.442695, %v3990_v10 }
0x32c0   :  { %5873 = vpow2.f32 %v5113_v27 }
0x32c6   :  { %v5874_v0 = vpop.eup %5873 }
0x32c7   :  { %v3998_v44 = vadd.f32 1.0, %v5874_v0 }
0x32c9   :  { %5875 = vrcp.f32 %v3998_v44  ;;  %v4025_v12 = vand.u32 2147483648, %v3998_v44  ;;  %vm4019_vm5 = vweird.f32 %v3998_v44  ;;  %v4023_v13 = vand.u32 2147483647, %v3998_v44 }
0x32ca   :  { %5877 = vpow2.f32 %v5112_v60 }
0x32cb   :  { %v4026_v17 = vor.u32 1.1754944e-38, %v4025_v12  ;;  %vm4024_vm12 = vcmp.eq.f32.partialorder %v4023_v13, 8.507059e+37 }
0x32cf   :  { %v5876_v41 = vpop.eup %5875 }
0x32d0   :  { %v5878_v53 = vpop.eup %5877  ;;  %v4015_v20 = vmul.f32 %v5876_v41, %v3998_v44  ;;  %vm4020_vm3 = vweird.f32 %v5876_v41 }
0x32d1   :  { %v3997_v14 = vadd.f32 1.0, %v5878_v53  ;;  %vm4021_vm9 = vmor %vm4019_vm5, %vm4020_vm3 }
0x32d2   :  { %v4016_v24 = vsub.f32 1.0, %v4015_v20 }
0x32d3   :  { %5879 = vrcp.f32 %v3997_v14  ;;  %v4010_v54 = vand.u32 2147483648, %v3997_v14  ;;  %vm4004_vm2 = vweird.f32 %v3997_v14  ;;  %v4008_v63 = vand.u32 2147483647, %v3997_v14 }
0x32d4   :  { %v4017_v37 = vmul.f32 %v5876_v41, %v4016_v24 }
0x32d5   :  { %v4011_v51 = vor.u32 1.1754944e-38, %v4010_v54  ;;  %vm4009_vm1 = vcmp.eq.f32.partialorder %v4008_v63, 8.507059e+37 }
0x32d6   :  { %v4018_v30 = vadd.f32 %v5876_v41, %v4017_v37 }
0x32d8   :  { %v4022_v16 = vsel %vm4021_vm9, %v5876_v41, %v4018_v30 }
0x32d9   :  { %v5880_v1 = vpop.eup %5879  ;;  %v4027_v57 = vsel %vm4024_vm12, %v4026_v17, %v4022_v16 }
0x32da   :  { %v4000_v61 = vmul.f32 %v5880_v1, %v3997_v14  ;;  %vm4005_vm15 = vweird.f32 %v5880_v1  ;;  %v4052_v37 = vsub.f32 1.0, %v4027_v57 }
0x32db   :  { %vm4006_vm11 = vmor %vm4004_vm2, %vm4005_vm15 }
0x32dc   :  { %v4001_v43 = vsub.f32 1.0, %v4000_v61 }
0x32de   :  { %v4002_v26 = vmul.f32 %v5880_v1, %v4001_v43 }
0x32e0   :  { %v4003_v9 = vadd.f32 %v5880_v1, %v4002_v26 }
0x32e2   :  { %v4007_v4 = vsel %vm4006_vm11, %v5880_v1, %v4003_v9 }
0x32e3   :  { %v4012_v29 = vsel %vm4009_vm1, %v4011_v51, %v4007_v4  ;;  %vm8223_vm1 = vcmp.eq.s32.totalorder %v6934_v62, 1 }
0x32e4   :  { %v4051_v20 = vsub.f32 1.0, %v4012_v29  ;;  %v4063_v24 = vmul.f32 %v4012_v29, %v7847_v36 }
0x3316   :  { %v4034_v35 = vpop.permute.xlu2 %4033 }
0x3317   :  { %v4038_v18 = vmul.f32 %v4034_v35, %v4027_v57  ;;  %v3807_v35 = vpop.f32.mrf.mxu0 }
0x3318   :  { %v3808_v43 = vadd.f32 %v7652_v42, %v3807_v35 }
0x3319   :  { %4043 = vrot.lane.b32.xlu1 %v4038_v18, %s6286_s27 }
0x3326   :  { %v4032_v49 = vpop.permute.xlu1 %4031 }
0x3327   :  { %v4037_v10 = vmul.f32 %v4032_v49, %v4012_v29 }
0x3329   :  { %4041 = vrot.lane.b32.xlu0 %v4037_v10, %s6286_s27 }
0x338b   :  { %v4044_v27 = vpop.permute.xlu1 %4043 }
0x338c   :  { %v4048_v0 = vadd.f32 %v5468_v40, %v4044_v27  ;;  %v4064_v40 = vmul.f32 %v4027_v57, %v7851_v47  ;;  %v3809_v57 = vpop.f32.mrf.mxu0 }
0x338d   :  { %v3810_v18 = vadd.f32 %v7652_v42, %v3809_v57 }
0x338e   :  { %5881 = vtanh.f32 %v4048_v0 }
0x338f   :  { %v5449_v26 = vpack.c.bf16 %v3810_v18, %v3808_v43 }
0x3391   :  { %v5472_v51 = vunpack.c.h.bf16 %v5449_v26 }
0x3394   :  { %v5882_v28 = vpop.eup %5881 }
0x3395   :  { %4057 = vrot.lane.b32.xlu0 %v5882_v28, %s6299_s26 }
0x339b   :  { %v4042_v44 = vpop.permute.xlu0 %4041 }
0x339c   :  { %v4047_v60 = vadd.f32 %v5467_v38, %v4042_v44 }
0x339e   :  { %5883 = vtanh.f32 %v4047_v60 }
0x33a4   :  { %v5884_v41 = vpop.eup %5883 }
0x33a5   :  { %4055 = vrot.lane.b32.xlu2 %v5884_v41, %s6299_s26 }
0x33ff   :  { %v4056_v53 = vpop.permute.xlu2 %4055 }
0x3400   :  { %v4061_v14 = vmul.f32 %v4056_v53, %v4051_v20 }
0x3402   :  { %v4065_v1 = vadd.f32 %v4063_v24, %v4061_v14 }
0x3404   :  { %v7874_v38 = vsel %vm8221_vm14, %v4065_v1, %v7847_v36  ;;  %vm8224_vm14 = vcmp.eq.s32.totalorder %v6943_v2, 1  ;;  %v5475_v2 = vunpack.c.l.bf16 %v7683_v33 }
0x3407   :  { %v4058_v30 = vpop.permute.xlu0 %4057 }
0x3408   :  { %v4062_v12 = vmul.f32 %v4058_v30, %v4052_v37 }
0x340a   :  { %v4066_v13 = vadd.f32 %v4064_v40, %v4062_v12 }
0x340c   :  { %v7879_v16 = vsel %vm8222_vm13, %v4066_v13, %v7851_v47 }
0x340d   :  { %v4073_v61 = vpack.c.bf16 %v7879_v16, %v7874_v38 }
0x340f   :  { %4075 = vrot.lane.b32.xlu1 %v4073_v61, %s6299_s26 }
0x3481   :  { %v4076_v17 = vpop.permute.xlu1 %4075 }
0x3482   :  { %5114 = vmatmul.msk.bf16.vlgmr.msrb.gmra.mxu2 %vm605_vm0, %v4076_v17 }
0x3483   :  { %4611 = vmatpush.bf16.msrb.mxu2 %v7792_v46  ;;  %v5471_v46 = vunpack.c.l.bf16 %v5449_v26 }
0x3487   :  { %4612 = vmatpush.bf16.msrb.mxu2 %v7797_v8 }
0x3505   :  { %v4089_v58 = vpop.f32.mrf.mxu2 }
0x3506   :  { %v4090_v36 = vadd.f32 %v7823_v21, %v4089_v58 }
0x3508   :  { %4136 = vrot.lane.b32.xlu2 %v4090_v36, %s6286_s27  ;;  %v4094_v9 = vadd.f32 %v5471_v46, %v4090_v36 }
0x350a   :  { %v5115_v8 = vmul.f32 -1.442695, %v4094_v9 }
0x350c   :  { %5885 = vpow2.f32 %v5115_v8 }
0x350d   :  { %v4091_v6 = vpop.f32.mrf.mxu2 }
0x350e   :  { %v4092_v47 = vadd.f32 %v7823_v21, %v4091_v6 }
0x3510   :  { %4138 = vrot.lane.b32.xlu0 %v4092_v47, %s6286_s27  ;;  %v4095_v29 = vadd.f32 %v5472_v51, %v4092_v47 }
0x3512   :  { %v5886_v54 = vpop.eup %5885  ;;  %v5116_v27 = vmul.f32 -1.442695, %v4095_v29 }
0x3513   :  { %v4102_v63 = vadd.f32 1.0, %v5886_v54 }
0x3515   :  { %5887 = vrcp.f32 %v4102_v63  ;;  %v4115_v44 = vand.u32 2147483648, %v4102_v63  ;;  %vm4109_vm3 = vweird.f32 %v4102_v63  ;;  %v4113_v42 = vand.u32 2147483647, %v4102_v63 }
0x3516   :  { %5889 = vpow2.f32 %v5116_v27 }
0x3517   :  { %v4116_v53 = vor.u32 1.1754944e-38, %v4115_v44  ;;  %vm4114_vm9 = vcmp.eq.f32.partialorder %v4113_v42, 8.507059e+37 }
0x351b   :  { %v5888_v4 = vpop.eup %5887 }
0x351c   :  { %v4105_v49 = vmul.f32 %v5888_v4, %v4102_v63  ;;  %vm4110_vm10 = vweird.f32 %v5888_v4  ;;  %v5890_v60 = vpop.eup %5889 }
0x351d   :  { %vm4111_vm5 = vmor %vm4109_vm3, %vm4110_vm10  ;;  %v4103_v20 = vadd.f32 1.0, %v5890_v60 }
0x351e   :  { %v4106_v10 = vsub.f32 1.0, %v4105_v49 }
0x351f   :  { %5891 = vrcp.f32 %v4103_v20  ;;  %v4130_v61 = vand.u32 2147483648, %v4103_v20  ;;  %vm4124_vm15 = vweird.f32 %v4103_v20  ;;  %v4128_v17 = vand.u32 2147483647, %v4103_v20 }
0x3520   :  { %v4107_v0 = vmul.f32 %v5888_v4, %v4106_v10 }
0x3521   :  { %v4131_v36 = vor.u32 1.1754944e-38, %v4130_v61  ;;  %vm4129_vm11 = vcmp.eq.f32.partialorder %v4128_v17, 8.507059e+37 }
0x3522   :  { %v4108_v28 = vadd.f32 %v5888_v4, %v4107_v0 }
0x3524   :  { %v4112_v41 = vsel %vm4111_vm5, %v5888_v4, %v4108_v28 }
0x3525   :  { %v4117_v24 = vsel %vm4114_vm9, %v4116_v53, %v4112_v41  ;;  %v5892_v30 = vpop.eup %5891 }
0x3526   :  { %v4120_v1 = vmul.f32 %v5892_v30, %v4103_v20  ;;  %vm4125_vm12 = vweird.f32 %v5892_v30  ;;  %v4156_v63 = vsub.f32 1.0, %v4117_v24  ;;  %v4168_v49 = vmul.f32 %v4117_v24, %v7874_v38 }
0x3527   :  { %vm4126_vm2 = vmor %vm4124_vm15, %vm4125_vm12 }
0x3528   :  { %v4121_v40 = vsub.f32 1.0, %v4120_v1 }
0x352a   :  { %v4122_v12 = vmul.f32 %v5892_v30, %v4121_v40 }
0x352c   :  { %v4123_v13 = vadd.f32 %v5892_v30, %v4122_v12 }
0x352e   :  { %v4127_v58 = vsel %vm4126_vm2, %v5892_v30, %v4123_v13 }
0x352f   :  { %v4132_v47 = vsel %vm4129_vm11, %v4131_v36, %v4127_v58 }
0x3530   :  { %v4157_v29 = vsub.f32 1.0, %v4132_v47 }
0x3562   :  { %v4137_v14 = vpop.permute.xlu2 %4136 }
0x3563   :  { %v4142_v37 = vmul.f32 %v4137_v14, %v4117_v24  ;;  %v5476_v14 = vunpack.c.h.bf16 %v7683_v33 }
0x3565   :  { %4146 = vrot.lane.b32.xlu1 %v4142_v37, %s6286_s27 }
0x3582   :  { %v4139_v6 = vpop.permute.xlu0 %4138 }
0x3583   :  { %v4143_v35 = vmul.f32 %v4139_v6, %v4132_v47 }
0x3585   :  { %4148 = vrot.lane.b32.xlu2 %v4143_v35, %s6286_s27 }
0x35d7   :  { %v4147_v57 = vpop.permute.xlu1 %4146 }
0x35d8   :  { %v4152_v18 = vadd.f32 %v5471_v46, %v4147_v57  ;;  %v4169_v46 = vmul.f32 %v4132_v47, %v7879_v16 }
0x35da   :  { %5893 = vtanh.f32 %v4152_v18 }
0x35df   :  { %v4149_v43 = vpop.permute.xlu2 %4148 }
0x35e0   :  { %v5894_v26 = vpop.eup %5893  ;;  %v4153_v9 = vadd.f32 %v5472_v51, %v4149_v43 }
0x35e1   :  { %4160 = vrot.lane.b32.xlu0 %v5894_v26, %s6299_s26 }
0x35e2   :  { %5895 = vtanh.f32 %v4153_v9 }
0x35e8   :  { %v5896_v8 = vpop.eup %5895 }
0x35e9   :  { %4162 = vrot.lane.b32.xlu1 %v5896_v8, %s6299_s26 }
0x3653   :  { %v4161_v54 = vpop.permute.xlu0 %4160 }
0x3654   :  { %v4166_v4 = vmul.f32 %v4161_v54, %v4156_v63 }
0x3656   :  { %v4170_v27 = vadd.f32 %v4168_v49, %v4166_v4 }
0x3658   :  { %v7902_v51 = vsel %vm8223_vm1, %v4170_v27, %v7874_v38 }
0x365b   :  { %v4163_v10 = vpop.permute.xlu1 %4162 }
0x365c   :  { %v4167_v0 = vmul.f32 %v4163_v10, %v4157_v29 }
0x365e   :  { %v4171_v28 = vadd.f32 %v4169_v46, %v4167_v0 }
0x3660   :  { %v7907_v44 = vsel %vm8224_vm14, %v4171_v28, %v7879_v16 }
0x3661   :  { %v4178_v42 = vpack.c.bf16 %v7907_v44, %v7902_v51 }
0x3663   :  { %4180 = vrot.lane.b32.xlu2 %v4178_v42, %s6299_s26 }
0x36bd   :  { %v4181_v60 = vpop.permute.xlu2 %4180 }
0x36be   :  { %5117 = vmatmul.msk.bf16.vlgmr.msra.gmra.mxu3 %vm605_vm0, %v4181_v60 }
0x3741   :  { %v4194_v41 = vpop.f32.mrf.mxu3 }
0x3742   :  { %v4195_v53 = vadd.f32 %v7823_v21, %v4194_v41 }
0x3744   :  { %4241 = vrot.lane.b32.xlu0 %v4195_v53, %s6286_s27  ;;  %v4199_v16 = vadd.f32 %v5475_v2, %v4195_v53 }
0x3746   :  { %v5118_v20 = vmul.f32 -1.442695, %v4199_v16 }
0x3748   :  { %5897 = vpow2.f32 %v5118_v20 }
0x3749   :  { %v4196_v62 = vpop.f32.mrf.mxu3 }
0x374a   :  { %v4197_v38 = vadd.f32 %v7823_v21, %v4196_v62 }
0x374c   :  { %4243 = vrot.lane.b32.xlu1 %v4197_v38, %s6286_s27  ;;  %v4200_v24 = vadd.f32 %v5476_v14, %v4197_v38 }
0x374e   :  { %v5119_v37 = vmul.f32 -1.442695, %v4200_v24  ;;  %v5898_v30 = vpop.eup %5897 }
0x374f   :  { %v4207_v1 = vadd.f32 1.0, %v5898_v30 }
0x3750   :  { %5899 = vpow2.f32 %v5119_v37 }
0x3751   :  { %5901 = vrcp.f32 %v4207_v1  ;;  %v4220_v33 = vand.u32 2147483648, %v4207_v1  ;;  %vm4214_vm10 = vweird.f32 %v4207_v1  ;;  %v4218_v57 = vand.u32 2147483647, %v4207_v1 }
0x3753   :  { %v4221_v26 = vor.u32 1.1754944e-38, %v4220_v33  ;;  %vm4219_vm5 = vcmp.eq.f32.partialorder %v4218_v57, 8.507059e+37 }
0x3756   :  { %v5900_v40 = vpop.eup %5899 }
0x3757   :  { %v4208_v12 = vadd.f32 1.0, %v5900_v40  ;;  %v5902_v13 = vpop.eup %5901 }
0x3758   :  { %v4210_v61 = vmul.f32 %v5902_v13, %v4207_v1  ;;  %vm4215_vm13 = vweird.f32 %v5902_v13 }
0x3759   :  { %5903 = vrcp.f32 %v4208_v12  ;;  %vm4216_vm3 = vmor %vm4214_vm10, %vm4215_vm13  ;;  %v4235_v4 = vand.u32 2147483648, %v4208_v12  ;;  %vm4229_vm12 = vweird.f32 %v4208_v12  ;;  %v4233_v49 = vand.u32 2147483647, %v4208_v12 }
0x375a   :  { %v4211_v17 = vsub.f32 1.0, %v4210_v61 }
0x375b   :  { %v4236_v10 = vor.u32 1.1754944e-38, %v4235_v4  ;;  %vm4234_vm2 = vcmp.eq.f32.partialorder %v4233_v49, 8.507059e+37 }
0x375c   :  { %v4212_v36 = vmul.f32 %v5902_v13, %v4211_v17 }
0x375e   :  { %v4213_v47 = vadd.f32 %v5902_v13, %v4212_v36 }
0x375f   :  { %v5904_v58 = vpop.eup %5903 }
0x3760   :  { %v4225_v6 = vmul.f32 %v5904_v58, %v4208_v12  ;;  %v4217_v18 = vsel %vm4216_vm3, %v5902_v13, %v4213_v47  ;;  %vm4230_vm9 = vweird.f32 %v5904_v58 }
0x3761   :  { %v4222_v8 = vsel %vm4219_vm5, %v4221_v26, %v4217_v18  ;;  %vm4231_vm15 = vmor %vm4229_vm12, %vm4230_vm9 }
0x3762   :  { %v4226_v35 = vsub.f32 1.0, %v4225_v6  ;;  %v4261_v16 = vsub.f32 1.0, %v4222_v8  ;;  %v4273_v24 = vmul.f32 %v4222_v8, %v7902_v51 }
0x3764   :  { %v4227_v43 = vmul.f32 %v5904_v58, %v4226_v35  ;;  %v5479_v35 = vunpack.c.l.bf16 %v7679_v11 }
0x3766   :  { %v4228_v63 = vadd.f32 %v5904_v58, %v4227_v43 }
0x3768   :  { %v4232_v29 = vsel %vm4231_vm15, %v5904_v58, %v4228_v63 }
0x3769   :  { %v4237_v46 = vsel %vm4234_vm2, %v4236_v10, %v4232_v29 }
0x376a   :  { %v4262_v37 = vsub.f32 1.0, %v4237_v46 }
0x37b6   :  { %v4242_v9 = vpop.permute.xlu0 %4241 }
0x37b7   :  { %v4247_v54 = vmul.f32 %v4242_v9, %v4222_v8 }
0x37b9   :  { %4251 = vrot.lane.b32.xlu2 %v4247_v54, %s6286_s27 }
0x37be   :  { %v4244_v27 = vpop.permute.xlu1 %4243 }
0x37bf   :  { %v4248_v0 = vmul.f32 %v4244_v27, %v4237_v46 }
0x37c1   :  { %4253 = vrot.lane.b32.xlu0 %v4248_v0, %s6286_s27 }
0x3813   :  { %v4252_v28 = vpop.permute.xlu2 %4251 }
0x3814   :  { %v4257_v42 = vadd.f32 %v5475_v2, %v4252_v28  ;;  %v4274_v2 = vmul.f32 %v4237_v46, %v7907_v44 }
0x3816   :  { %5905 = vtanh.f32 %v4257_v42 }
0x381c   :  { %v5906_v60 = vpop.eup %5905 }
0x381d   :  { %4265 = vrot.lane.b32.xlu1 %v5906_v60, %s6299_s26 }
0x3833   :  { %v4254_v41 = vpop.permute.xlu0 %4253 }
0x3834   :  { %v4258_v53 = vadd.f32 %v5476_v14, %v4254_v41 }
0x3836   :  { %5907 = vtanh.f32 %v4258_v53 }
0x383c   :  { %v5908_v62 = vpop.eup %5907 }
0x383d   :  { %4267 = vrot.lane.b32.xlu2 %v5908_v62, %s6299_s26 }
0x388f   :  { %v4266_v38 = vpop.permute.xlu1 %4265 }
0x3890   :  { %v4271_v20 = vmul.f32 %v4266_v38, %v4261_v16 }
0x3892   :  { %v4275_v1 = vadd.f32 %v4273_v24, %v4271_v20 }
0x3894   :  { %v7928_v14 = vsel %vm1222_vm4, %v4275_v1, %v7902_v51 }
0x3897   :  { %v4268_v30 = vpop.permute.xlu2 %4267 }
0x3898   :  { %v4272_v40 = vmul.f32 %v4268_v30, %v4262_v37 }
0x389a   :  { %v4276_v12 = vadd.f32 %v4274_v2, %v4272_v40 }
0x389c   :  { %v7933_v13 = vsel %vm1223_vm7, %v4276_v12, %v7907_v44 }
0x389d   :  { %v4283_v61 = vpack.c.bf16 %v7933_v13, %v7928_v14 }
0x389f   :  { %4285 = vrot.lane.b32.xlu0 %v4283_v61, %s6299_s26 }
0x3911   :  { %v4286_v17 = vpop.permute.xlu0 %4285 }
0x3912   :  { %5120 = vmatmul.msk.bf16.vlgmr.msra.gmra.mxu2 %vm605_vm0, %v4286_v17 }
0x3995   :  { %v4299_v58 = vpop.f32.mrf.mxu2 }
0x3996   :  { %v4300_v36 = vadd.f32 %v7823_v21, %v4299_v58 }
0x3998   :  { %4346 = vrot.lane.b32.xlu1 %v4300_v36, %s6286_s27  ;;  %v4304_v33 = vadd.f32 %v5479_v35, %v4300_v36 }
0x399a   :  { %v5121_v18 = vmul.f32 -1.442695, %v4304_v33 }
0x399d   :  { %v4301_v50 = vpop.f32.mrf.mxu2 }
0x399e   :  { %v4302_v51 = vadd.f32 %v7823_v21, %v4301_v50 }
0x39a0   :  { %4348 = vrot.lane.b32.xlu2 %v4302_v51, %s6286_s27  ;;  %v4305_v44 = vadd.f32 %v5480_v7, %v4302_v51 }
0x39a2   :  { %v5122_v6 = vmul.f32 -1.442695, %v4305_v44 }
0x39a4   :  { %5909 = vpow2.f32 %v5122_v6 }
0x39aa   :  { %v5910_v47 = vpop.eup %5909 }
0x39ab   :  { %v4313_v57 = vadd.f32 1.0, %v5910_v47 }
0x39ad   :  { %5911 = vrcp.f32 %v4313_v57  ;;  %v4340_v29 = vand.u32 2147483648, %v4313_v57  ;;  %vm4334_vm7 = vweird.f32 %v4313_v57  ;;  %v4338_v10 = vand.u32 2147483647, %v4313_v57 }
0x39ae   :  { %5913 = vpow2.f32 %v5121_v18 }
0x39af   :  { %v4341_v46 = vor.u32 1.1754944e-38, %v4340_v29  ;;  %vm4339_vm1 = vcmp.eq.f32.partialorder %v4338_v10, 8.507059e+37  ;;  %v5484_v29 = vunpack.c.h.bf16 %v7670_v25 }
0x39b3   :  { %v5912_v43 = vpop.eup %5911 }
0x39b4   :  { %v5914_v26 = vpop.eup %5913  ;;  %v4330_v9 = vmul.f32 %v5912_v43, %v4313_v57  ;;  %vm4335_vm4 = vweird.f32 %v5912_v43 }
0x39b5   :  { %v4312_v8 = vadd.f32 1.0, %v5914_v26  ;;  %vm4336_vm11 = vmor %vm4334_vm7, %vm4335_vm4  ;;  %vm8225_vm7 = vcmp.eq.s32.totalorder %v6683_v45, 1 }
0x39b6   :  { %v4331_v54 = vsub.f32 1.0, %v4330_v9 }
0x39b7   :  { %5915 = vrcp.f32 %v4312_v8  ;;  %v4325_v62 = vand.u32 2147483648, %v4312_v8  ;;  %vm4319_vm13 = vweird.f32 %v4312_v8  ;;  %v4323_v38 = vand.u32 2147483647, %v4312_v8 }
0x39b8   :  { %v4332_v63 = vmul.f32 %v5912_v43, %v4331_v54 }
0x39b9   :  { %v4326_v20 = vor.u32 1.1754944e-38, %v4325_v62  ;;  %vm4324_vm3 = vcmp.eq.f32.partialorder %v4323_v38, 8.507059e+37 }
0x39ba   :  { %v4333_v4 = vadd.f32 %v5912_v43, %v4332_v63 }
0x39bc   :  { %v4337_v11 = vsel %vm4336_vm11, %v5912_v43, %v4333_v4  ;;  %vm8226_vm11 = vcmp.eq.s32.totalorder %v6692_v56, 1 }
0x39bd   :  { %v5916_v49 = vpop.eup %5915  ;;  %v4342_v28 = vsel %vm4339_vm1, %v4341_v46, %v4337_v11 }
0x39be   :  { %v4315_v27 = vmul.f32 %v5916_v49, %v4312_v8  ;;  %vm4320_vm14 = vweird.f32 %v5916_v49  ;;  %v4367_v44 = vsub.f32 1.0, %v4342_v28 }
0x39bf   :  { %vm4321_vm10 = vmor %vm4319_vm13, %vm4320_vm14 }
0x39c0   :  { %v4316_v60 = vsub.f32 1.0, %v4315_v27 }
0x39c2   :  { %v4317_v41 = vmul.f32 %v5916_v49, %v4316_v60 }
0x39c4   :  { %v4318_v53 = vadd.f32 %v5916_v49, %v4317_v41 }
0x39c6   :  { %v4322_v16 = vsel %vm4321_vm10, %v5916_v49, %v4318_v53 }
0x39c7   :  { %v4327_v37 = vsel %vm4324_vm3, %v4326_v20, %v4322_v16 }
0x39c8   :  { %v4366_v36 = vsub.f32 1.0, %v4327_v37  ;;  %v4378_v51 = vmul.f32 %v4327_v37, %v7928_v14 }
0x39fa   :  { %v4349_v0 = vpop.permute.xlu2 %4348 }
0x39fb   :  { %v4353_v42 = vmul.f32 %v4349_v0, %v4342_v28 }
0x39fd   :  { %4358 = vrot.lane.b32.xlu1 %v4353_v42, %s6286_s27 }
0x3a0a   :  { %v4347_v24 = vpop.permute.xlu1 %4346 }
0x3a0b   :  { %v4352_v30 = vmul.f32 %v4347_v24, %v4327_v37 }
0x3a0d   :  { %4356 = vrot.lane.b32.xlu0 %v4352_v30, %s6286_s27 }
0x3a6f   :  { %v4359_v1 = vpop.permute.xlu1 %4358 }
0x3a70   :  { %v4363_v2 = vadd.f32 %v5480_v7, %v4359_v1  ;;  %v4379_v7 = vmul.f32 %v4342_v28, %v7933_v13 }
0x3a72   :  { %5917 = vtanh.f32 %v4363_v2 }
0x3a78   :  { %v5918_v40 = vpop.eup %5917 }
0x3a79   :  { %4372 = vrot.lane.b32.xlu0 %v5918_v40, %s6299_s26 }
0x3a7f   :  { %v4357_v12 = vpop.permute.xlu0 %4356 }
0x3a80   :  { %v4362_v61 = vadd.f32 %v5479_v35, %v4357_v12 }
0x3a82   :  { %5919 = vtanh.f32 %v4362_v61 }
0x3a88   :  { %v5920_v17 = vpop.eup %5919 }
0x3a89   :  { %4370 = vrot.lane.b32.xlu2 %v5920_v17, %s6299_s26 }
0x3ae3   :  { %v4371_v58 = vpop.permute.xlu2 %4370 }
0x3ae4   :  { %v4376_v50 = vmul.f32 %v4371_v58, %v4366_v36 }
0x3ae6   :  { %v4380_v47 = vadd.f32 %v4378_v51, %v4376_v50 }
0x3ae8   :  { %v7954_v35 = vsel %vm1094_vm6, %v4380_v47, %v7928_v14 }
0x3aeb   :  { %v4373_v6 = vpop.permute.xlu0 %4372 }
0x3aec   :  { %v4377_v33 = vmul.f32 %v4373_v6, %v4367_v44 }
0x3aee   :  { %v4381_v57 = vadd.f32 %v4379_v7, %v4377_v33 }
0x3af0   :  { %v7959_v18 = vsel %vm1095_vm8, %v4381_v57, %v7933_v13 }
0x3af1   :  { %v4388_v43 = vpack.c.bf16 %v7959_v18, %v7954_v35 }
0x3af3   :  { %4390 = vrot.lane.b32.xlu1 %v4388_v43, %s6299_s26 }
0x3b65   :  { %v4391_v26 = vpop.permute.xlu1 %4390 }
0x3b66   :  { %5123 = vmatmul.msk.bf16.vlgmr.msrb.gmra.mxu3 %vm605_vm0, %v4391_v26 }
0x3be9   :  { %v4404_v9 = vpop.f32.mrf.mxu3 }
0x3bea   :  { %v4405_v8 = vadd.f32 %v7823_v21, %v4404_v9 }
0x3bec   :  { %4451 = vrot.lane.b32.xlu2 %v4405_v8, %s6286_s27  ;;  %v4409_v13 = vadd.f32 %v5483_v52, %v4405_v8 }
0x3bee   :  { %v5124_v54 = vmul.f32 -1.442695, %v4409_v13 }
0x3bf0   :  { %5921 = vpow2.f32 %v5124_v54 }
0x3bf1   :  { %v4406_v32 = vpop.f32.mrf.mxu3 }
0x3bf2   :  { %v4407_v14 = vadd.f32 %v7823_v21, %v4406_v32 }
0x3bf4   :  { %4453 = vrot.lane.b32.xlu0 %v4407_v14, %s6286_s27  ;;  %v4410_v11 = vadd.f32 %v5484_v29, %v4407_v14 }
0x3bf6   :  { %v5922_v63 = vpop.eup %5921  ;;  %v5125_v46 = vmul.f32 -1.442695, %v4410_v11 }
0x3bf7   :  { %v4417_v4 = vadd.f32 1.0, %v5922_v63 }
0x3bf9   :  { %5923 = vrcp.f32 %v4417_v4  ;;  %v4430_v42 = vand.u32 2147483648, %v4417_v4  ;;  %vm4424_vm8 = vweird.f32 %v4417_v4  ;;  %v4428_v60 = vand.u32 2147483647, %v4417_v4 }
0x3bfa   :  { %5925 = vpow2.f32 %v5125_v46 }
0x3bfb   :  { %v4431_v62 = vor.u32 1.1754944e-38, %v4430_v42  ;;  %vm4429_vm9 = vcmp.eq.f32.partialorder %v4428_v60, 8.507059e+37 }
0x3bff   :  { %v5924_v49 = vpop.eup %5923 }
0x3c00   :  { %v4420_v10 = vmul.f32 %v5924_v49, %v4417_v4  ;;  %vm4425_vm6 = vweird.f32 %v5924_v49  ;;  %v5926_v41 = vpop.eup %5925 }
0x3c01   :  { %vm4426_vm5 = vmor %vm4424_vm8, %vm4425_vm6  ;;  %v4418_v38 = vadd.f32 1.0, %v5926_v41 }
0x3c02   :  { %v4421_v27 = vsub.f32 1.0, %v4420_v10  ;;  %v7991_v10 = vpop.f32.mrf.mxu1 }
0x3c03   :  { %5927 = vrcp.f32 %v4418_v38  ;;  %v4445_v40 = vand.u32 2147483648, %v4418_v38  ;;  %vm4439_vm15 = vweird.f32 %v4418_v38  ;;  %v4443_v12 = vand.u32 2147483647, %v4418_v38 }
0x3c04   :  { %v4422_v0 = vmul.f32 %v5924_v49, %v4421_v27  ;;  %v5487_v27 = vunpack.c.l.bf16 %v7660_v22 }
0x3c05   :  { %v4446_v17 = vor.u32 1.1754944e-38, %v4445_v40  ;;  %vm4444_vm4 = vcmp.eq.f32.partialorder %v4443_v12, 8.507059e+37 }
0x3c06   :  { %v4423_v28 = vadd.f32 %v5924_v49, %v4422_v0 }
0x3c08   :  { %v4427_v53 = vsel %vm4426_vm5, %v5924_v49, %v4423_v28  ;;  %v5488_v28 = vunpack.c.h.bf16 %v7660_v22 }
0x3c09   :  { %v4432_v20 = vsel %vm4429_vm9, %v4431_v62, %v4427_v53  ;;  %v5928_v24 = vpop.eup %5927 }
0x3c0a   :  { %v4435_v37 = vmul.f32 %v5928_v24, %v4418_v38  ;;  %vm4440_vm12 = vweird.f32 %v5928_v24  ;;  %v4471_v43 = vsub.f32 1.0, %v4432_v20  ;;  %v4483_v9 = vmul.f32 %v4432_v20, %v7954_v35  ;;  %v7993_v11 = vpop.f32.mrf.mxu1 }
0x3c0b   :  { %vm4441_vm2 = vmor %vm4439_vm15, %vm4440_vm12 }
0x3c0c   :  { %v4436_v30 = vsub.f32 1.0, %v4435_v37 }
0x3c0e   :  { %v4437_v1 = vmul.f32 %v5928_v24, %v4436_v30 }
0x3c10   :  { %v4438_v2 = vadd.f32 %v5928_v24, %v4437_v1 }
0x3c12   :  { %v4442_v61 = vsel %vm4441_vm2, %v5928_v24, %v4438_v2 }
0x3c13   :  { %v4447_v36 = vsel %vm4444_vm4, %v4446_v17, %v4442_v61  ;;  %vm8227_vm4 = vcmp.eq.s32.totalorder %v6622_v59, 1 }
0x3c14   :  { %v4472_v8 = vsub.f32 1.0, %v4447_v36 }
0x3c46   :  { %v4452_v16 = vpop.permute.xlu2 %4451 }
0x3c47   :  { %v4457_v25 = vmul.f32 %v4452_v16, %v4432_v20 }
0x3c49   :  { %4461 = vrot.lane.b32.xlu1 %v4457_v25, %s6286_s27 }
0x3c66   :  { %v4454_v58 = vpop.permute.xlu0 %4453 }
0x3c67   :  { %v4458_v50 = vmul.f32 %v4454_v58, %v4447_v36 }
0x3c69   :  { %4463 = vrot.lane.b32.xlu2 %v4458_v50, %s6286_s27 }
0x3cbb   :  { %v4462_v51 = vpop.permute.xlu1 %4461 }
0x3cbc   :  { %v4467_v44 = vadd.f32 %v5483_v52, %v4462_v51  ;;  %v4484_v52 = vmul.f32 %v4447_v36, %v7959_v18 }
0x3cbe   :  { %5929 = vtanh.f32 %v4467_v44 }
0x3cc3   :  { %v4464_v6 = vpop.permute.xlu2 %4463 }
0x3cc4   :  { %v5930_v47 = vpop.eup %5929  ;;  %v4468_v7 = vadd.f32 %v5484_v29, %v4464_v6 }
0x3cc5   :  { %4475 = vrot.lane.b32.xlu0 %v5930_v47, %s6299_s26 }
0x3cc6   :  { %5931 = vtanh.f32 %v4468_v7 }
0x3ccc   :  { %v5932_v33 = vpop.eup %5931 }
0x3ccd   :  { %4477 = vrot.lane.b32.xlu1 %v5932_v33, %s6299_s26 }
0x3d37   :  { %v4476_v57 = vpop.permute.xlu0 %4475 }
0x3d38   :  { %v4481_v26 = vmul.f32 %v4476_v57, %v4471_v43 }
0x3d3a   :  { %v4485_v14 = vadd.f32 %v4483_v9, %v4481_v26 }
0x3d3c   :  { %v7980_v63 = vsel %vm8225_vm7, %v4485_v14, %v7954_v35  ;;  %vm8228_vm7 = vcmp.eq.s32.totalorder %v6626_v5, 1 }
0x3d3f   :  { %v4478_v32 = vpop.permute.xlu1 %4477 }
0x3d40   :  { %v4482_v13 = vmul.f32 %v4478_v32, %v4472_v8  ;;  %v5979_v8 = vld [vmem:[%s8113_s13] ss:$0 sm:$0xff] }
0x3d41   :  { %v3645_v32 = vadd.f32 %v5979_v8, %v7831_v39 }
0x3d42   :  { %v4486_v54 = vadd.f32 %v4484_v52, %v4482_v13 }
0x3d44   :  { %v7985_v4 = vsel %vm8226_vm11, %v4486_v54, %v7959_v18  ;;  %v3647_v54 = vadd.f32 %v5979_v8, %v7833_v31 }
0x3d45   :  { %v4493_v49 = vpack.c.bf16 %v7985_v4, %v7980_v63 }
0x3d47   :  { %4495 = vrot.lane.b32.xlu2 %v4493_v49, %s6299_s26  ;;  %v5980_v49 = vld [vmem:[%s8112_s12] ss:$0 sm:$0xff] }
0x3d48   :  { %v2848_v39 = vadd.f32 %v5980_v49, %v7991_v10 }
0x3da1   :  { %v4496_v29 = vpop.permute.xlu2 %4495 }
0x3da2   :  { %5126 = vmatmul.msk.bf16.vlgmr.msra.gmra.mxu1 %vm605_vm0, %v4496_v29  ;;  %v2850_v29 = vadd.f32 %v5980_v49, %v7993_v11 }
0x3e1f   :  { %v4509_v45 = vpop.f32.mrf.mxu1 }
0x3e20   :  { %v4510_v35 = vadd.f32 %v7823_v21, %v4509_v45  ;;  %v8017_v45 = vpack.c.bf16 %v2850_v29, %v2848_v39 }
0x3e22   :  { %4556 = vrot.lane.b32.xlu0 %v4510_v35, %s6286_s27  ;;  %v4514_v46 = vadd.f32 %v5487_v27, %v4510_v35  ;;  %v5419_v35 = vunpack.c.l.bf16 %v8017_v45 }
0x3e24   :  { %v5127_v0 = vmul.f32 -1.442695, %v4514_v46 }
0x3e26   :  { %5933 = vpow2.f32 %v5127_v0 }
0x3e27   :  { %v4511_v56 = vpop.f32.mrf.mxu1 }
0x3e28   :  { %v4512_v18 = vadd.f32 %v7823_v21, %v4511_v56  ;;  %v3649_v56 = vadd.f32 %v5419_v35, %v3645_v32 }
0x3e2a   :  { %4558 = vrot.lane.b32.xlu1 %v4512_v18, %s6286_s27  ;;  %v4515_v42 = vadd.f32 %v5488_v28, %v4512_v18  ;;  %v5075_v18 = vmul.f32 -1.442695, %v3649_v56  ;;  %v5491_v56 = vunpack.c.l.bf16 %v7656_v19 }
0x3e2c   :  { %v5128_v60 = vmul.f32 -1.442695, %v4515_v42  ;;  %v5934_v41 = vpop.eup %5933 }
0x3e2d   :  { %v4522_v53 = vadd.f32 1.0, %v5934_v41 }
0x3e2e   :  { %5935 = vpow2.f32 %v5128_v60 }
0x3e2f   :  { %5937 = vrcp.f32 %v4522_v53  ;;  %v4535_v22 = vand.u32 2147483648, %v4522_v53  ;;  %vm4529_vm14 = vweird.f32 %v4522_v53  ;;  %v4533_v2 = vand.u32 2147483647, %v4522_v53 }
0x3e31   :  { %v4536_v61 = vor.u32 1.1754944e-38, %v4535_v22  ;;  %vm4534_vm10 = vcmp.eq.f32.partialorder %v4533_v2, 8.507059e+37 }
0x3e34   :  { %v5936_v62 = vpop.eup %5935 }
0x3e35   :  { %v4523_v38 = vadd.f32 1.0, %v5936_v62  ;;  %v5938_v16 = vpop.eup %5937 }
0x3e36   :  { %v4525_v21 = vmul.f32 %v5938_v16, %v4522_v53  ;;  %vm4530_vm1 = vweird.f32 %v5938_v16 }
0x3e37   :  { %5939 = vrcp.f32 %v4523_v38  ;;  %vm4531_vm13 = vmor %vm4529_vm14, %vm4530_vm1  ;;  %v4550_v51 = vand.u32 2147483648, %v4523_v38  ;;  %vm4544_vm6 = vweird.f32 %v4523_v38  ;;  %v4548_v44 = vand.u32 2147483647, %v4523_v38 }
0x3e38   :  { %v4526_v20 = vsub.f32 1.0, %v4525_v21 }
0x3e39   :  { %v4551_v47 = vor.u32 1.1754944e-38, %v4550_v51  ;;  %vm4549_vm5 = vcmp.eq.f32.partialorder %v4548_v44, 8.507059e+37 }
0x3e3a   :  { %v4527_v24 = vmul.f32 %v5938_v16, %v4526_v20 }
0x3e3c   :  { %v4528_v30 = vadd.f32 %v5938_v16, %v4527_v24 }
0x3e3d   :  { %v5940_v25 = vpop.eup %5939 }
0x3e3e   :  { %v4540_v37 = vmul.f32 %v5940_v25, %v4523_v38  ;;  %v4532_v40 = vsel %vm4531_vm13, %v5938_v16, %v4528_v30  ;;  %vm4545_vm3 = vweird.f32 %v5940_v25 }
0x3e3f   :  { %v4537_v58 = vsel %vm4534_vm10, %v4536_v61, %v4532_v40  ;;  %vm4546_vm8 = vmor %vm4544_vm6, %vm4545_vm3 }
0x3e40   :  { %v4541_v1 = vsub.f32 1.0, %v4540_v37  ;;  %v4576_v41 = vsub.f32 1.0, %v4537_v58  ;;  %v4588_v21 = vmul.f32 %v4537_v58, %v7980_v63 }
0x3e42   :  { %v4542_v12 = vmul.f32 %v5940_v25, %v4541_v1 }
0x3e44   :  { %v4543_v50 = vadd.f32 %v5940_v25, %v4542_v12 }
0x3e46   :  { %v4547_v6 = vsel %vm4546_vm8, %v5940_v25, %v4543_v50 }
0x3e47   :  { %v4552_v33 = vsel %vm4549_vm5, %v4551_v47, %v4547_v6 }
0x3e48   :  { %v4577_v20 = vsub.f32 1.0, %v4552_v33  ;;  %v4589_v22 = vmul.f32 %v4552_v33, %v7985_v4 }
0x3e94   :  { %v4557_v17 = vpop.permute.xlu0 %4556 }
0x3e95   :  { %v4562_v36 = vmul.f32 %v4557_v17, %v4537_v58 }
0x3e97   :  { %4566 = vrot.lane.b32.xlu2 %v4562_v36, %s6286_s27  ;;  %v5420_v36 = vunpack.c.h.bf16 %v8017_v45 }
0x3e99   :  { %v3650_v59 = vadd.f32 %v5420_v36, %v3647_v54 }
0x3e9c   :  { %v4559_v7 = vpop.permute.xlu1 %4558 }
0x3e9d   :  { %v4563_v57 = vmul.f32 %v4559_v7, %v4552_v33 }
0x3e9f   :  { %4568 = vrot.lane.b32.xlu0 %v4563_v57, %s6286_s27  ;;  %v5981_v57 = vld [vmem:[%s8117_s17] ss:$0 sm:$0xff] }
0x3ef1   :  { %v4567_v43 = vpop.permute.xlu2 %4566 }
0x3ef2   :  { %v4572_v26 = vadd.f32 %v5487_v27, %v4567_v43 }
0x3ef4   :  { %5941 = vtanh.f32 %v4572_v26 }
0x3efa   :  { %v5942_v9 = vpop.eup %5941 }
0x3efb   :  { %4580 = vrot.lane.b32.xlu1 %v5942_v9, %s6299_s26 }
0x3f03   :  { %3691 = vrot.lane.b32.xlu1 %v3645_v32, %s6286_s27 }
0x3f11   :  { %v4569_v14 = vpop.permute.xlu0 %4568 }
0x3f12   :  { %v4573_v52 = vadd.f32 %v5488_v28, %v4569_v14 }
0x3f14   :  { %5943 = vtanh.f32 %v4573_v52 }
0x3f15   :  { %5945 = vpow2.f32 %v5075_v18 }
0x3f1a   :  { %v5944_v13 = vpop.eup %5943 }
0x3f1b   :  { %4582 = vrot.lane.b32.xlu2 %v5944_v13, %s6299_s26  ;;  %v5946_v31 = vpop.eup %5945 }
0x3f1c   :  { %v3657_v27 = vadd.f32 1.0, %v5946_v31 }
0x3f1e   :  { %5947 = vrcp.f32 %v3657_v27  ;;  %v3670_v10 = vand.u32 2147483648, %v3657_v27  ;;  %vm3664_vm12 = vweird.f32 %v3657_v27  ;;  %v3668_v53 = vand.u32 2147483647, %v3657_v27 }
0x3f20   :  { %v3671_v16 = vor.u32 1.1754944e-38, %v3670_v10  ;;  %vm3669_vm2 = vcmp.eq.f32.partialorder %v3668_v53, 8.507059e+37 }
0x3f23   :  { %3693 = vrot.lane.b32.xlu2 %v3647_v54, %s6286_s27 }
0x3f24   :  { %v5948_v46 = vpop.eup %5947 }
0x3f25   :  { %v3660_v0 = vmul.f32 %v5948_v46, %v3657_v27  ;;  %vm3665_vm9 = vweird.f32 %v5948_v46  ;;  %v5492_v27 = vunpack.c.h.bf16 %v7656_v19 }
0x3f26   :  { %vm3666_vm15 = vmor %vm3664_vm12, %vm3665_vm9 }
0x3f27   :  { %v3661_v28 = vsub.f32 1.0, %v3660_v0 }
0x3f29   :  { %v3662_v42 = vmul.f32 %v5948_v46, %v3661_v28 }
0x3f2b   :  { %v3663_v11 = vadd.f32 %v5948_v46, %v3662_v42 }
0x3f2d   :  { %v3667_v38 = vsel %vm3666_vm15, %v5948_v46, %v3663_v11 }
0x3f2e   :  { %v8023_v25 = vsel %vm3669_vm2, %v3671_v16, %v3667_v38  ;;  %vm8229_vm2 = vcmp.eq.s32.totalorder %v8209_v48, 1 }
0x3f2f   :  { %v3711_v45 = vsub.f32 1.0, %v8023_v25 }
0x3f6d   :  { %v4581_v60 = vpop.permute.xlu1 %4580 }
0x3f6e   :  { %v4586_v62 = vmul.f32 %v4581_v60, %v4576_v41 }
0x3f70   :  { %v4590_v30 = vadd.f32 %v4588_v21, %v4586_v62 }
0x3f72   :  { %v8031_v12 = vsel %vm8227_vm4, %v4590_v30, %v7980_v63  ;;  %v5076_v63 = vmul.f32 -1.442695, %v3650_v59  ;;  %vm8230_vm4 = vcmp.eq.s32.totalorder %v8213_v55, 1 }
0x3f74   :  { %5949 = vpow2.f32 %v5076_v63 }
0x3f75   :  { %v3692_v24 = vpop.permute.xlu1 %3691  ;;  %v4583_v37 = vpop.permute.xlu2 %4582 }
0x3f76   :  { %v3697_v1 = vmul.f32 %v3692_v24, %v8023_v25  ;;  %v4587_v2 = vmul.f32 %v4583_v37, %v4577_v20 }
0x3f78   :  { %v4591_v40 = vadd.f32 %v4589_v22, %v4587_v2  ;;  %3701 = vrot.lane.b32.xlu2 %v3697_v1, %s6286_s27 }
0x3f7a   :  { %v8036_v61 = vsel %vm8228_vm7, %v4591_v40, %v7985_v4  ;;  %v5950_v50 = vpop.eup %5949  ;;  %vm8231_vm7 = vcmp.eq.s32.totalorder %v6567_v23, 1 }
0x3f7b   :  { %v4598_v17 = vpack.c.bf16 %v8036_v61, %v8031_v12  ;;  %v3658_v51 = vadd.f32 1.0, %v5950_v50 }
0x3f7d   :  { %4600 = vrot.lane.b32.xlu0 %v4598_v17, %s6299_s26  ;;  %5951 = vrcp.f32 %v3658_v51  ;;  %v3694_v47 = vpop.permute.xlu2 %3693  ;;  %v3685_v26 = vand.u32 2147483648, %v3658_v51  ;;  %vm3679_vm1 = vweird.f32 %v3658_v51  ;;  %v3683_v9 = vand.u32 2147483647, %v3658_v51 }
0x3f7f   :  { %v3686_v14 = vor.u32 1.1754944e-38, %v3685_v26  ;;  %vm3684_vm13 = vcmp.eq.f32.partialorder %v3683_v9, 8.507059e+37 }
0x3f83   :  { %v5952_v5 = vpop.eup %5951 }
0x3f84   :  { %v3675_v4 = vmul.f32 %v5952_v5, %v3658_v51  ;;  %vm3680_vm11 = vweird.f32 %v5952_v5 }
0x3f85   :  { %vm3681_vm14 = vmor %vm3679_vm1, %vm3680_vm11  ;;  %vm8232_vm11 = vcmp.eq.s32.totalorder %v6570_v34, 1  ;;  %v5583_v34 = vld [vmem:[%s8119_s19] ss:$0 sm:$0xff]  ;;  %s4828_s19 = sshll.u32 %s6300_s30, 4  ;;  %s4829_s19 = int_to_ptr.vmem [resolvable:$true] %s4828_s19 }
0x3f86   :  { %v3676_v44 = vsub.f32 1.0, %v3675_v4 }
0x3f88   :  { %v3677_v6 = vmul.f32 %v5952_v5, %v3676_v44 }
0x3f8a   :  { %v3678_v33 = vadd.f32 %v5952_v5, %v3677_v6 }
0x3f8c   :  { %v3682_v8 = vsel %vm3681_vm14, %v5952_v5, %v3678_v33 }
0x3f8d   :  { %v8049_v52 = vsel %vm3684_vm13, %v3686_v14, %v3682_v8  ;;  %v3723_v8 = vmul.f32 %v8023_v25, %v7780_v15  ;;  %v5200_v25 = vld [vmem:[#allocation19 + $0x8] sm:$0xff] }
0x3f8e   :  { %v3698_v49 = vmul.f32 %v3694_v47, %v8049_v52  ;;  %4729 = vmatpush.bf16.msra.mxu3 %v5200_v25 }
0x3fd2   :  { %v3702_v32 = vpop.permute.xlu2 %3701 }
0x3fd3   :  { %v3707_v13 = vadd.f32 %v5419_v35, %v3702_v32  ;;  %v3712_v32 = vsub.f32 1.0, %v8049_v52 }
0x3fd5   :  { %5953 = vtanh.f32 %v3707_v13 }
0x3fdb   :  { %v5954_v39 = vpop.eup %5953 }
0x3fef   :  { %v4601_v58 = vpop.permute.xlu0 %4600 }
0x3ff0   :  { %5129 = vmatmul.msk.bf16.vlgmr.msrb.gmra.mxu2 %vm605_vm0, %v4601_v58 }
0x4073   :  { %v4614_v7 = vpop.f32.mrf.mxu2 }
0x4074   :  { %v4615_v43 = vadd.f32 %v5981_v57, %v4614_v7 }
0x4076   :  { %4661 = vrot.lane.b32.xlu0 %v4615_v43, %s6286_s27  ;;  %v4619_v18 = vadd.f32 %v5491_v56, %v4615_v43 }
0x4078   :  { %v5130_v31 = vmul.f32 -1.442695, %v4619_v18 }
0x407a   :  { %5955 = vpow2.f32 %v5130_v31  ;;  %v5199_v31 = vld [vmem:[#allocation19] sm:$0xff] }
0x407b   :  { %v4616_v54 = vpop.f32.mrf.mxu2  ;;  %4730 = vmatpush.bf16.msra.mxu3 %v5199_v31 }
0x407c   :  { %v4617_v29 = vadd.f32 %v5981_v57, %v4616_v54  ;;  %v3724_v54 = vmul.f32 %v8049_v52, %v7788_v3 }
0x407e   :  { %4663 = vrot.lane.b32.xlu1 %v4617_v29, %s6286_s27  ;;  %3703 = vrot.lane.b32.xlu0 %v3698_v49, %s6286_s27  ;;  %v4620_v35 = vadd.f32 %v5492_v27, %v4617_v29 }
0x4080   :  { %v5131_v46 = vmul.f32 -1.442695, %v4620_v35  ;;  %v5956_v0 = vpop.eup %5955 }
0x4081   :  { %v4627_v28 = vadd.f32 1.0, %v5956_v0 }
0x4082   :  { %5957 = vpow2.f32 %v5131_v46  ;;  %v5202_v46 = vld [vmem:[#allocation19 + $0x18] sm:$0xff] }
0x4083   :  { %5959 = vrcp.f32 %v4627_v28  ;;  %v4640_v19 = vand.u32 2147483648, %v4627_v28  ;;  %vm4634_vm3 = vweird.f32 %v4627_v28  ;;  %v4638_v20 = vand.u32 2147483647, %v4627_v28  ;;  %4772 = vmatpush.bf16.msrb.mxu1 %v5202_v46 }
0x4085   :  { %v4641_v30 = vor.u32 1.1754944e-38, %v4640_v19  ;;  %vm4639_vm8 = vcmp.eq.f32.partialorder %v4638_v20, 8.507059e+37 }
0x4086   :  { %3715 = vrot.lane.b32.xlu0 %v5954_v39, %s6299_s26 }
0x4088   :  { %v5958_v42 = vpop.eup %5957 }
0x4089   :  { %v4628_v60 = vadd.f32 1.0, %v5958_v42  ;;  %v5960_v11 = vpop.eup %5959 }
0x408a   :  { %v4630_v10 = vmul.f32 %v5960_v11, %v4627_v28  ;;  %vm4635_vm10 = vweird.f32 %v5960_v11 }
0x408b   :  { %5961 = vrcp.f32 %v4628_v60  ;;  %vm4636_vm6 = vmor %vm4634_vm3, %vm4635_vm10  ;;  %v4655_v17 = vand.u32 2147483648, %v4628_v60  ;;  %vm4649_vm9 = vweird.f32 %v4628_v60  ;;  %v4653_v58 = vand.u32 2147483647, %v4628_v60 }
0x408c   :  { %v4631_v41 = vsub.f32 1.0, %v4630_v10 }
0x408d   :  { %v4656_v63 = vor.u32 1.1754944e-38, %v4655_v17  ;;  %vm4654_vm15 = vcmp.eq.f32.partialorder %v4653_v58, 8.507059e+37 }
0x408e   :  { %v4632_v62 = vmul.f32 %v5960_v11, %v4631_v41 }
0x4090   :  { %v4633_v16 = vadd.f32 %v5960_v11, %v4632_v62 }
0x4091   :  { %v5962_v53 = vpop.eup %5961 }
0x4092   :  { %v4645_v38 = vmul.f32 %v5962_v53, %v4628_v60  ;;  %v4637_v24 = vsel %vm4636_vm6, %v5960_v11, %v4633_v16  ;;  %vm4650_vm5 = vweird.f32 %v5962_v53  ;;  %v5203_v16 = vld [vmem:[#allocation21] sm:$0xff] }
0x4093   :  { %v4642_v22 = vsel %vm4639_vm8, %v4641_v30, %v4637_v24  ;;  %vm4651_vm12 = vmor %vm4649_vm9, %vm4650_vm5 }
0x4094   :  { %v4646_v21 = vsub.f32 1.0, %v4645_v38  ;;  %v4681_v35 = vsub.f32 1.0, %v4642_v22  ;;  %v4693_v0 = vmul.f32 %v4642_v22, %v8031_v12  ;;  %v5204_v38 = vld [vmem:[#allocation21 + $0x8] sm:$0xff] }
0x4095   :  { %4814 = vmatpush.bf16.msra.mxu2 %v5204_v38 }
0x4096   :  { %v4647_v37 = vmul.f32 %v5962_v53, %v4646_v21 }
0x4098   :  { %v4648_v40 = vadd.f32 %v5962_v53, %v4647_v37 }
0x4099   :  { %4815 = vmatpush.bf16.msra.mxu2 %v5203_v16 }
0x409a   :  { %v4652_v59 = vsel %vm4651_vm12, %v5962_v53, %v4648_v40 }
0x409b   :  { %v4657_v51 = vsel %vm4654_vm15, %v4656_v63, %v4652_v59 }
0x409c   :  { %v4682_v28 = vsub.f32 1.0, %v4657_v51  ;;  %v4694_v55 = vmul.f32 %v4657_v51, %v8036_v61 }
0x40e8   :  { %v4662_v1 = vpop.permute.xlu0 %4661 }
0x40e9   :  { %v4667_v2 = vmul.f32 %v4662_v1, %v4642_v22 }
0x40eb   :  { %4671 = vrot.lane.b32.xlu1 %v4667_v2, %s6286_s27  ;;  %v5584_v2 = vld [vmem:[%s8121_s21] ss:$0 sm:$0xff] }
0x40f0   :  { %v4664_v50 = vpop.permute.xlu1 %4663  ;;  %v3704_v5 = vpop.permute.xlu0 %3703 }
0x40f1   :  { %v4668_v4 = vmul.f32 %v4664_v50, %v4657_v51  ;;  %v3708_v44 = vadd.f32 %v5420_v36, %v3704_v5 }
0x40f3   :  { %5963 = vtanh.f32 %v3708_v44  ;;  %4673 = vrot.lane.b32.xlu2 %v4668_v4, %s6286_s27 }
0x40f8   :  { %v3716_v9 = vpop.permute.xlu0 %3715 }
0x40f9   :  { %v5964_v6 = vpop.eup %5963  ;;  %v3721_v36 = vmul.f32 %v3716_v9, %v3711_v45 }
0x40fa   :  { %3717 = vrot.lane.b32.xlu1 %v5964_v6, %s6299_s26 }
0x40fb   :  { %v3725_v13 = vadd.f32 %v3723_v8, %v3721_v36 }
0x40fd   :  { %v3727_v39 = vsel %vm8229_vm2, %v3725_v13, %v7780_v15  ;;  %v5201_v15 = vld [vmem:[#allocation19 + $0x10] sm:$0xff] }
0x40fe   :  { %4773 = vmatpush.bf16.msrb.mxu1 %v5201_v15 }
0x414d   :  { %v4674_v47 = vpop.permute.xlu2 %4673 }
0x414e   :  { %v4678_v7 = vadd.f32 %v5492_v27, %v4674_v47 }
0x4150   :  { %5965 = vtanh.f32 %v4678_v7 }
0x4156   :  { %v5966_v33 = vpop.eup %5965 }
0x4157   :  { %4687 = vrot.lane.b32.xlu0 %v5966_v33, %s6299_s26 }
0x415d   :  { %v4672_v57 = vpop.permute.xlu1 %4671 }
0x415e   :  { %v4677_v43 = vadd.f32 %v5491_v56, %v4672_v57 }
0x4160   :  { %5967 = vtanh.f32 %v4677_v43 }
0x4166   :  { %v5968_v26 = vpop.eup %5967 }
0x4167   :  { %4685 = vrot.lane.b32.xlu2 %v5968_v26, %s6299_s26 }
0x416c   :  { %v3718_v14 = vpop.permute.xlu1 %3717 }
0x416d   :  { %v3722_v49 = vmul.f32 %v3718_v14, %v3712_v32 }
0x416f   :  { %v3726_v29 = vadd.f32 %v3724_v54, %v3722_v49 }
0x4171   :  { %v3728_v56 = vsel %vm8230_vm4, %v3726_v29, %v7788_v3 }
0x4172   :  { %v4700_v18 = vpack.c.bf16 %v3728_v56, %v3727_v39 }
0x4174   :  { %4706 = vrot.lane.b32.xlu1 %v4700_v18, %s6299_s26 }
0x41c1   :  { %v4686_v27 = vpop.permute.xlu2 %4685 }
0x41c2   :  { %v4691_v52 = vmul.f32 %v4686_v27, %v4681_v35 }
0x41c4   :  { %v4695_v42 = vadd.f32 %v4693_v0, %v4691_v52 }
0x41c6   :  { %v4697_v11 = vsel %vm8231_vm7, %v4695_v42, %v8031_v12 }
0x41c9   :  { %v4688_v48 = vpop.permute.xlu0 %4687 }
0x41ca   :  { %v4692_v3 = vmul.f32 %v4688_v48, %v4682_v28 }
0x41cc   :  { %v4696_v60 = vadd.f32 %v4694_v55, %v4692_v3 }
0x41ce   :  { %v4698_v10 = vsel %vm8232_vm11, %v4696_v60, %v8036_v61 }
0x41cf   :  { %v4742_v41 = vpack.c.bf16 %v4698_v10, %v4697_v11 }
0x41d1   :  { %4749 = vrot.lane.b32.xlu2 %v4742_v41, %s6299_s26 }
0x41e6   :  { %v4707_v53 = vpop.permute.xlu1 %4706 }
0x41e7   :  { %5140 = vmatmul.msk.bf16.vlgmr.msra.gmra.mxu3 %vm605_vm0, %v4707_v53 }
0x422b   :  { %v4750_v62 = vpop.permute.xlu2 %4749 }
0x422c   :  { %5149 = vmatmul.msk.bf16.vlgmr.msrb.gmra.mxu1 %vm605_vm0, %v4750_v62 }
0x426a   :  { %v4732_v21 = vpop.f32.mrf.mxu3 }
0x426b   :  { %v4740_v61 = vadd.f32 %v5583_v34, %v4732_v21 }
0x4272   :  { %v4734_v12 = vpop.f32.mrf.mxu3 }
0x4273   :  { %v4741_v19 = vadd.f32 %v5583_v34, %v4734_v12 }
0x42a9   :  { %v4775_v23 = vpop.f32.mrf.mxu1 }
0x42aa   :  { %v4780_v20 = vadd.f32 %v4775_v23, %v4740_v61 }
0x42ac   :  { %v4782_v30 = vmax.f32 %v4780_v20, 0.0 }
0x42b1   :  { %v4777_v24 = vpop.f32.mrf.mxu1 }
0x42b2   :  { %v4781_v37 = vadd.f32 %v4777_v24, %v4741_v19 }
0x42b4   :  { %v4783_v1 = vmax.f32 %v4781_v37, 0.0 }
0x42b6   :  { %v4784_v22 = vpack.c.bf16 %v4783_v1, %v4782_v30 }
0x42b8   :  { %5158 = vmatmul.msk.bf16.vlgmr.msra.gmra.mxu2 %vm605_vm0, %v4784_v22 }
0x433b   :  { %v4817_v40 = vpop.f32.mrf.mxu2 }
0x433c   :  { %v4818_v17 = vadd.f32 %v5584_v2, %v4817_v40 }
0x433e   :  { %4822 = vst [vmem:[#allocation22] sm:$0xff] %v4818_v17 }
0x4343   :  { %v4819_v58 = vpop.f32.mrf.mxu2 }
0x4344   :  { %v4820_v59 = vadd.f32 %v5584_v2, %v4819_v58 }
0x4346   :  { %4823 = vst [vmem:[#allocation22 + $0x8] sm:$0xff] %v4820_v59 }
0x4347   :  { %4836 = dma.vmem_to_hbm [thread:$0]  %s4829_s19, 256, %s4831_s23, [#allocation6], %s6301_s20, %s6301_s20, %s6302_s3  }
0x4348   :  { %6282 = dma.done.wait [#allocation6], 256  }
0x4349   :  { %6283 = vsyncadd [#allocation6], 4294967040 }
0x434a   :  { %4841 = vsyncpa [#allocation5], 1 }
0x434b   :  { %4842 = vsyncpa [#allocation8], 1 }
0x434c   :  { %4843 = vsyncpa [#allocation11], 1 }
0x434d   :  { %4844 = vsyncpa [#allocation14], 1 }
0x434e   :  { %4845 = vsyncpa [#allocation17], 1 }
0x434f   :  { %4846 = vsyncpa [#allocation20], 1 }
0x4350   :  { %4847 = vsyncpa [#allocation6], 1 }

</bundles_post_ra>
